<compile_context>
chip_gen: v7x
topology: tpu7x:2x2x1
jax: 0.10.0
libtpu: 0.0.40
codegen_flags: <defaults>
</compile_context>

<pallas_src>
import functools

import jax
import jax.numpy as jnp
from jax.experimental import pallas as pl
from jax.experimental.pallas import tpu as pltpu

LEAKY_SLOPE = 0.2
EPS = 1e-5  # nn.InstanceNorm2d default eps


# ----------------------------- Pallas kernel --------------------------------

def _fused_conv_kernel(x_ref, w_ref, sgb_ref, o_ref, *,
                       KR, KC, OH, OW, has_bias, norm, act):
    """Conv (+bias) (+InstanceNorm) (+activation) for one (sample, cout-tile).

    x_ref   : (1, Hm, Wm, Cm)    bf16 reflect-padded (phase-merged if stride=2)
    w_ref   : (n_ct, K, tile_c)  bf16 folded weight, K = KR*KC*Cm
    sgb_ref : (n_ct, 3, tile_c)  f32 rows = [bias, gamma, beta]
    o_ref   : (1, OH, OW, tile_c)
    """
    cm = x_ref.shape[-1]
    tile_c = o_ref.shape[-1]
    P = OH * OW

    # im2col in VMEM only: KR*KC unit-stride slices concatenated along lanes.
    pieces = []
    for a in range(KR):
        for b in range(KC):
            pieces.append(x_ref[0, a:a + OH, b:b + OW, :])       # (OH, OW, Cm)
    patches = jnp.concatenate(pieces, axis=-1) if len(pieces) > 1 else pieces[0]
    patches = patches.reshape(P, KR * KC * cm)                   # (P, K) bf16

    c = pl.program_id(1)
    acc = jnp.dot(patches, w_ref[c], preferred_element_type=jnp.float32)

    svec = sgb_ref[c]                                            # (3, tile_c) f32
    if has_bias:
        acc = acc + svec[0:1, :]
    if norm:
        # One-pass InstanceNorm2d (biased variance over spatial, affine):
        # var = E[x^2] - mean^2; scale/shift folded into one elementwise pass.
        inv_p = 1.0 / P
        mean = jnp.sum(acc, axis=0, keepdims=True) * inv_p
        var = jnp.sum(acc * acc, axis=0, keepdims=True) * inv_p - mean * mean
        var = jnp.maximum(var, 0.0)
        s = svec[1:2, :] * jax.lax.rsqrt(var + EPS)
        t = svec[2:3, :] - mean * s
        acc = acc * s + t
    if act == "leaky":
        acc = jnp.maximum(acc, LEAKY_SLOPE * acc)                # LeakyReLU(0.2)
    elif act == "sigmoid":
        acc = jax.nn.sigmoid(acc)
    o_ref[...] = acc.reshape(1, OH, OW, tile_c).astype(o_ref.dtype)


# ------------------------------ JAX wrapper ----------------------------------

def conv_in_act(x_nhwc, w_torch, bias, gamma, beta, *,
                stride, norm, act, out_dtype):
    """Conv2d(k=4, pad=1 reflect, stride) [+bias] [+InstanceNorm2d(affine)] [+act].

    x_nhwc : bf16 NHWC, channel count a multiple of 8 (zero-padded channels OK).
    w_torch: PyTorch layout (Cout, Cin, KH, KW), f32."""
    Cout, Cin, KH, KW = w_torch.shape
    N, H, W, Cin_x = x_nhwc.shape
    S = stride
    assert Cin_x % 8 == 0 and Cin_x >= Cin
    cin_p = Cin_x                                    # weight Cin padded to input
    cout_p = Cout if Cout % 8 == 0 else 128          # lane-dense final layer 1->128
    tile_c = 256 if cout_p >= 256 else cout_p        # full 256-wide MXU (v6e/v7x)
    n_ct = cout_p // tile_c
    OH = (H + 2 - KH) // S + 1
    OW = (W + 2 - KW) // S + 1
    KR, KC = KH // S, KW // S                        # taps per axis, merged layout
    K = KH * KW * cin_p

    # --- weight: (Cout,Cin,KH,KW) -> folded (n_ct, K, tile_c), bf16 -----------
    wt = jnp.transpose(w_torch, (2, 3, 1, 0))                    # (KH,KW,Cin,Cout)
    wt = jnp.pad(wt, ((0, 0), (0, 0), (0, cin_p - Cin), (0, cout_p - Cout)))
    wt = wt.reshape(KR, S, KC, S, cin_p, cout_p)                 # (a,ph,b,pw,c,co)
    wt = wt.transpose(0, 2, 1, 3, 4, 5)                          # (a,b,ph,pw,c,co)
    wt = wt.reshape(K, n_ct, tile_c).transpose(1, 0, 2)          # (n_ct, K, tile_c)
    wt = wt.astype(jnp.bfloat16)

    # --- bias / gamma / beta merged into one (n_ct, 3, tile_c) f32 operand ----
    def _fill(v, default):
        full = jnp.full((cout_p,), default, jnp.float32)
        if v is not None:
            full = full.at[:Cout].set(v.astype(jnp.float32))
        return full
    sgb = jnp.stack([_fill(bias, 0.0), _fill(gamma, 1.0), _fill(beta, 0.0)])
    sgb = sgb.reshape(3, n_ct, tile_c).transpose(1, 0, 2)        # (n_ct, 3, tile_c)

    # --- reflect pad + (stride-2) phase merge, all bf16 -----------------------
    # TODO(synk): fold this pad/merge into the producing kernel's epilogue to
    # remove the remaining per-layer XLA round trip (review item #2).
    xp = jnp.pad(x_nhwc, ((0, 0), (1, 1), (1, 1), (0, 0)), mode="reflect")
    if S > 1:
        Hp, Wp = H + 2, W + 2
        Hc, Wc = -(-Hp // S), -(-Wp // S)
        xp = jnp.pad(xp, ((0, 0), (0, Hc * S - Hp), (0, Wc * S - Wp), (0, 0)))
        xp = xp.reshape(N, Hc, S, Wc, S, cin_p)
        xp = xp.transpose(0, 1, 3, 2, 4, 5).reshape(N, Hc, Wc, S * S * cin_p)
    Hm, Wm, Cm = xp.shape[1:]

    kernel = functools.partial(
        _fused_conv_kernel, KR=KR, KC=KC, OH=OH, OW=OW,
        has_bias=bias is not None, norm=norm, act=act)

    out_isz = 2 if out_dtype == jnp.bfloat16 else 4
    flops = 2 * N * OH * OW * K * cout_p
    bytes_accessed = (xp.size * 2 + wt.size * 2 + sgb.size * 4
                      + N * OH * OW * cout_p * out_isz)

    out = pl.pallas_call(
        kernel,
        out_shape=jax.ShapeDtypeStruct((N, OH, OW, cout_p), out_dtype),
        grid=(N, n_ct),
        in_specs=[
            # image: constant along the cout-tile axis -> DMA'd once per sample
            pl.BlockSpec((1, Hm, Wm, Cm), lambda n, c: (n, 0, 0, 0)),
            # folded weight + merged scale vectors: constant block index
            # -> fetched exactly once for the whole grid
            pl.BlockSpec((n_ct, K, tile_c), lambda n, c: (0, 0, 0)),
            pl.BlockSpec((n_ct, 3, tile_c), lambda n, c: (0, 0, 0)),
        ],
        out_specs=pl.BlockSpec((1, OH, OW, tile_c), lambda n, c: (n, 0, 0, c)),
        compiler_params=pltpu.CompilerParams(
            # Batch axis is the (mega)core-sharded one; the cout-tile axis
            # shares the per-sample image block so keep it "arbitrary".
            dimension_semantics=("parallel", "arbitrary")),
        cost_estimate=pl.CostEstimate(
            flops=flops,
            transcendentals=N * OH * OW * cout_p if act == "sigmoid" else 0,
            bytes_accessed=bytes_accessed),
    )(xp, wt, sgb)

    return out[..., :Cout] if cout_p != Cout else out


# ---------------------------- parameters -------------------------------------

def init_params(key, features=(64, 128, 256, 512)):
    """Deterministic synthetic init mirroring the PyTorch module's shapes."""
    params = {}
    k0, key = jax.random.split(key)
    params["initial"] = {  # Conv2d(3, f0, k=4, s=2, p=1, reflect), bias=True
        "w": 0.05 * jax.random.normal(k0, (features[0], 3, 4, 4), jnp.float32),
        "b": 0.01 * jnp.arange(features[0], dtype=jnp.float32),
    }
    blocks, strides = [], []
    in_c = features[0]
    for f in features[1:]:
        kk, key = jax.random.split(key)
        blocks.append({  # Conv2d(bias=False) + InstanceNorm2d(affine) + LeakyReLU
            "w": 0.05 * jax.random.normal(kk, (f, in_c, 4, 4), jnp.float32),
            "gamma": jnp.ones((f,), jnp.float32),
            "beta": jnp.zeros((f,), jnp.float32),
        })
        strides.append(1 if f == features[-1] else 2)
        in_c = f
    kk, key = jax.random.split(key)
    params["blocks"] = blocks
    params["final"] = {  # Conv2d(in_c, 1, k=4, s=1, bias=False) + IN(1) + Sigmoid
        "w": 0.05 * jax.random.normal(kk, (1, in_c, 4, 4), jnp.float32),
        "gamma": jnp.ones((1,), jnp.float32),
        "beta": jnp.zeros((1,), jnp.float32),
    }
    return params, tuple(strides)


# ------------------------------ forward --------------------------------------

def discriminator_forward(params, strides, x_nchw, y_nchw):
    x = jnp.concatenate([x_nchw, y_nchw], axis=1)        # torch.cat([x, y], dim=1)
    x = jnp.transpose(x, (0, 2, 3, 1))                   # NCHW -> NHWC
    # Pad the 3 input channels to 32 so the stride-2 phase-merged layout has a
    # lane-dense 128-wide channel dim (zero channels x zero weights: exact no-op).
    cpad = (-x.shape[-1]) % 32
    if cpad:
        x = jnp.pad(x, ((0, 0), (0, 0), (0, 0), (0, cpad)))
    x = x.astype(jnp.bfloat16)                           # bf16 activations end-to-end

    # initial: Conv(3->f0, s=2, bias=True) + LeakyReLU(0.2)
    x = conv_in_act(x, params["initial"]["w"], params["initial"]["b"], None, None,
                    stride=2, norm=False, act="leaky", out_dtype=jnp.bfloat16)

    # DiscBlocks: Conv(bias=False) -> InstanceNorm(affine) -> LeakyReLU(0.2)
    for blk, s in zip(params["blocks"], strides):
        x = conv_in_act(x, blk["w"], None, blk["gamma"], blk["beta"],
                        stride=s, norm=True, act="leaky", out_dtype=jnp.bfloat16)

    # final: Conv(->1, bias=False) -> InstanceNorm(1, affine) -> Sigmoid
    x = conv_in_act(x, params["final"]["w"], None,
                    params["final"]["gamma"], params["final"]["beta"],
                    stride=1, norm=True, act="sigmoid", out_dtype=jnp.float32)
    return jnp.transpose(x, (0, 3, 1, 2))                # NHWC -> NCHW


# -------------------------------- main ----------------------------------------

if __name__ == "__main__":
    key = jax.random.PRNGKey(0)
    kp, kx, ky = jax.random.split(key, 3)

    params, strides = init_params(kp, features=(64, 128, 256, 512))

    # cat([x, y], dim=1) must give 3 channels for the initial conv: 2 + 1.
    # Spatial 32 keeps all five convs valid (32 -> 16 -> 8 -> 4 -> 3 -> 2).
    x = jax.random.normal(kx, (2, 2, 32, 32), jnp.float32)
    y = jax.random.normal(ky, (2, 1, 32, 32), jnp.float32)

    fwd = jax.jit(lambda a, b: discriminator_forward(params, strides, a, b))
    out = fwd(x, y)
    jax.block_until_ready(out)

    assert out.shape == (2, 1, 2, 2), out.shape
    assert bool(jnp.all(jnp.isfinite(out)))
    assert bool(jnp.all((out >= 0.0) & (out <= 1.0)))    # sigmoid range sanity check
    print("KERNEL_OK")
</pallas_src>

<mosaic_0001>
module attributes {stable_mosaic.version = 11 : i64} {
  func.func @_fused_conv_kernel(%arg0: i32, %arg1: i32, %arg2: memref<1x17x17x128xbf16, #tpu.memory_space<vmem>>, %arg3: memref<1x512x64xbf16, #tpu.memory_space<vmem>>, %arg4: memref<1x3x64xf32, #tpu.memory_space<vmem>>, %arg5: memref<1x16x16x64xbf16, #tpu.memory_space<vmem>>) attributes {dimension_semantics = [#tpu.dimension_semantics<parallel>, #tpu.dimension_semantics<arbitrary>], iteration_bounds = array<i64: 2, 1>, scalar_prefetch = 0 : i64, scratch_operands = 0 : i64, tpu.core_type = #tpu.core_type<tc>, window_params = [{transform_indices = @transform_0, window_bounds = array<i64: 1, 17, 17, 128>}, {pipeline_mode = #tpu.pipeline_mode<synchronous>, transform_indices = @transform_1, window_bounds = array<i64: 1, 512, 64>}, {pipeline_mode = #tpu.pipeline_mode<synchronous>, transform_indices = @transform_2, window_bounds = array<i64: 1, 3, 64>}, {transform_indices = @transform_3, window_bounds = array<i64: 1, 16, 16, 64>}]} {
    %c0 = arith.constant 0 : index
    %c0_0 = arith.constant 0 : index
    %c0_1 = arith.constant 0 : index
    %c0_2 = arith.constant 0 : index
    %0 = vector.load %arg2[%c0, %c0_0, %c0_1, %c0_2] : memref<1x17x17x128xbf16, #tpu.memory_space<vmem>>, vector<1x16x16x128xbf16>
    %1 = vector.shape_cast %0 : vector<1x16x16x128xbf16> to vector<16x16x128xbf16>
    %c0_3 = arith.constant 0 : index
    %c0_4 = arith.constant 0 : index
    %c1 = arith.constant 1 : index
    %c0_5 = arith.constant 0 : index
    %2 = vector.load %arg2[%c0_3, %c0_4, %c1, %c0_5] : memref<1x17x17x128xbf16, #tpu.memory_space<vmem>>, vector<1x16x16x128xbf16>
    %3 = vector.shape_cast %2 : vector<1x16x16x128xbf16> to vector<16x16x128xbf16>
    %c0_6 = arith.constant 0 : index
    %c1_7 = arith.constant 1 : index
    %c0_8 = arith.constant 0 : index
    %c0_9 = arith.constant 0 : index
    %4 = vector.load %arg2[%c0_6, %c1_7, %c0_8, %c0_9] : memref<1x17x17x128xbf16, #tpu.memory_space<vmem>>, vector<1x16x16x128xbf16>
    %5 = vector.shape_cast %4 : vector<1x16x16x128xbf16> to vector<16x16x128xbf16>
    %c0_10 = arith.constant 0 : index
    %c1_11 = arith.constant 1 : index
    %c1_12 = arith.constant 1 : index
    %c0_13 = arith.constant 0 : index
    %6 = vector.load %arg2[%c0_10, %c1_11, %c1_12, %c0_13] : memref<1x17x17x128xbf16, #tpu.memory_space<vmem>>, vector<1x16x16x128xbf16>
    %7 = vector.shape_cast %6 : vector<1x16x16x128xbf16> to vector<16x16x128xbf16>
    %8 = tpu.concatenate %1, %3, %5, %7 in 2 : vector<16x16x128xbf16>, vector<16x16x128xbf16>, vector<16x16x128xbf16>, vector<16x16x128xbf16> -> vector<16x16x512xbf16>
    %9 = vector.shape_cast %8 : vector<16x16x512xbf16> to vector<256x512xbf16>
    %10 = arith.index_cast %arg1 : i32 to index
    %c0_14 = arith.constant 0 : index
    %c0_15 = arith.constant 0 : index
    %11 = vector.load %arg3[%10, %c0_14, %c0_15] : memref<1x512x64xbf16, #tpu.memory_space<vmem>>, vector<1x512x64xbf16>
    %12 = vector.shape_cast %11 : vector<1x512x64xbf16> to vector<512x64xbf16>
    %cst = arith.constant dense<0.000000e+00> : vector<256x64xf32>
    %13 = tpu.matmul %9, %12, %cst {dimension_numbers = #tpu.dot_dimension_numbers<[1], [0], [0], [1], [0, 0, 1, 1], [], []>} : vector<256x512xbf16>, vector<512x64xbf16>, vector<256x64xf32> -> vector<256x64xf32>
    %14 = arith.index_cast %arg1 : i32 to index
    %c0_16 = arith.constant 0 : index
    %c0_17 = arith.constant 0 : index
    %15 = vector.load %arg4[%14, %c0_16, %c0_17] : memref<1x3x64xf32, #tpu.memory_space<vmem>>, vector<1x3x64xf32>
    %16 = vector.shape_cast %15 : vector<1x3x64xf32> to vector<3x64xf32>
    %17 = vector.extract_strided_slice %16 {offsets = [0, 0], sizes = [1, 64], strides = [1, 1]} : vector<3x64xf32> to vector<1x64xf32>
    %18 = vector.broadcast %17 : vector<1x64xf32> to vector<256x64xf32>
    %19 = arith.addf %13, %18 : vector<256x64xf32>
    %cst_18 = arith.constant 2.000000e-01 : f32
    %20 = vector.broadcast %cst_18 : f32 to vector<256x64xf32>
    %21 = arith.mulf %20, %19 : vector<256x64xf32>
    %22 = arith.maximumf %19, %21 : vector<256x64xf32>
    %23 = vector.shape_cast %22 : vector<256x64xf32> to vector<1x16x16x64xf32>
    %24 = arith.truncf %23 : vector<1x16x16x64xf32> to vector<1x16x16x64xbf16>
    %c0_19 = arith.constant 0 : index
    %c0_20 = arith.constant 0 : index
    %c0_21 = arith.constant 0 : index
    %c0_22 = arith.constant 0 : index
    %25 = vector.load %arg5[%c0_19, %c0_20, %c0_21, %c0_22] : memref<1x16x16x64xbf16, #tpu.memory_space<vmem>>, vector<1x16x16x64xbf16>
    tpu.vector_store %arg5[%c0_19, %c0_20, %c0_21, %c0_22], %24 {strides = array<i32>} : memref<1x16x16x64xbf16, #tpu.memory_space<vmem>>, vector<1x16x16x64xbf16>,
    return
  }
  func.func @transform_0(%arg0: i32, %arg1: i32) -> (i32, i32, i32, i32) {
    %c0_i32 = arith.constant 0 : i32
    %c0_i32_0 = arith.constant 0 : i32
    %c0_i32_1 = arith.constant 0 : i32
    %c0_i32_2 = arith.constant 0 : i32
    return %arg0, %c0_i32, %c0_i32_0, %c0_i32_1 : i32, i32, i32, i32
  }
  func.func @transform_1(%arg0: i32, %arg1: i32) -> (i32, i32, i32) {
    %c0_i32 = arith.constant 0 : i32
    %c0_i32_0 = arith.constant 0 : i32
    %c0_i32_1 = arith.constant 0 : i32
    %c0_i32_2 = arith.constant 0 : i32
    return %c0_i32, %c0_i32_0, %c0_i32_1 : i32, i32, i32
  }
  func.func @transform_2(%arg0: i32, %arg1: i32) -> (i32, i32, i32) {
    %c0_i32 = arith.constant 0 : i32
    %c0_i32_0 = arith.constant 0 : i32
    %c0_i32_1 = arith.constant 0 : i32
    %c0_i32_2 = arith.constant 0 : i32
    return %c0_i32, %c0_i32_0, %c0_i32_1 : i32, i32, i32
  }
  func.func @transform_3(%arg0: i32, %arg1: i32) -> (i32, i32, i32, i32) {
    %c0_i32 = arith.constant 0 : i32
    %c0_i32_0 = arith.constant 0 : i32
    %c0_i32_1 = arith.constant 0 : i32
    return %arg0, %c0_i32, %c0_i32_0, %arg1 : i32, i32, i32, i32
  }
}

module attributes {stable_mosaic.version = 11 : i64} {
  func.func @_fused_conv_kernel(%arg0: i32, %arg1: i32, %arg2: memref<1x9x9x256xbf16, #tpu.memory_space<vmem>>, %arg3: memref<1x1024x128xbf16, #tpu.memory_space<vmem>>, %arg4: memref<1x3x128xf32, #tpu.memory_space<vmem>>, %arg5: memref<1x8x8x128xbf16, #tpu.memory_space<vmem>>) attributes {dimension_semantics = [#tpu.dimension_semantics<parallel>, #tpu.dimension_semantics<arbitrary>], iteration_bounds = array<i64: 2, 1>, scalar_prefetch = 0 : i64, scratch_operands = 0 : i64, tpu.core_type = #tpu.core_type<tc>, window_params = [{transform_indices = @transform_0, window_bounds = array<i64: 1, 9, 9, 256>}, {pipeline_mode = #tpu.pipeline_mode<synchronous>, transform_indices = @transform_1, window_bounds = array<i64: 1, 1024, 128>}, {pipeline_mode = #tpu.pipeline_mode<synchronous>, transform_indices = @transform_2, window_bounds = array<i64: 1, 3, 128>}, {transform_indices = @transform_3, window_bounds = array<i64: 1, 8, 8, 128>}]} {
    %c0 = arith.constant 0 : index
    %c0_0 = arith.constant 0 : index
    %c0_1 = arith.constant 0 : index
    %c0_2 = arith.constant 0 : index
    %0 = vector.load %arg2[%c0, %c0_0, %c0_1, %c0_2] : memref<1x9x9x256xbf16, #tpu.memory_space<vmem>>, vector<1x8x8x256xbf16>
    %1 = vector.shape_cast %0 : vector<1x8x8x256xbf16> to vector<8x8x256xbf16>
    %c0_3 = arith.constant 0 : index
    %c0_4 = arith.constant 0 : index
    %c1 = arith.constant 1 : index
    %c0_5 = arith.constant 0 : index
    %2 = vector.load %arg2[%c0_3, %c0_4, %c1, %c0_5] : memref<1x9x9x256xbf16, #tpu.memory_space<vmem>>, vector<1x8x8x256xbf16>
    %3 = vector.shape_cast %2 : vector<1x8x8x256xbf16> to vector<8x8x256xbf16>
    %c0_6 = arith.constant 0 : index
    %c1_7 = arith.constant 1 : index
    %c0_8 = arith.constant 0 : index
    %c0_9 = arith.constant 0 : index
    %4 = vector.load %arg2[%c0_6, %c1_7, %c0_8, %c0_9] : memref<1x9x9x256xbf16, #tpu.memory_space<vmem>>, vector<1x8x8x256xbf16>
    %5 = vector.shape_cast %4 : vector<1x8x8x256xbf16> to vector<8x8x256xbf16>
    %c0_10 = arith.constant 0 : index
    %c1_11 = arith.constant 1 : index
    %c1_12 = arith.constant 1 : index
    %c0_13 = arith.constant 0 : index
    %6 = vector.load %arg2[%c0_10, %c1_11, %c1_12, %c0_13] : memref<1x9x9x256xbf16, #tpu.memory_space<vmem>>, vector<1x8x8x256xbf16>
    %7 = vector.shape_cast %6 : vector<1x8x8x256xbf16> to vector<8x8x256xbf16>
    %8 = tpu.concatenate %1, %3, %5, %7 in 2 : vector<8x8x256xbf16>, vector<8x8x256xbf16>, vector<8x8x256xbf16>, vector<8x8x256xbf16> -> vector<8x8x1024xbf16>
    %9 = vector.shape_cast %8 : vector<8x8x1024xbf16> to vector<64x1024xbf16>
    %10 = arith.index_cast %arg1 : i32 to index
    %c0_14 = arith.constant 0 : index
    %c0_15 = arith.constant 0 : index
    %11 = vector.load %arg3[%10, %c0_14, %c0_15] : memref<1x1024x128xbf16, #tpu.memory_space<vmem>>, vector<1x1024x128xbf16>
    %12 = vector.shape_cast %11 : vector<1x1024x128xbf16> to vector<1024x128xbf16>
    %cst = arith.constant dense<0.000000e+00> : vector<64x128xf32>
    %13 = tpu.matmul %9, %12, %cst {dimension_numbers = #tpu.dot_dimension_numbers<[1], [0], [0], [1], [0, 0, 1, 1], [], []>} : vector<64x1024xbf16>, vector<1024x128xbf16>, vector<64x128xf32> -> vector<64x128xf32>
    %14 = arith.index_cast %arg1 : i32 to index
    %c0_16 = arith.constant 0 : index
    %c0_17 = arith.constant 0 : index
    %15 = vector.load %arg4[%14, %c0_16, %c0_17] : memref<1x3x128xf32, #tpu.memory_space<vmem>>, vector<1x3x128xf32>
    %16 = vector.shape_cast %15 : vector<1x3x128xf32> to vector<3x128xf32>
    %cst_18 = arith.constant dense<0.000000e+00> : vector<128xf32>
    %17 = vector.multi_reduction <add>, %13, %cst_18 [0] : vector<64x128xf32> to vector<128xf32>
    %18 = vector.shape_cast %17 : vector<128xf32> to vector<1x128xf32>
    %cst_19 = arith.constant 1.562500e-02 : f32
    %19 = vector.broadcast %cst_19 : f32 to vector<1x128xf32>
    %20 = arith.mulf %18, %19 : vector<1x128xf32>
    %21 = arith.mulf %13, %13 : vector<64x128xf32>
    %cst_20 = arith.constant dense<0.000000e+00> : vector<128xf32>
    %22 = vector.multi_reduction <add>, %21, %cst_20 [0] : vector<64x128xf32> to vector<128xf32>
    %23 = vector.shape_cast %22 : vector<128xf32> to vector<1x128xf32>
    %cst_21 = arith.constant 1.562500e-02 : f32
    %24 = vector.broadcast %cst_21 : f32 to vector<1x128xf32>
    %25 = arith.mulf %23, %24 : vector<1x128xf32>
    %26 = arith.mulf %20, %20 : vector<1x128xf32>
    %27 = arith.subf %25, %26 : vector<1x128xf32>
    %cst_22 = arith.constant 0.000000e+00 : f32
    %28 = vector.broadcast %cst_22 : f32 to vector<1x128xf32>
    %29 = arith.maximumf %27, %28 : vector<1x128xf32>
    %30 = vector.extract_strided_slice %16 {offsets = [1, 0], sizes = [1, 128], strides = [1, 1]} : vector<3x128xf32> to vector<1x128xf32>
    %cst_23 = arith.constant 9.99999974E-6 : f32
    %31 = vector.broadcast %cst_23 : f32 to vector<1x128xf32>
    %32 = arith.addf %29, %31 : vector<1x128xf32>
    %33 = math.rsqrt %32 : vector<1x128xf32>
    %34 = arith.mulf %30, %33 : vector<1x128xf32>
    %35 = vector.extract_strided_slice %16 {offsets = [2, 0], sizes = [1, 128], strides = [1, 1]} : vector<3x128xf32> to vector<1x128xf32>
    %36 = arith.mulf %20, %34 : vector<1x128xf32>
    %37 = arith.subf %35, %36 : vector<1x128xf32>
    %38 = vector.broadcast %34 : vector<1x128xf32> to vector<64x128xf32>
    %39 = arith.mulf %13, %38 : vector<64x128xf32>
    %40 = vector.broadcast %37 : vector<1x128xf32> to vector<64x128xf32>
    %41 = arith.addf %39, %40 : vector<64x128xf32>
    %cst_24 = arith.constant 2.000000e-01 : f32
    %42 = vector.broadcast %cst_24 : f32 to vector<64x128xf32>
    %43 = arith.mulf %42, %41 : vector<64x128xf32>
    %44 = arith.maximumf %41, %43 : vector<64x128xf32>
    %45 = vector.shape_cast %44 : vector<64x128xf32> to vector<1x8x8x128xf32>
    %46 = arith.truncf %45 : vector<1x8x8x128xf32> to vector<1x8x8x128xbf16>
    %c0_25 = arith.constant 0 : index
    %c0_26 = arith.constant 0 : index
    %c0_27 = arith.constant 0 : index
    %c0_28 = arith.constant 0 : index
    %47 = vector.load %arg5[%c0_25, %c0_26, %c0_27, %c0_28] : memref<1x8x8x128xbf16, #tpu.memory_space<vmem>>, vector<1x8x8x128xbf16>
    tpu.vector_store %arg5[%c0_25, %c0_26, %c0_27, %c0_28], %46 {strides = array<i32>} : memref<1x8x8x128xbf16, #tpu.memory_space<vmem>>, vector<1x8x8x128xbf16>,
    return
  }
  func.func @transform_0(%arg0: i32, %arg1: i32) -> (i32, i32, i32, i32) {
    %c0_i32 = arith.constant 0 : i32
    %c0_i32_0 = arith.constant 0 : i32
    %c0_i32_1 = arith.constant 0 : i32
    %c0_i32_2 = arith.constant 0 : i32
    return %arg0, %c0_i32, %c0_i32_0, %c0_i32_1 : i32, i32, i32, i32
  }
  func.func @transform_1(%arg0: i32, %arg1: i32) -> (i32, i32, i32) {
    %c0_i32 = arith.constant 0 : i32
    %c0_i32_0 = arith.constant 0 : i32
    %c0_i32_1 = arith.constant 0 : i32
    %c0_i32_2 = arith.constant 0 : i32
    return %c0_i32, %c0_i32_0, %c0_i32_1 : i32, i32, i32
  }
  func.func @transform_2(%arg0: i32, %arg1: i32) -> (i32, i32, i32) {
    %c0_i32 = arith.constant 0 : i32
    %c0_i32_0 = arith.constant 0 : i32
    %c0_i32_1 = arith.constant 0 : i32
    %c0_i32_2 = arith.constant 0 : i32
    return %c0_i32, %c0_i32_0, %c0_i32_1 : i32, i32, i32
  }
  func.func @transform_3(%arg0: i32, %arg1: i32) -> (i32, i32, i32, i32) {
    %c0_i32 = arith.constant 0 : i32
    %c0_i32_0 = arith.constant 0 : i32
    %c0_i32_1 = arith.constant 0 : i32
    return %arg0, %c0_i32, %c0_i32_0, %arg1 : i32, i32, i32, i32
  }
}

module attributes {stable_mosaic.version = 11 : i64} {
  func.func @_fused_conv_kernel(%arg0: i32, %arg1: i32, %arg2: memref<1x5x5x512xbf16, #tpu.memory_space<vmem>>, %arg3: memref<1x2048x256xbf16, #tpu.memory_space<vmem>>, %arg4: memref<1x3x256xf32, #tpu.memory_space<vmem>>, %arg5: memref<1x4x4x256xbf16, #tpu.memory_space<vmem>>) attributes {dimension_semantics = [#tpu.dimension_semantics<parallel>, #tpu.dimension_semantics<arbitrary>], iteration_bounds = array<i64: 2, 1>, scalar_prefetch = 0 : i64, scratch_operands = 0 : i64, tpu.core_type = #tpu.core_type<tc>, window_params = [{transform_indices = @transform_0, window_bounds = array<i64: 1, 5, 5, 512>}, {pipeline_mode = #tpu.pipeline_mode<synchronous>, transform_indices = @transform_1, window_bounds = array<i64: 1, 2048, 256>}, {pipeline_mode = #tpu.pipeline_mode<synchronous>, transform_indices = @transform_2, window_bounds = array<i64: 1, 3, 256>}, {transform_indices = @transform_3, window_bounds = array<i64: 1, 4, 4, 256>}]} {
    %c0 = arith.constant 0 : index
    %c0_0 = arith.constant 0 : index
    %c0_1 = arith.constant 0 : index
    %c0_2 = arith.constant 0 : index
    %0 = vector.load %arg2[%c0, %c0_0, %c0_1, %c0_2] : memref<1x5x5x512xbf16, #tpu.memory_space<vmem>>, vector<1x4x4x512xbf16>
    %1 = vector.shape_cast %0 : vector<1x4x4x512xbf16> to vector<4x4x512xbf16>
    %c0_3 = arith.constant 0 : index
    %c0_4 = arith.constant 0 : index
    %c1 = arith.constant 1 : index
    %c0_5 = arith.constant 0 : index
    %2 = vector.load %arg2[%c0_3, %c0_4, %c1, %c0_5] : memref<1x5x5x512xbf16, #tpu.memory_space<vmem>>, vector<1x4x4x512xbf16>
    %3 = vector.shape_cast %2 : vector<1x4x4x512xbf16> to vector<4x4x512xbf16>
    %c0_6 = arith.constant 0 : index
    %c1_7 = arith.constant 1 : index
    %c0_8 = arith.constant 0 : index
    %c0_9 = arith.constant 0 : index
    %4 = vector.load %arg2[%c0_6, %c1_7, %c0_8, %c0_9] : memref<1x5x5x512xbf16, #tpu.memory_space<vmem>>, vector<1x4x4x512xbf16>
    %5 = vector.shape_cast %4 : vector<1x4x4x512xbf16> to vector<4x4x512xbf16>
    %c0_10 = arith.constant 0 : index
    %c1_11 = arith.constant 1 : index
    %c1_12 = arith.constant 1 : index
    %c0_13 = arith.constant 0 : index
    %6 = vector.load %arg2[%c0_10, %c1_11, %c1_12, %c0_13] : memref<1x5x5x512xbf16, #tpu.memory_space<vmem>>, vector<1x4x4x512xbf16>
    %7 = vector.shape_cast %6 : vector<1x4x4x512xbf16> to vector<4x4x512xbf16>
    %8 = tpu.concatenate %1, %3, %5, %7 in 2 : vector<4x4x512xbf16>, vector<4x4x512xbf16>, vector<4x4x512xbf16>, vector<4x4x512xbf16> -> vector<4x4x2048xbf16>
    %9 = vector.shape_cast %8 : vector<4x4x2048xbf16> to vector<16x2048xbf16>
    %10 = arith.index_cast %arg1 : i32 to index
    %c0_14 = arith.constant 0 : index
    %c0_15 = arith.constant 0 : index
    %11 = vector.load %arg3[%10, %c0_14, %c0_15] : memref<1x2048x256xbf16, #tpu.memory_space<vmem>>, vector<1x2048x256xbf16>
    %12 = vector.shape_cast %11 : vector<1x2048x256xbf16> to vector<2048x256xbf16>
    %cst = arith.constant dense<0.000000e+00> : vector<16x256xf32>
    %13 = tpu.matmul %9, %12, %cst {dimension_numbers = #tpu.dot_dimension_numbers<[1], [0], [0], [1], [0, 0, 1, 1], [], []>} : vector<16x2048xbf16>, vector<2048x256xbf16>, vector<16x256xf32> -> vector<16x256xf32>
    %14 = arith.index_cast %arg1 : i32 to index
    %c0_16 = arith.constant 0 : index
    %c0_17 = arith.constant 0 : index
    %15 = vector.load %arg4[%14, %c0_16, %c0_17] : memref<1x3x256xf32, #tpu.memory_space<vmem>>, vector<1x3x256xf32>
    %16 = vector.shape_cast %15 : vector<1x3x256xf32> to vector<3x256xf32>
    %cst_18 = arith.constant dense<0.000000e+00> : vector<256xf32>
    %17 = vector.multi_reduction <add>, %13, %cst_18 [0] : vector<16x256xf32> to vector<256xf32>
    %18 = vector.shape_cast %17 : vector<256xf32> to vector<1x256xf32>
    %cst_19 = arith.constant 6.250000e-02 : f32
    %19 = vector.broadcast %cst_19 : f32 to vector<1x256xf32>
    %20 = arith.mulf %18, %19 : vector<1x256xf32>
    %21 = arith.mulf %13, %13 : vector<16x256xf32>
    %cst_20 = arith.constant dense<0.000000e+00> : vector<256xf32>
    %22 = vector.multi_reduction <add>, %21, %cst_20 [0] : vector<16x256xf32> to vector<256xf32>
    %23 = vector.shape_cast %22 : vector<256xf32> to vector<1x256xf32>
    %cst_21 = arith.constant 6.250000e-02 : f32
    %24 = vector.broadcast %cst_21 : f32 to vector<1x256xf32>
    %25 = arith.mulf %23, %24 : vector<1x256xf32>
    %26 = arith.mulf %20, %20 : vector<1x256xf32>
    %27 = arith.subf %25, %26 : vector<1x256xf32>
    %cst_22 = arith.constant 0.000000e+00 : f32
    %28 = vector.broadcast %cst_22 : f32 to vector<1x256xf32>
    %29 = arith.maximumf %27, %28 : vector<1x256xf32>
    %30 = vector.extract_strided_slice %16 {offsets = [1, 0], sizes = [1, 256], strides = [1, 1]} : vector<3x256xf32> to vector<1x256xf32>
    %cst_23 = arith.constant 9.99999974E-6 : f32
    %31 = vector.broadcast %cst_23 : f32 to vector<1x256xf32>
    %32 = arith.addf %29, %31 : vector<1x256xf32>
    %33 = math.rsqrt %32 : vector<1x256xf32>
    %34 = arith.mulf %30, %33 : vector<1x256xf32>
    %35 = vector.extract_strided_slice %16 {offsets = [2, 0], sizes = [1, 256], strides = [1, 1]} : vector<3x256xf32> to vector<1x256xf32>
    %36 = arith.mulf %20, %34 : vector<1x256xf32>
    %37 = arith.subf %35, %36 : vector<1x256xf32>
    %38 = vector.broadcast %34 : vector<1x256xf32> to vector<16x256xf32>
    %39 = arith.mulf %13, %38 : vector<16x256xf32>
    %40 = vector.broadcast %37 : vector<1x256xf32> to vector<16x256xf32>
    %41 = arith.addf %39, %40 : vector<16x256xf32>
    %cst_24 = arith.constant 2.000000e-01 : f32
    %42 = vector.broadcast %cst_24 : f32 to vector<16x256xf32>
    %43 = arith.mulf %42, %41 : vector<16x256xf32>
    %44 = arith.maximumf %41, %43 : vector<16x256xf32>
    %45 = vector.shape_cast %44 : vector<16x256xf32> to vector<1x4x4x256xf32>
    %46 = arith.truncf %45 : vector<1x4x4x256xf32> to vector<1x4x4x256xbf16>
    %c0_25 = arith.constant 0 : index
    %c0_26 = arith.constant 0 : index
    %c0_27 = arith.constant 0 : index
    %c0_28 = arith.constant 0 : index
    %47 = vector.load %arg5[%c0_25, %c0_26, %c0_27, %c0_28] : memref<1x4x4x256xbf16, #tpu.memory_space<vmem>>, vector<1x4x4x256xbf16>
    tpu.vector_store %arg5[%c0_25, %c0_26, %c0_27, %c0_28], %46 {strides = array<i32>} : memref<1x4x4x256xbf16, #tpu.memory_space<vmem>>, vector<1x4x4x256xbf16>,
    return
  }
  func.func @transform_0(%arg0: i32, %arg1: i32) -> (i32, i32, i32, i32) {
    %c0_i32 = arith.constant 0 : i32
    %c0_i32_0 = arith.constant 0 : i32
    %c0_i32_1 = arith.constant 0 : i32
    %c0_i32_2 = arith.constant 0 : i32
    return %arg0, %c0_i32, %c0_i32_0, %c0_i32_1 : i32, i32, i32, i32
  }
  func.func @transform_1(%arg0: i32, %arg1: i32) -> (i32, i32, i32) {
    %c0_i32 = arith.constant 0 : i32
    %c0_i32_0 = arith.constant 0 : i32
    %c0_i32_1 = arith.constant 0 : i32
    %c0_i32_2 = arith.constant 0 : i32
    return %c0_i32, %c0_i32_0, %c0_i32_1 : i32, i32, i32
  }
  func.func @transform_2(%arg0: i32, %arg1: i32) -> (i32, i32, i32) {
    %c0_i32 = arith.constant 0 : i32
    %c0_i32_0 = arith.constant 0 : i32
    %c0_i32_1 = arith.constant 0 : i32
    %c0_i32_2 = arith.constant 0 : i32
    return %c0_i32, %c0_i32_0, %c0_i32_1 : i32, i32, i32
  }
  func.func @transform_3(%arg0: i32, %arg1: i32) -> (i32, i32, i32, i32) {
    %c0_i32 = arith.constant 0 : i32
    %c0_i32_0 = arith.constant 0 : i32
    %c0_i32_1 = arith.constant 0 : i32
    return %arg0, %c0_i32, %c0_i32_0, %arg1 : i32, i32, i32, i32
  }
}

module attributes {stable_mosaic.version = 11 : i64} {
  func.func @_fused_conv_kernel(%arg0: i32, %arg1: i32, %arg2: memref<1x6x6x256xbf16, #tpu.memory_space<vmem>>, %arg3: memref<2x4096x256xbf16, #tpu.memory_space<vmem>>, %arg4: memref<2x3x256xf32, #tpu.memory_space<vmem>>, %arg5: memref<1x3x3x256xbf16, #tpu.memory_space<vmem>>) attributes {dimension_semantics = [#tpu.dimension_semantics<parallel>, #tpu.dimension_semantics<arbitrary>], iteration_bounds = array<i64: 2, 2>, scalar_prefetch = 0 : i64, scratch_operands = 0 : i64, tpu.core_type = #tpu.core_type<tc>, window_params = [{transform_indices = @transform_0, window_bounds = array<i64: 1, 6, 6, 256>}, {pipeline_mode = #tpu.pipeline_mode<synchronous>, transform_indices = @transform_1, window_bounds = array<i64: 2, 4096, 256>}, {pipeline_mode = #tpu.pipeline_mode<synchronous>, transform_indices = @transform_2, window_bounds = array<i64: 2, 3, 256>}, {transform_indices = @transform_3, window_bounds = array<i64: 1, 3, 3, 256>}]} {
    %c0 = arith.constant 0 : index
    %c0_0 = arith.constant 0 : index
    %c0_1 = arith.constant 0 : index
    %c0_2 = arith.constant 0 : index
    %0 = vector.load %arg2[%c0, %c0_0, %c0_1, %c0_2] : memref<1x6x6x256xbf16, #tpu.memory_space<vmem>>, vector<1x3x3x256xbf16>
    %1 = vector.shape_cast %0 : vector<1x3x3x256xbf16> to vector<3x3x256xbf16>
    %c0_3 = arith.constant 0 : index
    %c0_4 = arith.constant 0 : index
    %c1 = arith.constant 1 : index
    %c0_5 = arith.constant 0 : index
    %2 = vector.load %arg2[%c0_3, %c0_4, %c1, %c0_5] : memref<1x6x6x256xbf16, #tpu.memory_space<vmem>>, vector<1x3x3x256xbf16>
    %3 = vector.shape_cast %2 : vector<1x3x3x256xbf16> to vector<3x3x256xbf16>
    %c0_6 = arith.constant 0 : index
    %c0_7 = arith.constant 0 : index
    %c2 = arith.constant 2 : index
    %c0_8 = arith.constant 0 : index
    %4 = vector.load %arg2[%c0_6, %c0_7, %c2, %c0_8] : memref<1x6x6x256xbf16, #tpu.memory_space<vmem>>, vector<1x3x3x256xbf16>
    %5 = vector.shape_cast %4 : vector<1x3x3x256xbf16> to vector<3x3x256xbf16>
    %c0_9 = arith.constant 0 : index
    %c0_10 = arith.constant 0 : index
    %c3 = arith.constant 3 : index
    %c0_11 = arith.constant 0 : index
    %6 = vector.load %arg2[%c0_9, %c0_10, %c3, %c0_11] : memref<1x6x6x256xbf16, #tpu.memory_space<vmem>>, vector<1x3x3x256xbf16>
    %7 = vector.shape_cast %6 : vector<1x3x3x256xbf16> to vector<3x3x256xbf16>
    %c0_12 = arith.constant 0 : index
    %c1_13 = arith.constant 1 : index
    %c0_14 = arith.constant 0 : index
    %c0_15 = arith.constant 0 : index
    %8 = vector.load %arg2[%c0_12, %c1_13, %c0_14, %c0_15] : memref<1x6x6x256xbf16, #tpu.memory_space<vmem>>, vector<1x3x3x256xbf16>
    %9 = vector.shape_cast %8 : vector<1x3x3x256xbf16> to vector<3x3x256xbf16>
    %c0_16 = arith.constant 0 : index
    %c1_17 = arith.constant 1 : index
    %c1_18 = arith.constant 1 : index
    %c0_19 = arith.constant 0 : index
    %10 = vector.load %arg2[%c0_16, %c1_17, %c1_18, %c0_19] : memref<1x6x6x256xbf16, #tpu.memory_space<vmem>>, vector<1x3x3x256xbf16>
    %11 = vector.shape_cast %10 : vector<1x3x3x256xbf16> to vector<3x3x256xbf16>
    %c0_20 = arith.constant 0 : index
    %c1_21 = arith.constant 1 : index
    %c2_22 = arith.constant 2 : index
    %c0_23 = arith.constant 0 : index
    %12 = vector.load %arg2[%c0_20, %c1_21, %c2_22, %c0_23] : memref<1x6x6x256xbf16, #tpu.memory_space<vmem>>, vector<1x3x3x256xbf16>
    %13 = vector.shape_cast %12 : vector<1x3x3x256xbf16> to vector<3x3x256xbf16>
    %c0_24 = arith.constant 0 : index
    %c1_25 = arith.constant 1 : index
    %c3_26 = arith.constant 3 : index
    %c0_27 = arith.constant 0 : index
    %14 = vector.load %arg2[%c0_24, %c1_25, %c3_26, %c0_27] : memref<1x6x6x256xbf16, #tpu.memory_space<vmem>>, vector<1x3x3x256xbf16>
    %15 = vector.shape_cast %14 : vector<1x3x3x256xbf16> to vector<3x3x256xbf16>
    %c0_28 = arith.constant 0 : index
    %c2_29 = arith.constant 2 : index
    %c0_30 = arith.constant 0 : index
    %c0_31 = arith.constant 0 : index
    %16 = vector.load %arg2[%c0_28, %c2_29, %c0_30, %c0_31] : memref<1x6x6x256xbf16, #tpu.memory_space<vmem>>, vector<1x3x3x256xbf16>
    %17 = vector.shape_cast %16 : vector<1x3x3x256xbf16> to vector<3x3x256xbf16>
    %c0_32 = arith.constant 0 : index
    %c2_33 = arith.constant 2 : index
    %c1_34 = arith.constant 1 : index
    %c0_35 = arith.constant 0 : index
    %18 = vector.load %arg2[%c0_32, %c2_33, %c1_34, %c0_35] : memref<1x6x6x256xbf16, #tpu.memory_space<vmem>>, vector<1x3x3x256xbf16>
    %19 = vector.shape_cast %18 : vector<1x3x3x256xbf16> to vector<3x3x256xbf16>
    %c0_36 = arith.constant 0 : index
    %c2_37 = arith.constant 2 : index
    %c2_38 = arith.constant 2 : index
    %c0_39 = arith.constant 0 : index
    %20 = vector.load %arg2[%c0_36, %c2_37, %c2_38, %c0_39] : memref<1x6x6x256xbf16, #tpu.memory_space<vmem>>, vector<1x3x3x256xbf16>
    %21 = vector.shape_cast %20 : vector<1x3x3x256xbf16> to vector<3x3x256xbf16>
    %c0_40 = arith.constant 0 : index
    %c2_41 = arith.constant 2 : index
    %c3_42 = arith.constant 3 : index
    %c0_43 = arith.constant 0 : index
    %22 = vector.load %arg2[%c0_40, %c2_41, %c3_42, %c0_43] : memref<1x6x6x256xbf16, #tpu.memory_space<vmem>>, vector<1x3x3x256xbf16>
    %23 = vector.shape_cast %22 : vector<1x3x3x256xbf16> to vector<3x3x256xbf16>
    %c0_44 = arith.constant 0 : index
    %c3_45 = arith.constant 3 : index
    %c0_46 = arith.constant 0 : index
    %c0_47 = arith.constant 0 : index
    %24 = vector.load %arg2[%c0_44, %c3_45, %c0_46, %c0_47] : memref<1x6x6x256xbf16, #tpu.memory_space<vmem>>, vector<1x3x3x256xbf16>
    %25 = vector.shape_cast %24 : vector<1x3x3x256xbf16> to vector<3x3x256xbf16>
    %c0_48 = arith.constant 0 : index
    %c3_49 = arith.constant 3 : index
    %c1_50 = arith.constant 1 : index
    %c0_51 = arith.constant 0 : index
    %26 = vector.load %arg2[%c0_48, %c3_49, %c1_50, %c0_51] : memref<1x6x6x256xbf16, #tpu.memory_space<vmem>>, vector<1x3x3x256xbf16>
    %27 = vector.shape_cast %26 : vector<1x3x3x256xbf16> to vector<3x3x256xbf16>
    %c0_52 = arith.constant 0 : index
    %c3_53 = arith.constant 3 : index
    %c2_54 = arith.constant 2 : index
    %c0_55 = arith.constant 0 : index
    %28 = vector.load %arg2[%c0_52, %c3_53, %c2_54, %c0_55] : memref<1x6x6x256xbf16, #tpu.memory_space<vmem>>, vector<1x3x3x256xbf16>
    %29 = vector.shape_cast %28 : vector<1x3x3x256xbf16> to vector<3x3x256xbf16>
    %c0_56 = arith.constant 0 : index
    %c3_57 = arith.constant 3 : index
    %c3_58 = arith.constant 3 : index
    %c0_59 = arith.constant 0 : index
    %30 = vector.load %arg2[%c0_56, %c3_57, %c3_58, %c0_59] : memref<1x6x6x256xbf16, #tpu.memory_space<vmem>>, vector<1x3x3x256xbf16>
    %31 = vector.shape_cast %30 : vector<1x3x3x256xbf16> to vector<3x3x256xbf16>
    %32 = tpu.concatenate %1, %3, %5, %7, %9, %11, %13, %15, %17, %19, %21, %23, %25, %27, %29, %31 in 2 : vector<3x3x256xbf16>, vector<3x3x256xbf16>, vector<3x3x256xbf16>, vector<3x3x256xbf16>, vector<3x3x256xbf16>, vector<3x3x256xbf16>, vector<3x3x256xbf16>, vector<3x3x256xbf16>, vector<3x3x256xbf16>, vector<3x3x256xbf16>, vector<3x3x256xbf16>, vector<3x3x256xbf16>, vector<3x3x256xbf16>, vector<3x3x256xbf16>, vector<3x3x256xbf16>, vector<3x3x256xbf16> -> vector<3x3x4096xbf16>
    %33 = vector.shape_cast %32 : vector<3x3x4096xbf16> to vector<9x4096xbf16>
    %34 = arith.index_cast %arg1 : i32 to index
    %c0_60 = arith.constant 0 : index
    %c0_61 = arith.constant 0 : index
    %35 = vector.load %arg3[%34, %c0_60, %c0_61] : memref<2x4096x256xbf16, #tpu.memory_space<vmem>>, vector<1x4096x256xbf16>
    %36 = vector.shape_cast %35 : vector<1x4096x256xbf16> to vector<4096x256xbf16>
    %cst = arith.constant dense<0.000000e+00> : vector<9x256xf32>
    %37 = tpu.matmul %33, %36, %cst {dimension_numbers = #tpu.dot_dimension_numbers<[1], [0], [0], [1], [0, 0, 1, 1], [], []>} : vector<9x4096xbf16>, vector<4096x256xbf16>, vector<9x256xf32> -> vector<9x256xf32>
    %38 = arith.index_cast %arg1 : i32 to index
    %c0_62 = arith.constant 0 : index
    %c0_63 = arith.constant 0 : index
    %39 = vector.load %arg4[%38, %c0_62, %c0_63] : memref<2x3x256xf32, #tpu.memory_space<vmem>>, vector<1x3x256xf32>
    %40 = vector.shape_cast %39 : vector<1x3x256xf32> to vector<3x256xf32>
    %cst_64 = arith.constant dense<0.000000e+00> : vector<256xf32>
    %41 = vector.multi_reduction <add>, %37, %cst_64 [0] : vector<9x256xf32> to vector<256xf32>
    %42 = vector.shape_cast %41 : vector<256xf32> to vector<1x256xf32>
    %cst_65 = arith.constant 0.111111112 : f32
    %43 = vector.broadcast %cst_65 : f32 to vector<1x256xf32>
    %44 = arith.mulf %42, %43 : vector<1x256xf32>
    %45 = arith.mulf %37, %37 : vector<9x256xf32>
    %cst_66 = arith.constant dense<0.000000e+00> : vector<256xf32>
    %46 = vector.multi_reduction <add>, %45, %cst_66 [0] : vector<9x256xf32> to vector<256xf32>
    %47 = vector.shape_cast %46 : vector<256xf32> to vector<1x256xf32>
    %cst_67 = arith.constant 0.111111112 : f32
    %48 = vector.broadcast %cst_67 : f32 to vector<1x256xf32>
    %49 = arith.mulf %47, %48 : vector<1x256xf32>
    %50 = arith.mulf %44, %44 : vector<1x256xf32>
    %51 = arith.subf %49, %50 : vector<1x256xf32>
    %cst_68 = arith.constant 0.000000e+00 : f32
    %52 = vector.broadcast %cst_68 : f32 to vector<1x256xf32>
    %53 = arith.maximumf %51, %52 : vector<1x256xf32>
    %54 = vector.extract_strided_slice %40 {offsets = [1, 0], sizes = [1, 256], strides = [1, 1]} : vector<3x256xf32> to vector<1x256xf32>
    %cst_69 = arith.constant 9.99999974E-6 : f32
    %55 = vector.broadcast %cst_69 : f32 to vector<1x256xf32>
    %56 = arith.addf %53, %55 : vector<1x256xf32>
    %57 = math.rsqrt %56 : vector<1x256xf32>
    %58 = arith.mulf %54, %57 : vector<1x256xf32>
    %59 = vector.extract_strided_slice %40 {offsets = [2, 0], sizes = [1, 256], strides = [1, 1]} : vector<3x256xf32> to vector<1x256xf32>
    %60 = arith.mulf %44, %58 : vector<1x256xf32>
    %61 = arith.subf %59, %60 : vector<1x256xf32>
    %62 = vector.broadcast %58 : vector<1x256xf32> to vector<9x256xf32>
    %63 = arith.mulf %37, %62 : vector<9x256xf32>
    %64 = vector.broadcast %61 : vector<1x256xf32> to vector<9x256xf32>
    %65 = arith.addf %63, %64 : vector<9x256xf32>
    %cst_70 = arith.constant 2.000000e-01 : f32
    %66 = vector.broadcast %cst_70 : f32 to vector<9x256xf32>
    %67 = arith.mulf %66, %65 : vector<9x256xf32>
    %68 = arith.maximumf %65, %67 : vector<9x256xf32>
    %69 = vector.shape_cast %68 : vector<9x256xf32> to vector<1x3x3x256xf32>
    %70 = arith.truncf %69 : vector<1x3x3x256xf32> to vector<1x3x3x256xbf16>
    %c0_71 = arith.constant 0 : index
    %c0_72 = arith.constant 0 : index
    %c0_73 = arith.constant 0 : index
    %c0_74 = arith.constant 0 : index
    %71 = vector.load %arg5[%c0_71, %c0_72, %c0_73, %c0_74] : memref<1x3x3x256xbf16, #tpu.memory_space<vmem>>, vector<1x3x3x256xbf16>
    tpu.vector_store %arg5[%c0_71, %c0_72, %c0_73, %c0_74], %70 {strides = array<i32>} : memref<1x3x3x256xbf16, #tpu.memory_space<vmem>>, vector<1x3x3x256xbf16>,
    return
  }
  func.func @transform_0(%arg0: i32, %arg1: i32) -> (i32, i32, i32, i32) {
    %c0_i32 = arith.constant 0 : i32
    %c0_i32_0 = arith.constant 0 : i32
    %c0_i32_1 = arith.constant 0 : i32
    %c0_i32_2 = arith.constant 0 : i32
    return %arg0, %c0_i32, %c0_i32_0, %c0_i32_1 : i32, i32, i32, i32
  }
  func.func @transform_1(%arg0: i32, %arg1: i32) -> (i32, i32, i32) {
    %c0_i32 = arith.constant 0 : i32
    %c0_i32_0 = arith.constant 0 : i32
    %c0_i32_1 = arith.constant 0 : i32
    %c0_i32_2 = arith.constant 0 : i32
    return %c0_i32, %c0_i32_0, %c0_i32_1 : i32, i32, i32
  }
  func.func @transform_2(%arg0: i32, %arg1: i32) -> (i32, i32, i32) {
    %c0_i32 = arith.constant 0 : i32
    %c0_i32_0 = arith.constant 0 : i32
    %c0_i32_1 = arith.constant 0 : i32
    %c0_i32_2 = arith.constant 0 : i32
    return %c0_i32, %c0_i32_0, %c0_i32_1 : i32, i32, i32
  }
  func.func @transform_3(%arg0: i32, %arg1: i32) -> (i32, i32, i32, i32) {
    %c0_i32 = arith.constant 0 : i32
    %c0_i32_0 = arith.constant 0 : i32
    %c0_i32_1 = arith.constant 0 : i32
    return %arg0, %c0_i32, %c0_i32_0, %arg1 : i32, i32, i32, i32
  }
}

module attributes {stable_mosaic.version = 11 : i64} {
  func.func @_fused_conv_kernel(%arg0: i32, %arg1: i32, %arg2: memref<1x5x5x512xbf16, #tpu.memory_space<vmem>>, %arg3: memref<1x8192x128xbf16, #tpu.memory_space<vmem>>, %arg4: memref<1x3x128xf32, #tpu.memory_space<vmem>>, %arg5: memref<1x2x2x128xf32, #tpu.memory_space<vmem>>) attributes {dimension_semantics = [#tpu.dimension_semantics<parallel>, #tpu.dimension_semantics<arbitrary>], iteration_bounds = array<i64: 2, 1>, scalar_prefetch = 0 : i64, scratch_operands = 0 : i64, tpu.core_type = #tpu.core_type<tc>, window_params = [{transform_indices = @transform_0, window_bounds = array<i64: 1, 5, 5, 512>}, {pipeline_mode = #tpu.pipeline_mode<synchronous>, transform_indices = @transform_1, window_bounds = array<i64: 1, 8192, 128>}, {pipeline_mode = #tpu.pipeline_mode<synchronous>, transform_indices = @transform_2, window_bounds = array<i64: 1, 3, 128>}, {transform_indices = @transform_3, window_bounds = array<i64: 1, 2, 2, 128>}]} {
    %c0 = arith.constant 0 : index
    %c0_0 = arith.constant 0 : index
    %c0_1 = arith.constant 0 : index
    %c0_2 = arith.constant 0 : index
    %0 = vector.load %arg2[%c0, %c0_0, %c0_1, %c0_2] : memref<1x5x5x512xbf16, #tpu.memory_space<vmem>>, vector<1x2x2x512xbf16>
    %1 = vector.shape_cast %0 : vector<1x2x2x512xbf16> to vector<2x2x512xbf16>
    %c0_3 = arith.constant 0 : index
    %c0_4 = arith.constant 0 : index
    %c1 = arith.constant 1 : index
    %c0_5 = arith.constant 0 : index
    %2 = vector.load %arg2[%c0_3, %c0_4, %c1, %c0_5] : memref<1x5x5x512xbf16, #tpu.memory_space<vmem>>, vector<1x2x2x512xbf16>
    %3 = vector.shape_cast %2 : vector<1x2x2x512xbf16> to vector<2x2x512xbf16>
    %c0_6 = arith.constant 0 : index
    %c0_7 = arith.constant 0 : index
    %c2 = arith.constant 2 : index
    %c0_8 = arith.constant 0 : index
    %4 = vector.load %arg2[%c0_6, %c0_7, %c2, %c0_8] : memref<1x5x5x512xbf16, #tpu.memory_space<vmem>>, vector<1x2x2x512xbf16>
    %5 = vector.shape_cast %4 : vector<1x2x2x512xbf16> to vector<2x2x512xbf16>
    %c0_9 = arith.constant 0 : index
    %c0_10 = arith.constant 0 : index
    %c3 = arith.constant 3 : index
    %c0_11 = arith.constant 0 : index
    %6 = vector.load %arg2[%c0_9, %c0_10, %c3, %c0_11] : memref<1x5x5x512xbf16, #tpu.memory_space<vmem>>, vector<1x2x2x512xbf16>
    %7 = vector.shape_cast %6 : vector<1x2x2x512xbf16> to vector<2x2x512xbf16>
    %c0_12 = arith.constant 0 : index
    %c1_13 = arith.constant 1 : index
    %c0_14 = arith.constant 0 : index
    %c0_15 = arith.constant 0 : index
    %8 = vector.load %arg2[%c0_12, %c1_13, %c0_14, %c0_15] : memref<1x5x5x512xbf16, #tpu.memory_space<vmem>>, vector<1x2x2x512xbf16>
    %9 = vector.shape_cast %8 : vector<1x2x2x512xbf16> to vector<2x2x512xbf16>
    %c0_16 = arith.constant 0 : index
    %c1_17 = arith.constant 1 : index
    %c1_18 = arith.constant 1 : index
    %c0_19 = arith.constant 0 : index
    %10 = vector.load %arg2[%c0_16, %c1_17, %c1_18, %c0_19] : memref<1x5x5x512xbf16, #tpu.memory_space<vmem>>, vector<1x2x2x512xbf16>
    %11 = vector.shape_cast %10 : vector<1x2x2x512xbf16> to vector<2x2x512xbf16>
    %c0_20 = arith.constant 0 : index
    %c1_21 = arith.constant 1 : index
    %c2_22 = arith.constant 2 : index
    %c0_23 = arith.constant 0 : index
    %12 = vector.load %arg2[%c0_20, %c1_21, %c2_22, %c0_23] : memref<1x5x5x512xbf16, #tpu.memory_space<vmem>>, vector<1x2x2x512xbf16>
    %13 = vector.shape_cast %12 : vector<1x2x2x512xbf16> to vector<2x2x512xbf16>
    %c0_24 = arith.constant 0 : index
    %c1_25 = arith.constant 1 : index
    %c3_26 = arith.constant 3 : index
    %c0_27 = arith.constant 0 : index
    %14 = vector.load %arg2[%c0_24, %c1_25, %c3_26, %c0_27] : memref<1x5x5x512xbf16, #tpu.memory_space<vmem>>, vector<1x2x2x512xbf16>
    %15 = vector.shape_cast %14 : vector<1x2x2x512xbf16> to vector<2x2x512xbf16>
    %c0_28 = arith.constant 0 : index
    %c2_29 = arith.constant 2 : index
    %c0_30 = arith.constant 0 : index
    %c0_31 = arith.constant 0 : index
    %16 = vector.load %arg2[%c0_28, %c2_29, %c0_30, %c0_31] : memref<1x5x5x512xbf16, #tpu.memory_space<vmem>>, vector<1x2x2x512xbf16>
    %17 = vector.shape_cast %16 : vector<1x2x2x512xbf16> to vector<2x2x512xbf16>
    %c0_32 = arith.constant 0 : index
    %c2_33 = arith.constant 2 : index
    %c1_34 = arith.constant 1 : index
    %c0_35 = arith.constant 0 : index
    %18 = vector.load %arg2[%c0_32, %c2_33, %c1_34, %c0_35] : memref<1x5x5x512xbf16, #tpu.memory_space<vmem>>, vector<1x2x2x512xbf16>
    %19 = vector.shape_cast %18 : vector<1x2x2x512xbf16> to vector<2x2x512xbf16>
    %c0_36 = arith.constant 0 : index
    %c2_37 = arith.constant 2 : index
    %c2_38 = arith.constant 2 : index
    %c0_39 = arith.constant 0 : index
    %20 = vector.load %arg2[%c0_36, %c2_37, %c2_38, %c0_39] : memref<1x5x5x512xbf16, #tpu.memory_space<vmem>>, vector<1x2x2x512xbf16>
    %21 = vector.shape_cast %20 : vector<1x2x2x512xbf16> to vector<2x2x512xbf16>
    %c0_40 = arith.constant 0 : index
    %c2_41 = arith.constant 2 : index
    %c3_42 = arith.constant 3 : index
    %c0_43 = arith.constant 0 : index
    %22 = vector.load %arg2[%c0_40, %c2_41, %c3_42, %c0_43] : memref<1x5x5x512xbf16, #tpu.memory_space<vmem>>, vector<1x2x2x512xbf16>
    %23 = vector.shape_cast %22 : vector<1x2x2x512xbf16> to vector<2x2x512xbf16>
    %c0_44 = arith.constant 0 : index
    %c3_45 = arith.constant 3 : index
    %c0_46 = arith.constant 0 : index
    %c0_47 = arith.constant 0 : index
    %24 = vector.load %arg2[%c0_44, %c3_45, %c0_46, %c0_47] : memref<1x5x5x512xbf16, #tpu.memory_space<vmem>>, vector<1x2x2x512xbf16>
    %25 = vector.shape_cast %24 : vector<1x2x2x512xbf16> to vector<2x2x512xbf16>
    %c0_48 = arith.constant 0 : index
    %c3_49 = arith.constant 3 : index
    %c1_50 = arith.constant 1 : index
    %c0_51 = arith.constant 0 : index
    %26 = vector.load %arg2[%c0_48, %c3_49, %c1_50, %c0_51] : memref<1x5x5x512xbf16, #tpu.memory_space<vmem>>, vector<1x2x2x512xbf16>
    %27 = vector.shape_cast %26 : vector<1x2x2x512xbf16> to vector<2x2x512xbf16>
    %c0_52 = arith.constant 0 : index
    %c3_53 = arith.constant 3 : index
    %c2_54 = arith.constant 2 : index
    %c0_55 = arith.constant 0 : index
    %28 = vector.load %arg2[%c0_52, %c3_53, %c2_54, %c0_55] : memref<1x5x5x512xbf16, #tpu.memory_space<vmem>>, vector<1x2x2x512xbf16>
    %29 = vector.shape_cast %28 : vector<1x2x2x512xbf16> to vector<2x2x512xbf16>
    %c0_56 = arith.constant 0 : index
    %c3_57 = arith.constant 3 : index
    %c3_58 = arith.constant 3 : index
    %c0_59 = arith.constant 0 : index
    %30 = vector.load %arg2[%c0_56, %c3_57, %c3_58, %c0_59] : memref<1x5x5x512xbf16, #tpu.memory_space<vmem>>, vector<1x2x2x512xbf16>
    %31 = vector.shape_cast %30 : vector<1x2x2x512xbf16> to vector<2x2x512xbf16>
    %32 = tpu.concatenate %1, %3, %5, %7, %9, %11, %13, %15, %17, %19, %21, %23, %25, %27, %29, %31 in 2 : vector<2x2x512xbf16>, vector<2x2x512xbf16>, vector<2x2x512xbf16>, vector<2x2x512xbf16>, vector<2x2x512xbf16>, vector<2x2x512xbf16>, vector<2x2x512xbf16>, vector<2x2x512xbf16>, vector<2x2x512xbf16>, vector<2x2x512xbf16>, vector<2x2x512xbf16>, vector<2x2x512xbf16>, vector<2x2x512xbf16>, vector<2x2x512xbf16>, vector<2x2x512xbf16>, vector<2x2x512xbf16> -> vector<2x2x8192xbf16>
    %33 = vector.shape_cast %32 : vector<2x2x8192xbf16> to vector<4x8192xbf16>
    %34 = arith.index_cast %arg1 : i32 to index
    %c0_60 = arith.constant 0 : index
    %c0_61 = arith.constant 0 : index
    %35 = vector.load %arg3[%34, %c0_60, %c0_61] : memref<1x8192x128xbf16, #tpu.memory_space<vmem>>, vector<1x8192x128xbf16>
    %36 = vector.shape_cast %35 : vector<1x8192x128xbf16> to vector<8192x128xbf16>
    %cst = arith.constant dense<0.000000e+00> : vector<4x128xf32>
    %37 = tpu.matmul %33, %36, %cst {dimension_numbers = #tpu.dot_dimension_numbers<[1], [0], [0], [1], [0, 0, 1, 1], [], []>} : vector<4x8192xbf16>, vector<8192x128xbf16>, vector<4x128xf32> -> vector<4x128xf32>
    %38 = arith.index_cast %arg1 : i32 to index
    %c0_62 = arith.constant 0 : index
    %c0_63 = arith.constant 0 : index
    %39 = vector.load %arg4[%38, %c0_62, %c0_63] : memref<1x3x128xf32, #tpu.memory_space<vmem>>, vector<1x3x128xf32>
    %40 = vector.shape_cast %39 : vector<1x3x128xf32> to vector<3x128xf32>
    %cst_64 = arith.constant dense<0.000000e+00> : vector<128xf32>
    %41 = vector.multi_reduction <add>, %37, %cst_64 [0] : vector<4x128xf32> to vector<128xf32>
    %42 = vector.shape_cast %41 : vector<128xf32> to vector<1x128xf32>
    %cst_65 = arith.constant 2.500000e-01 : f32
    %43 = vector.broadcast %cst_65 : f32 to vector<1x128xf32>
    %44 = arith.mulf %42, %43 : vector<1x128xf32>
    %45 = arith.mulf %37, %37 : vector<4x128xf32>
    %cst_66 = arith.constant dense<0.000000e+00> : vector<128xf32>
    %46 = vector.multi_reduction <add>, %45, %cst_66 [0] : vector<4x128xf32> to vector<128xf32>
    %47 = vector.shape_cast %46 : vector<128xf32> to vector<1x128xf32>
    %cst_67 = arith.constant 2.500000e-01 : f32
    %48 = vector.broadcast %cst_67 : f32 to vector<1x128xf32>
    %49 = arith.mulf %47, %48 : vector<1x128xf32>
    %50 = arith.mulf %44, %44 : vector<1x128xf32>
    %51 = arith.subf %49, %50 : vector<1x128xf32>
    %cst_68 = arith.constant 0.000000e+00 : f32
    %52 = vector.broadcast %cst_68 : f32 to vector<1x128xf32>
    %53 = arith.maximumf %51, %52 : vector<1x128xf32>
    %54 = vector.extract_strided_slice %40 {offsets = [1, 0], sizes = [1, 128], strides = [1, 1]} : vector<3x128xf32> to vector<1x128xf32>
    %cst_69 = arith.constant 9.99999974E-6 : f32
    %55 = vector.broadcast %cst_69 : f32 to vector<1x128xf32>
    %56 = arith.addf %53, %55 : vector<1x128xf32>
    %57 = math.rsqrt %56 : vector<1x128xf32>
    %58 = arith.mulf %54, %57 : vector<1x128xf32>
    %59 = vector.extract_strided_slice %40 {offsets = [2, 0], sizes = [1, 128], strides = [1, 1]} : vector<3x128xf32> to vector<1x128xf32>
    %60 = arith.mulf %44, %58 : vector<1x128xf32>
    %61 = arith.subf %59, %60 : vector<1x128xf32>
    %62 = vector.broadcast %58 : vector<1x128xf32> to vector<4x128xf32>
    %63 = arith.mulf %37, %62 : vector<4x128xf32>
    %64 = vector.broadcast %61 : vector<1x128xf32> to vector<4x128xf32>
    %65 = arith.addf %63, %64 : vector<4x128xf32>
    %66 = arith.negf %65 : vector<4x128xf32>
    %67 = math.exp %66 : vector<4x128xf32>
    %cst_70 = arith.constant 1.000000e+00 : f32
    %68 = vector.broadcast %cst_70 : f32 to vector<4x128xf32>
    %69 = arith.addf %68, %67 : vector<4x128xf32>
    %70 = arith.divf %68, %69 : vector<4x128xf32>
    %71 = vector.shape_cast %70 : vector<4x128xf32> to vector<1x2x2x128xf32>
    %c0_71 = arith.constant 0 : index
    %c0_72 = arith.constant 0 : index
    %c0_73 = arith.constant 0 : index
    %c0_74 = arith.constant 0 : index
    %72 = vector.load %arg5[%c0_71, %c0_72, %c0_73, %c0_74] : memref<1x2x2x128xf32, #tpu.memory_space<vmem>>, vector<1x2x2x128xf32>
    tpu.vector_store %arg5[%c0_71, %c0_72, %c0_73, %c0_74], %71 {strides = array<i32>} : memref<1x2x2x128xf32, #tpu.memory_space<vmem>>, vector<1x2x2x128xf32>,
    return
  }
  func.func @transform_0(%arg0: i32, %arg1: i32) -> (i32, i32, i32, i32) {
    %c0_i32 = arith.constant 0 : i32
    %c0_i32_0 = arith.constant 0 : i32
    %c0_i32_1 = arith.constant 0 : i32
    %c0_i32_2 = arith.constant 0 : i32
    return %arg0, %c0_i32, %c0_i32_0, %c0_i32_1 : i32, i32, i32, i32
  }
  func.func @transform_1(%arg0: i32, %arg1: i32) -> (i32, i32, i32) {
    %c0_i32 = arith.constant 0 : i32
    %c0_i32_0 = arith.constant 0 : i32
    %c0_i32_1 = arith.constant 0 : i32
    %c0_i32_2 = arith.constant 0 : i32
    return %c0_i32, %c0_i32_0, %c0_i32_1 : i32, i32, i32
  }
  func.func @transform_2(%arg0: i32, %arg1: i32) -> (i32, i32, i32) {
    %c0_i32 = arith.constant 0 : i32
    %c0_i32_0 = arith.constant 0 : i32
    %c0_i32_1 = arith.constant 0 : i32
    %c0_i32_2 = arith.constant 0 : i32
    return %c0_i32, %c0_i32_0, %c0_i32_1 : i32, i32, i32
  }
  func.func @transform_3(%arg0: i32, %arg1: i32) -> (i32, i32, i32, i32) {
    %c0_i32 = arith.constant 0 : i32
    %c0_i32_0 = arith.constant 0 : i32
    %c0_i32_1 = arith.constant 0 : i32
    return %arg0, %c0_i32, %c0_i32_0, %arg1 : i32, i32, i32, i32
  }
}

</mosaic_0001>

<bundles_post_ra>
// kernel: _lambda_.5
= control target key start
LH: loop header
LB: loop body
LE: loop exit
PB: predicated region body
PF: predicated region fallthrough
CT: control target
= control target key end

     0   :  { %s2496_s12 = smov 0   ;;  %s2498_s13 = smov 0   ;;  %s2949_s0 = inlined_call_operand.vmem [shape: bf16[2,17,17,128], index: 0, kind: input, shape index: {}]   ;;  %s2950_s1 = inlined_call_operand.vmem [shape: bf16[1,512,64], index: 1, kind: input, shape index: {}]   ;;  %s2951_s2 = inlined_call_operand.vmem [shape: f32[1,3,64], index: 2, kind: input, shape index: {}]   ;;  %s2952_s3 = inlined_call_operand.vmem [shape: bf16[2,16,16,64], index: 3, kind: output, shape index: {}]  }
   0x1   :  { %s2500_s14 = smov 0  }
   0x2 LB: > { %s25_s15 = sadd.s32 1, %s2470_s13  ;;  %p1892_p0 = scmp.ge.s32.totalorder %s2474_s14, 1  ;;  %s2474_s14 = sphi %s2500_s14, %s13_s14   ;;  %s2470_s13 = sphi %s2498_s13, %s2954_s13   ;;  %s2466_s12 = sphi %s2496_s12, %s2953_s12  }
   0x3   : > { %p27_p1 = scmp.ge.s32.totalorder %s25_s15, 2  ;;  %p151_p2 = scmp.lt.s32.totalorder %s2474_s14, 3 }
   0x5   : > { %s2956_s15 = smov (%p27_p1, %s25_s15), 0  ;;  %p152_p3 = pnand %p1892_p0, %p151_p2 }
   0x6   : > { %v2356_v0 = vld [vmem:[%s2950_s1 + $0x40] sm:$0xff] (!%p152_p3)   ;;  %v2360_v4 = vld [vmem:[%s2950_s1 + $0x48] sm:$0xff] (!%p152_p3)   ;;  %v2364_v8 = vld [vmem:[%s2950_s1 + $0x50] sm:$0xff] (!%p152_p3)   ;;  %p178_p4 = scmp.lt.s32.totalorder (!%p152_p3), %s2466_s12, 1  ;;  %vm433_vm0 = vsmask.f32 (!%p152_p3), 7424 }
   0x7   : > { %155 = sbr.rel (%p152_p3) target bundleno = 388 (0x184), region = 32  ;;  %v2357_v1 = vld [vmem:[%s2950_s1 + $0xc0] sm:$0xff] (!%p152_p3)   ;;  %2107 = vmatprep.subr.bf16.mxu0 (!%p152_p3), %v2356_v0  ;;  %v2361_v5 = vld [vmem:[%s2950_s1 + $0xc8] sm:$0xff] (!%p152_p3)   ;;  %v2365_v9 = vld [vmem:[%s2950_s1 + $0xd0] sm:$0xff] (!%p152_p3)   ;;  %vm1774_vm1 = vcmask (!%p152_p3), 519168  }
   0x8   : > { %v2358_v2 = vld [vmem:[%s2950_s1] sm:$0xff] (!%p152_p3)   ;;  %2219 = vmatprep.subr.bf16.mxu1 (!%p152_p3), %v2357_v1  ;;  %v2362_v6 = vld [vmem:[%s2950_s1 + $0x8] sm:$0xff] (!%p152_p3)   ;;  %v2366_v10 = vld [vmem:[%s2950_s1 + $0x10] sm:$0xff] (!%p152_p3)  }
   0x9   : > { %v2359_v3 = vld [vmem:[%s2950_s1 + $0x80] sm:$0xff] (!%p152_p3)   ;;  %2108 = vmatpush3.bf16.msra.mxu0 (!%p152_p3), %v2358_v2  ;;  %v2363_v7 = vld [vmem:[%s2950_s1 + $0x88] sm:$0xff] (!%p152_p3)   ;;  %v2367_v11 = vld [vmem:[%s2950_s1 + $0x90] sm:$0xff] (!%p152_p3)  }
   0xa   : > { %2220 = vmatpush3.bf16.msra.mxu1 (!%p152_p3), %v2359_v3  ;;  %2109 = vmatprep.subr.bf16.mxu0 (!%p152_p3), %v2360_v4  ;;  %v2368_v12 = vld [vmem:[%s2950_s1 + $0x58] sm:$0xff] (!%p152_p3)   ;;  %v2372_v16 = vld [vmem:[%s2950_s1 + $0x60] sm:$0xff] (!%p152_p3)   ;;  %v2376_v20 = vld [vmem:[%s2950_s1 + $0x68] sm:$0xff] (!%p152_p3)  }
   0xb   : > { %2221 = vmatprep.subr.bf16.mxu1 (!%p152_p3), %v2361_v5  ;;  %v2369_v13 = vld [vmem:[%s2950_s1 + $0xd8] sm:$0xff] (!%p152_p3)   ;;  %v2373_v17 = vld [vmem:[%s2950_s1 + $0xe0] sm:$0xff] (!%p152_p3)   ;;  %v2377_v21 = vld [vmem:[%s2950_s1 + $0xe8] sm:$0xff] (!%p152_p3)  }
   0xc   : > { %v2370_v14 = vld [vmem:[%s2950_s1 + $0x18] sm:$0xff] (!%p152_p3)   ;;  %v2374_v18 = vld [vmem:[%s2950_s1 + $0x20] sm:$0xff] (!%p152_p3)   ;;  %v2378_v22 = vld [vmem:[%s2950_s1 + $0x28] sm:$0xff] (!%p152_p3)  }
   0xd   : > { %2110 = vmatpush3.bf16.msra.mxu0 (!%p152_p3), %v2362_v6  ;;  %v2371_v15 = vld [vmem:[%s2950_s1 + $0x98] sm:$0xff] (!%p152_p3)   ;;  %v2375_v19 = vld [vmem:[%s2950_s1 + $0xa0] sm:$0xff] (!%p152_p3)   ;;  %v2379_v23 = vld [vmem:[%s2950_s1 + $0xa8] sm:$0xff] (!%p152_p3)  }
   0xe   : > { %2222 = vmatpush3.bf16.msra.mxu1 %v2363_v7  ;;  %2111 = vmatprep.subr.bf16.mxu0 %v2364_v8  ;;  %s2958_s12 = smov (!%p178_p4, %s2466_s12), 1  ;;  %v2380_v24 = vld [vmem:[%s2950_s1 + $0x70] sm:$0xff]   ;;  %v2384_v28 = vld [vmem:[%s2950_s1 + $0x78] sm:$0xff]  }
   0xf   : > { %2223 = vmatprep.subr.bf16.mxu1 %v2365_v9  ;;  %v2381_v25 = vld [vmem:[%s2950_s1 + $0xf0] sm:$0xff]   ;;  %s2331_s24 = smul.u32 204, %s2958_s12  ;;  %v2385_v29 = vld [vmem:[%s2950_s1 + $0xf8] sm:$0xff]   ;;  %s2074_s17 = sshll.u32 %s2958_s12, 7 }
  0x10   : > { %v2382_v26 = vld [vmem:[%s2950_s1 + $0x30] sm:$0xff]   ;;  %v2386_v30 = vld [vmem:[%s2950_s1 + $0x38] sm:$0xff]   ;;  %s2844_s20 = scalar_lea.vmem %s2952_s3, %s2074_s17 }
  0x11   : > { %2112 = vmatpush3.bf16.msra.mxu0 %v2366_v10  ;;  %v2383_v27 = vld [vmem:[%s2950_s1 + $0xb0] sm:$0xff]   ;;  %s2617_s8 = scalar_lea.vmem %s2949_s0, %s2331_s24  ;;  %v2387_v31 = vld [vmem:[%s2950_s1 + $0xb8] sm:$0xff]  }
  0x12   : > { %2224 = vmatpush3.bf16.msra.mxu1 %v2367_v11  ;;  %2113 = vmatprep.subr.bf16.mxu0 %v2368_v12  ;;  %v2388_v32 = vld [vmem:[%s2617_s8] sm:$0xff]   ;;  %v2389_v33 = vld [vmem:[%s2617_s8 + $0x8] ss:$0 sps:$4 sm:$0x11]   ;;  %v2390_v37 = vld [vmem:[%s2617_s8 + $0xc] sm:$0xff]  }
  0x13   : > { %2225 = vmatprep.subr.bf16.mxu1 %v2369_v13  ;;  %v435_v34 = vshrl.u32 %v2388_v32, 16  ;;  %v437_v35 = vshll.u32 %v2388_v32, 16  ;;  %v442_v36 = vshll.u32 %v2389_v33, 16  ;;  %v2391_v38 = vld [vmem:[%s2617_s8 + $0x14] ss:$0 sps:$4 sm:$0x11]  }
  0x14   : > { %v2392_v39 = vld [vmem:[%s2617_s8 + $0xc] sm:$0xff]   ;;  %v787_v42 = vshrl.u32 %v2390_v37, 16  ;;  %v789_v43 = vshll.u32 %v2390_v37, 16  ;;  %v794_v44 = vshll.u32 %v2391_v38, 16  ;;  %v2394_v50 = vld [vmem:[%s2617_s8 + $0x18] sm:$0xff]   ;;  %v2635_v60 = vld [vmem:[%s2617_s8 + $0x24] sm:$0xff]  }
  0x15   : > { %2114 = vmatpush3.bf16.msra.mxu0 %v2370_v14  ;;  %v439_v40 = vrot.slane %v437_v35, 1  ;;  %v444_v41 = vrot.slane %v442_v36, 1  ;;  %v2393_v45 = vld [vmem:[%s2617_s8 + $0x14] ss:$0 sps:$4 sm:$0x11]   ;;  %v447_v46 = vshrl.u32 %v2392_v39, 16 }
  0x16   : > { %2226 = vmatpush3.bf16.msra.mxu1 %v2371_v15  ;;  %2115 = vmatprep.subr.bf16.mxu0 %v2372_v16  ;;  %v449_v47 = vshll.u32 %v2392_v39, 16  ;;  %v791_v49 = vrot.slane %v789_v43, 1  ;;  %v796_v51 = vrot.slane %v794_v44, 1  ;;  %v454_v53 = vshll.u32 %v2393_v45, 16  ;;  %v2630_v54 = vld [vmem:[%s2617_s8 + $0x18] sm:$0xff]   ;;  %v2641_v4 = vld [vmem:[%s2617_s8 + $0x24] sm:$0xff]  }
  0x17   : > { %2227 = vmatprep.subr.bf16.mxu1 %v2373_v17  ;;  %v440_v48 = vor.u32 %v439_v40, %v435_v34  ;;  %v2395_v57 = vld [vmem:[%s2617_s8 + $0x20] ss:$0 sps:$4 sm:$0x11]   ;;  %v799_v58 = vshrl.u32 %v2394_v50, 16  ;;  %v801_v59 = vshll.u32 %v2394_v50, 16  ;;  %v459_v63 = vshrl.u32 %v2630_v54, 16 }
  0x18   : > { %v451_v52 = vrot.slane %v449_v47, 1  ;;  %v792_v56 = vor.u32 %v791_v49, %v787_v42  ;;  %v456_v62 = vrot.slane %v454_v53, 1  ;;  %v806_v2 = vshll.u32 %v2395_v57, 16  ;;  %v2397_v6 = vld [vmem:[%s2617_s8 + $0x20] ss:$0 sps:$4 sm:$0x11]  }
  0x19   : > { %2116 = vmatpush3.bf16.msra.mxu0 %v2374_v18  ;;  %v445_v55 = vsel %vm433_vm0, %v440_v48, %v444_v41  ;;  %v803_v1 = vrot.slane %v801_v59, 1  ;;  %v461_v3 = vshll.u32 %v2630_v54, 16  ;;  %v811_v7 = vshrl.u32 %v2635_v60, 16  ;;  %v2399_v12 = vld [vmem:[%s2617_s8 + $0x2c] ss:$0 sps:$4 sm:$0x11]  }
  0x1a   : > { %2228 = vmatpush3.bf16.msra.mxu1 %v2375_v19  ;;  %2117 = vmatprep.subr.bf16.mxu0 %v2376_v20  ;;  %v452_v61 = vor.u32 %v451_v52, %v447_v46  ;;  %v797_v0 = vsel %vm433_vm0, %v792_v56, %v796_v51  ;;  %v808_v9 = vrot.slane %v806_v2, 1  ;;  %v466_v11 = vshll.u32 %v2397_v6, 16  ;;  %v2401_v20 = vld [vmem:[%s2617_s8 + $0x2c] ss:$0 sps:$4 sm:$0x11]   ;;  %v2657_v33 = vld [vmem:[%s2617_s8 + $0x30] sm:$0xff]  }
  0x1b   : > { %2229 = vmatprep.subr.bf16.mxu1 %v2377_v21  ;;  %1292 = vmatprep.mubr.bf16.mxu0 %v445_v55  ;;  %v804_v8 = vor.u32 %v803_v1, %v799_v58  ;;  %v463_v10 = vrot.slane %v461_v3, 1  ;;  %v813_v13 = vshll.u32 %v2635_v60, 16  ;;  %v471_v14 = vshrl.u32 %v2641_v4, 16  ;;  %v2661_v38 = vld [vmem:[%s2617_s8 + $0x3c] sm:$0xff]   ;;  %v2676_v55 = vld [vmem:[%s2617_s8 + $0x48] sm:$0xff]  }
  0x1c   : > { %1453 = vmatprep.mubr.bf16.mxu1 %v797_v0  ;;  %v457_v5 = vsel %vm433_vm0, %v452_v61, %v456_v62  ;;  %v468_v17 = vrot.slane %v466_v11, 1  ;;  %v818_v19 = vshll.u32 %v2399_v12, 16  ;;  %v473_v21 = vshll.u32 %v2641_v4, 16  ;;  %v2407_v44 = vld [vmem:[%s2617_s8 + $0x44] ss:$0 sps:$4 sm:$0x11]  }
  0x1d   : > { %2118 = vmatpush3.bf16.msra.mxu0 %v2378_v22  ;;  %v809_v15 = vsel %vm433_vm0, %v804_v8, %v808_v9  ;;  %v464_v16 = vor.u32 %v463_v10, %v459_v63  ;;  %v815_v18 = vrot.slane %v813_v13, 1  ;;  %v2402_v22 = vld [vmem:[%s2617_s8 + $0x30] sm:$0xff]   ;;  %v483_v42 = vshrl.u32 %v2657_v33, 16  ;;  %v2669_v48 = vld [vmem:[%s2617_s8 + $0x3c] sm:$0xff]   ;;  %v2685_v3 = vld [vmem:[%s2617_s8 + $0x48] sm:$0xff]  }
  0x1e   : > { %2230 = vmatpush3.bf16.msra.mxu1 %v2379_v23  ;;  %2119 = vmatprep.subr.bf16.mxu0 %v2380_v24  ;;  %v837_v45 = vshll.u32 %v2661_v38, 16  ;;  %v835_v49 = vshrl.u32 %v2661_v38, 16  ;;  %v2409_v51 = vld [vmem:[%s2617_s8 + $0x44] ss:$0 sps:$4 sm:$0x11]   ;;  %v842_v53 = vshll.u32 %v2407_v44, 16 }
  0x1f   : > { %2231 = vmatprep.subr.bf16.mxu1 %v2381_v25  ;;  %v469_v23 = vsel %vm433_vm0, %v464_v16, %v468_v17  ;;  %v816_v24 = vor.u32 %v815_v18, %v811_v7  ;;  %v820_v25 = vrot.slane %v818_v19, 1  ;;  %v497_v58 = vshll.u32 %v2669_v48, 16  ;;  %v2411_v62 = vld [vmem:[%s2617_s8 + $0x50] ss:$0 sps:$4 sm:$0x11]  }
  0x20   : > { %v844_v61 = vrot.slane %v842_v53, 1  ;;  %v495_v63 = vshrl.u32 %v2669_v48, 16  ;;  %v502_v0 = vshll.u32 %v2409_v51, 16  ;;  %v854_v8 = vshll.u32 %v2411_v62, 16  ;;  %v2723_v44 = vld [vmem:[%s2617_s8 + $0x6c] sm:$0xff]  }
  0x21   : > { %2120 = vmatpush3.bf16.msra.mxu0 %v2382_v26  ;;  %v478_v26 = vshll.u32 %v2401_v20, 16  ;;  %v499_v2 = vrot.slane %v497_v58, 1  ;;  %v2413_v9 = vld [vmem:[%s2617_s8 + $0x50] ss:$0 sps:$4 sm:$0x11]   ;;  %v509_v12 = vshll.u32 %v2685_v3, 16 }
  0x22   : > { %2232 = vmatpush3.bf16.msra.mxu1 %v2383_v27  ;;  %2121 = vmatprep.subr.bf16.mxu0 %v2384_v28  ;;  %v475_v27 = vrot.slane %v473_v21, 1  ;;  %v2403_v28 = vld [vmem:[%s2617_s8 + $0x38] ss:$0 sps:$4 sm:$0x11]   ;;  %v504_v11 = vrot.slane %v502_v0, 1  ;;  %v507_v17 = vshrl.u32 %v2685_v3, 16 }
  0x23   : > { %2233 = vmatprep.subr.bf16.mxu1 %v2385_v29  ;;  %v823_v29 = vshrl.u32 %v2402_v22, 16  ;;  %v830_v36 = vshll.u32 %v2403_v28, 16  ;;  %v500_v10 = vor.u32 %v499_v2, %v495_v63  ;;  %v511_v18 = vrot.slane %v509_v12, 1  ;;  %v2700_v20 = vld [vmem:[%s2617_s8 + $0x54] sm:$0xff]  }
  0x24   : > { %v476_v34 = vor.u32 %v475_v27, %v471_v14  ;;  %v514_v19 = vshll.u32 %v2413_v9, 16  ;;  %v885_v51 = vshll.u32 %v2723_v44, 16  ;;  %v883_v58 = vshrl.u32 %v2723_v44, 16  ;;  %v2739_v63 = vld [vmem:[%s2617_s8 + $0x78] sm:$0xff]  }
  0x25   : > { %2122 = vmatpush3.bf16.msra.mxu0 %v2386_v30  ;;  %v825_v30 = vshll.u32 %v2402_v22, 16  ;;  %v832_v41 = vrot.slane %v830_v36, 1  ;;  %v505_v16 = vsel %vm433_vm0, %v500_v10, %v504_v11  ;;  %v512_v27 = vor.u32 %v511_v18, %v507_v17  ;;  %v2748_v12 = vld [vmem:[%s2617_s8 + $0x78] sm:$0xff]  }
  0x26   : > { %2234 = vmatpush3.bf16.msra.mxu1 %v2387_v31  ;;  %v821_v31 = vsel %vm433_vm0, %v816_v24, %v820_v25  ;;  %v2706_v25 = vld [vmem:[%s2617_s8 + $0x60] sm:$0xff]   ;;  %v516_v28 = vrot.slane %v514_v19, 1  ;;  %v557_v19 = vshll.u32 %v2748_v12, 16 }
  0x27   : > { %v827_v35 = vrot.slane %v825_v30, 1  ;;  %v2419_v30 = vld [vmem:[%s2617_s8 + $0x68] ss:$0 sps:$4 sm:$0x11]  }
  0x28   : > { %1293 = vmatmul.mubr.bf16.vlgmr.msra.gmra.mrb[0].mxu0 %v2388_v32  ;;  %v480_v32 = vrot.slane %v478_v26, 1  ;;  %v2417_v26 = vld [vmem:[%s2617_s8 + $0x5c] ss:$0 sps:$4 sm:$0x11]  }
  0x29   : > { %1454 = vmatmul.mubr.bf16.vlgmr.msra.gmra.mrb[0].mxu1 %v2390_v37  ;;  %1300 = vmatprep.mubr.bf16.mxu0 %v457_v5  ;;  %v2405_v37 = vld [vmem:[%s2617_s8 + $0x38] ss:$0 sps:$4 sm:$0x11]   ;;  %v828_v40 = vor.u32 %v827_v35, %v823_v29  ;;  %v521_v29 = vshll.u32 %v2700_v20, 16  ;;  %v519_v35 = vshrl.u32 %v2700_v20, 16 }
  0x2a   : > { %1461 = vmatprep.mubr.bf16.mxu1 %v809_v15  ;;  %v490_v43 = vshll.u32 %v2405_v37, 16  ;;  %v481_v46 = vsel %vm433_vm0, %v476_v34, %v480_v32  ;;  %v2689_v5 = vld [vmem:[%s2617_s8 + $0x54] sm:$0xff]   ;;  %v856_v15 = vrot.slane %v854_v8, 1  ;;  %v517_v34 = vsel %vm433_vm0, %v512_v27, %v516_v28 }
  0x2b   : > { %v833_v52 = vsel %vm433_vm0, %v828_v40, %v832_v41  ;;  %v861_v13 = vshll.u32 %v2689_v5, 16  ;;  %v859_v21 = vshrl.u32 %v2689_v5, 16  ;;  %v523_v36 = vrot.slane %v521_v29, 1  ;;  %v2764_v29 = vld [vmem:[%s2617_s8 + $0x84] sm:$0xff]  }
  0x2c   : > { %v492_v57 = vrot.slane %v490_v43, 1  ;;  %v526_v37 = vshll.u32 %v2417_v26, 16  ;;  %v2421_v43 = vld [vmem:[%s2617_s8 + $0x68] ss:$0 sps:$4 sm:$0x11]   ;;  %v559_v28 = vrot.slane %v557_v19, 1 }
  0x2d   : > { %v538_v53 = vshll.u32 %v2421_v43, 16  ;;  %v567_v43 = vshrl.u32 %v2764_v29, 16 }
  0x30   : > { %1301 = vmatmul.mubr.bf16.gmra.mrb[4].mxu0 %v2392_v39  ;;  %v485_v39 = vshll.u32 %v2657_v33, 16 }
  0x31   : > { %1308 = vmatprep.mubr.bf16.mxu0 %v469_v23  ;;  %1462 = vmatmul.mubr.bf16.gmra.mrb[4].mxu1 %v2394_v50  ;;  %v839_v50 = vrot.slane %v837_v45, 1  ;;  %v524_v45 = vor.u32 %v523_v36, %v519_v35 }
  0x32   : > { %1469 = vmatprep.mubr.bf16.mxu1 %v821_v31  ;;  %v487_v47 = vrot.slane %v485_v39, 1  ;;  %v871_v39 = vshrl.u32 %v2706_v25, 16 }
  0x33   : > { %v840_v59 = vor.u32 %v839_v50, %v835_v49  ;;  %v2423_v49 = vld [vmem:[%s2617_s8 + $0x74] ss:$0 sps:$4 sm:$0x11]  }
  0x34   : > { %v488_v56 = vor.u32 %v487_v47, %v483_v42  ;;  %v878_v42 = vshll.u32 %v2419_v30, 16  ;;  %v890_v62 = vshll.u32 %v2423_v49, 16 }
  0x35   : > { %v845_v6 = vsel %vm433_vm0, %v840_v59, %v844_v61  ;;  %v887_v61 = vrot.slane %v885_v51, 1  ;;  %v2786_v51 = vld [vmem:[%s2617_s8 + $0x9c] sm:$0xff]  }
  0x36   : > { %v493_v1 = vsel %vm433_vm0, %v488_v56, %v492_v57  ;;  %v880_v50 = vrot.slane %v878_v42, 1 }
  0x38   : > { %1309 = vmatmul.mubr.bf16.gmra.mrb[8].mxu0 %v2630_v54  ;;  %v849_v54 = vshll.u32 %v2676_v55, 16 }
  0x39   : > { %1316 = vmatprep.mubr.bf16.mxu0 %v481_v46  ;;  %1470 = vmatmul.mubr.bf16.gmra.mrb[8].mxu1 %v2635_v60  ;;  %v847_v60 = vshrl.u32 %v2676_v55, 16  ;;  %v528_v46 = vrot.slane %v526_v37, 1  ;;  %v569_v37 = vshll.u32 %v2764_v29, 16 }
  0x3a   : > { %1477 = vmatprep.mubr.bf16.mxu1 %v833_v52  ;;  %v851_v7 = vrot.slane %v849_v54, 1  ;;  %v2425_v54 = vld [vmem:[%s2617_s8 + $0x74] ss:$0 sps:$4 sm:$0x11]  }
  0x3b   : > { %v529_v56 = vsel %vm433_vm0, %v524_v45, %v528_v46  ;;  %v550_v9 = vshll.u32 %v2425_v54, 16  ;;  %v571_v45 = vrot.slane %v569_v37, 1  ;;  %v2448_v37 = vld [vmem:[%s2617_s8 + $0xb4] sm:$0xff]  }
  0x3c   : > { %v852_v14 = vor.u32 %v851_v7, %v847_v60  ;;  %v2427_v60 = vld [vmem:[%s2617_s8 + $0x80] ss:$0 sps:$4 sm:$0x11]   ;;  %v897_v7 = vshll.u32 %v2739_v63, 16 }
  0x3d   : > { %v552_v18 = vrot.slane %v550_v9, 1 }
  0x3e   : > { %v857_v23 = vsel %vm433_vm0, %v852_v14, %v856_v15  ;;  %v2753_v14 = vld [vmem:[%s2617_s8 + $0x84] sm:$0xff]  }
  0x40   : > { %1317 = vmatmul.mubr.bf16.gmra.mrb[12].mxu0 %v2641_v4  ;;  %v2415_v4 = vld [vmem:[%s2617_s8 + $0x5c] ss:$0 sps:$4 sm:$0x11]  }
  0x41   : > { %1324 = vmatprep.mubr.bf16.mxu0 %v493_v1  ;;  %1478 = vmatmul.mubr.bf16.gmra.mrb[12].mxu1 %v2402_v22  ;;  %v863_v22 = vrot.slane %v861_v13, 1  ;;  %v866_v24 = vshll.u32 %v2415_v4, 16  ;;  %v540_v1 = vrot.slane %v538_v53, 1  ;;  %v2429_v13 = vld [vmem:[%s2617_s8 + $0x80] ss:$0 sps:$4 sm:$0x11]  }
  0x42   : > { %1485 = vmatprep.mubr.bf16.mxu1 %v845_v6  ;;  %v892_v6 = vrot.slane %v890_v62, 1  ;;  %v899_v4 = vrot.slane %v897_v7, 1  ;;  %v562_v26 = vshll.u32 %v2429_v13, 16  ;;  %v2802_v7 = vld [vmem:[%s2617_s8 + $0xa8] sm:$0xff]  }
  0x43   : > { %v864_v31 = vor.u32 %v863_v22, %v859_v21  ;;  %v868_v32 = vrot.slane %v866_v24, 1  ;;  %v909_v21 = vshll.u32 %v2753_v14, 16  ;;  %v555_v24 = vshrl.u32 %v2748_v12, 16  ;;  %v2443_v13 = vld [vmem:[%s2617_s8 + $0xb0] ss:$0 sps:$4 sm:$0x11]  }
  0x44   : > { %v564_v36 = vrot.slane %v562_v26, 1 }
  0x45   : > { %v869_v40 = vsel %vm433_vm0, %v864_v31, %v868_v32  ;;  %v911_v30 = vrot.slane %v909_v21, 1  ;;  %v560_v35 = vor.u32 %v559_v28, %v555_v24  ;;  %v943_v21 = vshrl.u32 %v2802_v7, 16 }
  0x47   : > { %v565_v42 = vsel %vm433_vm0, %v560_v35, %v564_v36 }
  0x48   : > { %1325 = vmatmul.mubr.bf16.gmra.mrb[16].mxu0 %v2657_v33  ;;  %v873_v33 = vshll.u32 %v2706_v25, 16 }
  0x49   : > { %1332 = vmatprep.mubr.bf16.mxu0 %v505_v16  ;;  %1486 = vmatmul.mubr.bf16.gmra.mrb[16].mxu1 %v2661_v38  ;;  %v2716_v38 = vld [vmem:[%s2617_s8 + $0x60] sm:$0xff]   ;;  %v902_v16 = vshll.u32 %v2427_v60, 16  ;;  %v931_v60 = vshrl.u32 %v2786_v51, 16 }
  0x4a   : > { %1493 = vmatprep.mubr.bf16.mxu1 %v857_v23  ;;  %v875_v41 = vrot.slane %v873_v33, 1  ;;  %v533_v47 = vshll.u32 %v2716_v38, 16  ;;  %v531_v52 = vshrl.u32 %v2716_v38, 16  ;;  %v2770_v33 = vld [vmem:[%s2617_s8 + $0x90] sm:$0xff]  }
  0x4b   : > { %v904_v23 = vrot.slane %v902_v16, 1  ;;  %v919_v49 = vshrl.u32 %v2770_v33, 16 }
  0x4c   : > { %v535_v57 = vrot.slane %v533_v47, 1  ;;  %v2780_v47 = vld [vmem:[%s2617_s8 + $0x90] sm:$0xff]  }
  0x4d   : > { %v579_v54 = vshrl.u32 %v2780_v47, 16 }
  0x4e   : > { %v536_v0 = vor.u32 %v535_v57, %v531_v52  ;;  %v572_v52 = vor.u32 %v571_v45, %v567_v43  ;;  %v581_v57 = vshll.u32 %v2780_v47, 16  ;;  %v2449_v45 = vld [vmem:[%s2617_s8 + $0xbc] ss:$0 sps:$4 sm:$0x11]  }
  0x50   : > { %1333 = vmatmul.mubr.bf16.gmra.mrb[20].mxu0 %v2669_v48  ;;  %v876_v48 = vor.u32 %v875_v41, %v871_v39  ;;  %v541_v10 = vsel %vm433_vm0, %v536_v0, %v540_v1  ;;  %v2435_v41 = vld [vmem:[%s2617_s8 + $0x98] ss:$0 sps:$4 sm:$0x11]   ;;  %v583_v0 = vrot.slane %v581_v57, 1 }
  0x51   : > { %1340 = vmatprep.mubr.bf16.mxu0 %v517_v34  ;;  %1494 = vmatmul.mubr.bf16.gmra.mrb[20].mxu1 %v2676_v55  ;;  %v2732_v55 = vld [vmem:[%s2617_s8 + $0x6c] sm:$0xff]  }
  0x52   : > { %1501 = vmatprep.mubr.bf16.mxu1 %v869_v40  ;;  %v881_v59 = vsel %vm433_vm0, %v876_v48, %v880_v50  ;;  %v545_v2 = vshll.u32 %v2732_v55, 16  ;;  %v543_v8 = vshrl.u32 %v2732_v55, 16  ;;  %v2433_v34 = vld [vmem:[%s2617_s8 + $0x8c] ss:$0 sps:$4 sm:$0x11]   ;;  %v926_v50 = vshll.u32 %v2435_v41, 16 }
  0x53   : > { %v574_v46 = vshll.u32 %v2433_v34, 16 }
  0x54   : > { %v547_v11 = vrot.slane %v545_v2, 1 }
  0x55   : > { %v576_v53 = vrot.slane %v574_v46, 1  ;;  %v617_v46 = vshll.u32 %v2448_v37, 16 }
  0x56   : > { %v548_v17 = vor.u32 %v547_v11, %v543_v8  ;;  %v584_v8 = vor.u32 %v583_v0, %v579_v54 }
  0x57   : > { %v577_v62 = vsel %vm433_vm0, %v572_v52, %v576_v53  ;;  %v615_v52 = vshrl.u32 %v2448_v37, 16  ;;  %v619_v53 = vrot.slane %v617_v46, 1 }
  0x58   : > { %1341 = vmatmul.mubr.bf16.gmra.mrb[24].mxu0 %v2685_v3  ;;  %v888_v3 = vor.u32 %v887_v61, %v883_v58  ;;  %v553_v27 = vsel %vm433_vm0, %v548_v17, %v552_v18  ;;  %v928_v58 = vrot.slane %v926_v50, 1  ;;  %v933_v61 = vshll.u32 %v2786_v51, 16 }
  0x59   : > { %1348 = vmatprep.mubr.bf16.mxu0 %v529_v56  ;;  %1502 = vmatmul.mubr.bf16.gmra.mrb[24].mxu1 %v2689_v5  ;;  %v895_v5 = vshrl.u32 %v2739_v63, 16  ;;  %v2437_v56 = vld [vmem:[%s2617_s8 + $0x98] ss:$0 sps:$4 sm:$0x11]  }
  0x5a   : > { %1509 = vmatprep.mubr.bf16.mxu1 %v881_v59  ;;  %v893_v15 = vsel %vm433_vm0, %v888_v3, %v892_v6  ;;  %v2439_v59 = vld [vmem:[%s2617_s8 + $0xa4] ss:$0 sps:$4 sm:$0x11]   ;;  %v586_v1 = vshll.u32 %v2437_v56, 16  ;;  %v935_v3 = vrot.slane %v933_v61, 1  ;;  %v622_v56 = vshll.u32 %v2449_v45, 16 }
  0x5b   : > { %v900_v22 = vor.u32 %v899_v4, %v895_v5  ;;  %v938_v6 = vshll.u32 %v2439_v59, 16  ;;  %v620_v59 = vor.u32 %v619_v53, %v615_v52 }
  0x5c   : > { %v588_v9 = vrot.slane %v586_v1, 1  ;;  %v624_v61 = vrot.slane %v622_v56, 1 }
  0x5d   : > { %v905_v31 = vsel %vm433_vm0, %v900_v22, %v904_v23  ;;  %v940_v5 = vrot.slane %v938_v6, 1  ;;  %v950_v23 = vshll.u32 %v2443_v13, 16 }
  0x5e   : > { %v589_v4 = vsel %vm433_vm0, %v584_v8, %v588_v9  ;;  %v625_v0 = vsel %vm433_vm0, %v620_v59, %v624_v61 }
  0x60   : > { %1349 = vmatmul.mubr.bf16.gmra.mrb[28].mxu0 %v2700_v20  ;;  %v2431_v20 = vld [vmem:[%s2617_s8 + $0x8c] ss:$0 sps:$4 sm:$0x11]  }
  0x61   : > { %1356 = vmatprep.mubr.bf16.mxu0 %v541_v10  ;;  %1510 = vmatmul.mubr.bf16.gmra.mrb[28].mxu1 %v2706_v25  ;;  %v907_v25 = vshrl.u32 %v2753_v14, 16  ;;  %v914_v32 = vshll.u32 %v2431_v20, 16  ;;  %v2441_v10 = vld [vmem:[%s2617_s8 + $0xa4] ss:$0 sps:$4 sm:$0x11]   ;;  %v2446_v20 = vld [vmem:[%s2617_s8 + $0xb4] sm:$0xff]  }
  0x62   : > { %1517 = vmatprep.mubr.bf16.mxu1 %v893_v15  ;;  %v945_v15 = vshll.u32 %v2802_v7, 16  ;;  %v598_v18 = vshll.u32 %v2441_v10, 16 }
  0x63   : > { %v912_v39 = vor.u32 %v911_v30, %v907_v25  ;;  %v916_v40 = vrot.slane %v914_v32, 1  ;;  %v952_v30 = vrot.slane %v950_v23, 1 }
  0x64   : > { %v947_v22 = vrot.slane %v945_v15, 1  ;;  %v600_v26 = vrot.slane %v598_v18, 1 }
  0x66   : > { %v948_v25 = vor.u32 %v947_v22, %v943_v21 }
  0x68   : > { %1357 = vmatmul.mubr.bf16.gmra.mrb[32].mxu0 %v2716_v38  ;;  %v921_v38 = vshll.u32 %v2770_v33, 16 }
  0x69   : > { %1364 = vmatprep.mubr.bf16.mxu0 %v553_v27  ;;  %1518 = vmatmul.mubr.bf16.gmra.mrb[32].mxu1 %v2723_v44  ;;  %v917_v44 = vsel %vm433_vm0, %v912_v39, %v916_v40  ;;  %v2445_v27 = vld [vmem:[%s2617_s8 + $0xb0] ss:$0 sps:$4 sm:$0x11]   ;;  %v955_v39 = vshrl.u32 %v2446_v20, 16 }
  0x6a   : > { %1525 = vmatprep.mubr.bf16.mxu1 %v905_v31  ;;  %v923_v48 = vrot.slane %v921_v38, 1  ;;  %v957_v31 = vshll.u32 %v2446_v20, 16  ;;  %v610_v36 = vshll.u32 %v2445_v27, 16  ;;  %v2450_v38 = vld [vmem:[%s2617_s8 + $0xc0] sm:$0xff]  }
  0x6b   : > { %v969_v50 = vshll.u32 %v2450_v38, 16 }
  0x6c   : > { %v959_v40 = vrot.slane %v957_v31, 1  ;;  %v612_v43 = vrot.slane %v610_v36, 1 }
  0x70   : > { %1365 = vmatmul.mubr.bf16.gmra.mrb[36].mxu0 %v2732_v55  ;;  %v924_v55 = vor.u32 %v923_v48, %v919_v49  ;;  %v2451_v48 = vld [vmem:[%s2617_s8 + $0xc8] ss:$0 sps:$4 sm:$0x11]  }
  0x71   : > { %1372 = vmatprep.mubr.bf16.mxu0 %v565_v42  ;;  %1526 = vmatmul.mubr.bf16.gmra.mrb[36].mxu1 %v2739_v63  ;;  %v2796_v63 = vld [vmem:[%s2617_s8 + $0x9c] sm:$0xff]  }
  0x72   : > { %1533 = vmatprep.mubr.bf16.mxu1 %v917_v44  ;;  %v929_v2 = vsel %vm433_vm0, %v924_v55, %v928_v58  ;;  %v593_v11 = vshll.u32 %v2796_v63, 16  ;;  %v591_v16 = vshrl.u32 %v2796_v63, 16  ;;  %v960_v44 = vor.u32 %v959_v40, %v955_v39 }
  0x73   : > { %v967_v55 = vshrl.u32 %v2450_v38, 16  ;;  %v974_v58 = vshll.u32 %v2451_v48, 16 }
  0x74   : > { %v595_v17 = vrot.slane %v593_v11, 1 }
  0x75   : > { %v976_v54 = vrot.slane %v974_v58, 1 }
  0x76   : > { %v596_v24 = vor.u32 %v595_v17, %v591_v16 }
  0x78   : > { %1373 = vmatmul.mubr.bf16.gmra.mrb[40].mxu0 %v2748_v12  ;;  %v936_v12 = vor.u32 %v935_v3, %v931_v60  ;;  %v601_v32 = vsel %vm433_vm0, %v596_v24, %v600_v26  ;;  %v1063_v3 = vld [vmem:[%s2951_s2] sm:$0x7] }
  0x79   : > { %1380 = vmatprep.mubr.bf16.mxu0 %v577_v62  ;;  %1534 = vmatmul.mubr.bf16.gmra.mrb[40].mxu1 %v2753_v14  ;;  %v2444_v14 = vld [vmem:[%s2617_s8 + $0xa8] sm:$0xff]  }
  0x7a   : > { %1541 = vmatprep.mubr.bf16.mxu1 %v929_v2  ;;  %v941_v19 = vsel %vm433_vm0, %v936_v12, %v940_v5  ;;  %v605_v28 = vshll.u32 %v2444_v14, 16  ;;  %v603_v34 = vshrl.u32 %v2444_v14, 16 }
  0x7c   : > { %v607_v35 = vrot.slane %v605_v28, 1 }
  0x7e   : > { %v608_v42 = vor.u32 %v607_v35, %v603_v34 }
  0x80   : > { %1381 = vmatmul.mubr.bf16.gmra.mrb[44].mxu0 %v2764_v29  ;;  %v2447_v29 = vld [vmem:[%s2617_s8 + $0xbc] ss:$0 sps:$4 sm:$0x11]  }
  0x81   : > { %1388 = vmatprep.mubr.bf16.mxu0 %v589_v4  ;;  %1542 = vmatmul.mubr.bf16.gmra.mrb[44].mxu1 %v2770_v33  ;;  %v953_v33 = vsel %vm433_vm0, %v948_v25, %v952_v30  ;;  %v962_v41 = vshll.u32 %v2447_v29, 16 }
  0x82   : > { %1549 = vmatprep.mubr.bf16.mxu1 %v941_v19 }
  0x83   : > { %v964_v49 = vrot.slane %v962_v41, 1 }
  0x85   : > { %v965_v57 = vsel %vm433_vm0, %v960_v44, %v964_v49 }
  0x88   : > { %1389 = vmatmul.mubr.bf16.gmra.mrb[48].mxu0 %v2780_v47  ;;  %v613_v47 = vsel %vm433_vm0, %v608_v42, %v612_v43 }
  0x89   : > { %1396 = vmatprep.mubr.bf16.mxu0 %v601_v32  ;;  %1550 = vmatmul.mubr.bf16.gmra.mrb[48].mxu1 %v2786_v51  ;;  %v971_v51 = vrot.slane %v969_v50, 1 }
  0x8a   : > { %1557 = vmatprep.mubr.bf16.mxu1 %v953_v33 }
  0x8b   : > { %v972_v62 = vor.u32 %v971_v51, %v967_v55 }
  0x8d   : > { %v977_v1 = vsel %vm433_vm0, %v972_v62, %v976_v54 }
  0x90   : > { %1397 = vmatmul.mubr.bf16.gmra.mrb[52].mxu0 %v2796_v63  ;;  %v1064_v63 = vlaneseq }
  0x91   : > { %1404 = vmatprep.mubr.bf16.mxu0 %v613_v47  ;;  %1558 = vmatmul.mubr.bf16.gmra.mrb[52].mxu1 %v2802_v7 }
  0x92   : > { %1565 = vmatprep.mubr.bf16.mxu1 %v965_v57  ;;  %v1065_v2 = vshrl.u32 %v1064_v63, 7 }
  0x94   : > { %v1066_v60 = vsub.s32 0, %v1065_v2 }
  0x96   : > { %v2836_v7 = vrot.slane %v1063_v3, %v1066_v60 }
  0x98   : > { %1405 = vmatmul.mubr.bf16.gmra.mrb[56].mxu0 %v2444_v14 }
  0x99   : > { %1412 = vmatprep.mubr.bf16.mxu0 %v625_v0  ;;  %1566 = vmatmul.mubr.bf16.gmra.mrb[56].mxu1 %v2446_v20 }
  0x9a   : > { %1573 = vmatprep.mubr.bf16.mxu1 %v977_v1 }
  0xa0   : > { %1413 = vmatmul.mubr.bf16.gmra.mrb[60].mxu0 %v2448_v37 }
  0xa1   : > { %1574 = vmatmul.mubr.bf16.gmra.mrb[60].mxu1 %v2450_v38 }
  0xfb   : > { %v2123_v6 = vpop.f32.mrb[0].mxu0 }
  0xfc   : > { %v2124_v8 = vpop.f32.mrb[1].mxu0  ;;  %v2235_v9 = vpop.f32.mrb[0].mxu1 }
  0xfd   : > { %v2125_v10 = vadd.f32 %v2124_v8, %v2123_v6  ;;  %v2126_v11 = vpop.f32.mrb[2].mxu0  ;;  %v2236_v12 = vpop.f32.mrb[1].mxu1 }
  0xfe   : > { %v2127_v5 = vpop.f32.mrb[3].mxu0  ;;  %v2237_v15 = vadd.f32 %v2236_v12, %v2235_v9  ;;  %v2238_v4 = vpop.f32.mrb[2].mxu1 }
  0xff   : > { %v1295_v13 = vadd.f32 %v2125_v10, %v2836_v7  ;;  %v2128_v16 = vadd.f32 %v2127_v5, %v2126_v11  ;;  %v2239_v17 = vpop.f32.mrb[3].mxu1 }
 0x100   : > { %v2240_v19 = vadd.f32 %v2239_v17, %v2238_v4 }
 0x101   : > { %v1456_v18 = vadd.f32 %v2237_v15, %v1295_v13  ;;  %v1298_v14 = vadd.f32 %v2128_v16, %v2836_v7 }
 0x103   : > { %v1582_v21 = vmul.f32 0.2, %v1456_v18  ;;  %v1459_v22 = vadd.f32 %v2240_v19, %v1298_v14  ;;  %v2129_v23 = vpop.f32.mrb[4].mxu0 }
 0x104   : > { %v2130_v20 = vpop.f32.mrb[5].mxu0  ;;  %v2241_v27 = vpop.f32.mrb[4].mxu1 }
 0x105   : > { %v1614_v24 = vmax.f32 %v1456_v18, %v1582_v21  ;;  %v1583_v26 = vmul.f32 0.2, %v1459_v22  ;;  %v2131_v28 = vadd.f32 %v2130_v20, %v2129_v23  ;;  %v2132_v25 = vpop.f32.mrb[6].mxu0  ;;  %v2242_v30 = vpop.f32.mrb[5].mxu1 }
 0x106   : > { %v2133_v29 = vpop.f32.mrb[7].mxu0  ;;  %v2243_v35 = vadd.f32 %v2242_v30, %v2241_v27  ;;  %v2244_v36 = vpop.f32.mrb[6].mxu1 }
 0x107   : > { %v2075_v31 = vpack.c.bf16 %v1614_v24, %v1614_v24  ;;  %v1615_v32 = vmax.f32 %v1459_v22, %v1583_v26  ;;  %v1303_v34 = vadd.f32 %v2131_v28, %v2836_v7  ;;  %v2134_v37 = vadd.f32 %v2133_v29, %v2132_v25  ;;  %v2245_v33 = vpop.f32.mrb[7].mxu1 }
 0x108   : > { %v2246_v41 = vadd.f32 %v2245_v33, %v2244_v36 }
 0x109   : > { %1775 = vst.msk [vmem:[%s2844_s20] sm:$0xf] %vm1774_vm1, %v2075_v31  ;;  %v2076_v39 = vpack.c.bf16 %v1615_v32, %v1615_v32  ;;  %v1464_v40 = vadd.f32 %v2243_v35, %v1303_v34  ;;  %v1306_v38 = vadd.f32 %v2134_v37, %v2836_v7 }
 0x10b   : > { %1776 = vst.msk [vmem:[%s2844_s20 + $0x4] sm:$0xf] %vm1774_vm1, %v2076_v39  ;;  %v1584_v42 = vmul.f32 0.2, %v1464_v40  ;;  %v2135_v43 = vpop.f32.mrb[8].mxu0  ;;  %v1467_v45 = vadd.f32 %v2246_v41, %v1306_v38 }
 0x10c   : > { %v2136_v46 = vpop.f32.mrb[9].mxu0  ;;  %v2247_v49 = vpop.f32.mrb[8].mxu1 }
 0x10d   : > { %v1616_v44 = vmax.f32 %v1464_v40, %v1584_v42  ;;  %v2137_v48 = vadd.f32 %v2136_v46, %v2135_v43  ;;  %v2138_v50 = vpop.f32.mrb[10].mxu0  ;;  %v1585_v47 = vmul.f32 0.2, %v1467_v45  ;;  %v2248_v52 = vpop.f32.mrb[9].mxu1 }
 0x10e   : > { %v2139_v53 = vpop.f32.mrb[11].mxu0  ;;  %v2249_v55 = vadd.f32 %v2248_v52, %v2247_v49  ;;  %v2250_v51 = vpop.f32.mrb[10].mxu1 }
 0x10f   : > { %v2077_v56 = vpack.c.bf16 %v1616_v44, %v1616_v44  ;;  %v1311_v57 = vadd.f32 %v2137_v48, %v2836_v7  ;;  %v2140_v58 = vadd.f32 %v2139_v53, %v2138_v50  ;;  %v1617_v59 = vmax.f32 %v1467_v45, %v1585_v47  ;;  %v2251_v61 = vpop.f32.mrb[11].mxu1 }
 0x110   : > { %v2252_v0 = vadd.f32 %v2251_v61, %v2250_v51 }
 0x111   : > { %1777 = vst.msk [vmem:[%s2844_s20 + $0x8] sm:$0xf] %vm1774_vm1, %v2077_v56  ;;  %v1472_v62 = vadd.f32 %v2249_v55, %v1311_v57  ;;  %v1314_v54 = vadd.f32 %v2140_v58, %v2836_v7  ;;  %v2078_v1 = vpack.c.bf16 %v1617_v59, %v1617_v59 }
 0x113   : > { %v1586_v63 = vmul.f32 0.2, %v1472_v62  ;;  %v1475_v2 = vadd.f32 %v2252_v0, %v1314_v54  ;;  %v2141_v60 = vpop.f32.mrb[12].mxu0  ;;  %1778 = vst.msk [vmem:[%s2844_s20 + $0xc] sm:$0xf] %vm1774_vm1, %v2078_v1 }
 0x114   : > { %v2142_v3 = vpop.f32.mrb[13].mxu0  ;;  %v2253_v9 = vpop.f32.mrb[12].mxu1 }
 0x115   : > { %v1618_v6 = vmax.f32 %v1472_v62, %v1586_v63  ;;  %v1587_v8 = vmul.f32 0.2, %v1475_v2  ;;  %v2143_v10 = vadd.f32 %v2142_v3, %v2141_v60  ;;  %v2144_v11 = vpop.f32.mrb[14].mxu0  ;;  %v2254_v12 = vpop.f32.mrb[13].mxu1 }
 0x116   : > { %v2145_v5 = vpop.f32.mrb[15].mxu0  ;;  %v2255_v16 = vadd.f32 %v2254_v12, %v2253_v9  ;;  %v2256_v17 = vpop.f32.mrb[14].mxu1 }
 0x117   : > { %v2079_v13 = vpack.c.bf16 %v1618_v6, %v1618_v6  ;;  %v1619_v15 = vmax.f32 %v1475_v2, %v1587_v8  ;;  %v1319_v4 = vadd.f32 %v2143_v10, %v2836_v7  ;;  %v2146_v18 = vadd.f32 %v2145_v5, %v2144_v11  ;;  %v2257_v14 = vpop.f32.mrb[15].mxu1 }
 0x118   : > { %v2258_v22 = vadd.f32 %v2257_v14, %v2256_v17 }
 0x119   : > { %1779 = vst.msk [vmem:[%s2844_s20 + $0x10] sm:$0xf] %vm1774_vm1, %v2079_v13  ;;  %v2080_v19 = vpack.c.bf16 %v1619_v15, %v1619_v15  ;;  %v1480_v21 = vadd.f32 %v2255_v16, %v1319_v4  ;;  %v1322_v23 = vadd.f32 %v2146_v18, %v2836_v7 }
 0x11b   : > { %1780 = vst.msk [vmem:[%s2844_s20 + $0x14] sm:$0xf] %vm1774_vm1, %v2080_v19  ;;  %v1588_v20 = vmul.f32 0.2, %v1480_v21  ;;  %v2147_v24 = vpop.f32.mrb[16].mxu0  ;;  %v1483_v26 = vadd.f32 %v2258_v22, %v1322_v23 }
 0x11c   : > { %v2148_v27 = vpop.f32.mrb[17].mxu0  ;;  %v2259_v25 = vpop.f32.mrb[16].mxu1 }
 0x11d   : > { %v1620_v28 = vmax.f32 %v1480_v21, %v1588_v20  ;;  %v2149_v30 = vadd.f32 %v2148_v27, %v2147_v24  ;;  %v2150_v29 = vpop.f32.mrb[18].mxu0  ;;  %v1589_v31 = vmul.f32 0.2, %v1483_v26  ;;  %v2260_v32 = vpop.f32.mrb[17].mxu1 }
 0x11e   : > { %v2151_v34 = vpop.f32.mrb[19].mxu0  ;;  %v2261_v37 = vadd.f32 %v2260_v32, %v2259_v25  ;;  %v2262_v33 = vpop.f32.mrb[18].mxu1 }
 0x11f   : > { %v2081_v35 = vpack.c.bf16 %v1620_v28, %v1620_v28  ;;  %v1327_v36 = vadd.f32 %v2149_v30, %v2836_v7  ;;  %v2152_v39 = vadd.f32 %v2151_v34, %v2150_v29  ;;  %v1621_v40 = vmax.f32 %v1483_v26, %v1589_v31  ;;  %v2263_v41 = vpop.f32.mrb[19].mxu1 }
 0x120   : > { %v2264_v43 = vadd.f32 %v2263_v41, %v2262_v33 }
 0x121   : > { %1781 = vst.msk [vmem:[%s2844_s20 + $0x18] sm:$0xf] %vm1774_vm1, %v2081_v35  ;;  %v1488_v38 = vadd.f32 %v2261_v37, %v1327_v36  ;;  %v1330_v42 = vadd.f32 %v2152_v39, %v2836_v7  ;;  %v2082_v45 = vpack.c.bf16 %v1621_v40, %v1621_v40 }
 0x123   : > { %v1590_v46 = vmul.f32 0.2, %v1488_v38  ;;  %v1491_v44 = vadd.f32 %v2264_v43, %v1330_v42  ;;  %v2153_v49 = vpop.f32.mrb[20].mxu0  ;;  %1782 = vst.msk [vmem:[%s2844_s20 + $0x1c] sm:$0xf] %vm1774_vm1, %v2082_v45 }
 0x124   : > { %v2154_v48 = vpop.f32.mrb[21].mxu0  ;;  %v2265_v52 = vpop.f32.mrb[20].mxu1 }
 0x125   : > { %v1622_v50 = vmax.f32 %v1488_v38, %v1590_v46  ;;  %v1591_v47 = vmul.f32 0.2, %v1491_v44  ;;  %v2155_v53 = vadd.f32 %v2154_v48, %v2153_v49  ;;  %v2156_v56 = vpop.f32.mrb[22].mxu0  ;;  %v2266_v57 = vpop.f32.mrb[21].mxu1 }
 0x126   : > { %v2157_v55 = vpop.f32.mrb[23].mxu0  ;;  %v2267_v61 = vadd.f32 %v2266_v57, %v2265_v52  ;;  %v2268_v62 = vpop.f32.mrb[22].mxu1 }
 0x127   : > { %v2083_v51 = vpack.c.bf16 %v1622_v50, %v1622_v50  ;;  %v1623_v58 = vmax.f32 %v1491_v44, %v1591_v47  ;;  %v1335_v59 = vadd.f32 %v2155_v53, %v2836_v7  ;;  %v2158_v54 = vadd.f32 %v2157_v55, %v2156_v56  ;;  %v2269_v0 = vpop.f32.mrb[23].mxu1 }
 0x128   : > { %v2270_v2 = vadd.f32 %v2269_v0, %v2268_v62 }
 0x129   : > { %1783 = vst.msk [vmem:[%s2844_s20 + $0x20] sm:$0xf] %vm1774_vm1, %v2083_v51  ;;  %v2084_v1 = vpack.c.bf16 %v1623_v58, %v1623_v58  ;;  %v1496_v63 = vadd.f32 %v2267_v61, %v1335_v59  ;;  %v1338_v60 = vadd.f32 %v2158_v54, %v2836_v7 }
 0x12b   : > { %1784 = vst.msk [vmem:[%s2844_s20 + $0x24] sm:$0xf] %vm1774_vm1, %v2084_v1  ;;  %v1592_v3 = vmul.f32 0.2, %v1496_v63  ;;  %v2159_v6 = vpop.f32.mrb[24].mxu0  ;;  %v1499_v8 = vadd.f32 %v2270_v2, %v1338_v60 }
 0x12c   : > { %v2160_v9 = vpop.f32.mrb[25].mxu0  ;;  %v2271_v11 = vpop.f32.mrb[24].mxu1 }
 0x12d   : > { %v1624_v10 = vmax.f32 %v1496_v63, %v1592_v3  ;;  %v2161_v12 = vadd.f32 %v2160_v9, %v2159_v6  ;;  %v2162_v5 = vpop.f32.mrb[26].mxu0  ;;  %v1593_v13 = vmul.f32 0.2, %v1499_v8  ;;  %v2272_v15 = vpop.f32.mrb[25].mxu1 }
 0x12e   : > { %v2163_v4 = vpop.f32.mrb[27].mxu0  ;;  %v2273_v18 = vadd.f32 %v2272_v15, %v2271_v11  ;;  %v2274_v14 = vpop.f32.mrb[26].mxu1 }
 0x12f   : > { %v2085_v16 = vpack.c.bf16 %v1624_v10, %v1624_v10  ;;  %v1343_v17 = vadd.f32 %v2161_v12, %v2836_v7  ;;  %v2164_v19 = vadd.f32 %v2163_v4, %v2162_v5  ;;  %v1625_v21 = vmax.f32 %v1499_v8, %v1593_v13  ;;  %v2275_v22 = vpop.f32.mrb[27].mxu1 }
 0x130   : > { %v2276_v24 = vadd.f32 %v2275_v22, %v2274_v14 }
 0x131   : > { %1785 = vst.msk [vmem:[%s2844_s20 + $0x28] sm:$0xf] %vm1774_vm1, %v2085_v16  ;;  %v1504_v23 = vadd.f32 %v2273_v18, %v1343_v17  ;;  %v1346_v20 = vadd.f32 %v2164_v19, %v2836_v7  ;;  %v2086_v26 = vpack.c.bf16 %v1625_v21, %v1625_v21 }
 0x133   : > { %v1594_v27 = vmul.f32 0.2, %v1504_v23  ;;  %v1507_v28 = vadd.f32 %v2276_v24, %v1346_v20  ;;  %v2165_v25 = vpop.f32.mrb[28].mxu0  ;;  %1786 = vst.msk [vmem:[%s2844_s20 + $0x2c] sm:$0xf] %vm1774_vm1, %v2086_v26 }
 0x134   : > { %v2166_v30 = vpop.f32.mrb[29].mxu0  ;;  %v2277_v32 = vpop.f32.mrb[28].mxu1 }
 0x135   : > { %v1626_v29 = vmax.f32 %v1504_v23, %v1594_v27  ;;  %v1595_v31 = vmul.f32 0.2, %v1507_v28  ;;  %v2167_v34 = vadd.f32 %v2166_v30, %v2165_v25  ;;  %v2168_v35 = vpop.f32.mrb[30].mxu0  ;;  %v2278_v36 = vpop.f32.mrb[29].mxu1 }
 0x136   : > { %v2169_v37 = vpop.f32.mrb[31].mxu0  ;;  %v2279_v41 = vadd.f32 %v2278_v36, %v2277_v32  ;;  %v2280_v38 = vpop.f32.mrb[30].mxu1 }
 0x137   : > { %v2087_v33 = vpack.c.bf16 %v1626_v29, %v1626_v29  ;;  %v1627_v39 = vmax.f32 %v1507_v28, %v1595_v31  ;;  %v1351_v40 = vadd.f32 %v2167_v34, %v2836_v7  ;;  %v2170_v42 = vadd.f32 %v2169_v37, %v2168_v35  ;;  %v2281_v43 = vpop.f32.mrb[31].mxu1 }
 0x138   : > { %v2282_v44 = vadd.f32 %v2281_v43, %v2280_v38 }
 0x139   : > { %1787 = vst.msk [vmem:[%s2844_s20 + $0x30] sm:$0xf] %vm1774_vm1, %v2087_v33  ;;  %v2088_v45 = vpack.c.bf16 %v1627_v39, %v1627_v39  ;;  %v1512_v46 = vadd.f32 %v2279_v41, %v1351_v40  ;;  %v1354_v49 = vadd.f32 %v2170_v42, %v2836_v7 }
 0x13b   : > { %1788 = vst.msk [vmem:[%s2844_s20 + $0x34] sm:$0xf] %vm1774_vm1, %v2088_v45  ;;  %v1596_v48 = vmul.f32 0.2, %v1512_v46  ;;  %v2171_v50 = vpop.f32.mrb[32].mxu0  ;;  %v1515_v47 = vadd.f32 %v2282_v44, %v1354_v49 }
 0x13c   : > { %v2172_v52 = vpop.f32.mrb[33].mxu0  ;;  %v2283_v56 = vpop.f32.mrb[32].mxu1 }
 0x13d   : > { %v1628_v53 = vmax.f32 %v1512_v46, %v1596_v48  ;;  %v2173_v57 = vadd.f32 %v2172_v52, %v2171_v50  ;;  %v2174_v55 = vpop.f32.mrb[34].mxu0  ;;  %v1597_v51 = vmul.f32 0.2, %v1515_v47  ;;  %v2284_v58 = vpop.f32.mrb[33].mxu1 }
 0x13e   : > { %v2175_v59 = vpop.f32.mrb[35].mxu0  ;;  %v2285_v54 = vadd.f32 %v2284_v58, %v2283_v56  ;;  %v2286_v0 = vpop.f32.mrb[34].mxu1 }
 0x13f   : > { %v2089_v61 = vpack.c.bf16 %v1628_v53, %v1628_v53  ;;  %v1359_v62 = vadd.f32 %v2173_v57, %v2836_v7  ;;  %v2176_v1 = vadd.f32 %v2175_v59, %v2174_v55  ;;  %v1629_v63 = vmax.f32 %v1515_v47, %v1597_v51  ;;  %v2287_v2 = vpop.f32.mrb[35].mxu1 }
 0x140   : > { %v2288_v6 = vadd.f32 %v2287_v2, %v2286_v0 }
 0x141   : > { %1789 = vst.msk [vmem:[%s2844_s20 + $0x38] sm:$0xf] %vm1774_vm1, %v2089_v61  ;;  %v1520_v60 = vadd.f32 %v2285_v54, %v1359_v62  ;;  %v1362_v3 = vadd.f32 %v2176_v1, %v2836_v7  ;;  %v2090_v8 = vpack.c.bf16 %v1629_v63, %v1629_v63 }
 0x143   : > { %v1598_v9 = vmul.f32 0.2, %v1520_v60  ;;  %v1523_v10 = vadd.f32 %v2288_v6, %v1362_v3  ;;  %v2177_v11 = vpop.f32.mrb[36].mxu0  ;;  %1790 = vst.msk [vmem:[%s2844_s20 + $0x3c] sm:$0xf] %vm1774_vm1, %v2090_v8 }
 0x144   : > { %v2178_v12 = vpop.f32.mrb[37].mxu0  ;;  %v2289_v15 = vpop.f32.mrb[36].mxu1 }
 0x145   : > { %v1630_v5 = vmax.f32 %v1520_v60, %v1598_v9  ;;  %v1599_v13 = vmul.f32 0.2, %v1523_v10  ;;  %v2179_v4 = vadd.f32 %v2178_v12, %v2177_v11  ;;  %v2180_v16 = vpop.f32.mrb[38].mxu0  ;;  %v2290_v17 = vpop.f32.mrb[37].mxu1 }
 0x146   : > { %v2181_v18 = vpop.f32.mrb[39].mxu0  ;;  %v2291_v22 = vadd.f32 %v2290_v17, %v2289_v15  ;;  %v2292_v23 = vpop.f32.mrb[38].mxu1 }
 0x147   : > { %v2091_v14 = vpack.c.bf16 %v1630_v5, %v1630_v5  ;;  %v1631_v19 = vmax.f32 %v1523_v10, %v1599_v13  ;;  %v1367_v21 = vadd.f32 %v2179_v4, %v2836_v7  ;;  %v2182_v20 = vadd.f32 %v2181_v18, %v2180_v16  ;;  %v2293_v24 = vpop.f32.mrb[39].mxu1 }
 0x148   : > { %v2294_v28 = vadd.f32 %v2293_v24, %v2292_v23 }
 0x149   : > { %1791 = vst.msk [vmem:[%s2844_s20 + $0x40] sm:$0xf] %vm1774_vm1, %v2091_v14  ;;  %v2092_v26 = vpack.c.bf16 %v1631_v19, %v1631_v19  ;;  %v1528_v27 = vadd.f32 %v2291_v22, %v1367_v21  ;;  %v1370_v25 = vadd.f32 %v2182_v20, %v2836_v7 }
 0x14b   : > { %1792 = vst.msk [vmem:[%s2844_s20 + $0x44] sm:$0xf] %vm1774_vm1, %v2092_v26  ;;  %v1600_v30 = vmul.f32 0.2, %v1528_v27  ;;  %v2183_v29 = vpop.f32.mrb[40].mxu0  ;;  %v1531_v31 = vadd.f32 %v2294_v28, %v1370_v25 }
 0x14c   : > { %v2184_v32 = vpop.f32.mrb[41].mxu0  ;;  %v2295_v35 = vpop.f32.mrb[40].mxu1 }
 0x14d   : > { %v1632_v34 = vmax.f32 %v1528_v27, %v1600_v30  ;;  %v2185_v36 = vadd.f32 %v2184_v32, %v2183_v29  ;;  %v2186_v37 = vpop.f32.mrb[42].mxu0  ;;  %v1601_v33 = vmul.f32 0.2, %v1531_v31  ;;  %v2296_v39 = vpop.f32.mrb[41].mxu1 }
 0x14e   : > { %v2187_v40 = vpop.f32.mrb[43].mxu0  ;;  %v2297_v42 = vadd.f32 %v2296_v39, %v2295_v35  ;;  %v2298_v43 = vpop.f32.mrb[42].mxu1 }
 0x14f   : > { %v2093_v41 = vpack.c.bf16 %v1632_v34, %v1632_v34  ;;  %v1375_v38 = vadd.f32 %v2185_v36, %v2836_v7  ;;  %v2188_v45 = vadd.f32 %v2187_v40, %v2186_v37  ;;  %v1633_v46 = vmax.f32 %v1531_v31, %v1601_v33  ;;  %v2299_v44 = vpop.f32.mrb[43].mxu1 }
 0x150   : > { %v2300_v50 = vadd.f32 %v2299_v44, %v2298_v43 }
 0x151   : > { %1793 = vst.msk [vmem:[%s2844_s20 + $0x48] sm:$0xf] %vm1774_vm1, %v2093_v41  ;;  %v1536_v49 = vadd.f32 %v2297_v42, %v1375_v38  ;;  %v1378_v48 = vadd.f32 %v2188_v45, %v2836_v7  ;;  %v2094_v47 = vpack.c.bf16 %v1633_v46, %v1633_v46 }
 0x153   : > { %v1602_v52 = vmul.f32 0.2, %v1536_v49  ;;  %v1539_v53 = vadd.f32 %v2300_v50, %v1378_v48  ;;  %v2189_v56 = vpop.f32.mrb[44].mxu0  ;;  %1794 = vst.msk [vmem:[%s2844_s20 + $0x4c] sm:$0xf] %vm1774_vm1, %v2094_v47 }
 0x154   : > { %v2190_v57 = vpop.f32.mrb[45].mxu0  ;;  %v2301_v58 = vpop.f32.mrb[44].mxu1 }
 0x155   : > { %v1634_v55 = vmax.f32 %v1536_v49, %v1602_v52  ;;  %v1603_v51 = vmul.f32 0.2, %v1539_v53  ;;  %v2191_v59 = vadd.f32 %v2190_v57, %v2189_v56  ;;  %v2192_v61 = vpop.f32.mrb[46].mxu0  ;;  %v2302_v62 = vpop.f32.mrb[45].mxu1 }
 0x156   : > { %v2193_v54 = vpop.f32.mrb[47].mxu0  ;;  %v2303_v2 = vadd.f32 %v2302_v62, %v2301_v58  ;;  %v2304_v60 = vpop.f32.mrb[46].mxu1 }
 0x157   : > { %v2095_v0 = vpack.c.bf16 %v1634_v55, %v1634_v55  ;;  %v1635_v1 = vmax.f32 %v1539_v53, %v1603_v51  ;;  %v1383_v63 = vadd.f32 %v2191_v59, %v2836_v7  ;;  %v2194_v3 = vadd.f32 %v2193_v54, %v2192_v61  ;;  %v2305_v6 = vpop.f32.mrb[47].mxu1 }
 0x158   : > { %v2306_v10 = vadd.f32 %v2305_v6, %v2304_v60 }
 0x159   : > { %1795 = vst.msk [vmem:[%s2844_s20 + $0x50] sm:$0xf] %vm1774_vm1, %v2095_v0  ;;  %v2096_v8 = vpack.c.bf16 %v1635_v1, %v1635_v1  ;;  %v1544_v9 = vadd.f32 %v2303_v2, %v1383_v63  ;;  %v1386_v11 = vadd.f32 %v2194_v3, %v2836_v7 }
 0x15b   : > { %1796 = vst.msk [vmem:[%s2844_s20 + $0x54] sm:$0xf] %vm1774_vm1, %v2096_v8  ;;  %v1604_v12 = vmul.f32 0.2, %v1544_v9  ;;  %v2195_v5 = vpop.f32.mrb[48].mxu0  ;;  %v1547_v13 = vadd.f32 %v2306_v10, %v1386_v11 }
 0x15c   : > { %v2196_v15 = vpop.f32.mrb[49].mxu0  ;;  %v2307_v16 = vpop.f32.mrb[48].mxu1 }
 0x15d   : > { %v1636_v4 = vmax.f32 %v1544_v9, %v1604_v12  ;;  %v2197_v17 = vadd.f32 %v2196_v15, %v2195_v5  ;;  %v2198_v18 = vpop.f32.mrb[50].mxu0  ;;  %v1605_v14 = vmul.f32 0.2, %v1547_v13  ;;  %v2308_v19 = vpop.f32.mrb[49].mxu1 }
 0x15e   : > { %v2199_v21 = vpop.f32.mrb[51].mxu0  ;;  %v2309_v20 = vadd.f32 %v2308_v19, %v2307_v16  ;;  %v2310_v24 = vpop.f32.mrb[50].mxu1 }
 0x15f   : > { %v2097_v22 = vpack.c.bf16 %v1636_v4, %v1636_v4  ;;  %v1391_v23 = vadd.f32 %v2197_v17, %v2836_v7  ;;  %v2200_v26 = vadd.f32 %v2199_v21, %v2198_v18  ;;  %v1637_v27 = vmax.f32 %v1547_v13, %v1605_v14  ;;  %v2311_v28 = vpop.f32.mrb[51].mxu1 }
 0x160   : > { %v2312_v29 = vadd.f32 %v2311_v28, %v2310_v24 }
 0x161   : > { %1797 = vst.msk [vmem:[%s2844_s20 + $0x58] sm:$0xf] %vm1774_vm1, %v2097_v22  ;;  %v1552_v25 = vadd.f32 %v2309_v20, %v1391_v23  ;;  %v1394_v30 = vadd.f32 %v2200_v26, %v2836_v7  ;;  %v2098_v31 = vpack.c.bf16 %v1637_v27, %v1637_v27 }
 0x163   : > { %v1606_v32 = vmul.f32 0.2, %v1552_v25  ;;  %v1555_v34 = vadd.f32 %v2312_v29, %v1394_v30  ;;  %v2201_v35 = vpop.f32.mrb[52].mxu0  ;;  %1798 = vst.msk [vmem:[%s2844_s20 + $0x5c] sm:$0xf] %vm1774_vm1, %v2098_v31 }
 0x164   : > { %v2202_v36 = vpop.f32.mrb[53].mxu0  ;;  %v2313_v39 = vpop.f32.mrb[52].mxu1 }
 0x165   : > { %v1638_v37 = vmax.f32 %v1552_v25, %v1606_v32  ;;  %v1607_v33 = vmul.f32 0.2, %v1555_v34  ;;  %v2203_v40 = vadd.f32 %v2202_v36, %v2201_v35  ;;  %v2204_v41 = vpop.f32.mrb[54].mxu0  ;;  %v2314_v38 = vpop.f32.mrb[53].mxu1 }
 0x166   : > { %v2205_v42 = vpop.f32.mrb[55].mxu0  ;;  %v2315_v44 = vadd.f32 %v2314_v38, %v2313_v39  ;;  %v2316_v49 = vpop.f32.mrb[54].mxu1 }
 0x167   : > { %v2099_v43 = vpack.c.bf16 %v1638_v37, %v1638_v37  ;;  %v1639_v45 = vmax.f32 %v1555_v34, %v1607_v33  ;;  %v1399_v46 = vadd.f32 %v2203_v40, %v2836_v7  ;;  %v2206_v48 = vadd.f32 %v2205_v42, %v2204_v41  ;;  %v2317_v50 = vpop.f32.mrb[55].mxu1 }
 0x168   : > { %v2318_v53 = vadd.f32 %v2317_v50, %v2316_v49 }
 0x169   : > { %1799 = vst.msk [vmem:[%s2844_s20 + $0x60] sm:$0xf] %vm1774_vm1, %v2099_v43  ;;  %v2100_v47 = vpack.c.bf16 %v1639_v45, %v1639_v45  ;;  %v1560_v52 = vadd.f32 %v2315_v44, %v1399_v46  ;;  %v1402_v56 = vadd.f32 %v2206_v48, %v2836_v7 }
 0x16b   : > { %1800 = vst.msk [vmem:[%s2844_s20 + $0x64] sm:$0xf] %vm1774_vm1, %v2100_v47  ;;  %v1608_v57 = vmul.f32 0.2, %v1560_v52  ;;  %v2207_v55 = vpop.f32.mrb[56].mxu0  ;;  %v1563_v51 = vadd.f32 %v2318_v53, %v1402_v56 }
 0x16c   : > { %v2208_v58 = vpop.f32.mrb[57].mxu0  ;;  %v2319_v61 = vpop.f32.mrb[56].mxu1 }
 0x16d   : > { %v1640_v59 = vmax.f32 %v1560_v52, %v1608_v57  ;;  %v2209_v62 = vadd.f32 %v2208_v58, %v2207_v55  ;;  %v2210_v54 = vpop.f32.mrb[58].mxu0  ;;  %v1609_v0 = vmul.f32 0.2, %v1563_v51  ;;  %v2320_v1 = vpop.f32.mrb[57].mxu1 }
 0x16e   : > { %v2211_v63 = vpop.f32.mrb[59].mxu0  ;;  %v2321_v3 = vadd.f32 %v2320_v1, %v2319_v61  ;;  %v2322_v6 = vpop.f32.mrb[58].mxu1 }
 0x16f   : > { %v2101_v2 = vpack.c.bf16 %v1640_v59, %v1640_v59  ;;  %v1407_v60 = vadd.f32 %v2209_v62, %v2836_v7  ;;  %v2212_v8 = vadd.f32 %v2211_v63, %v2210_v54  ;;  %v1641_v9 = vmax.f32 %v1563_v51, %v1609_v0  ;;  %v2323_v10 = vpop.f32.mrb[59].mxu1 }
 0x170   : > { %v2324_v5 = vadd.f32 %v2323_v10, %v2322_v6 }
 0x171   : > { %1801 = vst.msk [vmem:[%s2844_s20 + $0x68] sm:$0xf] %vm1774_vm1, %v2101_v2  ;;  %v1568_v11 = vadd.f32 %v2321_v3, %v1407_v60  ;;  %v1410_v12 = vadd.f32 %v2212_v8, %v2836_v7  ;;  %v2102_v13 = vpack.c.bf16 %v1641_v9, %v1641_v9 }
 0x173   : > { %v1610_v15 = vmul.f32 0.2, %v1568_v11  ;;  %v1571_v4 = vadd.f32 %v2324_v5, %v1410_v12  ;;  %v2213_v16 = vpop.f32.mrb[60].mxu0  ;;  %1802 = vst.msk [vmem:[%s2844_s20 + $0x6c] sm:$0xf] %vm1774_vm1, %v2102_v13 }
 0x174   : > { %v2214_v17 = vpop.f32.mrb[61].mxu0  ;;  %v2325_v19 = vpop.f32.mrb[60].mxu1 }
 0x175   : > { %v1642_v18 = vmax.f32 %v1568_v11, %v1610_v15  ;;  %v1611_v14 = vmul.f32 0.2, %v1571_v4  ;;  %v2215_v21 = vadd.f32 %v2214_v17, %v2213_v16  ;;  %v2216_v22 = vpop.f32.mrb[62].mxu0  ;;  %v2326_v23 = vpop.f32.mrb[61].mxu1 }
 0x176   : > { %v2217_v20 = vpop.f32.mrb[63].mxu0  ;;  %v2327_v28 = vadd.f32 %v2326_v23, %v2325_v19  ;;  %v2328_v25 = vpop.f32.mrb[62].mxu1 }
 0x177   : > { %v2103_v24 = vpack.c.bf16 %v1642_v18, %v1642_v18  ;;  %v1643_v26 = vmax.f32 %v1571_v4, %v1611_v14  ;;  %v1415_v27 = vadd.f32 %v2215_v21, %v2836_v7  ;;  %v2218_v30 = vadd.f32 %v2217_v20, %v2216_v22  ;;  %v2329_v29 = vpop.f32.mrb[63].mxu1 }
 0x178   : > { %v2330_v34 = vadd.f32 %v2329_v29, %v2328_v25 }
 0x179   : > { %1803 = vst.msk [vmem:[%s2844_s20 + $0x70] sm:$0xf] %vm1774_vm1, %v2103_v24  ;;  %v2104_v31 = vpack.c.bf16 %v1643_v26, %v1643_v26  ;;  %v1576_v32 = vadd.f32 %v2327_v28, %v1415_v27  ;;  %v1418_v35 = vadd.f32 %v2218_v30, %v2836_v7 }
 0x17b   : > { %1804 = vst.msk [vmem:[%s2844_s20 + $0x74] sm:$0xf] %vm1774_vm1, %v2104_v31  ;;  %v1612_v36 = vmul.f32 0.2, %v1576_v32  ;;  %v1579_v37 = vadd.f32 %v2330_v34, %v1418_v35 }
 0x17d   : > { %v1644_v33 = vmax.f32 %v1576_v32, %v1612_v36  ;;  %v1613_v39 = vmul.f32 0.2, %v1579_v37 }
 0x17f   : > { %v2105_v40 = vpack.c.bf16 %v1644_v33, %v1644_v33  ;;  %v1645_v41 = vmax.f32 %v1579_v37, %v1613_v39 }
 0x181   : > { %1805 = vst.msk [vmem:[%s2844_s20 + $0x78] sm:$0xf] %vm1774_vm1, %v2105_v40  ;;  %v2106_v38 = vpack.c.bf16 %v1645_v41, %v1645_v41 }
 0x183   : > { %1806 = vst.msk [vmem:[%s2844_s20 + $0x7c] sm:$0xf] %vm1774_vm1, %v2106_v38 }
 0x184 PF: > { %s13_s14 = sadd.s32 1, %s2474_s14   ;;  %s2953_s12 = smov %s2470_s13 }
 0x185   : > { %p10_p5 = scmp.ge.s32.totalorder %s13_s14, 4   ;;  %s2954_s13 = smov %s2956_s15 }
 0x187   :  { %12 = sbr.rel (!%p10_p5) target bundleno = 2 (0x2), region = 65 }

// kernel: _lambda_.6
= control target key start
LH: loop header
LB: loop body
LE: loop exit
PB: predicated region body
PF: predicated region fallthrough
CT: control target
= control target key end

     0   :  { %s2156_s12 = smov 0   ;;  %s2158_s13 = smov 0   ;;  %s2513_s0 = inlined_call_operand.vmem [shape: bf16[2,9,9,256], index: 0, kind: input, shape index: {}]   ;;  %s2514_s1 = inlined_call_operand.vmem [shape: bf16[1,1024,128], index: 1, kind: input, shape index: {}]   ;;  %s2515_s2 = inlined_call_operand.vmem [shape: f32[1,3,128], index: 2, kind: input, shape index: {}]   ;;  %s2516_s3 = inlined_call_operand.vmem [shape: bf16[2,8,8,128], index: 3, kind: output, shape index: {}]  }
   0x1   :  { %s2160_s14 = smov 0  }
   0x2 LB: > { %s25_s15 = sadd.s32 1, %s2130_s13  ;;  %p1639_p0 = scmp.ge.s32.totalorder %s2134_s14, 1  ;;  %s2134_s14 = sphi %s2160_s14, %s13_s14   ;;  %s2130_s13 = sphi %s2158_s13, %s2518_s13   ;;  %s2126_s12 = sphi %s2156_s12, %s2517_s12  }
   0x3   : > { %p27_p1 = scmp.ge.s32.totalorder %s25_s15, 2  ;;  %p151_p2 = scmp.lt.s32.totalorder %s2134_s14, 3 }
   0x5   : > { %s2520_s15 = smov (%p27_p1, %s25_s15), 0  ;;  %p152_p3 = pnand %p1639_p0, %p151_p2 }
   0x6   : > { %v1998_v0 = vld [vmem:[%s2514_s1 + $0x40] sm:$0xff] (!%p152_p3)   ;;  %v2002_v4 = vld [vmem:[%s2514_s1 + $0x48] sm:$0xff] (!%p152_p3)   ;;  %v2006_v8 = vld [vmem:[%s2514_s1 + $0x50] sm:$0xff] (!%p152_p3)   ;;  %p178_p4 = scmp.lt.s32.totalorder (!%p152_p3), %s2126_s12, 1 }
   0x7   : > { %155 = sbr.rel (%p152_p3) target bundleno = 374 (0x176), region = 32  ;;  %v1999_v1 = vld [vmem:[%s2514_s1 + $0xc0] sm:$0xff] (!%p152_p3)   ;;  %1813 = vmatprep.subr.bf16.mxu0 (!%p152_p3), %v1998_v0  ;;  %v2003_v5 = vld [vmem:[%s2514_s1 + $0xc8] sm:$0xff] (!%p152_p3)   ;;  %v2007_v9 = vld [vmem:[%s2514_s1 + $0xd0] sm:$0xff] (!%p152_p3)  }
   0x8   : > { %v2000_v2 = vld [vmem:[%s2514_s1] sm:$0xff] (!%p152_p3)   ;;  %1853 = vmatprep.subr.bf16.mxu1 (!%p152_p3), %v1999_v1  ;;  %v2004_v6 = vld [vmem:[%s2514_s1 + $0x8] sm:$0xff] (!%p152_p3)   ;;  %v2008_v10 = vld [vmem:[%s2514_s1 + $0x10] sm:$0xff] (!%p152_p3)  }
   0x9   : > { %v2001_v3 = vld [vmem:[%s2514_s1 + $0x80] sm:$0xff] (!%p152_p3)   ;;  %1814 = vmatpush3.bf16.msra.mxu0 (!%p152_p3), %v2000_v2  ;;  %v2005_v7 = vld [vmem:[%s2514_s1 + $0x88] sm:$0xff] (!%p152_p3)   ;;  %v2009_v11 = vld [vmem:[%s2514_s1 + $0x90] sm:$0xff] (!%p152_p3)  }
   0xa   : > { %1854 = vmatpush3.bf16.msra.mxu1 (!%p152_p3), %v2001_v3  ;;  %1815 = vmatprep.subr.bf16.mxu0 (!%p152_p3), %v2002_v4  ;;  %v2010_v12 = vld [vmem:[%s2514_s1 + $0x58] sm:$0xff] (!%p152_p3)   ;;  %v2014_v16 = vld [vmem:[%s2514_s1 + $0x60] sm:$0xff] (!%p152_p3)   ;;  %v2018_v20 = vld [vmem:[%s2514_s1 + $0x68] sm:$0xff] (!%p152_p3)  }
   0xb   : > { %1855 = vmatprep.subr.bf16.mxu1 (!%p152_p3), %v2003_v5  ;;  %v2011_v13 = vld [vmem:[%s2514_s1 + $0xd8] sm:$0xff] (!%p152_p3)   ;;  %v2015_v17 = vld [vmem:[%s2514_s1 + $0xe0] sm:$0xff] (!%p152_p3)   ;;  %v2019_v21 = vld [vmem:[%s2514_s1 + $0xe8] sm:$0xff] (!%p152_p3)  }
   0xc   : > { %v2012_v14 = vld [vmem:[%s2514_s1 + $0x18] sm:$0xff] (!%p152_p3)   ;;  %v2016_v18 = vld [vmem:[%s2514_s1 + $0x20] sm:$0xff] (!%p152_p3)   ;;  %v2020_v22 = vld [vmem:[%s2514_s1 + $0x28] sm:$0xff] (!%p152_p3)  }
   0xd   : > { %1816 = vmatpush3.bf16.msra.mxu0 (!%p152_p3), %v2004_v6  ;;  %v2013_v15 = vld [vmem:[%s2514_s1 + $0x98] sm:$0xff] (!%p152_p3)   ;;  %v2017_v19 = vld [vmem:[%s2514_s1 + $0xa0] sm:$0xff] (!%p152_p3)   ;;  %v2021_v23 = vld [vmem:[%s2514_s1 + $0xa8] sm:$0xff] (!%p152_p3)  }
   0xe   : > { %1856 = vmatpush3.bf16.msra.mxu1 %v2005_v7  ;;  %1817 = vmatprep.subr.bf16.mxu0 %v2006_v8  ;;  %s2522_s12 = smov (!%p178_p4, %s2126_s12), 1  ;;  %v2022_v24 = vld [vmem:[%s2514_s1 + $0x70] sm:$0xff]   ;;  %v2026_v28 = vld [vmem:[%s2514_s1 + $0x78] sm:$0xff]   ;;  %v2036_v42 = vld [vmem:[%s2514_s1 + $0x140] sm:$0xff]  }
   0xf   : > { %1857 = vmatprep.subr.bf16.mxu1 %v2007_v9  ;;  %v2023_v25 = vld [vmem:[%s2514_s1 + $0xf0] sm:$0xff]   ;;  %s1973_s22 = smul.u32 144, %s2522_s12  ;;  %v2027_v29 = vld [vmem:[%s2514_s1 + $0xf8] sm:$0xff]   ;;  %v2037_v47 = vld [vmem:[%s2514_s1 + $0x1c0] sm:$0xff]   ;;  %s1789_s10 = sshll.u32 %s2522_s12, 5 }
  0x10   : > { %v2024_v26 = vld [vmem:[%s2514_s1 + $0x30] sm:$0xff]   ;;  %v2028_v30 = vld [vmem:[%s2514_s1 + $0x38] sm:$0xff]   ;;  %v2038_v48 = vld [vmem:[%s2514_s1 + $0x100] sm:$0xff]   ;;  %s190_s17 = scalar_lea.vmem %s2516_s3, %s1789_s10 }
  0x11   : > { %1818 = vmatpush3.bf16.msra.mxu0 %v2008_v10  ;;  %v2025_v27 = vld [vmem:[%s2514_s1 + $0xb0] sm:$0xff]   ;;  %s2274_s6 = scalar_lea.vmem %s2513_s0, %s1973_s22  ;;  %v2029_v31 = vld [vmem:[%s2514_s1 + $0xb8] sm:$0xff]   ;;  %v2040_v57 = vld [vmem:[%s2514_s1 + $0x148] sm:$0xff]  }
  0x12   : > { %1858 = vmatpush3.bf16.msra.mxu1 %v2009_v11  ;;  %1819 = vmatprep.subr.bf16.mxu0 %v2010_v12  ;;  %v192_v32 = vld [vmem:[%s2274_s6] sm:$0xff]  ;;  %v2284_v33 = vld [vmem:[%s2274_s6 + $0x10] sm:$0xff]  ;;  %v200_v34 = vld [vmem:[%s2274_s6 + $0x8] sm:$0x11] }
  0x13   : > { %1859 = vmatprep.subr.bf16.mxu1 %v2011_v13  ;;  %v1692_v35 = vcombine.high %v192_v32, %v2284_v33  ;;  %v201_v36 = vld [vmem:[%s2274_s6 + $0x18] sm:$0x11]  ;;  %v1659_v37 = vcombine.low %v192_v32, %v200_v34  ;;  %v1660_v38 = vcombine.high %v192_v32, %v200_v34  ;;  %v1691_v39 = vcombine.low %v192_v32, %v2284_v33  ;;  %v2039_v62 = vld [vmem:[%s2514_s1 + $0x180] sm:$0xff]   ;;  %v2042_v63 = vld [vmem:[%s2514_s1 + $0x108] sm:$0xff]  }
  0x14   : > { %v1661_v40 = vcombine.low %v2284_v33, %v201_v36  ;;  %v1662_v41 = vcombine.high %v2284_v33, %v201_v36  ;;  %v2041_v2 = vld [vmem:[%s2514_s1 + $0x1c8] sm:$0xff]   ;;  %v2314_v3 = vld [vmem:[%s2274_s6 + $0x20] sm:$0xff]  ;;  %v2317_v4 = vld [vmem:[%s2274_s6 + $0x30] sm:$0xff] }
  0x15   : > { %1820 = vmatpush3.bf16.msra.mxu0 %v2012_v14  ;;  %1220 = vmatprep.mubr.bf16.mxu0 %v1692_v35  ;;  %v297_v43 = vshrl.u32 %v1660_v38, 16  ;;  %v299_v44 = vshll.u32 %v1660_v38, 16  ;;  %v290_v45 = vshrl.u32 %v1659_v37, 16  ;;  %v292_v46 = vshll.u32 %v1659_v37, 16  ;;  %v202_v5 = vld [vmem:[%s2274_s6 + $0x28] sm:$0x11] }
  0x16   : > { %1860 = vmatpush3.bf16.msra.mxu1 %v2013_v15  ;;  %1821 = vmatprep.subr.bf16.mxu0 %v2014_v16  ;;  %v311_v49 = vshrl.u32 %v1662_v41, 16  ;;  %v313_v50 = vshll.u32 %v1662_v41, 16  ;;  %v304_v51 = vshrl.u32 %v1661_v40, 16  ;;  %v306_v52 = vshll.u32 %v1661_v40, 16  ;;  %v203_v6 = vld [vmem:[%s2274_s6 + $0x38] sm:$0x11] }
  0x17   : > { %1861 = vmatprep.subr.bf16.mxu1 %v2015_v17  ;;  %v301_v53 = vrot.slane %v299_v44, 1  ;;  %v294_v54 = vrot.slane %v292_v46, 1  ;;  %v2043_v7 = vld [vmem:[%s2514_s1 + $0x188] sm:$0xff]   ;;  %v1700_v8 = vcombine.high %v2314_v3, %v2317_v4  ;;  %v1664_v9 = vcombine.high %v2314_v3, %v202_v5  ;;  %v2050_v12 = vld [vmem:[%s2514_s1 + $0x150] sm:$0xff]   ;;  %v2054_v32 = vld [vmem:[%s2514_s1 + $0x158] sm:$0xff]  }
  0x18   : > { %v315_v55 = vrot.slane %v313_v50, 1  ;;  %v308_v56 = vrot.slane %v306_v52, 1  ;;  %v1666_v10 = vcombine.high %v2317_v4, %v203_v6  ;;  %v1699_v11 = vcombine.low %v2314_v3, %v2317_v4  ;;  %v2051_v15 = vld [vmem:[%s2514_s1 + $0x1d0] sm:$0xff]   ;;  %v2055_v36 = vld [vmem:[%s2514_s1 + $0x1d8] sm:$0xff]   ;;  %v2357_v41 = vld [vmem:[%s2274_s6 + $0x40] sm:$0xff] }
  0x19   : > { %1822 = vmatpush3.bf16.msra.mxu0 %v2016_v18  ;;  %v302_v58 = vor.u32 %v301_v53, %v297_v43  ;;  %v295_v59 = vor.u32 %v294_v54, %v290_v45  ;;  %v1663_v13 = vcombine.low %v2314_v3, %v202_v5  ;;  %v1665_v14 = vcombine.low %v2317_v4, %v203_v6  ;;  %v2056_v38 = vld [vmem:[%s2514_s1 + $0x118] sm:$0xff]   ;;  %v204_v43 = vld [vmem:[%s2274_s6 + $0x48] sm:$0x11]  ;;  %v2065_v52 = vld [vmem:[%s2514_s1 + $0x1e0] sm:$0xff]  }
  0x1a   : > { %1862 = vmatpush3.bf16.msra.mxu1 %v2017_v19  ;;  %1823 = vmatprep.subr.bf16.mxu0 %v2018_v20  ;;  %v316_v60 = vor.u32 %v315_v55, %v311_v49  ;;  %v309_v61 = vor.u32 %v308_v56, %v304_v51  ;;  %v325_v16 = vshrl.u32 %v1664_v9, 16  ;;  %v327_v17 = vshll.u32 %v1664_v9, 16  ;;  %v2057_v40 = vld [vmem:[%s2514_s1 + $0x198] sm:$0xff]  }
  0x1b   : > { %1863 = vmatprep.subr.bf16.mxu1 %v2019_v21  ;;  %v339_v18 = vshrl.u32 %v1666_v10, 16  ;;  %v341_v19 = vshll.u32 %v1666_v10, 16  ;;  %v318_v20 = vshrl.u32 %v1663_v13, 16  ;;  %v320_v21 = vshll.u32 %v1663_v13, 16  ;;  %v205_v44 = vld [vmem:[%s2274_s6 + $0x58] sm:$0x11] }
  0x1c   : > { %v1694_v0 = vcombine.low %v302_v58, %v316_v60  ;;  %v1693_v1 = vcombine.low %v295_v59, %v309_v61  ;;  %v1668_v46 = vcombine.high %v2357_v41, %v204_v43  ;;  %v1667_v50 = vcombine.low %v2357_v41, %v204_v43  ;;  %v2069_v10 = vld [vmem:[%s2514_s1 + $0x1e8] sm:$0xff]  }
  0x1d   : > { %1824 = vmatpush3.bf16.msra.mxu0 %v2020_v22  ;;  %v332_v22 = vshrl.u32 %v1665_v14, 16 }
  0x1e   : > { %1864 = vmatpush3.bf16.msra.mxu1 %v2021_v23  ;;  %1825 = vmatprep.subr.bf16.mxu0 %v2022_v24  ;;  %v334_v23 = vshll.u32 %v1665_v14, 16  ;;  %v329_v24 = vrot.slane %v327_v17, 1  ;;  %v353_v53 = vshrl.u32 %v1668_v46, 16  ;;  %v355_v54 = vshll.u32 %v1668_v46, 16  ;;  %v2071_v14 = vld [vmem:[%s2514_s1 + $0x1a8] sm:$0xff]  }
  0x1f   : > { %1865 = vmatprep.subr.bf16.mxu1 %v2023_v25  ;;  %1285 = vmatprep.mubr.bf16.mxu1 %v1694_v0  ;;  %v343_v25 = vrot.slane %v341_v19, 1  ;;  %v348_v58 = vshll.u32 %v1667_v50, 16  ;;  %v2067_v0 = vld [vmem:[%s2514_s1 + $0x1a0] sm:$0xff]   ;;  %v206_v17 = vld [vmem:[%s2274_s6 + $0x68] sm:$0x11]  ;;  %v1696_v19 = vcombine.high %v2284_v33, %v2314_v3 }
  0x20   : > { %v357_v61 = vrot.slane %v355_v54, 1  ;;  %v2085_v54 = vld [vmem:[%s2514_s1 + $0x1b8] sm:$0xff]  }
  0x21   : > { %1826 = vmatpush3.bf16.msra.mxu0 %v2024_v26  ;;  %v2052_v26 = vld [vmem:[%s2514_s1 + $0x110] sm:$0xff]  }
  0x22   : > { %1866 = vmatpush3.bf16.msra.mxu1 %v2025_v27  ;;  %1827 = vmatprep.subr.bf16.mxu0 %v2026_v28  ;;  %v2053_v27 = vld [vmem:[%s2514_s1 + $0x190] sm:$0xff]   ;;  %v322_v28 = vrot.slane %v320_v21, 1  ;;  %v358_v5 = vor.u32 %v357_v61, %v353_v53 }
  0x23   : > { %1867 = vmatprep.subr.bf16.mxu1 %v2027_v29  ;;  %v336_v29 = vrot.slane %v334_v23, 1 }
  0x24   : > { %v323_v34 = vor.u32 %v322_v28, %v318_v20 }
  0x25   : > { %1828 = vmatpush3.bf16.msra.mxu0 %v2028_v30  ;;  %v330_v30 = vor.u32 %v329_v24, %v325_v16  ;;  %v337_v35 = vor.u32 %v336_v29, %v332_v22  ;;  %v2400_v16 = vld [vmem:[%s2274_s6 + $0x70] sm:$0xff] }
  0x26   : > { %1868 = vmatpush3.bf16.msra.mxu1 %v2029_v31  ;;  %1893 = vmatprep.subr.bf16.mxu0 %v2036_v42  ;;  %v344_v31 = vor.u32 %v343_v25, %v339_v18  ;;  %v2360_v42 = vld [vmem:[%s2274_s6 + $0x50] sm:$0xff]  ;;  %v207_v18 = vld [vmem:[%s2274_s6 + $0x78] sm:$0x11] }
  0x27   : > { %1933 = vmatprep.subr.bf16.mxu1 %v2037_v47  ;;  %v1708_v45 = vcombine.high %v2357_v41, %v2360_v42  ;;  %v1670_v47 = vcombine.high %v2360_v42, %v205_v44  ;;  %v1707_v49 = vcombine.low %v2357_v41, %v2360_v42  ;;  %v1669_v51 = vcombine.low %v2360_v42, %v205_v44  ;;  %v2078_v24 = vld [vmem:[%s2514_s1 + $0x170] sm:$0xff]  }
  0x28   : > { %1221 = vmatmul.mubr.bf16.vlgmr.msra.gmra.mrb[0].mxu0 %v1691_v39  ;;  %v1702_v37 = vcombine.low %v330_v30, %v344_v31  ;;  %v1701_v39 = vcombine.low %v323_v34, %v337_v35  ;;  %v1674_v22 = vcombine.high %v2400_v16, %v207_v18 }
  0x29   : > { %1894 = vmatpush3.bf16.msra.mxu0 %v2038_v48  ;;  %1286 = vmatmul.mubr.bf16.vlgmr.msra.gmra.mrb[0].mxu1 %v1693_v1  ;;  %v2064_v48 = vld [vmem:[%s2514_s1 + $0x160] sm:$0xff]   ;;  %v367_v55 = vshrl.u32 %v1670_v47, 16  ;;  %v369_v56 = vshll.u32 %v1670_v47, 16  ;;  %v360_v59 = vshrl.u32 %v1669_v51, 16  ;;  %v362_v60 = vshll.u32 %v1669_v51, 16  ;;  %v2082_v47 = vld [vmem:[%s2514_s1 + $0x178] sm:$0xff]  }
  0x2a   : > { %1895 = vmatprep.subr.bf16.mxu0 %v2040_v57  ;;  %1934 = vmatpush3.bf16.msra.mxu1 %v2039_v62  ;;  %v346_v57 = vshrl.u32 %v1667_v50, 16  ;;  %v350_v1 = vrot.slane %v348_v58, 1  ;;  %v395_v30 = vshrl.u32 %v1674_v22, 16  ;;  %v397_v31 = vshll.u32 %v1674_v22, 16  ;;  %v2083_v50 = vld [vmem:[%s2514_s1 + $0x1f8] sm:$0xff]  }
  0x2b   : > { %1228 = vmatprep.mubr.bf16.mxu0 %v1700_v8  ;;  %1935 = vmatprep.subr.bf16.mxu1 %v2041_v2  ;;  %v371_v62 = vrot.slane %v369_v56, 1  ;;  %v364_v2 = vrot.slane %v362_v60, 1  ;;  %v1695_v56 = vcombine.low %v2284_v33, %v2314_v3  ;;  %v1703_v58 = vcombine.low %v2317_v4, %v2357_v41 }
  0x2c   : > { %1293 = vmatprep.mubr.bf16.mxu1 %v1702_v37  ;;  %v351_v8 = vor.u32 %v350_v1, %v346_v57  ;;  %v1704_v57 = vcombine.high %v2317_v4, %v2357_v41 }
  0x2d   : > { %1896 = vmatpush3.bf16.msra.mxu0 %v2042_v63  ;;  %v2066_v63 = vld [vmem:[%s2514_s1 + $0x120] sm:$0xff]   ;;  %v372_v6 = vor.u32 %v371_v62, %v367_v55  ;;  %v365_v9 = vor.u32 %v364_v2, %v360_v59  ;;  %v1651_v55 = vld [vmem:[%s2274_s6 + $0x18] sm:$0x11]  ;;  %v1652_v59 = vld [vmem:[%s2274_s6 + $0x28] sm:$0x11] }
  0x2e   : > { %1897 = vmatprep.subr.bf16.mxu0 %v2050_v12  ;;  %1936 = vmatpush3.bf16.msra.mxu1 %v2043_v7  ;;  %v2068_v7 = vld [vmem:[%s2514_s1 + $0x168] sm:$0xff]   ;;  %v1675_v60 = vcombine.low %v2284_v33, %v1651_v55  ;;  %v1676_v61 = vcombine.high %v2284_v33, %v1651_v55  ;;  %v1653_v62 = vld [vmem:[%s2274_s6 + $0x38] sm:$0x11]  ;;  %v1677_v1 = vcombine.low %v2314_v3, %v1652_v59  ;;  %v1650_v55 = vld [vmem:[%s2274_s6 + $0x80] sm:$0xff] }
  0x2f   : > { %1937 = vmatprep.subr.bf16.mxu1 %v2051_v15  ;;  %v2070_v12 = vld [vmem:[%s2514_s1 + $0x128] sm:$0xff]   ;;  %v1709_v13 = vcombine.low %v351_v8, %v365_v9  ;;  %v2397_v15 = vld [vmem:[%s2274_s6 + $0x60] sm:$0xff]  ;;  %v1678_v2 = vcombine.high %v2314_v3, %v1652_v59 }
  0x30   : > { %1229 = vmatmul.mubr.bf16.gmra.mrb[4].mxu0 %v1699_v11  ;;  %v1710_v11 = vcombine.low %v358_v5, %v372_v6  ;;  %v1716_v20 = vcombine.high %v2397_v15, %v2400_v16  ;;  %v1672_v21 = vcombine.high %v2397_v15, %v206_v17  ;;  %v1715_v23 = vcombine.low %v2397_v15, %v2400_v16 }
  0x31   : > { %1898 = vmatpush3.bf16.msra.mxu0 %v2052_v26  ;;  %1294 = vmatmul.mubr.bf16.gmra.mrb[4].mxu1 %v1701_v39  ;;  %v1671_v25 = vcombine.low %v2397_v15, %v206_v17  ;;  %v1673_v26 = vcombine.low %v2400_v16, %v207_v18  ;;  %v2080_v39 = vld [vmem:[%s2514_s1 + $0x130] sm:$0xff]   ;;  %v1680_v5 = vcombine.high %v2317_v4, %v1653_v62  ;;  %v468_v8 = vshll.u32 %v1675_v60, 16 }
  0x32   : > { %1899 = vmatprep.subr.bf16.mxu0 %v2054_v32  ;;  %1938 = vmatpush3.bf16.msra.mxu1 %v2053_v27  ;;  %v2079_v27 = vld [vmem:[%s2514_s1 + $0x1f0] sm:$0xff]   ;;  %v381_v28 = vshrl.u32 %v1672_v21, 16  ;;  %v383_v29 = vshll.u32 %v1672_v21, 16  ;;  %v473_v9 = vshrl.u32 %v1676_v61, 16  ;;  %v475_v33 = vshll.u32 %v1676_v61, 16 }
  0x33   : > { %1939 = vmatprep.subr.bf16.mxu1 %v2055_v36  ;;  %1236 = vmatprep.mubr.bf16.mxu0 %v1708_v45  ;;  %v374_v32 = vshrl.u32 %v1671_v25, 16  ;;  %v376_v34 = vshll.u32 %v1671_v25, 16  ;;  %v388_v35 = vshrl.u32 %v1673_v26, 16  ;;  %v390_v36 = vshll.u32 %v1673_v26, 16 }
  0x34   : > { %1301 = vmatprep.mubr.bf16.mxu1 %v1710_v11  ;;  %v385_v37 = vrot.slane %v383_v29, 1  ;;  %v482_v11 = vshll.u32 %v1677_v1, 16  ;;  %v477_v17 = vrot.slane %v475_v33, 1  ;;  %v501_v3 = vshrl.u32 %v1680_v5, 16 }
  0x35   : > { %1900 = vmatpush3.bf16.msra.mxu0 %v2056_v38  ;;  %v399_v38 = vrot.slane %v397_v31, 1  ;;  %v378_v43 = vrot.slane %v376_v34, 1  ;;  %v392_v44 = vrot.slane %v390_v36, 1  ;;  %v503_v18 = vshll.u32 %v1680_v5, 16 }
  0x36   : > { %1901 = vmatprep.subr.bf16.mxu0 %v2064_v48  ;;  %1940 = vmatpush3.bf16.msra.mxu1 %v2057_v40  ;;  %v2081_v40 = vld [vmem:[%s2514_s1 + $0x1b0] sm:$0xff]   ;;  %v386_v45 = vor.u32 %v385_v37, %v381_v28  ;;  %v1711_v59 = vcombine.low %v2360_v42, %v2397_v15  ;;  %v1720_v33 = vcombine.high %v2400_v16, %v1650_v55 }
  0x37   : > { %1941 = vmatprep.subr.bf16.mxu1 %v2065_v52  ;;  %v400_v46 = vor.u32 %v399_v38, %v395_v30  ;;  %v379_v48 = vor.u32 %v378_v43, %v374_v32  ;;  %v2084_v52 = vld [vmem:[%s2514_s1 + $0x138] sm:$0xff]   ;;  %v505_v26 = vrot.slane %v503_v18, 1  ;;  %v1656_v32 = vld [vmem:[%s2274_s6 + $0x68] sm:$0x11] }
  0x38   : > { %1237 = vmatmul.mubr.bf16.gmra.mrb[8].mxu0 %v1707_v49  ;;  %v393_v49 = vor.u32 %v392_v44, %v388_v35 }
  0x39   : > { %1902 = vmatpush3.bf16.msra.mxu0 %v2066_v63  ;;  %1302 = vmatmul.mubr.bf16.gmra.mrb[8].mxu1 %v1709_v13  ;;  %v1718_v51 = vcombine.low %v386_v45, %v400_v46  ;;  %v1654_v63 = vld [vmem:[%s2274_s6 + $0x48] sm:$0x11]  ;;  %v489_v13 = vshll.u32 %v1678_v2, 16  ;;  %v506_v34 = vor.u32 %v505_v26, %v501_v3 }
  0x3a   : > { %1942 = vmatpush3.bf16.msra.mxu1 %v2067_v0  ;;  %1903 = vmatprep.subr.bf16.mxu0 %v2068_v7  ;;  %v1717_v53 = vcombine.low %v379_v48, %v393_v49  ;;  %v1712_v0 = vcombine.high %v2360_v42, %v2397_v15  ;;  %v1682_v6 = vcombine.high %v2357_v41, %v1654_v63  ;;  %v466_v7 = vshrl.u32 %v1675_v60, 16 }
  0x3b   : > { %1943 = vmatprep.subr.bf16.mxu1 %v2069_v10  ;;  %1244 = vmatprep.mubr.bf16.mxu0 %v1716_v20  ;;  %v480_v10 = vshrl.u32 %v1677_v1, 16  ;;  %v491_v20 = vrot.slane %v489_v13, 1  ;;  %v1681_v31 = vcombine.low %v2357_v41, %v1654_v63  ;;  %v1685_v49 = vcombine.low %v2397_v15, %v1656_v32 }
  0x3c   : > { %1309 = vmatprep.mubr.bf16.mxu1 %v1718_v51  ;;  %v515_v21 = vshrl.u32 %v1682_v6, 16  ;;  %v517_v22 = vshll.u32 %v1682_v6, 16 }
  0x3d   : > { %1904 = vmatpush3.bf16.msra.mxu0 %v2070_v12  ;;  %v487_v12 = vshrl.u32 %v1678_v2, 16  ;;  %v508_v43 = vshrl.u32 %v1681_v31, 16  ;;  %v510_v45 = vshll.u32 %v1681_v31, 16  ;;  %v536_v63 = vshrl.u32 %v1685_v49, 16 }
  0x3e   : > { %1944 = vmatpush3.bf16.msra.mxu1 %v2071_v14  ;;  %1905 = vmatprep.subr.bf16.mxu0 %v2078_v24  ;;  %v470_v14 = vrot.slane %v468_v8, 1  ;;  %v478_v24 = vor.u32 %v477_v17, %v473_v9  ;;  %v519_v30 = vrot.slane %v517_v22, 1  ;;  %v538_v1 = vshll.u32 %v1685_v49, 16 }
  0x3f   : > { %1945 = vmatprep.subr.bf16.mxu1 %v2079_v27  ;;  %v1679_v27 = vcombine.low %v2317_v4, %v1653_v62  ;;  %v492_v28 = vor.u32 %v491_v20, %v487_v12  ;;  %v1686_v4 = vcombine.high %v2397_v15, %v1656_v32 }
  0x40   : > { %1245 = vmatmul.mubr.bf16.gmra.mrb[12].mxu0 %v1715_v23  ;;  %v1655_v23 = vld [vmem:[%s2274_s6 + $0x58] sm:$0x11]  ;;  %v471_v25 = vor.u32 %v470_v14, %v466_v7  ;;  %v540_v9 = vrot.slane %v538_v1, 1 }
  0x41   : > { %1350 = vmatprep.mubr.bf16.mxu0 %v1696_v19  ;;  %1906 = vmatpush3.bf16.msra.mxu0 %v2080_v39  ;;  %v484_v19 = vrot.slane %v482_v11, 1  ;;  %v494_v35 = vshrl.u32 %v1679_v27, 16  ;;  %v496_v36 = vshll.u32 %v1679_v27, 16  ;;  %v1684_v37 = vcombine.high %v2360_v42, %v1655_v23 }
  0x42   : > { %1946 = vmatpush3.bf16.msra.mxu1 %v2081_v40  ;;  %1907 = vmatprep.subr.bf16.mxu0 %v2082_v47  ;;  %v1698_v38 = vcombine.low %v478_v24, %v492_v28  ;;  %v520_v40 = vor.u32 %v519_v30, %v515_v21  ;;  %v1683_v48 = vcombine.low %v2360_v42, %v1655_v23 }
  0x43   : > { %1947 = vmatprep.subr.bf16.mxu1 %v2083_v50  ;;  %1310 = vmatmul.mubr.bf16.gmra.mrb[12].mxu1 %v1717_v53  ;;  %v485_v29 = vor.u32 %v484_v19, %v480_v10  ;;  %v498_v44 = vrot.slane %v496_v36, 1  ;;  %v529_v46 = vshrl.u32 %v1684_v37, 16  ;;  %v531_v47 = vshll.u32 %v1684_v37, 16  ;;  %v1657_v50 = vld [vmem:[%s2274_s6 + $0x78] sm:$0x11] }
  0x44   : > { %1415 = vmatprep.mubr.bf16.mxu1 %v1698_v38  ;;  %v1706_v41 = vcombine.low %v506_v34, %v520_v40  ;;  %v543_v53 = vshrl.u32 %v1686_v4, 16  ;;  %v524_v60 = vshll.u32 %v1683_v48, 16  ;;  %v1688_v6 = vcombine.high %v2400_v16, %v1657_v50 }
  0x45   : > { %1908 = vmatpush3.bf16.msra.mxu0 %v2084_v52  ;;  %v1697_v39 = vcombine.low %v471_v25, %v485_v29  ;;  %v499_v51 = vor.u32 %v498_v44, %v494_v35  ;;  %v512_v52 = vrot.slane %v510_v45, 1  ;;  %v1687_v13 = vcombine.low %v2400_v16, %v1657_v50 }
  0x46   : > { %1948 = vmatpush3.bf16.msra.mxu1 %v2085_v54  ;;  %v545_v54 = vshll.u32 %v1686_v4, 16  ;;  %v526_v5 = vrot.slane %v524_v60, 1  ;;  %v557_v10 = vshrl.u32 %v1688_v6, 16  ;;  %v559_v11 = vshll.u32 %v1688_v6, 16 }
  0x47   : > { %v513_v61 = vor.u32 %v512_v52, %v508_v43  ;;  %v541_v17 = vor.u32 %v540_v9, %v536_v63  ;;  %v552_v20 = vshll.u32 %v1687_v13, 16  ;;  %v1719_v25 = vcombine.low %v2400_v16, %v1650_v55 }
  0x48   : > { %1351 = vmatmul.mubr.bf16.vlgmr.msra.gmra.mrb[16].mxu0 %v1695_v56  ;;  %v1658_v56 = vld [vmem:[%s2274_s6 + $0x88] sm:$0x11]  ;;  %v547_v62 = vrot.slane %v545_v54, 1  ;;  %v561_v3 = vrot.slane %v559_v11, 1  ;;  %v550_v26 = vshrl.u32 %v1687_v13, 16 }
  0x49   : > { %1358 = vmatprep.mubr.bf16.mxu0 %v1704_v57  ;;  %v533_v57 = vrot.slane %v531_v47, 1  ;;  %v1705_v7 = vcombine.low %v499_v51, %v513_v61  ;;  %v1689_v18 = vcombine.low %v1650_v55, %v1658_v56  ;;  %v554_v27 = vrot.slane %v552_v20, 1 }
  0x4a   : > { %v548_v8 = vor.u32 %v547_v62, %v543_v53  ;;  %v562_v21 = vor.u32 %v561_v3, %v557_v10 }
  0x4b   : > { %1416 = vmatmul.mubr.bf16.vlgmr.msra.gmra.mrb[16].mxu1 %v1697_v39  ;;  %v534_v2 = vor.u32 %v533_v57, %v529_v46  ;;  %v566_v22 = vshll.u32 %v1689_v18, 16  ;;  %v564_v28 = vshrl.u32 %v1689_v18, 16  ;;  %v555_v31 = vor.u32 %v554_v27, %v550_v26 }
  0x4c   : > { %1423 = vmatprep.mubr.bf16.mxu1 %v1706_v41 }
  0x4d   : > { %v1714_v12 = vcombine.low %v534_v2, %v548_v8  ;;  %v568_v29 = vrot.slane %v566_v22, 1 }
  0x4f   : > { %v569_v32 = vor.u32 %v568_v29, %v564_v28 }
  0x50   : > { %1359 = vmatmul.mubr.bf16.gmra.mrb[20].mxu0 %v1703_v58  ;;  %v522_v58 = vshrl.u32 %v1683_v48, 16 }
  0x51   : > { %1366 = vmatprep.mubr.bf16.mxu0 %v1712_v0  ;;  %v1690_v0 = vcombine.high %v1650_v55, %v1658_v56  ;;  %v1721_v34 = vcombine.low %v555_v31, %v569_v32 }
  0x52   : > { %v527_v14 = vor.u32 %v526_v5, %v522_v58 }
  0x53   : > { %v571_v42 = vshrl.u32 %v1690_v0, 16  ;;  %v573_v15 = vshll.u32 %v1690_v0, 16  ;;  %1424 = vmatmul.mubr.bf16.gmra.mrb[20].mxu1 %v1705_v7 }
  0x54   : > { %1431 = vmatprep.mubr.bf16.mxu1 %v1714_v12  ;;  %v1713_v24 = vcombine.low %v527_v14, %v541_v17 }
  0x55   : > { %v575_v19 = vrot.slane %v573_v15, 1 }
  0x57   : > { %v576_v23 = vor.u32 %v575_v19, %v571_v42 }
  0x58   : > { %1367 = vmatmul.mubr.bf16.gmra.mrb[24].mxu0 %v1711_v59 }
  0x59   : > { %1374 = vmatprep.mubr.bf16.mxu0 %v1720_v33  ;;  %v1722_v30 = vcombine.low %v562_v21, %v576_v23 }
  0x5b   : > { %1432 = vmatmul.mubr.bf16.gmra.mrb[24].mxu1 %v1713_v24 }
  0x5c   : > { %1439 = vmatprep.mubr.bf16.mxu1 %v1722_v30 }
  0x60   : > { %1375 = vmatmul.mubr.bf16.gmra.mrb[28].mxu0 %v1719_v25 }
  0x63   : > { %1440 = vmatmul.mubr.bf16.gmra.mrb[28].mxu1 %v1721_v34 }
  0xfb   : > { %v1829_v35 = vpop.f32.mrb[0].mxu0 }
  0xfc   : > { %v1830_v36 = vpop.f32.mrb[1].mxu0  ;;  %v1869_v43 = vpop.f32.mrb[0].mxu1 }
  0xfd   : > { %v1831_v37 = vadd.f32 %v1830_v36, %v1829_v35  ;;  %v1832_v38 = vpop.f32.mrb[2].mxu0  ;;  %v1870_v16 = vpop.f32.mrb[1].mxu1 }
  0xfe   : > { %v1833_v39 = vpop.f32.mrb[3].mxu0  ;;  %v1871_v44 = vadd.f32 %v1870_v16, %v1869_v43  ;;  %v1872_v45 = vpop.f32.mrb[2].mxu1 }
  0xff   : > { %v1834_v40 = vadd.f32 %v1833_v39, %v1832_v38  ;;  %v1873_v46 = vpop.f32.mrb[3].mxu1 }
 0x100   : > { %v1288_v47 = vadd.f32 %v1871_v44, %v1831_v37  ;;  %v1874_v48 = vadd.f32 %v1873_v46, %v1872_v45 }
 0x102   : > { %v1291_v52 = vadd.f32 %v1874_v48, %v1834_v40 }
 0x103   : > { %v1835_v4 = vpop.f32.mrb[4].mxu0 }
 0x104   : > { %v1836_v41 = vpop.f32.mrb[5].mxu0  ;;  %v1875_v54 = vpop.f32.mrb[4].mxu1 }
 0x105   : > { %v1837_v49 = vadd.f32 %v1836_v41, %v1835_v4  ;;  %v1838_v50 = vpop.f32.mrb[6].mxu0  ;;  %v1876_v55 = vpop.f32.mrb[5].mxu1 }
 0x106   : > { %v1839_v51 = vpop.f32.mrb[7].mxu0  ;;  %v1877_v56 = vadd.f32 %v1876_v55, %v1875_v54  ;;  %v1878_v57 = vpop.f32.mrb[6].mxu1 }
 0x107   : > { %v1840_v53 = vadd.f32 %v1839_v51, %v1838_v50  ;;  %v1879_v59 = vpop.f32.mrb[7].mxu1 }
 0x108   : > { %v1296_v60 = vadd.f32 %v1877_v56, %v1837_v49  ;;  %v1880_v61 = vadd.f32 %v1879_v59, %v1878_v57 }
 0x10a   : > { %v1299_v2 = vadd.f32 %v1880_v61, %v1840_v53 }
 0x10b   : > { %v1841_v58 = vpop.f32.mrb[8].mxu0 }
 0x10c   : > { %v1842_v62 = vpop.f32.mrb[9].mxu0  ;;  %v1881_v0 = vpop.f32.mrb[8].mxu1 }
 0x10d   : > { %v1843_v63 = vadd.f32 %v1842_v62, %v1841_v58  ;;  %v1844_v1 = vpop.f32.mrb[10].mxu0  ;;  %v1882_v7 = vpop.f32.mrb[9].mxu1 }
 0x10e   : > { %v1845_v5 = vpop.f32.mrb[11].mxu0  ;;  %v1883_v8 = vadd.f32 %v1882_v7, %v1881_v0  ;;  %v1884_v9 = vpop.f32.mrb[10].mxu1 }
 0x10f   : > { %v1846_v6 = vadd.f32 %v1845_v5, %v1844_v1  ;;  %v1885_v33 = vpop.f32.mrb[11].mxu1 }
 0x110   : > { %v1304_v11 = vadd.f32 %v1883_v8, %v1843_v63  ;;  %v1886_v12 = vadd.f32 %v1885_v33, %v1884_v9 }
 0x112   : > { %v1307_v14 = vadd.f32 %v1886_v12, %v1846_v6 }
 0x113   : > { %v1847_v10 = vpop.f32.mrb[12].mxu0 }
 0x114   : > { %v1848_v42 = vpop.f32.mrb[13].mxu0 }
 0x115   : > { %v1849_v15 = vadd.f32 %v1848_v42, %v1847_v10  ;;  %v1850_v13 = vpop.f32.mrb[14].mxu0 }
 0x116   : > { %v1851_v17 = vpop.f32.mrb[15].mxu0  ;;  %v1887_v18 = vpop.f32.mrb[12].mxu1 }
 0x117   : > { %v1852_v3 = vadd.f32 %v1851_v17, %v1850_v13  ;;  %v1888_v19 = vpop.f32.mrb[13].mxu1 }
 0x118   : > { %v1889_v20 = vadd.f32 %v1888_v19, %v1887_v18  ;;  %v1890_v21 = vpop.f32.mrb[14].mxu1 }
 0x119   : > { %v1891_v23 = vpop.f32.mrb[15].mxu1 }
 0x11a   : > { %v1312_v25 = vadd.f32 %v1889_v20, %v1849_v15  ;;  %v1892_v26 = vadd.f32 %v1891_v23, %v1890_v21 }
 0x11b   : > { %v1909_v22 = vpop.f32.mrb[16].mxu0 }
 0x11c   : > { %v1910_v24 = vpop.f32.mrb[17].mxu0  ;;  %v1315_v30 = vadd.f32 %v1892_v26, %v1852_v3 }
 0x11d   : > { %v1911_v27 = vadd.f32 %v1910_v24, %v1909_v22  ;;  %v1912_v28 = vpop.f32.mrb[18].mxu0 }
 0x11e   : > { %v1913_v29 = vpop.f32.mrb[19].mxu0  ;;  %v1949_v36 = vpop.f32.mrb[16].mxu1 }
 0x11f   : > { %v1353_v31 = vadd.f32 %v1911_v27, %v1288_v47  ;;  %v1914_v32 = vadd.f32 %v1913_v29, %v1912_v28  ;;  %v1950_v38 = vpop.f32.mrb[17].mxu1 }
 0x120   : > { %v1951_v43 = vadd.f32 %v1950_v38, %v1949_v36  ;;  %v1952_v16 = vpop.f32.mrb[18].mxu1 }
 0x121   : > { %v1356_v34 = vadd.f32 %v1914_v32, %v1291_v52  ;;  %v1953_v45 = vpop.f32.mrb[19].mxu1 }
 0x122   : > { %v2473_v41 = vadd.f32 %v1951_v43, %v1353_v31  ;;  %v1954_v48 = vadd.f32 %v1953_v45, %v1952_v16 }
 0x123   : > { %v1915_v35 = vpop.f32.mrb[20].mxu0 }
 0x124   : > { %v1916_v37 = vpop.f32.mrb[21].mxu0  ;;  %v2475_v50 = vadd.f32 %v1954_v48, %v1356_v34  ;;  %v1465_v51 = vmul.f32 %v2473_v41, %v2473_v41 }
 0x125   : > { %v1917_v39 = vadd.f32 %v1916_v37, %v1915_v35  ;;  %v1918_v40 = vpop.f32.mrb[22].mxu0 }
 0x126   : > { %v1919_v44 = vpop.f32.mrb[23].mxu0  ;;  %v1451_v52 = vadd.f32 %v2475_v50, %v2473_v41  ;;  %v1466_v53 = vmul.f32 %v2475_v50, %v2475_v50  ;;  %v1955_v54 = vpop.f32.mrb[20].mxu1 }
 0x127   : > { %v1361_v4 = vadd.f32 %v1917_v39, %v1296_v60  ;;  %v1920_v46 = vadd.f32 %v1919_v44, %v1918_v40  ;;  %v1956_v56 = vpop.f32.mrb[21].mxu1 }
 0x128   : > { %v1473_v58 = vadd.f32 %v1466_v53, %v1465_v51  ;;  %v1957_v60 = vadd.f32 %v1956_v56, %v1955_v54  ;;  %v1958_v61 = vpop.f32.mrb[22].mxu1 }
 0x129   : > { %v1364_v49 = vadd.f32 %v1920_v46, %v1299_v2  ;;  %v1959_v63 = vpop.f32.mrb[23].mxu1 }
 0x12a   : > { %v2483_v5 = vadd.f32 %v1957_v60, %v1361_v4  ;;  %v1960_v6 = vadd.f32 %v1959_v63, %v1958_v61 }
 0x12b   : > { %v1921_v47 = vpop.f32.mrb[24].mxu0 }
 0x12c   : > { %v1922_v55 = vpop.f32.mrb[25].mxu0  ;;  %v1452_v7 = vadd.f32 %v1451_v52, %v2483_v5  ;;  %v1467_v8 = vmul.f32 %v2483_v5, %v2483_v5  ;;  %v2488_v9 = vadd.f32 %v1960_v6, %v1364_v49 }
 0x12d   : > { %v1923_v57 = vadd.f32 %v1922_v55, %v1921_v47  ;;  %v1924_v59 = vpop.f32.mrb[26].mxu0 }
 0x12e   : > { %v1925_v62 = vpop.f32.mrb[27].mxu0  ;;  %v1474_v10 = vadd.f32 %v1473_v58, %v1467_v8  ;;  %v1453_v12 = vadd.f32 %v1452_v7, %v2488_v9  ;;  %v1468_v42 = vmul.f32 %v2488_v9, %v2488_v9  ;;  %v1498_v7 = vlaneseq }
 0x12f   : > { %v1369_v1 = vadd.f32 %v1923_v57, %v1304_v11  ;;  %v1926_v2 = vadd.f32 %v1925_v62, %v1924_v59  ;;  %v1961_v11 = vpop.f32.mrb[24].mxu1 }
 0x130   : > { %v1962_v13 = vpop.f32.mrb[25].mxu1  ;;  %v1499_v8 = vshrl.u32 %v1498_v7, 7 }
 0x131   : > { %v1372_v0 = vadd.f32 %v1926_v2, %v1307_v14  ;;  %v1475_v14 = vadd.f32 %v1474_v10, %v1468_v42  ;;  %v1963_v18 = vadd.f32 %v1962_v13, %v1961_v11  ;;  %v1964_v19 = vpop.f32.mrb[26].mxu1 }
 0x132   : > { %v1965_v21 = vpop.f32.mrb[27].mxu1  ;;  %v1500_v10 = vsub.s32 1, %v1499_v8  ;;  %v1512_v13 = vsub.s32 2, %v1499_v8 }
 0x133   : > { %v1927_v33 = vpop.f32.mrb[28].mxu0  ;;  %v1434_v24 = vadd.f32 %v1963_v18, %v1369_v1  ;;  %v1966_v26 = vadd.f32 %v1965_v21, %v1964_v19 }
 0x134   : > { %v1928_v15 = vpop.f32.mrb[29].mxu0 }
 0x135   : > { %v1929_v17 = vadd.f32 %v1928_v15, %v1927_v33  ;;  %v1930_v3 = vpop.f32.mrb[30].mxu0  ;;  %v1454_v28 = vadd.f32 %v1453_v12, %v1434_v24  ;;  %v1469_v29 = vmul.f32 %v1434_v24, %v1434_v24  ;;  %v1437_v31 = vadd.f32 %v1966_v26, %v1372_v0  ;;  %v1450_v33 = vld [vmem:[%s2515_s2] sm:$0x7] }
 0x136   : > { %v1931_v20 = vpop.f32.mrb[31].mxu0  ;;  %v1967_v36 = vpop.f32.mrb[28].mxu1 }
 0x137   : > { %v1377_v22 = vadd.f32 %v1929_v17, %v1312_v25  ;;  %v1932_v23 = vadd.f32 %v1931_v20, %v1930_v3  ;;  %v1476_v32 = vadd.f32 %v1475_v14, %v1469_v29  ;;  %v1455_v34 = vadd.f32 %v1454_v28, %v1437_v31  ;;  %v1968_v37 = vpop.f32.mrb[29].mxu1 }
 0x138   : > { %v1470_v35 = vmul.f32 %v1437_v31, %v1437_v31  ;;  %v1969_v39 = vadd.f32 %v1968_v37, %v1967_v36  ;;  %v1970_v40 = vpop.f32.mrb[30].mxu1 }
 0x139   : > { %v1380_v27 = vadd.f32 %v1932_v23, %v1315_v30  ;;  %v1971_v43 = vpop.f32.mrb[31].mxu1 }
 0x13a   : > { %v1477_v38 = vadd.f32 %v1476_v32, %v1470_v35  ;;  %v1442_v16 = vadd.f32 %v1969_v39, %v1377_v22  ;;  %v1972_v44 = vadd.f32 %v1971_v43, %v1970_v40 }
 0x13c   : > { %v1456_v45 = vadd.f32 %v1455_v34, %v1442_v16  ;;  %v1471_v25 = vmul.f32 %v1442_v16, %v1442_v16  ;;  %v1445_v4 = vadd.f32 %v1972_v44, %v1380_v27 }
 0x13e   : > { %v1478_v46 = vadd.f32 %v1477_v38, %v1471_v25  ;;  %v1457_v48 = vadd.f32 %v1456_v45, %v1445_v4  ;;  %v1472_v30 = vmul.f32 %v1445_v4, %v1445_v4 }
 0x140   : > { %v1458_v49 = vrot.slane %v1457_v48, 4  ;;  %v1479_v47 = vadd.f32 %v1478_v46, %v1472_v30 }
 0x142   : > { %v1459_v51 = vadd.f32 %v1458_v49, %v1457_v48  ;;  %v1480_v52 = vrot.slane %v1479_v47, 4 }
 0x144   : > { %v1460_v53 = vrot.slane %v1459_v51, 2  ;;  %v1481_v54 = vadd.f32 %v1480_v52, %v1479_v47 }
 0x146   : > { %v1461_v55 = vadd.f32 %v1460_v53, %v1459_v51  ;;  %v1482_v56 = vrot.slane %v1481_v54, 2 }
 0x148   : > { %v1462_v57 = vrot.slane %v1461_v55, 1  ;;  %v1483_v59 = vadd.f32 %v1482_v56, %v1481_v54 }
 0x14a   : > { %v1463_v58 = vadd.f32 %v1462_v57, %v1461_v55  ;;  %v1484_v60 = vrot.slane %v1483_v59, 1 }
 0x14c   : > { %v1464_v61 = vmul.f32 0.015625, %v1463_v58  ;;  %v1485_v62 = vadd.f32 %v1484_v60, %v1483_v59 }
 0x14e   : > { %v1486_v63 = vmul.f32 0.015625, %v1485_v62  ;;  %v1487_v1 = vmul.f32 %v1464_v61, %v1464_v61 }
 0x150   : > { %v1488_v2 = vsub.f32 %v1486_v63, %v1487_v1 }
 0x152   : > { %v1489_v6 = vmax.f32 %v1488_v2, 0.0 }
 0x154   : > { %v1490_v0 = vadd.f32 1e-05, %v1489_v6 }
 0x156   : > { %2110 = vrsqrt.f32 %v1490_v0 }
 0x160   : > { %v2111_v12 = vpop.eup %2110 }
 0x161   : > { %v1492_v42 = vmul.f32 %v2111_v12, %v1450_v33 }
 0x163   : > { %v1493_v11 = vmul.f32 %v1492_v42, %v1464_v61  ;;  %v1501_v15 = vrot.slane %v1492_v42, %v1500_v10 }
 0x165   : > { %v1495_v17 = vrot.slane %v1493_v11, 7  ;;  %v1502_v3 = vmul.f32 %v1501_v15, %v2473_v41  ;;  %v1503_v14 = vmul.f32 %v1501_v15, %v2475_v50  ;;  %v1504_v18 = vmul.f32 %v1501_v15, %v2483_v5 }
 0x166   : > { %v1505_v19 = vmul.f32 %v1501_v15, %v2488_v9  ;;  %v1506_v20 = vmul.f32 %v1501_v15, %v1434_v24  ;;  %v1507_v21 = vmul.f32 %v1501_v15, %v1437_v31  ;;  %v1508_v22 = vmul.f32 %v1501_v15, %v1442_v16 }
 0x167   : > { %v1497_v23 = vsub.f32 %v1450_v33, %v1495_v17  ;;  %v1509_v26 = vmul.f32 %v1501_v15, %v1445_v4 }
 0x169   : > { %v1513_v27 = vrot.slane %v1497_v23, %v1512_v13 }
 0x16b   : > { %v1514_v28 = vadd.f32 %v1513_v27, %v1502_v3  ;;  %v1515_v29 = vadd.f32 %v1513_v27, %v1503_v14  ;;  %v1516_v32 = vadd.f32 %v1513_v27, %v1504_v18  ;;  %v1517_v34 = vadd.f32 %v1513_v27, %v1505_v19 }
 0x16c   : > { %v1518_v35 = vadd.f32 %v1513_v27, %v1506_v20  ;;  %v1519_v36 = vadd.f32 %v1513_v27, %v1507_v21  ;;  %v1520_v41 = vadd.f32 %v1513_v27, %v1508_v22  ;;  %v1521_v37 = vadd.f32 %v1513_v27, %v1509_v26 }
 0x16d   : > { %v1522_v50 = vmul.f32 0.2, %v1514_v28  ;;  %v1523_v38 = vmul.f32 0.2, %v1515_v29  ;;  %v1524_v5 = vmul.f32 0.2, %v1516_v32 }
 0x16e   : > { %v1525_v39 = vmul.f32 0.2, %v1517_v34  ;;  %v1526_v9 = vmul.f32 0.2, %v1518_v35  ;;  %v1527_v24 = vmul.f32 0.2, %v1519_v36 }
 0x16f   : > { %v1528_v31 = vmul.f32 0.2, %v1520_v41  ;;  %v1529_v40 = vmul.f32 0.2, %v1521_v37  ;;  %v1530_v43 = vmax.f32 %v1514_v28, %v1522_v50  ;;  %v1531_v16 = vmax.f32 %v1515_v29, %v1523_v38 }
 0x170   : > { %v1532_v44 = vmax.f32 %v1516_v32, %v1524_v5  ;;  %v1533_v45 = vmax.f32 %v1517_v34, %v1525_v39  ;;  %v1534_v25 = vmax.f32 %v1518_v35, %v1526_v9  ;;  %v1535_v4 = vmax.f32 %v1519_v36, %v1527_v24 }
 0x171   : > { %v1536_v46 = vmax.f32 %v1520_v41, %v1528_v31  ;;  %v1537_v48 = vmax.f32 %v1521_v37, %v1529_v40  ;;  %v1793_v30 = vpack.c.bf16 %v1531_v16, %v1530_v43 }
 0x172   : > { %v1798_v49 = vpack.c.bf16 %v1533_v45, %v1532_v44  ;;  %v1803_v47 = vpack.c.bf16 %v1535_v4, %v1534_v25 }
 0x173   : > { %1794 = vst [vmem:[%s190_s17] sm:$0xff] %v1793_v30   ;;  %v1808_v51 = vpack.c.bf16 %v1537_v48, %v1536_v46 }
 0x174   : > { %1810 = vst [vmem:[%s190_s17 + $0x8] sm:$0xff] %v1798_v49   ;;  %1811 = vst [vmem:[%s190_s17 + $0x10] sm:$0xff] %v1803_v47  }
 0x175   : > { %1812 = vst [vmem:[%s190_s17 + $0x18] sm:$0xff] %v1808_v51  }
 0x176 PF: > { %s13_s14 = sadd.s32 1, %s2134_s14   ;;  %s2517_s12 = smov %s2130_s13 }
 0x177   : > { %p10_p5 = scmp.ge.s32.totalorder %s13_s14, 4   ;;  %s2518_s13 = smov %s2520_s15 }
 0x179   :  { %12 = sbr.rel (!%p10_p5) target bundleno = 2 (0x2), region = 65 }

// kernel: _lambda_.7
= control target key start
LH: loop header
LB: loop body
LE: loop exit
PB: predicated region body
PF: predicated region fallthrough
CT: control target
= control target key end

     0   :  { %s4115_s12 = smov 0   ;;  %s4117_s13 = smov 0   ;;  %s5102_s0 = inlined_call_operand.vmem [shape: bf16[2,5,5,512], index: 0, kind: input, shape index: {}]   ;;  %s5103_s1 = inlined_call_operand.vmem [shape: bf16[1,2048,256], index: 1, kind: input, shape index: {}]   ;;  %s5104_s2 = inlined_call_operand.vmem [shape: f32[1,3,256], index: 2, kind: input, shape index: {}]   ;;  %s5105_s3 = inlined_call_operand.vmem [shape: bf16[2,4,4,256], index: 3, kind: output, shape index: {}]  }
   0x1   :  { %s4119_s14 = smov 0  }
   0x2 LB: > { %s25_s15 = sadd.s32 1, %s4088_s13  ;;  %p3209_p0 = scmp.ge.s32.totalorder %s4092_s14, 1  ;;  %s4092_s14 = sphi %s4119_s14, %s13_s14   ;;  %s4088_s13 = sphi %s4117_s13, %s5107_s13   ;;  %s4084_s12 = sphi %s4115_s12, %s5106_s12  }
   0x3   : > { %p27_p1 = scmp.ge.s32.totalorder %s25_s15, 2  ;;  %p151_p2 = scmp.lt.s32.totalorder %s4092_s14, 3 }
   0x5   : > { %s5109_s15 = smov (%p27_p1, %s25_s15), 0  ;;  %p152_p3 = pnand %p3209_p0, %p151_p2 }
   0x6   : > { %v3650_v0 = vld [vmem:[%s5103_s1 + $0x4] ss:$8 sps:$4 sm:$0xff] (!%p152_p3)   ;;  %v3654_v2 = vld [vmem:[%s5103_s1] ss:$8 sps:$4 sm:$0xff] (!%p152_p3)   ;;  %v3656_v4 = vld [vmem:[%s5103_s1 + $0x14] ss:$8 sps:$4 sm:$0xff] (!%p152_p3)   ;;  %v633_v41 = vlaneseq (!%p152_p3) }
   0x7   : > { %155 = sbr.rel (%p152_p3) target bundleno = 550 (0x226), region = 32  ;;  %v3652_v1 = vld [vmem:[%s5103_s1 + $0x404] ss:$8 sps:$4 sm:$0xff] (!%p152_p3)   ;;  %2582 = vmatprep.subr.bf16.mxu1 (!%p152_p3), %v3650_v0  ;;  %v3655_v3 = vld [vmem:[%s5103_s1 + $0x400] ss:$8 sps:$4 sm:$0xff] (!%p152_p3)   ;;  %p179_p4 = scmp.lt.s32.totalorder (!%p152_p3), %s4084_s12, 1 }
   0x8   : > { %2754 = vmatprep.subr.bf16.mxu0 (!%p152_p3), %v3652_v1  ;;  %2583 = vmatpush1.bf16.msra.mxu1 (!%p152_p3), %v3654_v2  ;;  %v3658_v5 = vld [vmem:[%s5103_s1 + $0x414] ss:$8 sps:$4 sm:$0xff] (!%p152_p3)   ;;  %v3660_v6 = vld [vmem:[%s5103_s1 + $0x10] ss:$8 sps:$4 sm:$0xff] (!%p152_p3)   ;;  %v3662_v8 = vld [vmem:[%s5103_s1 + $0x24] ss:$8 sps:$4 sm:$0xff] (!%p152_p3)  }
   0x9   : > { %2755 = vmatpush1.bf16.msra.mxu0 (!%p152_p3), %v3655_v3  ;;  %2584 = vmatprep.subr.bf16.mxu1 (!%p152_p3), %v3656_v4  ;;  %v3661_v7 = vld [vmem:[%s5103_s1 + $0x410] ss:$8 sps:$4 sm:$0xff] (!%p152_p3)   ;;  %v3664_v9 = vld [vmem:[%s5103_s1 + $0x424] ss:$8 sps:$4 sm:$0xff] (!%p152_p3)   ;;  %v3666_v10 = vld [vmem:[%s5103_s1 + $0x20] ss:$8 sps:$4 sm:$0xff] (!%p152_p3)  }
   0xa   : > { %2756 = vmatprep.subr.bf16.mxu0 (!%p152_p3), %v3658_v5  ;;  %v3667_v11 = vld [vmem:[%s5103_s1 + $0x420] ss:$8 sps:$4 sm:$0xff] (!%p152_p3)   ;;  %v3668_v12 = vld [vmem:[%s5103_s1 + $0x34] ss:$8 sps:$4 sm:$0xff] (!%p152_p3)   ;;  %v3672_v14 = vld [vmem:[%s5103_s1 + $0x30] ss:$8 sps:$4 sm:$0xff] (!%p152_p3)  }
   0xb   : > { %v3670_v13 = vld [vmem:[%s5103_s1 + $0x434] ss:$8 sps:$4 sm:$0xff] (!%p152_p3)   ;;  %v3673_v15 = vld [vmem:[%s5103_s1 + $0x430] ss:$8 sps:$4 sm:$0xff] (!%p152_p3)   ;;  %v3674_v16 = vld [vmem:[%s5103_s1 + $0x44] ss:$8 sps:$4 sm:$0xff] (!%p152_p3)  }
   0xc   : > { %2585 = vmatpush1.bf16.msra.mxu1 (!%p152_p3), %v3660_v6  ;;  %v3676_v17 = vld [vmem:[%s5103_s1 + $0x444] ss:$8 sps:$4 sm:$0xff] (!%p152_p3)   ;;  %v3678_v18 = vld [vmem:[%s5103_s1 + $0x40] ss:$8 sps:$4 sm:$0xff] (!%p152_p3)   ;;  %v3680_v20 = vld [vmem:[%s5103_s1 + $0x54] ss:$8 sps:$4 sm:$0xff] (!%p152_p3)  }
   0xd   : > { %2757 = vmatpush1.bf16.msra.mxu0 (!%p152_p3), %v3661_v7  ;;  %2586 = vmatprep.subr.bf16.mxu1 (!%p152_p3), %v3662_v8  ;;  %v3679_v19 = vld [vmem:[%s5103_s1 + $0x440] ss:$8 sps:$4 sm:$0xff] (!%p152_p3)   ;;  %v3682_v21 = vld [vmem:[%s5103_s1 + $0x454] ss:$8 sps:$4 sm:$0xff] (!%p152_p3)   ;;  %v3684_v22 = vld [vmem:[%s5103_s1 + $0x50] ss:$8 sps:$4 sm:$0xff] (!%p152_p3)  }
   0xe   : > { %2758 = vmatprep.subr.bf16.mxu0 %v3664_v9  ;;  %v3685_v23 = vld [vmem:[%s5103_s1 + $0x450] ss:$8 sps:$4 sm:$0xff]   ;;  %v3686_v24 = vld [vmem:[%s5103_s1 + $0x64] ss:$8 sps:$4 sm:$0xff]   ;;  %v3690_v26 = vld [vmem:[%s5103_s1 + $0x60] ss:$8 sps:$4 sm:$0xff]  }
   0xf   : > { %v3688_v25 = vld [vmem:[%s5103_s1 + $0x464] ss:$8 sps:$4 sm:$0xff]   ;;  %v3691_v27 = vld [vmem:[%s5103_s1 + $0x460] ss:$8 sps:$4 sm:$0xff]   ;;  %v3692_v28 = vld [vmem:[%s5103_s1 + $0x74] ss:$8 sps:$4 sm:$0xff]  }
  0x10   : > { %2587 = vmatpush1.bf16.msra.mxu1 %v3666_v10  ;;  %v3694_v29 = vld [vmem:[%s5103_s1 + $0x474] ss:$8 sps:$4 sm:$0xff]   ;;  %v3696_v30 = vld [vmem:[%s5103_s1 + $0x70] ss:$8 sps:$4 sm:$0xff]   ;;  %v3698_v32 = vld [vmem:[%s5103_s1 + $0x84] ss:$8 sps:$4 sm:$0xff]  }
  0x11   : > { %2759 = vmatpush1.bf16.msra.mxu0 %v3667_v11  ;;  %2588 = vmatprep.subr.bf16.mxu1 %v3668_v12  ;;  %v3697_v31 = vld [vmem:[%s5103_s1 + $0x470] ss:$8 sps:$4 sm:$0xff]   ;;  %v3700_v33 = vld [vmem:[%s5103_s1 + $0x484] ss:$8 sps:$4 sm:$0xff]   ;;  %v3702_v34 = vld [vmem:[%s5103_s1 + $0x80] ss:$8 sps:$4 sm:$0xff]  }
  0x12   : > { %2760 = vmatprep.subr.bf16.mxu0 %v3670_v13  ;;  %v3703_v35 = vld [vmem:[%s5103_s1 + $0x480] ss:$8 sps:$4 sm:$0xff]   ;;  %v3704_v36 = vld [vmem:[%s5103_s1 + $0x94] ss:$8 sps:$4 sm:$0xff]   ;;  %s5111_s12 = smov (!%p179_p4, %s4084_s12), 1  ;;  %v4272_v48 = vshrl.u32 %v633_v41, 7 }
  0x13   : > { %v3706_v37 = vld [vmem:[%s5103_s1 + $0x494] ss:$8 sps:$4 sm:$0xff]   ;;  %v3708_v38 = vld [vmem:[%s5103_s1 + $0x90] ss:$8 sps:$4 sm:$0xff]   ;;  %v4094_v39 = vmov 1983009808  }
  0x14   : > { %2589 = vmatpush1.bf16.msra.mxu1 %v3672_v14  ;;  %v631_v40 = vunpack.c.l.s4 %v4094_v39  ;;  %v3709_v42 = vld [vmem:[%s5103_s1 + $0x490] ss:$8 sps:$4 sm:$0xff]   ;;  %v3710_v43 = vld [vmem:[%s5103_s1 + $0xa4] ss:$8 sps:$4 sm:$0xff]   ;;  %s3624_s29 = smul.u32 80, %s5111_s12  ;;  %s3579_s19 = sshll.u32 %s5111_s12, 4 }
  0x15   : > { %2761 = vmatpush1.bf16.msra.mxu0 %v3673_v15  ;;  %2590 = vmatprep.subr.bf16.mxu1 %v3674_v16  ;;  %v3712_v44 = vld [vmem:[%s5103_s1 + $0x4a4] ss:$8 sps:$4 sm:$0xff]   ;;  %v3714_v45 = vld [vmem:[%s5103_s1 + $0xa0] ss:$8 sps:$4 sm:$0xff]   ;;  %v3716_v49 = vld [vmem:[%s5103_s1 + $0xb4] ss:$8 sps:$4 sm:$0xff]   ;;  %s192_s21 = scalar_lea.vmem %s5105_s3, %s3579_s19 }
  0x16   : > { %2762 = vmatprep.subr.bf16.mxu0 %v3676_v17  ;;  %v3715_v46 = vld [vmem:[%s5103_s1 + $0x4a0] ss:$8 sps:$4 sm:$0xff]   ;;  %v632_v47 = vunpack.c.0.s8 %v631_v40  ;;  %s4280_s17 = scalar_lea.vmem %s5102_s0, %s3624_s29  ;;  %v3718_v50 = vld [vmem:[%s5103_s1 + $0x4b4] ss:$8 sps:$4 sm:$0xff]   ;;  %v3720_v51 = vld [vmem:[%s5103_s1 + $0xb0] ss:$8 sps:$4 sm:$0xff]  }
  0x17   : > { %v3721_v52 = vld [vmem:[%s5103_s1 + $0x4b0] ss:$8 sps:$4 sm:$0xff]   ;;  %v3580_v53 = vld.sshfl [vmem:[%s4280_s17] sm:$0xf pattern:$0x76325410] }
  0x18   : > { %2591 = vmatpush1.bf16.msra.mxu1 %v3678_v18  ;;  %v4293_v54 = vsub.s32 %v632_v47, %v4272_v48  ;;  %v3722_v55 = vld [vmem:[%s5103_s1 + $0xc4] ss:$8 sps:$4 sm:$0xff]   ;;  %v3584_v56 = vld.sshfl [vmem:[%s4280_s17 + $0x10] sm:$0xf pattern:$0x76325410] }
  0x19   : > { %2763 = vmatpush1.bf16.msra.mxu0 %v3679_v19  ;;  %2592 = vmatprep.subr.bf16.mxu1 %v3680_v20  ;;  %v3724_v57 = vld [vmem:[%s5103_s1 + $0x4c4] ss:$8 sps:$4 sm:$0xff]   ;;  %v3293_v59 = vcombine.low %v3580_v53, %v3584_v56  ;;  %v3592_v60 = vld.sshfl [vmem:[%s4280_s17 + $0x30] sm:$0xf pattern:$0x76325410] }
  0x1a   : > { %2764 = vmatprep.subr.bf16.mxu0 %v3682_v21  ;;  %v3588_v58 = vld.sshfl [vmem:[%s4280_s17 + $0x20] sm:$0xf pattern:$0x76325410]  ;;  %v3728_v3 = vld [vmem:[%s5103_s1 + $0xd4] ss:$8 sps:$4 sm:$0xff]  }
  0x1b   : > { %v3301_v61 = vcombine.low %v3584_v56, %v3588_v58  ;;  %v3726_v62 = vld [vmem:[%s5103_s1 + $0xc0] ss:$8 sps:$4 sm:$0xff]   ;;  %v3295_v63 = vcombine.low %v3588_v58, %v3592_v60  ;;  %v1152_v0 = vrot.slane %v3293_v59, %v4293_v54  ;;  %v3730_v6 = vld [vmem:[%s5103_s1 + $0x4d4] ss:$8 sps:$4 sm:$0xff]   ;;  %v3732_v9 = vld [vmem:[%s5103_s1 + $0xd0] ss:$8 sps:$4 sm:$0xff]  }
  0x1c   : > { %2593 = vmatpush1.bf16.msra.mxu1 %v3684_v22  ;;  %v3594_v1 = vld.sshfl [vmem:[%s4280_s17 + $0x40] sm:$0xf pattern:$0x76325410]  ;;  %v3733_v10 = vld [vmem:[%s5103_s1 + $0x4d0] ss:$8 sps:$4 sm:$0xff]  }
  0x1d   : > { %2765 = vmatpush1.bf16.msra.mxu0 %v3685_v23  ;;  %2594 = vmatprep.subr.bf16.mxu1 %v3686_v24  ;;  %v3727_v2 = vld [vmem:[%s5103_s1 + $0x4c0] ss:$8 sps:$4 sm:$0xff]   ;;  %v3303_v4 = vcombine.low %v3592_v60, %v3594_v1  ;;  %v1224_v5 = vrot.slane %v3301_v61, %v4293_v54  ;;  %v1166_v7 = vrot.slane %v3295_v63, %v4293_v54  ;;  %v3734_v12 = vld [vmem:[%s5103_s1 + $0xe4] ss:$8 sps:$4 sm:$0xff]   ;;  %v3740_v17 = vld [vmem:[%s5103_s1 + $0xf4] ss:$8 sps:$4 sm:$0xff]  }
  0x1e   : > { %2766 = vmatprep.subr.bf16.mxu0 %v3688_v25  ;;  %v3736_v14 = vld [vmem:[%s5103_s1 + $0x4e4] ss:$8 sps:$4 sm:$0xff]   ;;  %v3738_v15 = vld [vmem:[%s5103_s1 + $0xe0] ss:$8 sps:$4 sm:$0xff]   ;;  %v3742_v18 = vld [vmem:[%s5103_s1 + $0x4f4] ss:$8 sps:$4 sm:$0xff]  }
  0x1f   : > { %v1238_v8 = vrot.slane %v3303_v4, %v4293_v54  ;;  %v1175_v11 = vcombine.high %v1152_v0, %v1166_v7  ;;  %v3739_v16 = vld [vmem:[%s5103_s1 + $0x4e0] ss:$8 sps:$4 sm:$0xff]   ;;  %v3744_v19 = vld [vmem:[%s5103_s1 + $0xf0] ss:$8 sps:$4 sm:$0xff]   ;;  %v3748_v21 = vld [vmem:[%s5103_s1 + $0x104] ss:$8 sps:$4 sm:$0xff]   ;;  %v1174_v25 = vcombine.low %v1152_v0, %v1166_v7 }
  0x20   : > { %2595 = vmatpush1.bf16.msra.mxu1 %v3690_v26  ;;  %v3745_v20 = vld [vmem:[%s5103_s1 + $0x4f0] ss:$8 sps:$4 sm:$0xff]   ;;  %v3751_v22 = vld [vmem:[%s5103_s1 + $0x504] ss:$8 sps:$4 sm:$0xff]   ;;  %v3746_v23 = vld [vmem:[%s5103_s1 + $0x100] ss:$8 sps:$4 sm:$0xff]  }
  0x21   : > { %2767 = vmatpush1.bf16.msra.mxu0 %v3691_v27  ;;  %2596 = vmatprep.subr.bf16.mxu1 %v3692_v28  ;;  %v1247_v13 = vcombine.high %v1224_v5, %v1238_v8  ;;  %v3749_v24 = vld [vmem:[%s5103_s1 + $0x500] ss:$8 sps:$4 sm:$0xff]   ;;  %v1246_v26 = vcombine.low %v1224_v5, %v1238_v8  ;;  %v3754_v27 = vld [vmem:[%s5103_s1 + $0x114] ss:$8 sps:$4 sm:$0xff]   ;;  %v3772_v39 = vld [vmem:[%s5103_s1 + $0x144] ss:$8 sps:$4 sm:$0xff]  }
  0x22   : > { %2768 = vmatprep.subr.bf16.mxu0 %v3694_v29  ;;  %2614 = vmatprep.mubr.bf16.mxu1 %v1175_v11  ;;  %v3757_v28 = vld [vmem:[%s5103_s1 + $0x514] ss:$8 sps:$4 sm:$0xff]   ;;  %v3752_v29 = vld [vmem:[%s5103_s1 + $0x110] ss:$8 sps:$4 sm:$0xff]   ;;  %v3775_v40 = vld [vmem:[%s5103_s1 + $0x544] ss:$8 sps:$4 sm:$0xff]  }
  0x23   : > { %2786 = vmatprep.mubr.bf16.mxu0 %v1247_v13  ;;  %v3770_v41 = vld [vmem:[%s5103_s1 + $0x140] ss:$8 sps:$4 sm:$0xff]   ;;  %v3784_v47 = vld [vmem:[%s5103_s1 + $0x164] ss:$8 sps:$4 sm:$0xff]   ;;  %v3791_v58 = vld [vmem:[%s5103_s1 + $0x570] ss:$8 sps:$4 sm:$0xff]  }
  0x24   : > { %2597 = vmatpush1.bf16.msra.mxu1 %v3696_v30  ;;  %v3755_v30 = vld [vmem:[%s5103_s1 + $0x510] ss:$8 sps:$4 sm:$0xff]   ;;  %v3581_v53 = vld.sshfl [vmem:[%s4280_s17 + $0x8] sm:$0xf pattern:$0x76325410] }
  0x25   : > { %2769 = vmatpush1.bf16.msra.mxu0 %v3697_v31  ;;  %2598 = vmatprep.subr.bf16.mxu1 %v3698_v32  ;;  %v3760_v31 = vld [vmem:[%s5103_s1 + $0x124] ss:$8 sps:$4 sm:$0xff]   ;;  %v3585_v56 = vld.sshfl [vmem:[%s4280_s17 + $0x18] sm:$0xf pattern:$0x76325410] }
  0x26   : > { %2770 = vmatprep.subr.bf16.mxu0 %v3700_v33  ;;  %v3763_v32 = vld [vmem:[%s5103_s1 + $0x524] ss:$8 sps:$4 sm:$0xff]   ;;  %v3758_v33 = vld [vmem:[%s5103_s1 + $0x120] ss:$8 sps:$4 sm:$0xff]   ;;  %v3294_v60 = vcombine.low %v3581_v53, %v3585_v56 }
  0x27   : > { %v3589_v59 = vld.sshfl [vmem:[%s4280_s17 + $0x28] sm:$0xf pattern:$0x76325410]  ;;  %v202_v53 = vld [vmem:[%s4280_s17] sm:$0x77] }
  0x28   : > { %2599 = vmatpush1.bf16.msra.mxu1 %v3702_v34  ;;  %v3761_v34 = vld [vmem:[%s5103_s1 + $0x520] ss:$8 sps:$4 sm:$0xff]   ;;  %v3593_v61 = vld.sshfl [vmem:[%s4280_s17 + $0x38] sm:$0xf pattern:$0x76325410]  ;;  %v4455_v1 = vrot.slane %v3294_v60, %v4293_v54 }
  0x29   : > { %2771 = vmatpush1.bf16.msra.mxu0 %v3703_v35  ;;  %2600 = vmatprep.subr.bf16.mxu1 %v3704_v36  ;;  %v3766_v35 = vld [vmem:[%s5103_s1 + $0x134] ss:$8 sps:$4 sm:$0xff]   ;;  %v3796_v63 = vld [vmem:[%s5103_s1 + $0x184] ss:$8 sps:$4 sm:$0xff]   ;;  %v3296_v0 = vcombine.low %v3589_v59, %v3593_v61  ;;  %v3794_v7 = vld [vmem:[%s5103_s1 + $0x180] ss:$8 sps:$4 sm:$0xff]  }
  0x2a   : > { %2772 = vmatprep.subr.bf16.mxu0 %v3706_v37  ;;  %v3769_v36 = vld [vmem:[%s5103_s1 + $0x534] ss:$8 sps:$4 sm:$0xff]   ;;  %v3764_v37 = vld [vmem:[%s5103_s1 + $0x130] ss:$8 sps:$4 sm:$0xff]   ;;  %v3797_v8 = vld [vmem:[%s5103_s1 + $0x580] ss:$8 sps:$4 sm:$0xff]  }
  0x2c   : > { %2601 = vmatpush1.bf16.msra.mxu1 %v3708_v38  ;;  %v3767_v38 = vld [vmem:[%s5103_s1 + $0x530] ss:$8 sps:$4 sm:$0xff]  }
  0x2d   : > { %2773 = vmatpush1.bf16.msra.mxu0 %v3709_v42  ;;  %2602 = vmatprep.subr.bf16.mxu1 %v3710_v43  ;;  %v3773_v42 = vld [vmem:[%s5103_s1 + $0x540] ss:$8 sps:$4 sm:$0xff]   ;;  %v3778_v43 = vld [vmem:[%s5103_s1 + $0x154] ss:$8 sps:$4 sm:$0xff]  }
  0x2e   : > { %2774 = vmatprep.subr.bf16.mxu0 %v3712_v44  ;;  %v3781_v44 = vld [vmem:[%s5103_s1 + $0x554] ss:$8 sps:$4 sm:$0xff]  }
  0x30   : > { %2603 = vmatpush1.bf16.msra.mxu1 %v3714_v45  ;;  %v3776_v45 = vld [vmem:[%s5103_s1 + $0x150] ss:$8 sps:$4 sm:$0xff]  }
  0x31   : > { %2775 = vmatpush1.bf16.msra.mxu0 %v3715_v46  ;;  %2604 = vmatprep.subr.bf16.mxu1 %v3716_v49  ;;  %v3779_v46 = vld [vmem:[%s5103_s1 + $0x550] ss:$8 sps:$4 sm:$0xff]   ;;  %v3787_v49 = vld [vmem:[%s5103_s1 + $0x564] ss:$8 sps:$4 sm:$0xff]  }
  0x32   : > { %2776 = vmatprep.subr.bf16.mxu0 %v3718_v50  ;;  %v3782_v50 = vld [vmem:[%s5103_s1 + $0x160] ss:$8 sps:$4 sm:$0xff]  }
  0x34   : > { %2605 = vmatpush1.bf16.msra.mxu1 %v3720_v51  ;;  %v3785_v51 = vld [vmem:[%s5103_s1 + $0x560] ss:$8 sps:$4 sm:$0xff]  }
  0x35   : > { %2777 = vmatpush1.bf16.msra.mxu0 %v3721_v52  ;;  %2606 = vmatprep.subr.bf16.mxu1 %v3722_v55  ;;  %v3790_v52 = vld [vmem:[%s5103_s1 + $0x174] ss:$8 sps:$4 sm:$0xff]  }
  0x36   : > { %2778 = vmatprep.subr.bf16.mxu0 %v3724_v57  ;;  %v3793_v55 = vld [vmem:[%s5103_s1 + $0x574] ss:$8 sps:$4 sm:$0xff]   ;;  %v3788_v57 = vld [vmem:[%s5103_s1 + $0x170] ss:$8 sps:$4 sm:$0xff]  }
  0x38   : > { %2607 = vmatpush1.bf16.msra.mxu1 %v3726_v62  ;;  %v3302_v62 = vcombine.low %v3585_v56, %v3589_v59  ;;  %v206_v56 = vld [vmem:[%s4280_s17 + $0x20] sm:$0x77]  ;;  %v3246_v59 = vcombine.high %v202_v53, %v202_v53 }
  0x39   : > { %2779 = vmatpush1.bf16.msra.mxu0 %v3727_v2  ;;  %2608 = vmatprep.subr.bf16.mxu1 %v3728_v3  ;;  %v3595_v2 = vld.sshfl [vmem:[%s4280_s17 + $0x48] sm:$0xf pattern:$0x76325410] }
  0x3a   : > { %2780 = vmatprep.subr.bf16.mxu0 %v3730_v6  ;;  %v3799_v3 = vld [vmem:[%s5103_s1 + $0x584] ss:$8 sps:$4 sm:$0xff]   ;;  %v3304_v4 = vcombine.low %v3593_v61, %v3595_v2  ;;  %v4462_v5 = vrot.slane %v3302_v62, %v4293_v54  ;;  %v4465_v6 = vrot.slane %v3296_v0, %v4293_v54  ;;  %v3854_v62 = vld [vmem:[%s5103_s1 + $0x220] ss:$8 sps:$4 sm:$0xff]   ;;  %v3253_v0 = vcombine.low %v206_v56, %v206_v56 }
  0x3c   : > { %2609 = vmatpush1.bf16.msra.mxu1 %v3732_v9  ;;  %v4474_v9 = vrot.slane %v3304_v4, %v4293_v54  ;;  %v1177_v11 = vcombine.high %v4455_v1, %v4465_v6  ;;  %v3862_v4 = vld [vmem:[%s5103_s1 + $0x234] ss:$8 sps:$4 sm:$0xff]  }
  0x3d   : > { %2781 = vmatpush1.bf16.msra.mxu0 %v3733_v10  ;;  %2610 = vmatprep.subr.bf16.mxu1 %v3734_v12  ;;  %v3802_v10 = vld [vmem:[%s5103_s1 + $0x194] ss:$8 sps:$4 sm:$0xff]  }
  0x3e   : > { %2782 = vmatprep.subr.bf16.mxu0 %v3736_v14  ;;  %v3805_v12 = vld [vmem:[%s5103_s1 + $0x594] ss:$8 sps:$4 sm:$0xff]   ;;  %v1249_v13 = vcombine.high %v4462_v5, %v4474_v9  ;;  %v3800_v14 = vld [vmem:[%s5103_s1 + $0x190] ss:$8 sps:$4 sm:$0xff]  }
  0x40   : > { %2611 = vmatpush1.bf16.msra.mxu1 %v3738_v15  ;;  %v3803_v15 = vld [vmem:[%s5103_s1 + $0x590] ss:$8 sps:$4 sm:$0xff]  }
  0x41   : > { %2783 = vmatpush1.bf16.msra.mxu0 %v3739_v16  ;;  %2612 = vmatprep.subr.bf16.mxu1 %v3740_v17  ;;  %v3808_v16 = vld [vmem:[%s5103_s1 + $0x1a4] ss:$8 sps:$4 sm:$0xff]  }
  0x42   : > { %2784 = vmatprep.subr.bf16.mxu0 %v3742_v18  ;;  %v3811_v17 = vld [vmem:[%s5103_s1 + $0x5a4] ss:$8 sps:$4 sm:$0xff]   ;;  %v3806_v18 = vld [vmem:[%s5103_s1 + $0x1a0] ss:$8 sps:$4 sm:$0xff]  }
  0x44   : > { %2613 = vmatpush1.bf16.msra.mxu1 %v3744_v19  ;;  %v3809_v19 = vld [vmem:[%s5103_s1 + $0x5a0] ss:$8 sps:$4 sm:$0xff]  }
  0x45   : > { %2785 = vmatpush1.bf16.msra.mxu0 %v3745_v20  ;;  %2625 = vmatprep.subr.bf16.mxu1 %v3748_v21  ;;  %v3814_v20 = vld [vmem:[%s5103_s1 + $0x1b4] ss:$8 sps:$4 sm:$0xff]  }
  0x46   : > { %2797 = vmatprep.subr.bf16.mxu0 %v3751_v22  ;;  %v3817_v21 = vld [vmem:[%s5103_s1 + $0x5b4] ss:$8 sps:$4 sm:$0xff]   ;;  %v3812_v22 = vld [vmem:[%s5103_s1 + $0x1b0] ss:$8 sps:$4 sm:$0xff]  }
  0x47   : > { %2615 = vmatmul.mubr.bf16.vlgmr.msra.gmra.mrb[0].mxu1 %v1174_v25  ;;  %v3823_v25 = vld [vmem:[%s5103_s1 + $0x5c4] ss:$8 sps:$4 sm:$0xff]  }
  0x48   : > { %2787 = vmatmul.mubr.bf16.vlgmr.msra.gmra.mrb[0].mxu0 %v1246_v26  ;;  %2626 = vmatpush1.bf16.msra.mxu1 %v3746_v23  ;;  %v3815_v23 = vld [vmem:[%s5103_s1 + $0x5b0] ss:$8 sps:$4 sm:$0xff]   ;;  %v3818_v26 = vld [vmem:[%s5103_s1 + $0x1c0] ss:$8 sps:$4 sm:$0xff]  }
  0x49   : > { %2798 = vmatpush1.bf16.msra.mxu0 %v3749_v24  ;;  %2627 = vmatprep.subr.bf16.mxu1 %v3754_v27  ;;  %v3820_v24 = vld [vmem:[%s5103_s1 + $0x1c4] ss:$8 sps:$4 sm:$0xff]   ;;  %v3821_v27 = vld [vmem:[%s5103_s1 + $0x5c0] ss:$8 sps:$4 sm:$0xff]  }
  0x4a   : > { %2799 = vmatprep.subr.bf16.mxu0 %v3757_v28  ;;  %2657 = vmatprep.mubr.bf16.mxu1 %v1177_v11  ;;  %v3826_v28 = vld [vmem:[%s5103_s1 + $0x1d4] ss:$8 sps:$4 sm:$0xff]  }
  0x4b   : > { %2829 = vmatprep.mubr.bf16.mxu0 %v1249_v13 }
  0x4c   : > { %2628 = vmatpush1.bf16.msra.mxu1 %v3752_v29  ;;  %v3829_v29 = vld [vmem:[%s5103_s1 + $0x5d4] ss:$8 sps:$4 sm:$0xff]  }
  0x4d   : > { %2800 = vmatpush1.bf16.msra.mxu0 %v3755_v30  ;;  %2629 = vmatprep.subr.bf16.mxu1 %v3760_v31  ;;  %v3824_v30 = vld [vmem:[%s5103_s1 + $0x1d0] ss:$8 sps:$4 sm:$0xff]  }
  0x4e   : > { %2801 = vmatprep.subr.bf16.mxu0 %v3763_v32  ;;  %v3827_v31 = vld [vmem:[%s5103_s1 + $0x5d0] ss:$8 sps:$4 sm:$0xff]   ;;  %v3832_v32 = vld [vmem:[%s5103_s1 + $0x1e4] ss:$8 sps:$4 sm:$0xff]  }
  0x50   : > { %2630 = vmatpush1.bf16.msra.mxu1 %v3758_v33  ;;  %v3835_v33 = vld [vmem:[%s5103_s1 + $0x5e4] ss:$8 sps:$4 sm:$0xff]  }
  0x51   : > { %2802 = vmatpush1.bf16.msra.mxu0 %v3761_v34  ;;  %2631 = vmatprep.subr.bf16.mxu1 %v3766_v35  ;;  %v3830_v34 = vld [vmem:[%s5103_s1 + $0x1e0] ss:$8 sps:$4 sm:$0xff]  }
  0x52   : > { %2803 = vmatprep.subr.bf16.mxu0 %v3769_v36  ;;  %v3833_v35 = vld [vmem:[%s5103_s1 + $0x5e0] ss:$8 sps:$4 sm:$0xff]   ;;  %v3838_v36 = vld [vmem:[%s5103_s1 + $0x1f4] ss:$8 sps:$4 sm:$0xff]  }
  0x54   : > { %2632 = vmatpush1.bf16.msra.mxu1 %v3764_v37  ;;  %v3841_v37 = vld [vmem:[%s5103_s1 + $0x5f4] ss:$8 sps:$4 sm:$0xff]  }
  0x55   : > { %2804 = vmatpush1.bf16.msra.mxu0 %v3767_v38  ;;  %2633 = vmatprep.subr.bf16.mxu1 %v3772_v39  ;;  %v3836_v38 = vld [vmem:[%s5103_s1 + $0x1f0] ss:$8 sps:$4 sm:$0xff]  }
  0x56   : > { %2805 = vmatprep.subr.bf16.mxu0 %v3775_v40  ;;  %v3839_v39 = vld [vmem:[%s5103_s1 + $0x5f0] ss:$8 sps:$4 sm:$0xff]   ;;  %v3844_v40 = vld [vmem:[%s5103_s1 + $0x204] ss:$8 sps:$4 sm:$0xff]  }
  0x58   : > { %2634 = vmatpush1.bf16.msra.mxu1 %v3770_v41  ;;  %v3847_v41 = vld [vmem:[%s5103_s1 + $0x604] ss:$8 sps:$4 sm:$0xff]  }
  0x59   : > { %2806 = vmatpush1.bf16.msra.mxu0 %v3773_v42  ;;  %2635 = vmatprep.subr.bf16.mxu1 %v3778_v43  ;;  %v3842_v42 = vld [vmem:[%s5103_s1 + $0x200] ss:$8 sps:$4 sm:$0xff]  }
  0x5a   : > { %2807 = vmatprep.subr.bf16.mxu0 %v3781_v44  ;;  %v3845_v43 = vld [vmem:[%s5103_s1 + $0x600] ss:$8 sps:$4 sm:$0xff]   ;;  %v1176_v44 = vcombine.low %v4455_v1, %v4465_v6  ;;  %v3254_v1 = vcombine.high %v206_v56, %v206_v56 }
  0x5c   : > { %2636 = vmatpush1.bf16.msra.mxu1 %v3776_v45  ;;  %v1248_v45 = vcombine.low %v4462_v5, %v4474_v9  ;;  %v3865_v9 = vld [vmem:[%s5103_s1 + $0x634] ss:$8 sps:$4 sm:$0xff]  }
  0x5d   : > { %2808 = vmatpush1.bf16.msra.mxu0 %v3779_v46  ;;  %2637 = vmatprep.subr.bf16.mxu1 %v3784_v47  ;;  %v3850_v46 = vld [vmem:[%s5103_s1 + $0x214] ss:$8 sps:$4 sm:$0xff]  }
  0x5e   : > { %2809 = vmatprep.subr.bf16.mxu0 %v3787_v49  ;;  %v3853_v47 = vld [vmem:[%s5103_s1 + $0x614] ss:$8 sps:$4 sm:$0xff]   ;;  %v3848_v49 = vld [vmem:[%s5103_s1 + $0x210] ss:$8 sps:$4 sm:$0xff]  }
  0x60   : > { %2638 = vmatpush1.bf16.msra.mxu1 %v3782_v50  ;;  %v3851_v50 = vld [vmem:[%s5103_s1 + $0x610] ss:$8 sps:$4 sm:$0xff]  }
  0x61   : > { %2810 = vmatpush1.bf16.msra.mxu0 %v3785_v51  ;;  %2639 = vmatprep.subr.bf16.mxu1 %v3790_v52  ;;  %v3856_v51 = vld [vmem:[%s5103_s1 + $0x224] ss:$8 sps:$4 sm:$0xff]  }
  0x62   : > { %2811 = vmatprep.subr.bf16.mxu0 %v3793_v55  ;;  %v3859_v52 = vld [vmem:[%s5103_s1 + $0x624] ss:$8 sps:$4 sm:$0xff]   ;;  %v204_v55 = vld [vmem:[%s4280_s17 + $0x10] sm:$0x77] }
  0x63   : > { %v3249_v60 = vcombine.low %v204_v55, %v204_v55  ;;  %v3250_v61 = vcombine.high %v204_v55, %v204_v55  ;;  %v3877_v55 = vld [vmem:[%s5103_s1 + $0x654] ss:$8 sps:$4 sm:$0xff]  }
  0x64   : > { %2640 = vmatpush1.bf16.msra.mxu1 %v3788_v57  ;;  %v208_v57 = vld [vmem:[%s4280_s17 + $0x30] sm:$0x77] }
  0x65   : > { %2812 = vmatpush1.bf16.msra.mxu0 %v3791_v58  ;;  %2641 = vmatprep.subr.bf16.mxu1 %v3796_v63  ;;  %v3245_v58 = vcombine.low %v202_v53, %v202_v53  ;;  %v3857_v63 = vld [vmem:[%s5103_s1 + $0x620] ss:$8 sps:$4 sm:$0xff]   ;;  %v4608_v2 = vcombine.low %v208_v57, %v208_v57  ;;  %v338_v11 = vshll.u32 %v3249_v60, 16  ;;  %v345_v13 = vshll.u32 %v3250_v61, 16  ;;  %v3874_v53 = vld [vmem:[%s5103_s1 + $0x254] ss:$8 sps:$4 sm:$0xff]  }
  0x66   : > { %2813 = vmatprep.subr.bf16.mxu0 %v3799_v3  ;;  %v4610_v3 = vcombine.high %v208_v57, %v208_v57 }
  0x67   : > { %v308_v5 = vshrl.u32 %v3245_v58, 16  ;;  %v310_v6 = vshll.u32 %v3245_v58, 16 }
  0x68   : > { %2642 = vmatpush1.bf16.msra.mxu1 %v3794_v7  ;;  %v315_v7 = vshrl.u32 %v3246_v59, 16 }
  0x69   : > { %2814 = vmatpush1.bf16.msra.mxu0 %v3797_v8  ;;  %2643 = vmatprep.subr.bf16.mxu1 %v3802_v10  ;;  %v317_v8 = vshll.u32 %v3246_v59, 16  ;;  %v336_v10 = vshrl.u32 %v3249_v60, 16  ;;  %v3872_v60 = vld [vmem:[%s5103_s1 + $0x250] ss:$8 sps:$4 sm:$0xff]  }
  0x6a   : > { %2815 = vmatprep.subr.bf16.mxu0 %v3805_v12  ;;  %v343_v12 = vshrl.u32 %v3250_v61, 16 }
  0x6c   : > { %2644 = vmatpush1.bf16.msra.mxu1 %v3800_v14  ;;  %v3860_v14 = vld [vmem:[%s5103_s1 + $0x230] ss:$8 sps:$4 sm:$0xff]  }
  0x6d   : > { %2816 = vmatpush1.bf16.msra.mxu0 %v3803_v15  ;;  %2645 = vmatprep.subr.bf16.mxu1 %v3808_v16  ;;  %v3863_v15 = vld [vmem:[%s5103_s1 + $0x630] ss:$8 sps:$4 sm:$0xff]   ;;  %v312_v16 = vrot.slane %v310_v6, 1  ;;  %v3880_v6 = vld [vmem:[%s5103_s1 + $0x264] ss:$8 sps:$4 sm:$0xff]  }
  0x6e   : > { %2817 = vmatprep.subr.bf16.mxu0 %v3811_v17  ;;  %v319_v17 = vrot.slane %v317_v8, 1 }
  0x70   : > { %2646 = vmatpush1.bf16.msra.mxu1 %v3806_v18  ;;  %v364_v18 = vshrl.u32 %v3253_v0, 16 }
  0x71   : > { %2818 = vmatpush1.bf16.msra.mxu0 %v3809_v19  ;;  %2647 = vmatprep.subr.bf16.mxu1 %v3814_v20  ;;  %v366_v19 = vshll.u32 %v3253_v0, 16  ;;  %v3868_v20 = vld [vmem:[%s5103_s1 + $0x244] ss:$8 sps:$4 sm:$0xff]  }
  0x72   : > { %2819 = vmatprep.subr.bf16.mxu0 %v3817_v21  ;;  %v3871_v21 = vld [vmem:[%s5103_s1 + $0x644] ss:$8 sps:$4 sm:$0xff]  }
  0x74   : > { %2648 = vmatpush1.bf16.msra.mxu1 %v3812_v22  ;;  %v340_v22 = vrot.slane %v338_v11, 1  ;;  %v3883_v11 = vld [vmem:[%s5103_s1 + $0x664] ss:$8 sps:$4 sm:$0xff]  }
  0x75   : > { %2820 = vmatpush1.bf16.msra.mxu0 %v3815_v23  ;;  %2649 = vmatprep.subr.bf16.mxu1 %v3820_v24  ;;  %v347_v23 = vrot.slane %v345_v13, 1  ;;  %v371_v24 = vshrl.u32 %v3254_v1, 16 }
  0x76   : > { %2821 = vmatprep.subr.bf16.mxu0 %v3823_v25  ;;  %v373_v25 = vshll.u32 %v3254_v1, 16  ;;  %v3875_v1 = vld [vmem:[%s5103_s1 + $0x650] ss:$8 sps:$4 sm:$0xff]  }
  0x78   : > { %2650 = vmatpush1.bf16.msra.mxu1 %v3818_v26  ;;  %v313_v26 = vor.u32 %v312_v16, %v308_v5  ;;  %v3878_v16 = vld [vmem:[%s5103_s1 + $0x260] ss:$8 sps:$4 sm:$0xff]  }
  0x79   : > { %2822 = vmatpush1.bf16.msra.mxu0 %v3821_v27  ;;  %2651 = vmatprep.subr.bf16.mxu1 %v3826_v28  ;;  %v320_v27 = vor.u32 %v319_v17, %v315_v7  ;;  %v368_v28 = vrot.slane %v366_v19, 1 }
  0x7a   : > { %2823 = vmatprep.subr.bf16.mxu0 %v3829_v29  ;;  %v392_v29 = vshrl.u32 %v4608_v2, 16 }
  0x7c   : > { %2652 = vmatpush1.bf16.msra.mxu1 %v3824_v30  ;;  %v3221_v30 = vld [vmem:[%s4280_s17 + $0x10] sm:$0x77] }
  0x7d   : > { %2824 = vmatpush1.bf16.msra.mxu0 %v3827_v31  ;;  %2653 = vmatprep.subr.bf16.mxu1 %v3832_v32  ;;  %v341_v31 = vor.u32 %v340_v22, %v336_v10  ;;  %v348_v32 = vor.u32 %v347_v23, %v343_v12 }
  0x7e   : > { %2825 = vmatprep.subr.bf16.mxu0 %v3835_v33  ;;  %v375_v33 = vrot.slane %v373_v25, 1  ;;  %v3881_v25 = vld [vmem:[%s5103_s1 + $0x660] ss:$8 sps:$4 sm:$0xff]  }
  0x80   : > { %2654 = vmatpush1.bf16.msra.mxu1 %v3830_v34  ;;  %v394_v34 = vshll.u32 %v4608_v2, 16 }
  0x81   : > { %2826 = vmatpush1.bf16.msra.mxu0 %v3833_v35  ;;  %2655 = vmatprep.subr.bf16.mxu1 %v3838_v36  ;;  %v3223_v35 = vld [vmem:[%s4280_s17 + $0x20] sm:$0x77] }
  0x82   : > { %2827 = vmatprep.subr.bf16.mxu0 %v3841_v37  ;;  %v3866_v36 = vld [vmem:[%s5103_s1 + $0x240] ss:$8 sps:$4 sm:$0xff]  }
  0x83   : > { %v3869_v37 = vld [vmem:[%s5103_s1 + $0x640] ss:$8 sps:$4 sm:$0xff]  }
  0x84   : > { %2656 = vmatpush1.bf16.msra.mxu1 %v3836_v38  ;;  %v369_v38 = vor.u32 %v368_v28, %v364_v18 }
  0x85   : > { %2828 = vmatpush1.bf16.msra.mxu0 %v3839_v39  ;;  %2668 = vmatprep.subr.bf16.mxu1 %v3844_v40  ;;  %v399_v39 = vshrl.u32 %v4610_v3, 16  ;;  %v401_v40 = vshll.u32 %v4610_v3, 16 }
  0x86   : > { %2840 = vmatprep.subr.bf16.mxu0 %v3847_v41  ;;  %v628_v41 = vcombine.low %v313_v26, %v320_v27  ;;  %v3886_v26 = vld [vmem:[%s5103_s1 + $0x274] ss:$8 sps:$4 sm:$0xff]  }
  0x87   : > { %2658 = vmatmul.mubr.bf16.vlgmr.msra.gmra.mrb[0].mxu1 %v1176_v44  ;;  %v696_v44 = vcombine.low %v341_v31, %v348_v32  ;;  %v3889_v31 = vld [vmem:[%s5103_s1 + $0x674] ss:$8 sps:$4 sm:$0xff]  }
  0x88   : > { %2830 = vmatmul.mubr.bf16.vlgmr.msra.gmra.mrb[0].mxu0 %v1248_v45  ;;  %2669 = vmatpush1.bf16.msra.mxu1 %v3842_v42  ;;  %v376_v42 = vor.u32 %v375_v33, %v371_v24  ;;  %v3225_v45 = vld [vmem:[%s4280_s17 + $0x30] sm:$0x77] }
  0x89   : > { %2841 = vmatpush1.bf16.msra.mxu0 %v3845_v43  ;;  %2670 = vmatprep.subr.bf16.mxu1 %v3850_v46  ;;  %v396_v43 = vrot.slane %v394_v34, 1  ;;  %v3277_v46 = vcombine.low %v3221_v30, %v3221_v30  ;;  %v704_v57 = vrot.slane %v696_v44, %v4293_v54  ;;  %v4655_v0 = vcombine.high %v3225_v45, %v3225_v45 }
  0x8a   : > { %2842 = vmatprep.subr.bf16.mxu0 %v3853_v47  ;;  %v403_v47 = vrot.slane %v401_v40, 1  ;;  %v764_v58 = vcombine.low %v369_v38, %v376_v42  ;;  %v3884_v40 = vld [vmem:[%s5103_s1 + $0x270] ss:$8 sps:$4 sm:$0xff]  }
  0x8b   : > { %v397_v56 = vor.u32 %v396_v43, %v392_v29  ;;  %v500_v59 = vshrl.u32 %v3277_v46, 16  ;;  %v502_v8 = vshll.u32 %v3277_v46, 16  ;;  %v563_v24 = vshrl.u32 %v4655_v0, 16  ;;  %v3892_v46 = vld [vmem:[%s5103_s1 + $0x284] ss:$8 sps:$4 sm:$0xff]  }
  0x8c   : > { %2671 = vmatpush1.bf16.msra.mxu1 %v3848_v49  ;;  %v636_v49 = vrot.slane %v628_v41, %v4293_v54  ;;  %v404_v61 = vor.u32 %v403_v47, %v399_v39  ;;  %v772_v2 = vrot.slane %v764_v58, %v4293_v54  ;;  %v565_v34 = vshll.u32 %v4655_v0, 16  ;;  %v3890_v58 = vld [vmem:[%s5103_s1 + $0x280] ss:$8 sps:$4 sm:$0xff]  }
  0x8d   : > { %2843 = vmatpush1.bf16.msra.mxu0 %v3851_v50  ;;  %2672 = vmatprep.subr.bf16.mxu1 %v3856_v51  ;;  %v3227_v50 = vld [vmem:[%s4280_s17 + $0x40] sm:$0x77]  ;;  %v3278_v51 = vcombine.high %v3221_v30, %v3221_v30  ;;  %v504_v18 = vrot.slane %v502_v8, 1 }
  0x8e   : > { %2844 = vmatprep.subr.bf16.mxu0 %v3859_v52  ;;  %v3281_v52 = vcombine.low %v3223_v35, %v3223_v35  ;;  %v3297_v3 = vcombine.low %v636_v49, %v704_v57  ;;  %v4663_v5 = vcombine.high %v3227_v50, %v3227_v50  ;;  %v832_v7 = vcombine.low %v397_v56, %v404_v61  ;;  %v3893_v61 = vld [vmem:[%s5103_s1 + $0x680] ss:$8 sps:$4 sm:$0xff]  }
  0x8f   : > { %v509_v10 = vshll.u32 %v3278_v51, 16  ;;  %v505_v28 = vor.u32 %v504_v18, %v500_v59  ;;  %v567_v42 = vrot.slane %v565_v34, 1  ;;  %v3911_v18 = vld [vmem:[%s5103_s1 + $0x6b0] ss:$8 sps:$4 sm:$0xff]  }
  0x90   : > { %2673 = vmatpush1.bf16.msra.mxu1 %v3854_v62  ;;  %v3282_v62 = vcombine.high %v3223_v35, %v3223_v35  ;;  %v4672_v12 = vrot.slane %v3297_v3, %v4293_v54  ;;  %v528_v13 = vshrl.u32 %v3281_v52, 16  ;;  %v840_v17 = vrot.slane %v832_v7, %v4293_v54  ;;  %v3896_v3 = vld [vmem:[%s5103_s1 + $0x290] ss:$8 sps:$4 sm:$0xff]   ;;  %v3907_v7 = vld [vmem:[%s5103_s1 + $0x6a4] ss:$8 sps:$4 sm:$0xff]  }
  0x91   : > { %2845 = vmatpush1.bf16.msra.mxu0 %v3857_v63  ;;  %2674 = vmatprep.subr.bf16.mxu1 %v3862_v4  ;;  %v3285_v63 = vcombine.low %v3225_v45, %v3225_v45  ;;  %v4661_v4 = vcombine.low %v3227_v50, %v3227_v50  ;;  %v511_v19 = vrot.slane %v509_v10, 1  ;;  %v591_v39 = vshrl.u32 %v4663_v5, 16  ;;  %v3887_v45 = vld [vmem:[%s5103_s1 + $0x670] ss:$8 sps:$4 sm:$0xff]   ;;  %v3902_v10 = vld [vmem:[%s5103_s1 + $0x2a0] ss:$8 sps:$4 sm:$0xff]  }
  0x92   : > { %2846 = vmatprep.subr.bf16.mxu0 %v3865_v9  ;;  %v507_v9 = vshrl.u32 %v3278_v51, 16  ;;  %v3299_v27 = vcombine.low %v772_v2, %v840_v17  ;;  %v593_v43 = vshll.u32 %v4663_v5, 16  ;;  %v3895_v51 = vld [vmem:[%s5103_s1 + $0x684] ss:$8 sps:$4 sm:$0xff]   ;;  %v3899_v5 = vld [vmem:[%s5103_s1 + $0x690] ss:$8 sps:$4 sm:$0xff]  }
  0x93   : > { %v556_v22 = vshrl.u32 %v3285_v63, 16  ;;  %v558_v23 = vshll.u32 %v3285_v63, 16  ;;  %v584_v35 = vshrl.u32 %v4661_v4, 16  ;;  %v586_v38 = vshll.u32 %v4661_v4, 16  ;;  %v3901_v63 = vld [vmem:[%s5103_s1 + $0x694] ss:$8 sps:$4 sm:$0xff]  }
  0x94   : > { %2675 = vmatpush1.bf16.msra.mxu1 %v3860_v14  ;;  %v530_v14 = vshll.u32 %v3281_v52, 16  ;;  %v512_v29 = vor.u32 %v511_v19, %v507_v9  ;;  %v568_v52 = vor.u32 %v567_v42, %v563_v24  ;;  %v3908_v17 = vld [vmem:[%s5103_s1 + $0x2b0] ss:$8 sps:$4 sm:$0xff]   ;;  %v3916_v19 = vld [vmem:[%s5103_s1 + $0x2c4] ss:$8 sps:$4 sm:$0xff]  }
  0x95   : > { %2847 = vmatpush1.bf16.msra.mxu0 %v3863_v15  ;;  %2676 = vmatprep.subr.bf16.mxu1 %v3868_v20  ;;  %v535_v15 = vshrl.u32 %v3282_v62, 16  ;;  %v537_v20 = vshll.u32 %v3282_v62, 16  ;;  %v560_v33 = vrot.slane %v558_v23, 1  ;;  %v588_v49 = vrot.slane %v586_v38, 1  ;;  %v3898_v62 = vld [vmem:[%s5103_s1 + $0x294] ss:$8 sps:$4 sm:$0xff]  }
  0x96   : > { %2848 = vmatprep.subr.bf16.mxu0 %v3871_v21  ;;  %v532_v21 = vrot.slane %v530_v14, 1  ;;  %v662_v44 = vcombine.low %v505_v28, %v512_v29  ;;  %v3910_v14 = vld [vmem:[%s5103_s1 + $0x2b4] ss:$8 sps:$4 sm:$0xff]   ;;  %v3931_v28 = vld [vmem:[%s5103_s1 + $0x6e4] ss:$8 sps:$4 sm:$0xff]  }
  0x97   : > { %v539_v30 = vrot.slane %v537_v20, 1  ;;  %v561_v41 = vor.u32 %v560_v33, %v556_v22  ;;  %v589_v56 = vor.u32 %v588_v49, %v584_v35  ;;  %v3919_v20 = vld [vmem:[%s5103_s1 + $0x6c4] ss:$8 sps:$4 sm:$0xff]   ;;  %v3917_v22 = vld [vmem:[%s5103_s1 + $0x6c0] ss:$8 sps:$4 sm:$0xff]  }
  0x98   : > { %2677 = vmatpush1.bf16.msra.mxu1 %v3866_v36  ;;  %v533_v32 = vor.u32 %v532_v21, %v528_v13  ;;  %v4691_v36 = vrot.slane %v3299_v27, %v4293_v54  ;;  %v3905_v13 = vld [vmem:[%s5103_s1 + $0x6a0] ss:$8 sps:$4 sm:$0xff]   ;;  %v3922_v23 = vld [vmem:[%s5103_s1 + $0x2d4] ss:$8 sps:$4 sm:$0xff]   ;;  %v3928_v27 = vld [vmem:[%s5103_s1 + $0x2e4] ss:$8 sps:$4 sm:$0xff]  }
  0x99   : > { %2849 = vmatpush1.bf16.msra.mxu0 %v3869_v37  ;;  %2678 = vmatprep.subr.bf16.mxu1 %v3874_v53  ;;  %v540_v37 = vor.u32 %v539_v30, %v535_v15  ;;  %v595_v53 = vrot.slane %v593_v43, 1  ;;  %v3913_v15 = vld [vmem:[%s5103_s1 + $0x6b4] ss:$8 sps:$4 sm:$0xff]   ;;  %v3914_v21 = vld [vmem:[%s5103_s1 + $0x2c0] ss:$8 sps:$4 sm:$0xff]  }
  0x9a   : > { %2850 = vmatprep.subr.bf16.mxu0 %v3877_v55  ;;  %v1211_v47 = vcombine.high %v4672_v12, %v4691_v36  ;;  %v670_v55 = vrot.slane %v662_v44, %v4293_v54  ;;  %v3925_v24 = vld [vmem:[%s5103_s1 + $0x6d4] ss:$8 sps:$4 sm:$0xff]   ;;  %v3926_v29 = vld [vmem:[%s5103_s1 + $0x2e0] ss:$8 sps:$4 sm:$0xff]  }
  0x9b   : > { %v730_v50 = vcombine.low %v533_v32, %v540_v37  ;;  %v596_v59 = vor.u32 %v595_v53, %v591_v39  ;;  %v3929_v30 = vld [vmem:[%s5103_s1 + $0x6e0] ss:$8 sps:$4 sm:$0xff]   ;;  %v205_v34 = vld [vmem:[%s4280_s17 + $0x18] sm:$0x77] }
  0x9c   : > { %2679 = vmatpush1.bf16.msra.mxu1 %v3872_v60  ;;  %2700 = vmatprep.mubr.bf16.mxu1 %v1211_v47  ;;  %v798_v60 = vcombine.low %v561_v41, %v568_v52  ;;  %v203_v32 = vld [vmem:[%s4280_s17 + $0x8] sm:$0x77]  ;;  %v209_v37 = vld [vmem:[%s4280_s17 + $0x38] sm:$0x77]  ;;  %v3251_v42 = vcombine.low %v205_v34, %v205_v34  ;;  %v3252_v43 = vcombine.high %v205_v34, %v205_v34 }
  0x9d   : > { %2851 = vmatpush1.bf16.msra.mxu0 %v3875_v1  ;;  %2680 = vmatprep.subr.bf16.mxu1 %v3880_v6  ;;  %v738_v57 = vrot.slane %v730_v50, %v4293_v54  ;;  %v866_v1 = vcombine.low %v589_v56, %v596_v59  ;;  %v3904_v6 = vld [vmem:[%s5103_s1 + $0x2a4] ss:$8 sps:$4 sm:$0xff]   ;;  %v3247_v38 = vcombine.low %v203_v32, %v203_v32  ;;  %v3937_v41 = vld [vmem:[%s5103_s1 + $0x6f4] ss:$8 sps:$4 sm:$0xff]  }
  0x9e   : > { %2852 = vmatprep.subr.bf16.mxu0 %v3883_v11  ;;  %v806_v0 = vrot.slane %v798_v60, %v4293_v54  ;;  %v207_v35 = vld [vmem:[%s4280_s17 + $0x28] sm:$0x77]  ;;  %v3248_v39 = vcombine.high %v203_v32, %v203_v32  ;;  %v3259_v47 = vcombine.low %v209_v37, %v209_v37  ;;  %v4817_v49 = vcombine.high %v209_v37, %v209_v37 }
  0x9f   : > { %v3305_v2 = vcombine.low %v670_v55, %v738_v57  ;;  %v874_v4 = vrot.slane %v866_v1, %v4293_v54  ;;  %v3255_v44 = vcombine.low %v207_v35, %v207_v35  ;;  %v322_v50 = vshrl.u32 %v3247_v38, 16  ;;  %v3948_v57 = vld [vmem:[%s5103_s1 + $0x304] ss:$8 sps:$4 sm:$0xff]  }
  0xa0   : > { %2681 = vmatpush1.bf16.msra.mxu1 %v3878_v16  ;;  %v324_v52 = vshll.u32 %v3247_v38, 16  ;;  %v329_v53 = vshrl.u32 %v3248_v39, 16  ;;  %v331_v55 = vshll.u32 %v3248_v39, 16  ;;  %v350_v56 = vshrl.u32 %v3251_v42, 16  ;;  %v3228_v39 = vld [vmem:[%s4280_s17 + $0x48] sm:$0x77] }
  0xa1   : > { %2853 = vmatpush1.bf16.msra.mxu0 %v3881_v25  ;;  %2682 = vmatprep.subr.bf16.mxu1 %v3886_v26  ;;  %v3307_v8 = vcombine.low %v806_v0, %v874_v4  ;;  %v4739_v9 = vrot.slane %v3305_v2, %v4293_v54  ;;  %v3920_v25 = vld [vmem:[%s5103_s1 + $0x2d0] ss:$8 sps:$4 sm:$0xff]   ;;  %v357_v59 = vshrl.u32 %v3252_v43, 16  ;;  %v359_v60 = vshll.u32 %v3252_v43, 16 }
  0xa2   : > { %2854 = vmatprep.subr.bf16.mxu0 %v3889_v31  ;;  %v3923_v26 = vld [vmem:[%s5103_s1 + $0x6d0] ss:$8 sps:$4 sm:$0xff]   ;;  %v1210_v31 = vcombine.low %v4672_v12, %v4691_v36  ;;  %v333_v0 = vrot.slane %v331_v55, 1  ;;  %v380_v1 = vshll.u32 %v3255_v44, 16 }
  0xa3   : > { %v4745_v11 = vrot.slane %v3307_v8, %v4293_v54  ;;  %v361_v4 = vrot.slane %v359_v60, 1  ;;  %v3963_v12 = vld [vmem:[%s5103_s1 + $0x710] ss:$8 sps:$4 sm:$0xff]  }
  0xa4   : > { %2683 = vmatpush1.bf16.msra.mxu1 %v3884_v40  ;;  %v3934_v40 = vld [vmem:[%s5103_s1 + $0x2f4] ss:$8 sps:$4 sm:$0xff]  }
  0xa5   : > { %2855 = vmatpush1.bf16.msra.mxu0 %v3887_v45  ;;  %2684 = vmatprep.subr.bf16.mxu1 %v3892_v46  ;;  %v1283_v16 = vcombine.high %v4739_v9, %v4745_v11  ;;  %v1282_v33 = vcombine.low %v4739_v9, %v4745_v11  ;;  %v3932_v45 = vld [vmem:[%s5103_s1 + $0x2f0] ss:$8 sps:$4 sm:$0xff]   ;;  %v3256_v46 = vcombine.high %v207_v35, %v207_v35 }
  0xa6   : > { %2856 = vmatprep.subr.bf16.mxu0 %v3895_v51  ;;  %v3935_v51 = vld [vmem:[%s5103_s1 + $0x6f0] ss:$8 sps:$4 sm:$0xff]  }
  0xa7   : > { %2872 = vmatprep.mubr.bf16.mxu0 %v1283_v16  ;;  %v385_v2 = vshrl.u32 %v3256_v46, 16  ;;  %v3957_v16 = vld [vmem:[%s5103_s1 + $0x700] ss:$8 sps:$4 sm:$0xff]  }
  0xa8   : > { %2685 = vmatpush1.bf16.msra.mxu1 %v3890_v58  ;;  %v352_v58 = vshll.u32 %v3251_v42, 16  ;;  %v3971_v42 = vld [vmem:[%s5103_s1 + $0x724] ss:$8 sps:$4 sm:$0xff]  }
  0xa9   : > { %2857 = vmatpush1.bf16.msra.mxu0 %v3893_v61  ;;  %2686 = vmatprep.subr.bf16.mxu1 %v3898_v62  ;;  %v378_v61 = vshrl.u32 %v3255_v44, 16  ;;  %v3959_v62 = vld [vmem:[%s5103_s1 + $0x704] ss:$8 sps:$4 sm:$0xff]  }
  0xaa   : > { %2858 = vmatprep.subr.bf16.mxu0 %v3901_v63  ;;  %v326_v63 = vrot.slane %v324_v52, 1  ;;  %v3966_v52 = vld [vmem:[%s5103_s1 + $0x320] ss:$8 sps:$4 sm:$0xff]  }
  0xac   : > { %2687 = vmatpush1.bf16.msra.mxu1 %v3896_v3  ;;  %v354_v3 = vrot.slane %v352_v58, 1  ;;  %v327_v8 = vor.u32 %v326_v63, %v322_v50  ;;  %v3291_v50 = vcombine.low %v3228_v39, %v3228_v39  ;;  %v3969_v58 = vld [vmem:[%s5103_s1 + $0x720] ss:$8 sps:$4 sm:$0xff]   ;;  %v3974_v63 = vld [vmem:[%s5103_s1 + $0x334] ss:$8 sps:$4 sm:$0xff]  }
  0xad   : > { %2859 = vmatpush1.bf16.msra.mxu0 %v3899_v5  ;;  %2688 = vmatprep.subr.bf16.mxu1 %v3904_v6  ;;  %v387_v5 = vshll.u32 %v3256_v46, 16  ;;  %v406_v6 = vshrl.u32 %v3259_v47, 16 }
  0xae   : > { %2860 = vmatprep.subr.bf16.mxu0 %v3907_v7  ;;  %v3946_v7 = vld [vmem:[%s5103_s1 + $0x300] ss:$8 sps:$4 sm:$0xff]  }
  0xb0   : > { %2689 = vmatpush1.bf16.msra.mxu1 %v3902_v10  ;;  %v334_v10 = vor.u32 %v333_v0, %v329_v53  ;;  %v3977_v0 = vld [vmem:[%s5103_s1 + $0x734] ss:$8 sps:$4 sm:$0xff]  }
  0xb1   : > { %2861 = vmatpush1.bf16.msra.mxu0 %v3905_v13  ;;  %2690 = vmatprep.subr.bf16.mxu1 %v3910_v14  ;;  %v382_v13 = vrot.slane %v380_v1, 1  ;;  %v408_v14 = vshll.u32 %v3259_v47, 16 }
  0xb2   : > { %2862 = vmatprep.subr.bf16.mxu0 %v3913_v15  ;;  %v3222_v15 = vld [vmem:[%s4280_s17 + $0x18] sm:$0x77] }
  0xb3   : > { %v3279_v32 = vcombine.low %v3222_v15, %v3222_v15  ;;  %v3280_v34 = vcombine.high %v3222_v15, %v3222_v15 }
  0xb4   : > { %2691 = vmatpush1.bf16.msra.mxu1 %v3908_v17  ;;  %v355_v17 = vor.u32 %v354_v3, %v350_v56 }
  0xb5   : > { %2863 = vmatpush1.bf16.msra.mxu0 %v3911_v18  ;;  %2692 = vmatprep.subr.bf16.mxu1 %v3916_v19  ;;  %v362_v18 = vor.u32 %v361_v4, %v357_v59  ;;  %v389_v19 = vrot.slane %v387_v5, 1  ;;  %v516_v46 = vshll.u32 %v3279_v32, 16  ;;  %v521_v56 = vshrl.u32 %v3280_v34, 16 }
  0xb6   : > { %2864 = vmatprep.subr.bf16.mxu0 %v3919_v20  ;;  %v413_v20 = vshrl.u32 %v4817_v49, 16 }
  0xb7   : > { %v518_v55 = vrot.slane %v516_v46, 1 }
  0xb8   : > { %2693 = vmatpush1.bf16.msra.mxu1 %v3914_v21  ;;  %v3224_v21 = vld [vmem:[%s4280_s17 + $0x28] sm:$0x77] }
  0xb9   : > { %2865 = vmatpush1.bf16.msra.mxu0 %v3917_v22  ;;  %2694 = vmatprep.subr.bf16.mxu1 %v3922_v23  ;;  %v3962_v22 = vld [vmem:[%s5103_s1 + $0x314] ss:$8 sps:$4 sm:$0xff]   ;;  %v3284_v11 = vcombine.high %v3224_v21, %v3224_v21 }
  0xba   : > { %2866 = vmatprep.subr.bf16.mxu0 %v3925_v24  ;;  %v3965_v23 = vld [vmem:[%s5103_s1 + $0x714] ss:$8 sps:$4 sm:$0xff]   ;;  %v383_v24 = vor.u32 %v382_v13, %v378_v61 }
  0xbb   : > { %v551_v4 = vshll.u32 %v3284_v11, 16 }
  0xbc   : > { %2695 = vmatpush1.bf16.msra.mxu1 %v3920_v25  ;;  %v410_v25 = vrot.slane %v408_v14, 1 }
  0xbd   : > { %2867 = vmatpush1.bf16.msra.mxu0 %v3923_v26  ;;  %2696 = vmatprep.subr.bf16.mxu1 %v3928_v27  ;;  %v415_v26 = vshll.u32 %v4817_v49, 16  ;;  %v629_v27 = vcombine.low %v327_v8, %v334_v10  ;;  %v3972_v10 = vld [vmem:[%s5103_s1 + $0x330] ss:$8 sps:$4 sm:$0xff]   ;;  %v553_v15 = vrot.slane %v551_v4, 1 }
  0xbe   : > { %2868 = vmatprep.subr.bf16.mxu0 %v3931_v28  ;;  %v390_v28 = vor.u32 %v389_v19, %v385_v2  ;;  %v411_v35 = vor.u32 %v410_v25, %v406_v6  ;;  %v4008_v4 = vld [vmem:[%s5103_s1 + $0x390] ss:$8 sps:$4 sm:$0xff]  }
  0xbf   : > { %v417_v37 = vrot.slane %v415_v26, 1  ;;  %v643_v38 = vrot.slane %v629_v27, %v4293_v54 }
  0xc0   : > { %2697 = vmatpush1.bf16.msra.mxu1 %v3926_v29  ;;  %v697_v29 = vcombine.low %v355_v17, %v362_v18  ;;  %v765_v9 = vcombine.low %v383_v24, %v390_v28  ;;  %v3975_v17 = vld [vmem:[%s5103_s1 + $0x730] ss:$8 sps:$4 sm:$0xff]  }
  0xc1   : > { %2869 = vmatpush1.bf16.msra.mxu0 %v3929_v30  ;;  %2698 = vmatprep.subr.bf16.mxu1 %v3934_v40  ;;  %v3226_v30 = vld [vmem:[%s4280_s17 + $0x38] sm:$0x77]  ;;  %v3283_v40 = vcombine.low %v3224_v21, %v3224_v21  ;;  %v418_v43 = vor.u32 %v417_v37, %v413_v20  ;;  %v598_v20 = vshrl.u32 %v3291_v50, 16  ;;  %v600_v21 = vshll.u32 %v3291_v50, 16 }
  0xc2   : > { %2870 = vmatprep.subr.bf16.mxu0 %v3937_v41  ;;  %v3960_v41 = vld [vmem:[%s5103_s1 + $0x310] ss:$8 sps:$4 sm:$0xff]   ;;  %v711_v36 = vrot.slane %v697_v29, %v4293_v54  ;;  %v3287_v44 = vcombine.low %v3226_v30, %v3226_v30  ;;  %v779_v47 = vrot.slane %v765_v9, %v4293_v54  ;;  %v3989_v9 = vld [vmem:[%s5103_s1 + $0x754] ss:$8 sps:$4 sm:$0xff]  }
  0xc3   : > { %v833_v53 = vcombine.low %v411_v35, %v418_v43  ;;  %v542_v60 = vshrl.u32 %v3283_v40, 16  ;;  %v544_v61 = vshll.u32 %v3283_v40, 16  ;;  %v602_v29 = vrot.slane %v600_v21, 1  ;;  %v3987_v43 = vld [vmem:[%s5103_s1 + $0x750] ss:$8 sps:$4 sm:$0xff]  }
  0xc4   : > { %2699 = vmatpush1.bf16.msra.mxu1 %v3932_v45  ;;  %v3288_v45 = vcombine.high %v3226_v30, %v3226_v30  ;;  %v3298_v49 = vcombine.low %v643_v38, %v711_v36  ;;  %v570_v6 = vshrl.u32 %v3287_v44, 16  ;;  %v3978_v38 = vld [vmem:[%s5103_s1 + $0x340] ss:$8 sps:$4 sm:$0xff]   ;;  %v3986_v36 = vld [vmem:[%s5103_s1 + $0x354] ss:$8 sps:$4 sm:$0xff]  }
  0xc5   : > { %2871 = vmatpush1.bf16.msra.mxu0 %v3935_v51  ;;  %2711 = vmatprep.subr.bf16.mxu1 %v3948_v57  ;;  %v4867_v51 = vcombine.high %v3228_v39, %v3228_v39  ;;  %v523_v57 = vshll.u32 %v3280_v34, 16  ;;  %v847_v1 = vrot.slane %v833_v53, %v4293_v54  ;;  %v546_v5 = vrot.slane %v544_v61, 1  ;;  %v3981_v39 = vld [vmem:[%s5103_s1 + $0x740] ss:$8 sps:$4 sm:$0xff]   ;;  %v3999_v61 = vld [vmem:[%s5103_s1 + $0x770] ss:$8 sps:$4 sm:$0xff]  }
  0xc6   : > { %2883 = vmatprep.subr.bf16.mxu0 %v3959_v62  ;;  %v4876_v59 = vrot.slane %v3298_v49, %v4293_v54  ;;  %v549_v62 = vshrl.u32 %v3284_v11, 16  ;;  %v577_v8 = vshrl.u32 %v3288_v45, 16  ;;  %v603_v40 = vor.u32 %v602_v29, %v598_v20  ;;  %v3995_v49 = vld [vmem:[%s5103_s1 + $0x764] ss:$8 sps:$4 sm:$0xff]   ;;  %v4029_v20 = vld [vmem:[%s5103_s1 + $0x7c0] ss:$8 sps:$4 sm:$0xff]  }
  0xc7   : > { %2701 = vmatmul.mubr.bf16.vlgmr.msra.gmra.mrb[0].mxu1 %v1210_v31  ;;  %v514_v31 = vshrl.u32 %v3279_v32, 16  ;;  %v525_v3 = vrot.slane %v523_v57, 1  ;;  %v3300_v13 = vcombine.low %v779_v47, %v847_v1  ;;  %v547_v18 = vor.u32 %v546_v5, %v542_v60  ;;  %v3992_v47 = vld [vmem:[%s5103_s1 + $0x364] ss:$8 sps:$4 sm:$0xff]   ;;  %v4001_v57 = vld [vmem:[%s5103_s1 + $0x774] ss:$8 sps:$4 sm:$0xff]  }
  0xc8   : > { %2873 = vmatmul.mubr.bf16.vlgmr.msra.gmra.mrb[0].mxu0 %v1282_v33  ;;  %2712 = vmatpush1.bf16.msra.mxu1 %v3946_v7  ;;  %v3968_v33 = vld [vmem:[%s5103_s1 + $0x324] ss:$8 sps:$4 sm:$0xff]   ;;  %v572_v7 = vshll.u32 %v3287_v44, 16  ;;  %v554_v25 = vor.u32 %v553_v15, %v549_v62  ;;  %v605_v27 = vshrl.u32 %v4867_v51, 16  ;;  %v607_v30 = vshll.u32 %v4867_v51, 16 }
  0xc9   : > { %2884 = vmatpush1.bf16.msra.mxu0 %v3957_v16  ;;  %2713 = vmatprep.subr.bf16.mxu1 %v3962_v22  ;;  %v519_v2 = vor.u32 %v518_v55, %v514_v31  ;;  %v526_v14 = vor.u32 %v525_v3, %v521_v56  ;;  %v579_v16 = vshll.u32 %v3288_v45, 16  ;;  %v3980_v22 = vld [vmem:[%s5103_s1 + $0x344] ss:$8 sps:$4 sm:$0xff]   ;;  %v4898_v24 = vrot.slane %v3300_v13, %v4293_v54  ;;  %v3990_v51 = vld [vmem:[%s5103_s1 + $0x360] ss:$8 sps:$4 sm:$0xff]  }
  0xca   : > { %2885 = vmatprep.subr.bf16.mxu0 %v3965_v23  ;;  %v574_v19 = vrot.slane %v572_v7, 1  ;;  %v3983_v23 = vld [vmem:[%s5103_s1 + $0x744] ss:$8 sps:$4 sm:$0xff]   ;;  %v731_v37 = vcombine.low %v547_v18, %v554_v25  ;;  %v3998_v56 = vld [vmem:[%s5103_s1 + $0x374] ss:$8 sps:$4 sm:$0xff]  }
  0xcb   : > { %v581_v26 = vrot.slane %v579_v16, 1  ;;  %v663_v32 = vcombine.low %v519_v2, %v526_v14  ;;  %v1213_v34 = vcombine.high %v4876_v59, %v4898_v24  ;;  %v3996_v60 = vld [vmem:[%s5103_s1 + $0x370] ss:$8 sps:$4 sm:$0xff]   ;;  %v4005_v1 = vld [vmem:[%s5103_s1 + $0x780] ss:$8 sps:$4 sm:$0xff]  }
  0xcc   : > { %2714 = vmatpush1.bf16.msra.mxu1 %v3960_v41  ;;  %v575_v28 = vor.u32 %v574_v19, %v570_v6  ;;  %v609_v41 = vrot.slane %v607_v30, 1  ;;  %v745_v11 = vrot.slane %v731_v37, %v4293_v54  ;;  %v4010_v2 = vld [vmem:[%s5103_s1 + $0x394] ss:$8 sps:$4 sm:$0xff]   ;;  %v4011_v5 = vld [vmem:[%s5103_s1 + $0x790] ss:$8 sps:$4 sm:$0xff]   ;;  %v1212_v37 = vcombine.low %v4876_v59, %v4898_v24 }
  0xcd   : > { %2886 = vmatpush1.bf16.msra.mxu0 %v3963_v12  ;;  %2715 = vmatprep.subr.bf16.mxu1 %v3968_v33  ;;  %v582_v35 = vor.u32 %v581_v26, %v577_v8  ;;  %v677_v12 = vrot.slane %v663_v32, %v4293_v54  ;;  %v4013_v3 = vld [vmem:[%s5103_s1 + $0x794] ss:$8 sps:$4 sm:$0xff]   ;;  %v4016_v6 = vld [vmem:[%s5103_s1 + $0x3a4] ss:$8 sps:$4 sm:$0xff]   ;;  %v4014_v8 = vld [vmem:[%s5103_s1 + $0x3a0] ss:$8 sps:$4 sm:$0xff]  }
  0xce   : > { %2887 = vmatprep.subr.bf16.mxu0 %v3971_v42  ;;  %2743 = vmatprep.mubr.bf16.mxu1 %v1213_v34  ;;  %v610_v33 = vor.u32 %v609_v41, %v605_v27  ;;  %v3984_v42 = vld [vmem:[%s5103_s1 + $0x350] ss:$8 sps:$4 sm:$0xff]   ;;  %v4019_v7 = vld [vmem:[%s5103_s1 + $0x7a4] ss:$8 sps:$4 sm:$0xff]   ;;  %v4022_v13 = vld [vmem:[%s5103_s1 + $0x3b4] ss:$8 sps:$4 sm:$0xff]  }
  0xcf   : > { %v799_v31 = vcombine.low %v575_v28, %v582_v35  ;;  %v3306_v46 = vcombine.low %v677_v12, %v745_v11  ;;  %v4025_v14 = vld [vmem:[%s5103_s1 + $0x7b4] ss:$8 sps:$4 sm:$0xff]   ;;  %v4020_v15 = vld [vmem:[%s5103_s1 + $0x3b0] ss:$8 sps:$4 sm:$0xff]   ;;  %v4031_v18 = vld [vmem:[%s5103_s1 + $0x7c4] ss:$8 sps:$4 sm:$0xff]  }
  0xd0   : > { %2716 = vmatpush1.bf16.msra.mxu1 %v3966_v52  ;;  %v867_v45 = vcombine.low %v603_v40, %v610_v33  ;;  %v3993_v52 = vld [vmem:[%s5103_s1 + $0x760] ss:$8 sps:$4 sm:$0xff]   ;;  %v4023_v16 = vld [vmem:[%s5103_s1 + $0x7b0] ss:$8 sps:$4 sm:$0xff]   ;;  %v4034_v21 = vld [vmem:[%s5103_s1 + $0x3d4] ss:$8 sps:$4 sm:$0xff]  }
  0xd1   : > { %2888 = vmatpush1.bf16.msra.mxu0 %v3969_v58  ;;  %2717 = vmatprep.subr.bf16.mxu1 %v3974_v63  ;;  %v813_v44 = vrot.slane %v799_v31, %v4293_v54  ;;  %v4939_v55 = vrot.slane %v3306_v46, %v4293_v54  ;;  %v4007_v63 = vld [vmem:[%s5103_s1 + $0x784] ss:$8 sps:$4 sm:$0xff]   ;;  %v4026_v19 = vld [vmem:[%s5103_s1 + $0x3c0] ss:$8 sps:$4 sm:$0xff]   ;;  %v4035_v25 = vld [vmem:[%s5103_s1 + $0x7d0] ss:$8 sps:$4 sm:$0xff]  }
  0xd2   : > { %2889 = vmatprep.subr.bf16.mxu0 %v3977_v0  ;;  %v881_v50 = vrot.slane %v867_v45, %v4293_v54  ;;  %v4002_v0 = vld [vmem:[%s5103_s1 + $0x380] ss:$8 sps:$4 sm:$0xff]   ;;  %v4040_v26 = vld [vmem:[%s5103_s1 + $0x3e4] ss:$8 sps:$4 sm:$0xff]   ;;  %v4046_v30 = vld [vmem:[%s5103_s1 + $0x3f4] ss:$8 sps:$4 sm:$0xff]  }
  0xd3   : > { %v4043_v27 = vld [vmem:[%s5103_s1 + $0x7e4] ss:$8 sps:$4 sm:$0xff]   ;;  %v4038_v28 = vld [vmem:[%s5103_s1 + $0x3e0] ss:$8 sps:$4 sm:$0xff]   ;;  %v4049_v32 = vld [vmem:[%s5103_s1 + $0x7f4] ss:$8 sps:$4 sm:$0xff]  }
  0xd4   : > { %2718 = vmatpush1.bf16.msra.mxu1 %v3972_v10  ;;  %v3308_v53 = vcombine.low %v813_v44, %v881_v50  ;;  %v4017_v10 = vld [vmem:[%s5103_s1 + $0x7a0] ss:$8 sps:$4 sm:$0xff]   ;;  %v4044_v34 = vld [vmem:[%s5103_s1 + $0x3f0] ss:$8 sps:$4 sm:$0xff]  }
  0xd5   : > { %2890 = vmatpush1.bf16.msra.mxu0 %v3975_v17  ;;  %2719 = vmatprep.subr.bf16.mxu1 %v3980_v22  ;;  %v4028_v17 = vld [vmem:[%s5103_s1 + $0x3c4] ss:$8 sps:$4 sm:$0xff]   ;;  %v4037_v22 = vld [vmem:[%s5103_s1 + $0x7d4] ss:$8 sps:$4 sm:$0xff]   ;;  %v4041_v29 = vld [vmem:[%s5103_s1 + $0x7e0] ss:$8 sps:$4 sm:$0xff]  }
  0xd6   : > { %2891 = vmatprep.subr.bf16.mxu0 %v3983_v23  ;;  %v4948_v58 = vrot.slane %v3308_v53, %v4293_v54  ;;  %v4004_v54 = vld [vmem:[%s5103_s1 + $0x384] ss:$8 sps:$4 sm:$0xff]   ;;  %v4032_v23 = vld [vmem:[%s5103_s1 + $0x3d0] ss:$8 sps:$4 sm:$0xff]  }
  0xd7   : > { %v4047_v35 = vld [vmem:[%s5103_s1 + $0x7f0] ss:$8 sps:$4 sm:$0xff]  }
  0xd8   : > { %2720 = vmatpush1.bf16.msra.mxu1 %v3978_v38  ;;  %v1285_v62 = vcombine.high %v4939_v55, %v4948_v58  ;;  %v1284_v38 = vcombine.low %v4939_v55, %v4948_v58 }
  0xd9   : > { %2892 = vmatpush1.bf16.msra.mxu0 %v3981_v39  ;;  %2721 = vmatprep.subr.bf16.mxu1 %v3986_v36 }
  0xda   : > { %2893 = vmatprep.subr.bf16.mxu0 %v3989_v9  ;;  %2915 = vmatprep.mubr.bf16.mxu0 %v1285_v62 }
  0xdc   : > { %2722 = vmatpush1.bf16.msra.mxu1 %v3984_v42 }
  0xdd   : > { %2894 = vmatpush1.bf16.msra.mxu0 %v3987_v43  ;;  %2723 = vmatprep.subr.bf16.mxu1 %v3992_v47 }
  0xde   : > { %2895 = vmatprep.subr.bf16.mxu0 %v3995_v49 }
  0xe0   : > { %2724 = vmatpush1.bf16.msra.mxu1 %v3990_v51 }
  0xe1   : > { %2896 = vmatpush1.bf16.msra.mxu0 %v3993_v52  ;;  %2725 = vmatprep.subr.bf16.mxu1 %v3998_v56 }
  0xe2   : > { %2897 = vmatprep.subr.bf16.mxu0 %v4001_v57 }
  0xe4   : > { %2726 = vmatpush1.bf16.msra.mxu1 %v3996_v60 }
  0xe5   : > { %2898 = vmatpush1.bf16.msra.mxu0 %v3999_v61  ;;  %2727 = vmatprep.subr.bf16.mxu1 %v4004_v54 }
  0xe6   : > { %2899 = vmatprep.subr.bf16.mxu0 %v4007_v63 }
  0xe8   : > { %2728 = vmatpush1.bf16.msra.mxu1 %v4002_v0 }
  0xe9   : > { %2900 = vmatpush1.bf16.msra.mxu0 %v4005_v1  ;;  %2729 = vmatprep.subr.bf16.mxu1 %v4010_v2 }
  0xea   : > { %2901 = vmatprep.subr.bf16.mxu0 %v4013_v3 }
  0xec   : > { %2730 = vmatpush1.bf16.msra.mxu1 %v4008_v4 }
  0xed   : > { %2902 = vmatpush1.bf16.msra.mxu0 %v4011_v5  ;;  %2731 = vmatprep.subr.bf16.mxu1 %v4016_v6 }
  0xee   : > { %2903 = vmatprep.subr.bf16.mxu0 %v4019_v7 }
  0xf0   : > { %2732 = vmatpush1.bf16.msra.mxu1 %v4014_v8 }
  0xf1   : > { %2904 = vmatpush1.bf16.msra.mxu0 %v4017_v10  ;;  %2733 = vmatprep.subr.bf16.mxu1 %v4022_v13 }
  0xf2   : > { %2905 = vmatprep.subr.bf16.mxu0 %v4025_v14 }
  0xf4   : > { %2734 = vmatpush1.bf16.msra.mxu1 %v4020_v15 }
  0xf5   : > { %2906 = vmatpush1.bf16.msra.mxu0 %v4023_v16  ;;  %2735 = vmatprep.subr.bf16.mxu1 %v4028_v17 }
  0xf6   : > { %2907 = vmatprep.subr.bf16.mxu0 %v4031_v18 }
  0xf8   : > { %2736 = vmatpush1.bf16.msra.mxu1 %v4026_v19 }
  0xf9   : > { %2908 = vmatpush1.bf16.msra.mxu0 %v4029_v20  ;;  %2737 = vmatprep.subr.bf16.mxu1 %v4034_v21 }
  0xfa   : > { %2909 = vmatprep.subr.bf16.mxu0 %v4037_v22 }
  0xfc   : > { %2738 = vmatpush1.bf16.msra.mxu1 %v4032_v23 }
  0xfd   : > { %2910 = vmatpush1.bf16.msra.mxu0 %v4035_v25  ;;  %2739 = vmatprep.subr.bf16.mxu1 %v4040_v26 }
  0xfe   : > { %2911 = vmatprep.subr.bf16.mxu0 %v4043_v27 }
 0x100   : > { %2740 = vmatpush1.bf16.msra.mxu1 %v4038_v28 }
 0x101   : > { %2912 = vmatpush1.bf16.msra.mxu0 %v4041_v29  ;;  %2741 = vmatprep.subr.bf16.mxu1 %v4046_v30 }
 0x102   : > { %2913 = vmatprep.subr.bf16.mxu0 %v4049_v32 }
 0x104   : > { %2742 = vmatpush1.bf16.msra.mxu1 %v4044_v34  ;;  %v2929_v34 = vld [vmem:[%s5104_s2] sm:$0x77] }
 0x105   : > { %2914 = vmatpush1.bf16.msra.mxu0 %v4047_v35 }
 0x107   : > { %2744 = vmatmul.mubr.bf16.vlgmr.msra.gmra.mrb[0].mxu1 %v1212_v37  ;;  %v2985_v37 = vsub.s32 1, %v4272_v48 }
 0x108   : > { %2916 = vmatmul.mubr.bf16.vlgmr.msra.gmra.mrb[0].mxu0 %v1284_v38  ;;  %v2989_v38 = vsub.s32 5, %v4272_v48 }
 0x1da   : > { %v2745_v39 = vpop.f32.mrb[0].mxu1 }
 0x1db   : > { %v2917_v40 = vpop.f32.mrb[0].mxu0  ;;  %v2747_v12 = vpop.f32.mrb[1].mxu1 }
 0x1dc   : > { %v5058_v41 = vadd.f32 %v2917_v40, %v2745_v39  ;;  %v2919_v36 = vpop.f32.mrb[1].mxu0  ;;  %v2749_v11 = vpop.f32.mrb[2].mxu1 }
 0x1dd   : > { %v5060_v9 = vadd.f32 %v2919_v36, %v2747_v12  ;;  %v2921_v31 = vpop.f32.mrb[2].mxu0  ;;  %v2751_v59 = vpop.f32.mrb[3].mxu1 }
 0x1de   : > { %v5062_v33 = vadd.f32 %v2921_v31, %v2749_v11  ;;  %v2923_v24 = vpop.f32.mrb[3].mxu0  ;;  %v2946_v43 = vmul.f32 %v5058_v41, %v5058_v41 }
 0x1df   : > { %v5064_v42 = vadd.f32 %v2923_v24, %v2751_v59  ;;  %v2947_v46 = vmul.f32 %v5060_v9, %v5060_v9 }
 0x1e0   : > { %v2930_v44 = vadd.f32 %v5062_v33, %v5058_v41  ;;  %v2948_v45 = vmul.f32 %v5062_v33, %v5062_v33 }
 0x1e1   : > { %v2937_v47 = vadd.f32 %v5064_v42, %v5060_v9  ;;  %v2949_v49 = vmul.f32 %v5064_v42, %v5064_v42 }
 0x1e2   : > { %v2931_v50 = vrot.slane %v2930_v44, 4  ;;  %v2950_v51 = vadd.f32 %v2948_v45, %v2946_v43 }
 0x1e3   : > { %v2938_v52 = vrot.slane %v2937_v47, 4  ;;  %v2957_v53 = vadd.f32 %v2949_v49, %v2947_v46  ;;  %v3016_v49 = vsub.s32 2, %v4272_v48 }
 0x1e4   : > { %v2932_v55 = vadd.f32 %v2931_v50, %v2930_v44  ;;  %v2951_v56 = vrot.slane %v2950_v51, 4  ;;  %v3020_v50 = vsub.s32 6, %v4272_v48 }
 0x1e5   : > { %v2939_v57 = vadd.f32 %v2938_v52, %v2937_v47  ;;  %v2958_v58 = vrot.slane %v2957_v53, 4 }
 0x1e6   : > { %v2933_v60 = vrot.slane %v2932_v55, 2  ;;  %v2952_v61 = vadd.f32 %v2951_v56, %v2950_v51 }
 0x1e7   : > { %v2940_v62 = vrot.slane %v2939_v57, 2  ;;  %v2959_v54 = vadd.f32 %v2958_v58, %v2957_v53 }
 0x1e8   : > { %v2934_v63 = vadd.f32 %v2933_v60, %v2932_v55  ;;  %v2953_v0 = vrot.slane %v2952_v61, 2 }
 0x1e9   : > { %v2941_v1 = vadd.f32 %v2940_v62, %v2939_v57  ;;  %v2960_v2 = vrot.slane %v2959_v54, 2 }
 0x1ea   : > { %v2935_v3 = vrot.slane %v2934_v63, 1  ;;  %v2954_v4 = vadd.f32 %v2953_v0, %v2952_v61 }
 0x1eb   : > { %v2942_v5 = vrot.slane %v2941_v1, 1  ;;  %v2961_v6 = vadd.f32 %v2960_v2, %v2959_v54 }
 0x1ec   : > { %v2936_v7 = vadd.f32 %v2935_v3, %v2934_v63  ;;  %v2955_v8 = vrot.slane %v2954_v4, 1 }
 0x1ed   : > { %v2943_v10 = vadd.f32 %v2942_v5, %v2941_v1  ;;  %v2962_v13 = vrot.slane %v2961_v6, 1 }
 0x1ee   : > { %v2944_v14 = vmul.f32 0.0625, %v2936_v7  ;;  %v2956_v15 = vadd.f32 %v2955_v8, %v2954_v4 }
 0x1ef   : > { %v2945_v16 = vmul.f32 0.0625, %v2943_v10  ;;  %v2963_v17 = vadd.f32 %v2962_v13, %v2961_v6 }
 0x1f0   : > { %v2964_v18 = vmul.f32 0.0625, %v2956_v15  ;;  %v2966_v19 = vmul.f32 %v2944_v14, %v2944_v14 }
 0x1f1   : > { %v2965_v20 = vmul.f32 0.0625, %v2963_v17  ;;  %v2967_v21 = vmul.f32 %v2945_v16, %v2945_v16 }
 0x1f2   : > { %v2968_v22 = vsub.f32 %v2964_v18, %v2966_v19 }
 0x1f3   : > { %v2969_v23 = vsub.f32 %v2965_v20, %v2967_v21 }
 0x1f4   : > { %v2970_v25 = vmax.f32 %v2968_v22, 0.0 }
 0x1f5   : > { %v2971_v26 = vmax.f32 %v2969_v23, 0.0 }
 0x1f6   : > { %v2972_v27 = vadd.f32 1e-05, %v2970_v25 }
 0x1f7   : > { %v2973_v28 = vadd.f32 1e-05, %v2971_v26 }
 0x1f8   : > { %4066 = vrsqrt.f32 %v2972_v27 }
 0x1f9   : > { %4068 = vrsqrt.f32 %v2973_v28 }
 0x202   : > { %v4067_v29 = vpop.eup %4066 }
 0x203   : > { %v4069_v30 = vpop.eup %4068 }
 0x204   : > { %v2978_v32 = vcombine.low %v4067_v29, %v4069_v30 }
 0x206   : > { %v2979_v35 = vrot.slane %v2978_v32, 7 }
 0x208   : > { %v2981_v39 = vmul.f32 %v2979_v35, %v2929_v34 }
 0x20a   : > { %v2986_v40 = vrot.slane %v2981_v39, %v2985_v37  ;;  %v2990_v12 = vrot.slane %v2981_v39, %v2989_v38 }
 0x20c   : > { %v2993_v36 = vmul.f32 %v2986_v40, %v2944_v14  ;;  %v2994_v11 = vmul.f32 %v2990_v12, %v2945_v16  ;;  %v3004_v31 = vrot.slane %v2986_v40, %v2985_v37  ;;  %v3008_v59 = vrot.slane %v2990_v12, %v2985_v37 }
 0x20e   : > { %v2997_v24 = vcombine.low %v2993_v36, %v2994_v11  ;;  %v3009_v43 = vmul.f32 %v5058_v41, %v3004_v31  ;;  %v3010_v44 = vmul.f32 %v5060_v9, %v3008_v59  ;;  %v3011_v45 = vmul.f32 %v5062_v33, %v3004_v31 }
 0x20f   : > { %v3012_v46 = vmul.f32 %v5064_v42, %v3008_v59 }
 0x210   : > { %v2998_v47 = vrot.slane %v2997_v24, 6 }
 0x212   : > { %v3000_v51 = vsub.f32 %v2929_v34, %v2998_v47 }
 0x214   : > { %v3017_v52 = vrot.slane %v3000_v51, %v3016_v49  ;;  %v3021_v53 = vrot.slane %v3000_v51, %v3020_v50 }
 0x216   : > { %v3027_v55 = vrot.slane %v3017_v52, %v3016_v49  ;;  %v3031_v56 = vrot.slane %v3021_v53, %v3016_v49 }
 0x218   : > { %v3032_v57 = vadd.f32 %v3027_v55, %v3009_v43  ;;  %v3033_v58 = vadd.f32 %v3031_v56, %v3010_v44  ;;  %v3034_v41 = vadd.f32 %v3027_v55, %v3011_v45  ;;  %v3035_v60 = vadd.f32 %v3031_v56, %v3012_v46 }
 0x21a   : > { %v3036_v9 = vmul.f32 0.2, %v3032_v57  ;;  %v3037_v61 = vmul.f32 0.2, %v3033_v58  ;;  %v3038_v33 = vmul.f32 0.2, %v3034_v41 }
 0x21b   : > { %v3039_v62 = vmul.f32 0.2, %v3035_v60 }
 0x21c   : > { %v3040_v42 = vmax.f32 %v3032_v57, %v3036_v9  ;;  %v3041_v54 = vmax.f32 %v3033_v58, %v3037_v61  ;;  %v3042_v63 = vmax.f32 %v3034_v41, %v3038_v33 }
 0x21d   : > { %v3043_v0 = vmax.f32 %v3035_v60, %v3039_v62 }
 0x21e   : > { %v3048_v1 = vcombine.low %v3040_v42, %v3041_v54  ;;  %v3049_v48 = vcombine.high %v3040_v42, %v3041_v54  ;;  %v3565_v2 = vcombine.low %v3041_v54, %v3041_v54  ;;  %v3566_v3 = vcombine.high %v3041_v54, %v3041_v54 }
 0x21f   : > { %v3050_v4 = vcombine.low %v3042_v63, %v3043_v0  ;;  %v3051_v5 = vcombine.high %v3042_v63, %v3043_v0  ;;  %v3567_v6 = vcombine.low %v3043_v0, %v3043_v0  ;;  %v3568_v7 = vcombine.high %v3043_v0, %v3043_v0 }
 0x220   : > { %v3569_v8 = vpack.c.bf16 %v3565_v2, %v3048_v1  ;;  %v3570_v10 = vpack.c.bf16 %v3566_v3, %v3049_v48 }
 0x221   : > { %v3571_v13 = vpack.c.bf16 %v3567_v6, %v3050_v4  ;;  %v3572_v14 = vpack.c.bf16 %v3568_v7, %v3051_v5 }
 0x222   : > { %3573 = vst.sshfl [vmem:[%s192_s21] sm:$0x33 pattern:$0x76325410] %v3569_v8 }
 0x223   : > { %3574 = vst.sshfl [vmem:[%s192_s21 + $0x4] sm:$0x33 pattern:$0x76325410] %v3570_v10 }
 0x224   : > { %3575 = vst.sshfl [vmem:[%s192_s21 + $0x8] sm:$0x33 pattern:$0x76325410] %v3571_v13 }
 0x225   : > { %3576 = vst.sshfl [vmem:[%s192_s21 + $0xc] sm:$0x33 pattern:$0x76325410] %v3572_v14 }
 0x226 PF: > { %s13_s14 = sadd.s32 1, %s4092_s14   ;;  %s5106_s12 = smov %s4088_s13 }
 0x227   : > { %p10_p5 = scmp.ge.s32.totalorder %s13_s14, 4   ;;  %s5107_s13 = smov %s5109_s15 }
 0x229   :  { %12 = sbr.rel (!%p10_p5) target bundleno = 2 (0x2), region = 65 }

// kernel: _lambda_.8
= control target key start
LH: loop header
LB: loop body
LE: loop exit
PB: predicated region body
PF: predicated region fallthrough
CT: control target
= control target key end

     0   :  { %s7929_s12 = smov 0   ;;  %s7931_s13 = smov 0   ;;  %s9456_s0 = inlined_call_operand.vmem [shape: bf16[2,6,6,256], index: 0, kind: input, shape index: {}]   ;;  %s9457_s1 = inlined_call_operand.vmem [shape: bf16[2,4096,256], index: 1, kind: input, shape index: {}]   ;;  %s9458_s2 = inlined_call_operand.vmem [shape: f32[2,3,256], index: 2, kind: input, shape index: {}]   ;;  %s9459_s3 = inlined_call_operand.vmem [shape: bf16[2,3,3,512], index: 3, kind: output, shape index: {}]  }
   0x1   :  { %s7933_s14 = smov 0   ;;  %s7935_s15 = smov 0  }
   0x2   :  { %s7937_s16 = smov 0   ;;  %s7939_s17 = smov 0  }
   0x3   :  { %s7941_s18 = smov 0  }
   0x4 LB: > { %s22_s19 = sadd.s32 1, %s7897_s16  ;;  %s25_s20 = sadd.s32 1, %s7901_s17  ;;  %s7905_s18 = sphi %s7941_s18, %s13_s18   ;;  %s7901_s17 = sphi %s7939_s17, %s9474_s17   ;;  %s7897_s16 = sphi %s7937_s16, %s9473_s16   ;;  %s7893_s15 = sphi %s7935_s15, %s9472_s15   ;;  %s7889_s14 = sphi %s7933_s14, %s9471_s14   ;;  %s7885_s13 = sphi %s7931_s13, %s9470_s13   ;;  %s7881_s12 = sphi %s7929_s12, %s9469_s12  }
   0x5   : > { %p23_p0 = scmp.ge.s32.totalorder %s22_s19, 2  ;;  %s6296_s21 = sadd.s32 4294967295, %s7905_s18  }
   0x6   : > { %p112_p1 = scmp.ne.s32.totalorder %s7885_s13, %s7881_s12  ;;  %p113_p2 = scmp.eq.s32.totalorder %s6296_s21, 3 }
   0x7   : > { %s9476_s19 = smov (%p23_p0, %s22_s19), 0  ;;  %s9478_s20 = smov (!%p23_p0, %s25_s20), %s7901_s17 }
   0x8   : > { %s98_s22 = ssub.s32 %s7897_s16, %s9476_s19  ;;  %p27_p3 = scmp.ge.s32.totalorder %s9478_s20, 2 }
   0x9   : > { %p6300_p4 = scmp.ge.s32.totalorder %s7905_s18, 1  ;;  %p7975_p5 = por %p113_p2, %p112_p1 }
   0xa   : > { %p151_p6 = scmp.lt.s32.totalorder %s7905_s18, 5  ;;  %s9480_s20 = smov (%p27_p3, %s9478_s20), 0 }
   0xb   : > { %s97_s24 = ssub.s32 %s7901_s17, %s9480_s20  ;;  %s102_s26 = sadd.s32 1, %s7885_s13 }
   0xc   : > { %p152_p7 = pnand %p6300_p4, %p151_p6  ;;  %s99_s25 = sor.u32 %s98_s22, %s97_s24 }
   0xd   : > { %p100_p8 = scmp.eq.s32.totalorder %s99_s25, 0  ;;  %s6908_s28 = sshll.u32 (!%p152_p7), %s7889_s14, 12  ;;  %v7907_v38 = vmov (!%p152_p7), 1966171168   ;;  %v718_v40 = vlaneseq (!%p152_p7)  ;;  %vm5826_vm0 = vcmask (!%p152_p7), 1040384   ;;  %vm6152_vm1 = vcmask (!%p152_p7), 1041408  }
   0xe   : > { %155 = sbr.rel (%p152_p7) target bundleno = 889 (0x379), region = 32  ;;  %s7992_s4 = scalar_lea.vmem (!%p152_p7), %s9457_s1, %s6908_s28  ;;  %v716_v39 = vunpack.c.l.s4 (!%p152_p7), %v7907_v38  ;;  %vm6153_vm2 = vsmask.f32 (!%p152_p7), 1280  ;;  %vm6155_vm3 = vcmask (!%p152_p7), 1043458   ;;  %vm6156_vm4 = vsmask.f32 (!%p152_p7), 3328 }
   0xf   : > { %s7986_s27 = scalar_select %p100_p8, %s7885_s13, %s102_s26  }
  0x10   : > { %v7031_v0 = vld [vmem:[%s7992_s4 + $0x4] ss:$8 sps:$4 sm:$0xff] (!%p152_p7)   ;;  %v7035_v2 = vld [vmem:[%s7992_s4] ss:$8 sps:$4 sm:$0xff] (!%p152_p7)   ;;  %v7037_v4 = vld [vmem:[%s7992_s4 + $0x14] ss:$8 sps:$4 sm:$0xff] (!%p152_p7)   ;;  %v717_v45 = vunpack.c.0.s8 (!%p152_p7), %v716_v39 }
  0x11   : > { %v7033_v1 = vld [vmem:[%s7992_s4 + $0x804] ss:$8 sps:$4 sm:$0xff] (!%p152_p7)   ;;  %5134 = vmatprep.subr.bf16.mxu1 (!%p152_p7), %v7031_v0  ;;  %v7036_v3 = vld [vmem:[%s7992_s4 + $0x800] ss:$8 sps:$4 sm:$0xff] (!%p152_p7)   ;;  %v7039_v5 = vld [vmem:[%s7992_s4 + $0x814] ss:$8 sps:$4 sm:$0xff] (!%p152_p7)  }
  0x12   : > { %5478 = vmatprep.subr.bf16.mxu0 (!%p152_p7), %v7033_v1  ;;  %5135 = vmatpush1.bf16.msra.mxu1 (!%p152_p7), %v7035_v2  ;;  %v7041_v6 = vld [vmem:[%s7992_s4 + $0x10] ss:$8 sps:$4 sm:$0xff] (!%p152_p7)   ;;  %v7043_v8 = vld [vmem:[%s7992_s4 + $0x24] ss:$8 sps:$4 sm:$0xff] (!%p152_p7)   ;;  %v7047_v10 = vld [vmem:[%s7992_s4 + $0x20] ss:$8 sps:$4 sm:$0xff] (!%p152_p7)  }
  0x13   : > { %5479 = vmatpush1.bf16.msra.mxu0 (!%p152_p7), %v7036_v3  ;;  %5136 = vmatprep.subr.bf16.mxu1 (!%p152_p7), %v7037_v4  ;;  %v7042_v7 = vld [vmem:[%s7992_s4 + $0x810] ss:$8 sps:$4 sm:$0xff] (!%p152_p7)   ;;  %v7045_v9 = vld [vmem:[%s7992_s4 + $0x824] ss:$8 sps:$4 sm:$0xff] (!%p152_p7)   ;;  %v7048_v11 = vld [vmem:[%s7992_s4 + $0x820] ss:$8 sps:$4 sm:$0xff] (!%p152_p7)  }
  0x14   : > { %5480 = vmatprep.subr.bf16.mxu0 (!%p152_p7), %v7039_v5  ;;  %v7049_v12 = vld [vmem:[%s7992_s4 + $0x34] ss:$8 sps:$4 sm:$0xff] (!%p152_p7)   ;;  %v7053_v14 = vld [vmem:[%s7992_s4 + $0x30] ss:$8 sps:$4 sm:$0xff] (!%p152_p7)   ;;  %v7055_v16 = vld [vmem:[%s7992_s4 + $0x44] ss:$8 sps:$4 sm:$0xff] (!%p152_p7)  }
  0x15   : > { %v7051_v13 = vld [vmem:[%s7992_s4 + $0x834] ss:$8 sps:$4 sm:$0xff]   ;;  %v7054_v15 = vld [vmem:[%s7992_s4 + $0x830] ss:$8 sps:$4 sm:$0xff]   ;;  %v7057_v17 = vld [vmem:[%s7992_s4 + $0x844] ss:$8 sps:$4 sm:$0xff]  }
  0x16   : > { %5137 = vmatpush1.bf16.msra.mxu1 %v7041_v6  ;;  %v7059_v18 = vld [vmem:[%s7992_s4 + $0x40] ss:$8 sps:$4 sm:$0xff]   ;;  %v7061_v20 = vld [vmem:[%s7992_s4 + $0x54] ss:$8 sps:$4 sm:$0xff]   ;;  %v7065_v22 = vld [vmem:[%s7992_s4 + $0x50] ss:$8 sps:$4 sm:$0xff]  }
  0x17   : > { %5481 = vmatpush1.bf16.msra.mxu0 %v7042_v7  ;;  %5138 = vmatprep.subr.bf16.mxu1 %v7043_v8  ;;  %v7060_v19 = vld [vmem:[%s7992_s4 + $0x840] ss:$8 sps:$4 sm:$0xff]   ;;  %v7063_v21 = vld [vmem:[%s7992_s4 + $0x854] ss:$8 sps:$4 sm:$0xff]   ;;  %v7066_v23 = vld [vmem:[%s7992_s4 + $0x850] ss:$8 sps:$4 sm:$0xff]  }
  0x18   : > { %5482 = vmatprep.subr.bf16.mxu0 %v7045_v9  ;;  %v7067_v24 = vld [vmem:[%s7992_s4 + $0x64] ss:$8 sps:$4 sm:$0xff]   ;;  %v7071_v26 = vld [vmem:[%s7992_s4 + $0x60] ss:$8 sps:$4 sm:$0xff]   ;;  %v7073_v28 = vld [vmem:[%s7992_s4 + $0x74] ss:$8 sps:$4 sm:$0xff]  }
  0x19   : > { %v7069_v25 = vld [vmem:[%s7992_s4 + $0x864] ss:$8 sps:$4 sm:$0xff]   ;;  %v7072_v27 = vld [vmem:[%s7992_s4 + $0x860] ss:$8 sps:$4 sm:$0xff]   ;;  %v7075_v29 = vld [vmem:[%s7992_s4 + $0x874] ss:$8 sps:$4 sm:$0xff]  }
  0x1a   : > { %5139 = vmatpush1.bf16.msra.mxu1 %v7047_v10  ;;  %v7077_v30 = vld [vmem:[%s7992_s4 + $0x70] ss:$8 sps:$4 sm:$0xff]   ;;  %v7079_v32 = vld [vmem:[%s7992_s4 + $0x84] ss:$8 sps:$4 sm:$0xff]   ;;  %p174_p9 = scmp.lt.s32.totalorder %s7893_s15, 1  ;;  %v8038_v46 = vshrl.u32 %v718_v40, 7  ;;  %vm6154_vm5 = vmand %vm6152_vm1, %vm6153_vm2 }
  0x1b   : > { %5483 = vmatpush1.bf16.msra.mxu0 %v7048_v11  ;;  %5140 = vmatprep.subr.bf16.mxu1 %v7049_v12  ;;  %v7078_v31 = vld [vmem:[%s7992_s4 + $0x870] ss:$8 sps:$4 sm:$0xff]   ;;  %v7081_v33 = vld [vmem:[%s7992_s4 + $0x884] ss:$8 sps:$4 sm:$0xff]   ;;  %v7083_v34 = vld [vmem:[%s7992_s4 + $0x80] ss:$8 sps:$4 sm:$0xff]  }
  0x1c   : > { %5484 = vmatprep.subr.bf16.mxu0 %v7051_v13  ;;  %v7084_v35 = vld [vmem:[%s7992_s4 + $0x880] ss:$8 sps:$4 sm:$0xff]   ;;  %v7085_v36 = vld [vmem:[%s7992_s4 + $0x94] ss:$8 sps:$4 sm:$0xff]   ;;  %s175_s5 = scalar_select %p174_p9, %s7893_s15, 1  ;;  %v8050_v51 = vsub.s32 %v717_v45, %v8038_v46  ;;  %vm6157_vm6 = vmand %vm6155_vm3, %vm6156_vm4 }
  0x1d   : > { %v7087_v37 = vld [vmem:[%s7992_s4 + $0x894] ss:$8 sps:$4 sm:$0xff]   ;;  %v7089_v41 = vld [vmem:[%s7992_s4 + $0x90] ss:$8 sps:$4 sm:$0xff]   ;;  %v7091_v43 = vld [vmem:[%s7992_s4 + $0xa4] ss:$8 sps:$4 sm:$0xff]  }
  0x1e   : > { %5141 = vmatpush1.bf16.msra.mxu1 %v7053_v14  ;;  %v7090_v42 = vld [vmem:[%s7992_s4 + $0x890] ss:$8 sps:$4 sm:$0xff]   ;;  %s6971_s6 = smul.u32 48, %s175_s5  ;;  %v7093_v44 = vld [vmem:[%s7992_s4 + $0x8a4] ss:$8 sps:$4 sm:$0xff]   ;;  %s6909_s10 = sshll.u32 %s7889_s14, 3  ;;  %vm6158_vm7 = vmor %vm6157_vm6, %vm6154_vm5 }
  0x1f   : > { %5485 = vmatpush1.bf16.msra.mxu0 %v7054_v15  ;;  %5142 = vmatprep.subr.bf16.mxu1 %v7055_v16  ;;  %v7095_v47 = vld [vmem:[%s7992_s4 + $0xa0] ss:$8 sps:$4 sm:$0xff]   ;;  %v7097_v49 = vld [vmem:[%s7992_s4 + $0xb4] ss:$8 sps:$4 sm:$0xff]   ;;  %v7101_v53 = vld [vmem:[%s7992_s4 + $0xb0] ss:$8 sps:$4 sm:$0xff]   ;;  %s5824_s22 = scalar_lea.vmem %s9458_s2, %s6909_s10 }
  0x20   : > { %5486 = vmatprep.subr.bf16.mxu0 %v7057_v17  ;;  %v7096_v48 = vld [vmem:[%s7992_s4 + $0x8a0] ss:$8 sps:$4 sm:$0xff]   ;;  %s8046_s9 = scalar_lea.vmem %s9456_s0, %s6971_s6  ;;  %v7099_v50 = vld [vmem:[%s7992_s4 + $0x8b4] ss:$8 sps:$4 sm:$0xff]   ;;  %v7102_v59 = vld [vmem:[%s7992_s4 + $0x8b0] ss:$8 sps:$4 sm:$0xff]  }
  0x21   : > { %v180_v52 = vld [vmem:[%s8046_s9] sm:$0x33]  ;;  %v8055_v54 = vld [vmem:[%s8046_s9 + $0x8] sm:$0x33]  ;;  %v8058_v55 = vld [vmem:[%s8046_s9 + $0x10] sm:$0x33] }
  0x22   : > { %5143 = vmatpush1.bf16.msra.mxu1 %v7059_v18  ;;  %v6320_v56 = vcombine.low %v180_v52, %v180_v52  ;;  %v6321_v57 = vcombine.high %v180_v52, %v180_v52  ;;  %v8061_v58 = vrot.slane %v180_v52, %v8050_v51  ;;  %v7103_v60 = vld [vmem:[%s7992_s4 + $0xc4] ss:$8 sps:$4 sm:$0xff]   ;;  %v6322_v61 = vcombine.low %v8055_v54, %v8055_v54  ;;  %v7107_v5 = vld [vmem:[%s7992_s4 + $0xc0] ss:$8 sps:$4 sm:$0xff]   ;;  %v7109_v12 = vld [vmem:[%s7992_s4 + $0xd4] ss:$8 sps:$4 sm:$0xff]  }
  0x23   : > { %5487 = vmatpush1.bf16.msra.mxu0 %v7060_v19  ;;  %5144 = vmatprep.subr.bf16.mxu1 %v7061_v20  ;;  %v6323_v62 = vcombine.high %v8055_v54, %v8055_v54  ;;  %v6324_v63 = vcombine.low %v8058_v55, %v8058_v55  ;;  %v7105_v0 = vld [vmem:[%s7992_s4 + $0x8c4] ss:$8 sps:$4 sm:$0xff]   ;;  %v6325_v1 = vcombine.high %v8058_v55, %v8058_v55  ;;  %v7108_v6 = vld [vmem:[%s7992_s4 + $0x8c0] ss:$8 sps:$4 sm:$0xff]   ;;  %s171_s24 = sand.u32 1, %s7881_s12   ;;  %s6904_s26 = sshll.u32 (%p7975_p5), %s7889_s14, 1 }
  0x24   : > { %5488 = vmatprep.subr.bf16.mxu0 %v7063_v21  ;;  %v223_v2 = vshrl.u32 %v6320_v56, 16  ;;  %v225_v3 = vshll.u32 %v6320_v56, 16  ;;  %v230_v4 = vshrl.u32 %v6321_v57, 16  ;;  %v183_v7 = vld [vmem:[%s8046_s9] sm:$0x66]  ;;  %v232_v8 = vshll.u32 %v6321_v57, 16 }
  0x25   : > { %v237_v9 = vshrl.u32 %v6322_v61, 16  ;;  %v239_v10 = vshll.u32 %v6322_v61, 16  ;;  %v244_v11 = vshrl.u32 %v6323_v62, 16  ;;  %v246_v14 = vshll.u32 %v6323_v62, 16  ;;  %v184_v17 = vld [vmem:[%s8046_s9 + $0x8] sm:$0x66] }
  0x26   : > { %5145 = vmatpush1.bf16.msra.mxu1 %v7065_v22  ;;  %v227_v13 = vrot.slane %v225_v3, 1  ;;  %v251_v15 = vshrl.u32 %v6324_v63, 16  ;;  %v253_v16 = vshll.u32 %v6324_v63, 16  ;;  %v234_v18 = vrot.slane %v232_v8, 1  ;;  %v7111_v22 = vld [vmem:[%s7992_s4 + $0x8d4] ss:$8 sps:$4 sm:$0xff]  }
  0x27   : > { %5489 = vmatpush1.bf16.msra.mxu0 %v7066_v23  ;;  %5146 = vmatprep.subr.bf16.mxu1 %v7067_v24  ;;  %v241_v19 = vrot.slane %v239_v10, 1  ;;  %v258_v20 = vshrl.u32 %v6325_v1, 16  ;;  %v260_v21 = vshll.u32 %v6325_v1, 16  ;;  %v185_v23 = vld [vmem:[%s8046_s9 + $0x10] sm:$0x66]  ;;  %s6970_s25 = smul.u32 12, %s171_s24 }
  0x28   : > { %5490 = vmatprep.subr.bf16.mxu0 %v7069_v25  ;;  %v8081_v24 = vor.u32 %v227_v13, %v223_v2  ;;  %v248_v25 = vrot.slane %v246_v14, 1  ;;  %v7115_v38 = vld [vmem:[%s7992_s4 + $0xe4] ss:$8 sps:$4 sm:$0xff]   ;;  %v8104_v40 = vcombine.low %v185_v23, %v185_v23  ;;  %v7121_v57 = vld [vmem:[%s7992_s4 + $0xf4] ss:$8 sps:$4 sm:$0xff]   ;;  %s6972_s28 = smul.u32 (%p7975_p5), 12, %s7893_s15 }
  0x29   : > { %v7123_v63 = vld [vmem:[%s7992_s4 + $0x8f4] ss:$8 sps:$4 sm:$0xff]   ;;  %s173_s12 = scalar_lea.vmem [#allocation2], %s6970_s25 }
  0x2a   : > { %5147 = vmatpush1.bf16.msra.mxu1 %v7071_v26  ;;  %v255_v26 = vrot.slane %v253_v16, 1  ;;  %v283_v52 = vrot.slane %v8104_v40, 1  ;;  %v7125_v16 = vld [vmem:[%s7992_s4 + $0xf0] ss:$8 sps:$4 sm:$0xff]   ;;  %s6177_s29 = sadd.s32 (%p7975_p5), %s6972_s28, %s6904_s26 }
  0x2b   : > { %5491 = vmatpush1.bf16.msra.mxu0 %v7072_v27  ;;  %5148 = vmatprep.subr.bf16.mxu1 %v7073_v28  ;;  %v8083_v27 = vcombine.low %v183_v7, %v183_v7  ;;  %v8085_v28 = vor.u32 %v234_v18, %v230_v4  ;;  %s6905_s30 = sshll.u32 (%p7975_p5), %s6177_s29, 1 }
  0x2c   : > { %5492 = vmatprep.subr.bf16.mxu0 %v7075_v29  ;;  %v8087_v29 = vor.u32 %v241_v19, %v237_v9  ;;  %s6179_s6 = scalar_lea.vmem (%p7975_p5), %s9459_s3, %s6905_s30 }
  0x2e   : > { %5149 = vmatpush1.bf16.msra.mxu1 %v7077_v30  ;;  %v262_v30 = vrot.slane %v260_v21, 1  ;;  %v712_v21 = vcombine.low %v8081_v24, %v8085_v28  ;;  %v985_v28 = vrot.slane %v8055_v54, %v8050_v51 }
  0x2f   : > { %5493 = vmatpush1.bf16.msra.mxu0 %v7078_v31  ;;  %5150 = vmatprep.subr.bf16.mxu1 %v7079_v32  ;;  %v8089_v31 = vcombine.high %v183_v7, %v183_v7  ;;  %v7113_v32 = vld [vmem:[%s7992_s4 + $0xd0] ss:$8 sps:$4 sm:$0xff]   ;;  %v318_v7 = vshrl.u32 %v8104_v40, 16 }
  0x30   : > { %5494 = vmatprep.subr.bf16.mxu0 %v7081_v33  ;;  %v7114_v33 = vld [vmem:[%s7992_s4 + $0x8d0] ss:$8 sps:$4 sm:$0xff]   ;;  %v8102_v39 = vor.u32 %v262_v30, %v258_v20 }
  0x31   : > { %v294_v56 = vshrl.u32 %v8089_v31, 16  ;;  %v320_v14 = vrot.slane %v318_v7, 1 }
  0x32   : > { %5151 = vmatpush1.bf16.msra.mxu1 %v7083_v34  ;;  %v8093_v34 = vor.u32 %v248_v25, %v244_v11  ;;  %v321_v11 = vshll.u32 %v8104_v40, 16  ;;  %v1249_v40 = vrot.slane %v8058_v55, %v8050_v51 }
  0x33   : > { %5495 = vmatpush1.bf16.msra.mxu0 %v7084_v35  ;;  %5152 = vmatprep.subr.bf16.mxu1 %v7085_v36  ;;  %v8095_v35 = vor.u32 %v255_v26, %v251_v15  ;;  %v8097_v36 = vcombine.low %v184_v17, %v184_v17  ;;  %v296_v1 = vrot.slane %v294_v56, 1 }
  0x34   : > { %5496 = vmatprep.subr.bf16.mxu0 %v7087_v37  ;;  %v8099_v37 = vcombine.high %v184_v17, %v184_v17  ;;  %v7126_v17 = vld [vmem:[%s7992_s4 + $0x8f0] ss:$8 sps:$4 sm:$0xff]   ;;  %v323_v19 = vrot.slane %v321_v11, 2  ;;  %v976_v26 = vcombine.low %v8087_v29, %v8093_v34 }
  0x35   : > { %v281_v45 = vrot.slane %v8097_v36, 1  ;;  %v302_v61 = vshrl.u32 %v8097_v36, 16  ;;  %v305_v62 = vshll.u32 %v8097_v36, 16  ;;  %v7156_v36 = vld [vmem:[%s7992_s4 + $0x904] ss:$8 sps:$4 sm:$0xff]  }
  0x36   : > { %5153 = vmatpush1.bf16.msra.mxu1 %v7089_v41  ;;  %v8106_v41 = vcombine.high %v185_v23, %v185_v23  ;;  %v310_v2 = vshrl.u32 %v8099_v37, 16  ;;  %v313_v3 = vshll.u32 %v8099_v37, 16  ;;  %v324_v30 = vor.u32 %v323_v19, %v320_v14 }
  0x37   : > { %5497 = vmatpush1.bf16.msra.mxu0 %v7090_v42  ;;  %5154 = vmatprep.subr.bf16.mxu1 %v7091_v43  ;;  %v7117_v42 = vld [vmem:[%s7992_s4 + $0x8e4] ss:$8 sps:$4 sm:$0xff]   ;;  %v279_v43 = vrot.slane %v8083_v27, 1 }
  0x38   : > { %5498 = vmatprep.subr.bf16.mxu0 %v7093_v44  ;;  %v280_v44 = vrot.slane %v8089_v31, 1  ;;  %v312_v9 = vrot.slane %v310_v2, 1  ;;  %v315_v10 = vrot.slane %v313_v3, 2  ;;  %v326_v15 = vshrl.u32 %v8106_v41, 16 }
  0x39   : > { %v329_v20 = vshll.u32 %v8106_v41, 16 }
  0x3a   : > { %5155 = vmatpush1.bf16.msra.mxu1 %v7095_v47  ;;  %v286_v47 = vshrl.u32 %v8083_v27, 16  ;;  %v316_v18 = vor.u32 %v315_v10, %v312_v9  ;;  %v713_v23 = vcombine.low %v279_v43, %v280_v44 }
  0x3b   : > { %5499 = vmatpush1.bf16.msra.mxu0 %v7096_v48  ;;  %5156 = vmatprep.subr.bf16.mxu1 %v7097_v49  ;;  %v7119_v48 = vld [vmem:[%s7992_s4 + $0xe0] ss:$8 sps:$4 sm:$0xff]  }
  0x3c   : > { %5500 = vmatprep.subr.bf16.mxu0 %v7099_v50  ;;  %v7120_v49 = vld [vmem:[%s7992_s4 + $0x8e0] ss:$8 sps:$4 sm:$0xff]   ;;  %v282_v50 = vrot.slane %v8099_v37, 1  ;;  %v735_v37 = vrot.slane %v713_v23, %v8050_v51 }
  0x3e   : > { %5157 = vmatpush1.bf16.msra.mxu1 %v7101_v53  ;;  %v289_v53 = vshll.u32 %v8083_v27, 16  ;;  %v7141_v27 = vld [vmem:[%s7992_s4 + $0x104] ss:$8 sps:$4 sm:$0xff]  }
  0x3f   : > { %5501 = vmatpush1.bf16.msra.mxu0 %v7102_v59  ;;  %5158 = vmatprep.subr.bf16.mxu1 %v7103_v60  ;;  %v288_v59 = vrot.slane %v286_v47, 1  ;;  %v297_v60 = vshll.u32 %v8089_v31, 16  ;;  %v331_v31 = vrot.slane %v329_v20, 2  ;;  %v992_v47 = vrot.slane %v976_v26, %v8050_v51 }
  0x40   : > { %5502 = vmatprep.subr.bf16.mxu0 %v7105_v0  ;;  %v291_v0 = vrot.slane %v289_v53, 2 }
  0x41   : > { %v299_v4 = vrot.slane %v297_v60, 2  ;;  %v1007_v56 = vcombine.low %v985_v28, %v992_v47 }
  0x42   : > { %5159 = vmatpush1.bf16.msra.mxu1 %v7107_v5  ;;  %v304_v5 = vrot.slane %v302_v61, 1  ;;  %v292_v8 = vor.u32 %v291_v0, %v288_v59 }
  0x43   : > { %5503 = vmatpush1.bf16.msra.mxu0 %v7108_v6  ;;  %5160 = vmatprep.subr.bf16.mxu1 %v7109_v12  ;;  %v307_v6 = vrot.slane %v305_v62, 2  ;;  %v300_v12 = vor.u32 %v299_v4, %v296_v1  ;;  %v1017_v0 = vrot.slane %v1007_v56, %v8050_v51  ;;  %v8174_v4 = vld [vmem:[%s8046_s9 + $0x18] sm:$0x33] }
  0x44   : > { %5504 = vmatprep.subr.bf16.mxu0 %v7111_v22  ;;  %v328_v22 = vrot.slane %v326_v15, 1  ;;  %v6346_v15 = vcombine.low %v8174_v4, %v8174_v4 }
  0x45   : > { %v308_v13 = vor.u32 %v307_v6, %v304_v5  ;;  %v714_v25 = vcombine.low %v292_v8, %v300_v12  ;;  %v8181_v12 = vld [vmem:[%s8046_s9 + $0x20] sm:$0x33] }
  0x46   : > { %5161 = vmatpush1.bf16.msra.mxu1 %v7113_v32  ;;  %v728_v32 = vrot.slane %v712_v21, %v8050_v51  ;;  %v332_v29 = vor.u32 %v331_v31, %v328_v22  ;;  %v6347_v22 = vcombine.high %v8174_v4, %v8174_v4  ;;  %v6348_v23 = vcombine.low %v8181_v12, %v8181_v12 }
  0x47   : > { %5505 = vmatpush1.bf16.msra.mxu0 %v7114_v33  ;;  %5162 = vmatprep.subr.bf16.mxu1 %v7115_v38  ;;  %v977_v33 = vcombine.low %v281_v45, %v282_v50  ;;  %v742_v38 = vrot.slane %v714_v25, %v8050_v51  ;;  %v978_v24 = vcombine.low %v308_v13, %v316_v18 }
  0x48   : > { %5506 = vmatprep.subr.bf16.mxu0 %v7117_v42  ;;  %v284_v42 = vrot.slane %v8106_v41, 1  ;;  %v743_v34 = vcombine.low %v8061_v58, %v728_v32  ;;  %v744_v43 = vcombine.high %v8061_v58, %v728_v32  ;;  %v1240_v50 = vcombine.low %v8095_v35, %v8102_v39 }
  0x49   : > { %v745_v44 = vcombine.low %v735_v37, %v742_v38  ;;  %v746_v45 = vcombine.high %v735_v37, %v742_v38  ;;  %v1006_v41 = vrot.slane %v978_v24, %v8050_v51  ;;  %v1242_v62 = vcombine.low %v324_v30, %v332_v29 }
  0x4a   : > { %5163 = vmatpush1.bf16.msra.mxu1 %v7119_v48  ;;  %v999_v48 = vrot.slane %v977_v33, %v8050_v51  ;;  %v760_v54 = vrot.slane %v744_v43, %v8050_v51  ;;  %v1241_v61 = vcombine.low %v283_v52, %v284_v42  ;;  %v1256_v52 = vrot.slane %v1240_v50, %v8050_v51 }
  0x4b   : > { %5507 = vmatpush1.bf16.msra.mxu0 %v7120_v49  ;;  %5164 = vmatprep.subr.bf16.mxu1 %v7121_v57  ;;  %v8149_v49 = vrot.slane %v743_v34, %v8050_v51  ;;  %v8156_v58 = vrot.slane %v745_v44, %v8050_v51  ;;  %v774_v53 = vrot.slane %v746_v45, %v8050_v51  ;;  %v489_v34 = vshrl.u32 %v6346_v15, 16  ;;  %v6311_v45 = vld [vmem:[%s8046_s9 + $0x10] sm:$0x66] }
  0x4c   : > { %5508 = vmatprep.subr.bf16.mxu0 %v7123_v63  ;;  %v1008_v57 = vcombine.high %v985_v28, %v992_v47  ;;  %v1009_v59 = vcombine.low %v999_v48, %v1006_v41  ;;  %v1010_v60 = vcombine.high %v999_v48, %v1006_v41  ;;  %v8162_v63 = vld [vmem:[%s8046_s9 + $0x10] sm:$0x33]  ;;  %v1263_v5 = vrot.slane %v1241_v61, %v8050_v51 }
  0x4d   : > { %v775_v35 = vcombine.low %v8149_v49, %v8156_v58  ;;  %v776_v39 = vcombine.low %v760_v54, %v774_v53  ;;  %v1270_v6 = vrot.slane %v1242_v62, %v8050_v51  ;;  %v6344_v7 = vcombine.low %v8162_v63, %v8162_v63  ;;  %v7163_v58 = vld [vmem:[%s7992_s4 + $0x120] ss:$8 sps:$4 sm:$0xff]  }
  0x4e   : > { %5165 = vmatpush1.bf16.msra.mxu1 %v7125_v16  ;;  %v1024_v1 = vrot.slane %v1008_v57, %v8050_v51  ;;  %v1031_v2 = vrot.slane %v1009_v59, %v8050_v51  ;;  %v1038_v3 = vrot.slane %v1010_v60, %v8050_v51  ;;  %v1271_v10 = vcombine.low %v1249_v40, %v1256_v52  ;;  %v6312_v59 = vld [vmem:[%s8046_s9 + $0x18] sm:$0x66] }
  0x4f   : > { %5509 = vmatpush1.bf16.msra.mxu0 %v7126_v17  ;;  %5177 = vmatprep.subr.bf16.mxu1 %v7141_v27  ;;  %v1272_v11 = vcombine.high %v1249_v40, %v1256_v52  ;;  %v1273_v13 = vcombine.low %v1263_v5, %v1270_v6  ;;  %v1274_v14 = vcombine.high %v1263_v5, %v1270_v6  ;;  %v475_v27 = vshrl.u32 %v6344_v7, 16 }
  0x50   : > { %5521 = vmatprep.subr.bf16.mxu0 %v7156_v36  ;;  %v1039_v8 = vcombine.low %v1017_v0, %v1031_v2  ;;  %v1040_v9 = vcombine.low %v1024_v1, %v1038_v3  ;;  %v6345_v55 = vcombine.high %v8162_v63, %v8162_v63  ;;  %v8188_v16 = vrot.slane %v1271_v10, %v8050_v51  ;;  %v6313_v0 = vld [vmem:[%s8046_s9 + $0x20] sm:$0x66] }
  0x51   : > { %v1288_v17 = vrot.slane %v1272_v11, %v8050_v51  ;;  %v8194_v20 = vrot.slane %v1273_v13, %v8050_v51  ;;  %v1302_v21 = vrot.slane %v1274_v14, %v8050_v51  ;;  %v477_v30 = vshll.u32 %v6344_v7, 16 }
  0x52   : > { %v1519_v18 = vunpack.i.h.s16 %v1039_v8  ;;  %v8191_v19 = vpack.i.b16 %v1039_v8, %v776_v39  ;;  %v482_v33 = vshrl.u32 %v6345_v55, 16  ;;  %v484_v36 = vshll.u32 %v6345_v55, 16 }
  0x53   : > { %v1303_v31 = vcombine.low %v8188_v16, %v8194_v20  ;;  %v1304_v32 = vcombine.low %v1288_v17, %v1302_v21  ;;  %v6349_v24 = vcombine.high %v8181_v12, %v8181_v12  ;;  %v479_v28 = vrot.slane %v477_v30, 1 }
  0x54   : > { %v8201_v25 = vpack.i.b16 %v1040_v9, %v1519_v18  ;;  %v6378_v26 = vcombine.low %v8149_v49, %v8191_v19  ;;  %v486_v29 = vrot.slane %v484_v36, 1  ;;  %v491_v43 = vshll.u32 %v6346_v15, 16 }
  0x55   : > { %v8214_v42 = vunpack.i.l.s16 %v1304_v32  ;;  %v8220_v47 = vor.u32 %v479_v28, %v475_v27  ;;  %v496_v48 = vshrl.u32 %v6347_v22, 16  ;;  %v498_v54 = vshll.u32 %v6347_v22, 16 }
  0x56   : > { %v6379_v37 = vcombine.low %v8201_v25, %v8188_v16  ;;  %v8210_v38 = vrot.slane %v6378_v26, %v8050_v51  ;;  %v8226_v50 = vor.u32 %v486_v29, %v482_v33  ;;  %v493_v53 = vrot.slane %v491_v43, 1 }
  0x57   : > { %v8224_v41 = vrot.slane %v8214_v42, %v8050_v51  ;;  %v503_v56 = vshrl.u32 %v6348_v23, 16  ;;  %v500_v60 = vrot.slane %v498_v54, 1  ;;  %v505_v61 = vshll.u32 %v6348_v23, 16 }
  0x58   : > { %v8217_v44 = vrot.slane %v6379_v37, %v8050_v51  ;;  %v510_v62 = vshrl.u32 %v6349_v24, 16  ;;  %v8234_v1 = vor.u32 %v493_v53, %v489_v34  ;;  %v512_v2 = vshll.u32 %v6349_v24, 16 }
  0x59   : > { %v2125_v39 = vcombine.high %v8224_v41, %v8224_v41  ;;  %v6350_v3 = vcombine.low %v6311_v45, %v6311_v45  ;;  %v8239_v52 = vor.u32 %v500_v60, %v496_v48  ;;  %v507_v5 = vrot.slane %v505_v61, 1 }
  0x5a   : > { %v2122_v57 = vcombine.high %v8210_v38, %v8217_v44  ;;  %v6351_v6 = vcombine.high %v6311_v45, %v6311_v45  ;;  %v514_v8 = vrot.slane %v512_v2, 1  ;;  %v6352_v9 = vcombine.low %v6312_v59, %v6312_v59 }
  0x5b   : > { %v8242_v7 = vrot.slane %v2125_v39, %v8050_v51  ;;  %v6353_v10 = vcombine.high %v6312_v59, %v6312_v59  ;;  %v8244_v11 = vor.u32 %v507_v5, %v503_v56  ;;  %v8246_v13 = vcombine.low %v6313_v0, %v6313_v0 }
  0x5c   : > { %v8237_v40 = vrot.slane %v2122_v57, %v8050_v51  ;;  %v8248_v14 = vcombine.high %v6313_v0, %v6313_v0  ;;  %v531_v55 = vrot.slane %v6350_v3, 1  ;;  %v8252_v17 = vor.u32 %v514_v8, %v510_v62 }
  0x5d   : > { %v532_v18 = vrot.slane %v6351_v6, 1  ;;  %v533_v21 = vrot.slane %v6352_v9, 1  ;;  %v534_v22 = vrot.slane %v6353_v10, 1  ;;  %v535_v23 = vrot.slane %v8246_v13, 1 }
  0x5e   : > { %v2187_v15 = vcombine.low %v8237_v40, %v8242_v7  ;;  %v536_v26 = vrot.slane %v8248_v14, 1  ;;  %v538_v27 = vshrl.u32 %v6350_v3, 16  ;;  %v541_v30 = vshll.u32 %v6350_v3, 16 }
  0x5f   : > { %v546_v32 = vshrl.u32 %v6351_v6, 16  ;;  %v549_v33 = vshll.u32 %v6351_v6, 16  ;;  %v554_v36 = vshrl.u32 %v6352_v9, 16  ;;  %v557_v24 = vshll.u32 %v6352_v9, 16 }
  0x60   : > { %5166 = vmatprep.mubr.bf16.mxu1 %v2187_v15  ;;  %v540_v37 = vrot.slane %v538_v27, 1  ;;  %v562_v28 = vshrl.u32 %v6353_v10, 16  ;;  %v565_v29 = vshll.u32 %v6353_v10, 16  ;;  %v543_v34 = vrot.slane %v541_v30, 2 }
  0x61   : > { %v548_v43 = vrot.slane %v546_v32, 1  ;;  %v551_v45 = vrot.slane %v549_v33, 2  ;;  %v556_v48 = vrot.slane %v554_v36, 1  ;;  %v559_v54 = vrot.slane %v557_v24, 2 }
  0x62   : > { %v564_v53 = vrot.slane %v562_v28, 1  ;;  %v567_v56 = vrot.slane %v565_v29, 2  ;;  %v570_v57 = vshrl.u32 %v8246_v13, 16  ;;  %v544_v59 = vor.u32 %v543_v34, %v540_v37 }
  0x63   : > { %v552_v60 = vor.u32 %v551_v45, %v548_v43  ;;  %v573_v61 = vshll.u32 %v8246_v13, 16  ;;  %v578_v62 = vshrl.u32 %v8248_v14, 16  ;;  %v560_v39 = vor.u32 %v559_v54, %v556_v48 }
  0x64   : > { %v568_v0 = vor.u32 %v567_v56, %v564_v53  ;;  %v572_v2 = vrot.slane %v570_v57, 1  ;;  %v581_v3 = vshll.u32 %v8248_v14, 16  ;;  %v844_v8 = vcombine.low %v8220_v47, %v8226_v50 }
  0x65   : > { %v575_v5 = vrot.slane %v573_v61, 2  ;;  %v580_v6 = vrot.slane %v578_v62, 1  ;;  %v845_v9 = vcombine.low %v531_v55, %v532_v18  ;;  %v846_v15 = vcombine.low %v544_v59, %v552_v60 }
  0x66   : > { %v583_v10 = vrot.slane %v581_v3, 2  ;;  %v853_v27 = vrot.slane %v8162_v63, %v8050_v51  ;;  %v1108_v13 = vcombine.low %v8234_v1, %v8239_v52  ;;  %v860_v32 = vrot.slane %v844_v8, %v8050_v51 }
  0x67   : > { %v576_v30 = vor.u32 %v575_v5, %v572_v2  ;;  %v867_v33 = vrot.slane %v845_v9, %v8050_v51  ;;  %v1109_v14 = vcombine.low %v533_v21, %v534_v22  ;;  %v874_v37 = vrot.slane %v846_v15, %v8050_v51 }
  0x68   : > { %v584_v36 = vor.u32 %v583_v10, %v580_v6  ;;  %v1110_v24 = vcombine.low %v560_v39, %v568_v0  ;;  %v1117_v47 = vrot.slane %v8174_v4, %v8050_v51  ;;  %v875_v50 = vcombine.low %v853_v27, %v860_v32 }
  0x69   : > { %v876_v55 = vcombine.high %v853_v27, %v860_v32  ;;  %v1124_v63 = vrot.slane %v1108_v13, %v8050_v51  ;;  %v1131_v18 = vrot.slane %v1109_v14, %v8050_v51  ;;  %v877_v1 = vcombine.low %v867_v33, %v874_v37 }
  0x6a   : > { %v878_v52 = vcombine.high %v867_v33, %v874_v37  ;;  %v1138_v28 = vrot.slane %v1110_v24, %v8050_v51  ;;  %v1372_v21 = vcombine.low %v8244_v11, %v8252_v17  ;;  %v885_v22 = vrot.slane %v875_v50, %v8050_v51  ;;  %v7159_v37 = vld [vmem:[%s7992_s4 + $0x114] ss:$8 sps:$4 sm:$0xff]  }
  0x6b   : > { %v892_v29 = vrot.slane %v876_v55, %v8050_v51  ;;  %v1139_v34 = vcombine.low %v1117_v47, %v1124_v63  ;;  %v1140_v43 = vcombine.high %v1117_v47, %v1124_v63  ;;  %v899_v4 = vrot.slane %v877_v1, %v8050_v51 }
  0x6c   : > { %v906_v45 = vrot.slane %v878_v52, %v8050_v51  ;;  %v1141_v48 = vcombine.low %v1131_v18, %v1138_v28  ;;  %v1142_v54 = vcombine.high %v1131_v18, %v1138_v28  ;;  %v1373_v57 = vcombine.low %v535_v23, %v536_v26  ;;  %v7157_v18 = vld [vmem:[%s7992_s4 + $0x110] ss:$8 sps:$4 sm:$0xff]   ;;  %v7165_v52 = vld [vmem:[%s7992_s4 + $0x124] ss:$8 sps:$4 sm:$0xff]  }
  0x6d   : > { %v1149_v53 = vrot.slane %v1139_v34, %v8050_v51  ;;  %v1156_v56 = vrot.slane %v1140_v43, %v8050_v51  ;;  %v1374_v59 = vcombine.low %v576_v30, %v584_v36  ;;  %v907_v60 = vcombine.low %v885_v22, %v899_v4  ;;  %v7139_v30 = vld [vmem:[%s7992_s4 + $0x100] ss:$8 sps:$4 sm:$0xff]  }
  0x6e   : > { %v908_v11 = vcombine.low %v892_v29, %v906_v45  ;;  %v1163_v17 = vrot.slane %v1141_v48, %v8050_v51  ;;  %v1170_v61 = vrot.slane %v1142_v54, %v8050_v51  ;;  %v1381_v62 = vrot.slane %v8181_v12, %v8050_v51 }
  0x6f   : > { %v1388_v39 = vrot.slane %v1372_v21, %v8050_v51  ;;  %v1395_v0 = vrot.slane %v1373_v57, %v8050_v51  ;;  %v1402_v2 = vrot.slane %v1374_v59, %v8050_v51  ;;  %v2121_v23 = vcombine.low %v8210_v38, %v8217_v44 }
  0x70   : > { %v1171_v3 = vcombine.low %v1149_v53, %v1163_v17  ;;  %v1172_v5 = vcombine.low %v1156_v56, %v1170_v61  ;;  %v8293_v26 = vrot.slane %v8224_v41, %v8050_v51  ;;  %v2188_v13 = vcombine.high %v8237_v40, %v8242_v7 }
  0x71   : > { %v1403_v6 = vcombine.low %v1381_v62, %v1388_v39  ;;  %v1404_v8 = vcombine.high %v1381_v62, %v1388_v39  ;;  %v1405_v12 = vcombine.low %v1395_v0, %v1402_v2  ;;  %v1406_v9 = vcombine.high %v1395_v0, %v1402_v2  ;;  %v7162_v2 = vld [vmem:[%s7992_s4 + $0x914] ss:$8 sps:$4 sm:$0xff]  }
  0x72   : > { %v1521_v10 = vunpack.i.h.s16 %v1171_v3  ;;  %v6372_v15 = vpack.i.b16 %v1171_v3, %v908_v11  ;;  %v8296_v27 = vrot.slane %v2121_v23, %v8050_v51  ;;  %v2078_v55 = vcombine.high %v8214_v42, %v8214_v42  ;;  %v7154_v11 = vld [vmem:[%s7992_s4 + $0x900] ss:$8 sps:$4 sm:$0xff]   ;;  %v7169_v3 = vld [vmem:[%s7992_s4 + $0x130] ss:$8 sps:$4 sm:$0xff]  }
  0x73   : > { %v1413_v38 = vrot.slane %v1403_v6, %v8050_v51  ;;  %v1420_v44 = vrot.slane %v1404_v8, %v8050_v51  ;;  %v1427_v41 = vrot.slane %v1405_v12, %v8050_v51  ;;  %v1434_v32 = vrot.slane %v1406_v9, %v8050_v51  ;;  %v7177_v6 = vld [vmem:[%s7992_s4 + $0x144] ss:$8 sps:$4 sm:$0xff]  }
  0x74   : > { %v6376_v33 = vpack.i.b16 %v1172_v5, %v1521_v10  ;;  %v6382_v14 = vcombine.low %v885_v22, %v6372_v15  ;;  %v2183_v36 = vcombine.low %v8296_v27, %v8293_v26  ;;  %v2184_v40 = vcombine.high %v8296_v27, %v8293_v26  ;;  %v7252_v26 = vld [vmem:[%s7992_s4 + $0xa04] ss:$8 sps:$4 sm:$0xff]   ;;  %v7259_v27 = vld [vmem:[%s7992_s4 + $0x220] ss:$8 sps:$4 sm:$0xff]  }
  0x75   : > { %v1435_v7 = vcombine.low %v1413_v38, %v1427_v41  ;;  %v1436_v24 = vcombine.low %v1420_v44, %v1434_v32  ;;  %v2075_v28 = vcombine.high %v775_v35, %v8191_v19  ;;  %v2077_v21 = vcombine.high %v8201_v25, %v1303_v31  ;;  %v7171_v25 = vld [vmem:[%s7992_s4 + $0x134] ss:$8 sps:$4 sm:$0xff]   ;;  %v7160_v44 = vld [vmem:[%s7992_s4 + $0x910] ss:$8 sps:$4 sm:$0xff]  }
  0x76   : > { %v6383_v47 = vcombine.low %v6376_v33, %v1413_v38  ;;  %v2319_v50 = vrot.slane %v6382_v14, %v8050_v51  ;;  %5167 = vmatmul.mubr.bf16.vlgmr.msra.gmra.mrb[0].mxu1 %v2183_v36  ;;  %v2309_v42 = vcombine.high %v907_v60, %v6372_v15  ;;  %v2120_v35 = vrot.slane %v2078_v55, %v8050_v51  ;;  %v7175_v14 = vld [vmem:[%s7992_s4 + $0x140] ss:$8 sps:$4 sm:$0xff]   ;;  %v7189_v55 = vld [vmem:[%s7992_s4 + $0x164] ss:$8 sps:$4 sm:$0xff]  }
  0x77   : > { %v1537_v63 = vunpack.i.l.s16 %v1436_v24  ;;  %5178 = vmatpush1.bf16.msra.mxu1 %v7139_v30  ;;  %5209 = vmatprep.mubr.bf16.mxu1 %v2188_v13  ;;  %v2311_v34 = vcombine.high %v6376_v33, %v1435_v7  ;;  %v2092_v45 = vrot.slane %v2075_v28, %v8050_v51  ;;  %v2106_v48 = vrot.slane %v2077_v21, %v8050_v51  ;;  %v7168_v33 = vld [vmem:[%s7992_s4 + $0x924] ss:$8 sps:$4 sm:$0xff]   ;;  %v7166_v24 = vld [vmem:[%s7992_s4 + $0x920] ss:$8 sps:$4 sm:$0xff]   ;;  %v7186_v21 = vld [vmem:[%s7992_s4 + $0x954] ss:$8 sps:$4 sm:$0xff]  }
  0x78   : > { %v2333_v1 = vrot.slane %v6383_v47, %v8050_v51  ;;  %5179 = vmatprep.subr.bf16.mxu1 %v7159_v37  ;;  %v2326_v16 = vrot.slane %v2309_v42, %v8050_v51  ;;  %v2126_v57 = vcombine.high %v2120_v35, %v2120_v35  ;;  %v8362_v9 = vrot.slane %v2120_v35, %v8050_v51  ;;  %v7183_v37 = vld [vmem:[%s7992_s4 + $0x154] ss:$8 sps:$4 sm:$0xff]   ;;  %v7178_v28 = vld [vmem:[%s7992_s4 + $0x940] ss:$8 sps:$4 sm:$0xff]   ;;  %v7193_v42 = vld [vmem:[%s7992_s4 + $0x170] ss:$8 sps:$4 sm:$0xff]  }
  0x79   : > { %v2312_v22 = vcombine.high %v1537_v63, %v1537_v63  ;;  %v2347_v29 = vrot.slane %v1537_v63, %v8050_v51  ;;  %v2124_v31 = vcombine.high %v2092_v45, %v2106_v48  ;;  %v2340_v53 = vrot.slane %v2311_v34, %v8050_v51  ;;  %v7174_v47 = vld [vmem:[%s7992_s4 + $0x934] ss:$8 sps:$4 sm:$0xff]   ;;  %v7172_v63 = vld [vmem:[%s7992_s4 + $0x930] ss:$8 sps:$4 sm:$0xff]   ;;  %v7192_v34 = vld [vmem:[%s7992_s4 + $0x964] ss:$8 sps:$4 sm:$0xff]  }
  0x7a   : > { %v2356_v43 = vcombine.high %v2319_v50, %v2333_v1  ;;  %v2355_v4 = vcombine.low %v2319_v50, %v2333_v1  ;;  %v2123_v60 = vcombine.low %v2092_v45, %v2106_v48  ;;  %v8352_v5 = vrot.slane %v2126_v57, %v8050_v51  ;;  %v7181_v50 = vld [vmem:[%s7992_s4 + $0x150] ss:$8 sps:$4 sm:$0xff]   ;;  %v7187_v1 = vld [vmem:[%s7992_s4 + $0x160] ss:$8 sps:$4 sm:$0xff]   ;;  %v7198_v48 = vld [vmem:[%s7992_s4 + $0x974] ss:$8 sps:$4 sm:$0xff]  }
  0x7b   : > { %v2359_v54 = vcombine.high %v2347_v29, %v2347_v29  ;;  %v8328_v49 = vrot.slane %v2347_v29, %v8050_v51  ;;  %5180 = vmatpush1.bf16.msra.mxu1 %v7157_v18  ;;  %v2354_v59 = vrot.slane %v2312_v22, %v8050_v51  ;;  %v8347_v62 = vrot.slane %v2124_v31, %v8050_v51  ;;  %v7180_v18 = vld [vmem:[%s7992_s4 + $0x944] ss:$8 sps:$4 sm:$0xff]   ;;  %v7184_v29 = vld [vmem:[%s7992_s4 + $0x950] ss:$8 sps:$4 sm:$0xff]   ;;  %v7190_v45 = vld [vmem:[%s7992_s4 + $0x960] ss:$8 sps:$4 sm:$0xff]  }
  0x7c   : > { %v2381_v19 = vrot.slane %v2356_v43, %v8050_v51  ;;  %v8335_v20 = vrot.slane %v2355_v4, %v8050_v51  ;;  %5181 = vmatprep.subr.bf16.mxu1 %v7165_v52  ;;  %v2358_v39 = vcombine.high %v2326_v16, %v2340_v53  ;;  %v8359_v12 = vrot.slane %v2123_v60, %v8050_v51  ;;  %v7195_v52 = vld [vmem:[%s7992_s4 + $0x174] ss:$8 sps:$4 sm:$0xff]   ;;  %v7201_v22 = vld [vmem:[%s7992_s4 + $0x184] ss:$8 sps:$4 sm:$0xff]   ;;  %v7199_v43 = vld [vmem:[%s7992_s4 + $0x180] ss:$8 sps:$4 sm:$0xff]  }
  0x7d   : > { %v2409_v56 = vrot.slane %v2359_v54, %v8050_v51  ;;  %v2360_v23 = vcombine.high %v2354_v59, %v2354_v59  ;;  %v2357_v10 = vcombine.low %v2326_v16, %v2340_v53  ;;  %v2189_v13 = vcombine.low %v8347_v62, %v8352_v5  ;;  %v7207_v4 = vld [vmem:[%s7992_s4 + $0x194] ss:$8 sps:$4 sm:$0xff]   ;;  %v7205_v54 = vld [vmem:[%s7992_s4 + $0x190] ss:$8 sps:$4 sm:$0xff]   ;;  %v7204_v16 = vld [vmem:[%s7992_s4 + $0x984] ss:$8 sps:$4 sm:$0xff]  }
  0x7e   : > { %v2417_v17 = vcombine.low %v8335_v20, %v8328_v49  ;;  %v2418_v61 = vcombine.high %v8335_v20, %v8328_v49  ;;  %v8356_v8 = vrot.slane %v2358_v39, %v8050_v51  ;;  %v8370_v38 = vrot.slane %v2354_v59, %v8050_v51  ;;  %v7196_v35 = vld [vmem:[%s7992_s4 + $0x970] ss:$8 sps:$4 sm:$0xff]   ;;  %v7202_v31 = vld [vmem:[%s7992_s4 + $0x980] ss:$8 sps:$4 sm:$0xff]   ;;  %v7210_v53 = vld [vmem:[%s7992_s4 + $0x994] ss:$8 sps:$4 sm:$0xff]  }
  0x7f   : > { %v2421_v0 = vcombine.low %v2381_v19, %v2409_v56  ;;  %5182 = vmatpush1.bf16.msra.mxu1 %v7163_v58  ;;  %v2422_v15 = vcombine.high %v2381_v19, %v2409_v56  ;;  %v8367_v30 = vrot.slane %v2360_v23, %v8050_v51  ;;  %v2185_v41 = vcombine.low %v8359_v12, %v8362_v9  ;;  %v7213_v58 = vld [vmem:[%s7992_s4 + $0x1a4] ss:$8 sps:$4 sm:$0xff]   ;;  %v7211_v19 = vld [vmem:[%s7992_s4 + $0x1a0] ss:$8 sps:$4 sm:$0xff]   ;;  %v7217_v56 = vld [vmem:[%s7992_s4 + $0x1b0] ss:$8 sps:$4 sm:$0xff]  }
  0x80   : > { %5183 = vmatprep.subr.bf16.mxu1 %v7171_v25  ;;  %v8376_v32 = vrot.slane %v2357_v10, %v8050_v51  ;;  %v7219_v25 = vld [vmem:[%s7992_s4 + $0x1b4] ss:$8 sps:$4 sm:$0xff]   ;;  %v7225_v57 = vld [vmem:[%s7992_s4 + $0x1c4] ss:$8 sps:$4 sm:$0xff]   ;;  %v7208_v59 = vld [vmem:[%s7992_s4 + $0x990] ss:$8 sps:$4 sm:$0xff]  }
  0x81   : > { %5510 = vmatprep.mubr.bf16.mxu0 %v2421_v0  ;;  %v2423_v36 = vcombine.low %v8356_v8, %v8367_v30  ;;  %v7216_v60 = vld [vmem:[%s7992_s4 + $0x9a4] ss:$8 sps:$4 sm:$0xff]   ;;  %v7214_v39 = vld [vmem:[%s7992_s4 + $0x9a0] ss:$8 sps:$4 sm:$0xff]   ;;  %v7222_v0 = vld [vmem:[%s7992_s4 + $0x9b4] ss:$8 sps:$4 sm:$0xff]  }
  0x82   : > { %5511 = vmatmul.mubr.bf16.vlgmr.msra.gmra.mrb[0].mxu0 %v2417_v17  ;;  %v2419_v7 = vcombine.low %v8376_v32, %v8370_v38  ;;  %v7231_v17 = vld [vmem:[%s7992_s4 + $0x1d4] ss:$8 sps:$4 sm:$0xff]   ;;  %v7220_v23 = vld [vmem:[%s7992_s4 + $0x9b0] ss:$8 sps:$4 sm:$0xff]   ;;  %v7235_v10 = vld [vmem:[%s7992_s4 + $0x1e0] ss:$8 sps:$4 sm:$0xff]  }
  0x83   : > { %5522 = vmatpush1.bf16.msra.mxu0 %v7154_v11  ;;  %5184 = vmatpush1.bf16.msra.mxu1 %v7169_v3  ;;  %v7223_v11 = vld [vmem:[%s7992_s4 + $0x1c0] ss:$8 sps:$4 sm:$0xff]   ;;  %v7237_v3 = vld [vmem:[%s7992_s4 + $0x1e4] ss:$8 sps:$4 sm:$0xff]   ;;  %v7270_v20 = vld [vmem:[%s7992_s4 + $0xa34] ss:$8 sps:$4 sm:$0xff]  }
  0x84   : > { %5523 = vmatprep.subr.bf16.mxu0 %v7162_v2  ;;  %5185 = vmatprep.subr.bf16.mxu1 %v7177_v6  ;;  %v7229_v2 = vld [vmem:[%s7992_s4 + $0x1d0] ss:$8 sps:$4 sm:$0xff]   ;;  %v7228_v6 = vld [vmem:[%s7992_s4 + $0x9c4] ss:$8 sps:$4 sm:$0xff]   ;;  %v7262_v49 = vld [vmem:[%s7992_s4 + $0xa20] ss:$8 sps:$4 sm:$0xff]  }
  0x85   : > { %5553 = vmatprep.mubr.bf16.mxu0 %v2422_v15  ;;  %v7243_v15 = vld [vmem:[%s7992_s4 + $0x1f4] ss:$8 sps:$4 sm:$0xff]  }
  0x87   : > { %5524 = vmatpush1.bf16.msra.mxu0 %v7160_v44  ;;  %5186 = vmatpush1.bf16.msra.mxu1 %v7175_v14  ;;  %v7226_v44 = vld [vmem:[%s7992_s4 + $0x9c0] ss:$8 sps:$4 sm:$0xff]   ;;  %v7241_v14 = vld [vmem:[%s7992_s4 + $0x1f0] ss:$8 sps:$4 sm:$0xff]  }
  0x88   : > { %5525 = vmatprep.subr.bf16.mxu0 %v7168_v33  ;;  %5187 = vmatprep.subr.bf16.mxu1 %v7183_v37  ;;  %v7234_v33 = vld [vmem:[%s7992_s4 + $0x9d4] ss:$8 sps:$4 sm:$0xff]   ;;  %v7249_v37 = vld [vmem:[%s7992_s4 + $0x204] ss:$8 sps:$4 sm:$0xff]  }
  0x8b   : > { %5526 = vmatpush1.bf16.msra.mxu0 %v7166_v24  ;;  %5188 = vmatpush1.bf16.msra.mxu1 %v7181_v50  ;;  %v7232_v24 = vld [vmem:[%s7992_s4 + $0x9d0] ss:$8 sps:$4 sm:$0xff]   ;;  %v7247_v50 = vld [vmem:[%s7992_s4 + $0x200] ss:$8 sps:$4 sm:$0xff]  }
  0x8c   : > { %5527 = vmatprep.subr.bf16.mxu0 %v7174_v47  ;;  %5189 = vmatprep.subr.bf16.mxu1 %v7189_v55  ;;  %v7240_v47 = vld [vmem:[%s7992_s4 + $0x9e4] ss:$8 sps:$4 sm:$0xff]   ;;  %v7255_v55 = vld [vmem:[%s7992_s4 + $0x214] ss:$8 sps:$4 sm:$0xff]  }
  0x8f   : > { %5528 = vmatpush1.bf16.msra.mxu0 %v7172_v63  ;;  %5190 = vmatpush1.bf16.msra.mxu1 %v7187_v1  ;;  %v7238_v63 = vld [vmem:[%s7992_s4 + $0x9e0] ss:$8 sps:$4 sm:$0xff]   ;;  %v7253_v1 = vld [vmem:[%s7992_s4 + $0x210] ss:$8 sps:$4 sm:$0xff]  }
  0x90   : > { %5529 = vmatprep.subr.bf16.mxu0 %v7180_v18  ;;  %5191 = vmatprep.subr.bf16.mxu1 %v7195_v52  ;;  %v7246_v18 = vld [vmem:[%s7992_s4 + $0x9f4] ss:$8 sps:$4 sm:$0xff]   ;;  %v7261_v52 = vld [vmem:[%s7992_s4 + $0x224] ss:$8 sps:$4 sm:$0xff]  }
  0x93   : > { %5530 = vmatpush1.bf16.msra.mxu0 %v7178_v28  ;;  %5192 = vmatpush1.bf16.msra.mxu1 %v7193_v42  ;;  %v7244_v28 = vld [vmem:[%s7992_s4 + $0x9f0] ss:$8 sps:$4 sm:$0xff]   ;;  %v7258_v42 = vld [vmem:[%s7992_s4 + $0xa14] ss:$8 sps:$4 sm:$0xff]  }
  0x94   : > { %5531 = vmatprep.subr.bf16.mxu0 %v7186_v21  ;;  %5193 = vmatprep.subr.bf16.mxu1 %v7201_v22  ;;  %v7250_v21 = vld [vmem:[%s7992_s4 + $0xa00] ss:$8 sps:$4 sm:$0xff]   ;;  %v7265_v22 = vld [vmem:[%s7992_s4 + $0x230] ss:$8 sps:$4 sm:$0xff]  }
  0x97   : > { %5532 = vmatpush1.bf16.msra.mxu0 %v7184_v29  ;;  %5194 = vmatpush1.bf16.msra.mxu1 %v7199_v43  ;;  %v2424_v29 = vcombine.high %v8356_v8, %v8367_v30  ;;  %v7391_v43 = vld [vmem:[%s7992_s4 + $0x380] ss:$8 sps:$4 sm:$0xff]  }
  0x98   : > { %5533 = vmatprep.subr.bf16.mxu0 %v7192_v34  ;;  %5195 = vmatprep.subr.bf16.mxu1 %v7207_v4  ;;  %v7273_v34 = vld [vmem:[%s7992_s4 + $0x244] ss:$8 sps:$4 sm:$0xff]  }
  0x9b   : > { %5534 = vmatpush1.bf16.msra.mxu0 %v7190_v45  ;;  %5196 = vmatpush1.bf16.msra.mxu1 %v7205_v54  ;;  %v7256_v45 = vld [vmem:[%s7992_s4 + $0xa10] ss:$8 sps:$4 sm:$0xff]   ;;  %v7271_v54 = vld [vmem:[%s7992_s4 + $0x240] ss:$8 sps:$4 sm:$0xff]  }
  0x9c   : > { %5535 = vmatprep.subr.bf16.mxu0 %v7198_v48  ;;  %5197 = vmatprep.subr.bf16.mxu1 %v7213_v58  ;;  %v7264_v48 = vld [vmem:[%s7992_s4 + $0xa24] ss:$8 sps:$4 sm:$0xff]   ;;  %v7279_v58 = vld [vmem:[%s7992_s4 + $0x254] ss:$8 sps:$4 sm:$0xff]  }
  0x9f   : > { %5536 = vmatpush1.bf16.msra.mxu0 %v7196_v35  ;;  %5198 = vmatpush1.bf16.msra.mxu1 %v7211_v19  ;;  %v7285_v35 = vld [vmem:[%s7992_s4 + $0x264] ss:$8 sps:$4 sm:$0xff]  }
  0xa0   : > { %5537 = vmatprep.subr.bf16.mxu0 %v7204_v16  ;;  %5199 = vmatprep.subr.bf16.mxu1 %v7219_v25  ;;  %v7268_v16 = vld [vmem:[%s7992_s4 + $0xa30] ss:$8 sps:$4 sm:$0xff]   ;;  %v7276_v19 = vld [vmem:[%s7992_s4 + $0xa44] ss:$8 sps:$4 sm:$0xff]   ;;  %v7291_v25 = vld [vmem:[%s7992_s4 + $0x274] ss:$8 sps:$4 sm:$0xff]  }
  0xa3   : > { %5538 = vmatpush1.bf16.msra.mxu0 %v7202_v31  ;;  %5200 = vmatpush1.bf16.msra.mxu1 %v7217_v56  ;;  %v7274_v31 = vld [vmem:[%s7992_s4 + $0xa40] ss:$8 sps:$4 sm:$0xff]   ;;  %v7289_v56 = vld [vmem:[%s7992_s4 + $0x270] ss:$8 sps:$4 sm:$0xff]  }
  0xa4   : > { %5539 = vmatprep.subr.bf16.mxu0 %v7210_v53  ;;  %5201 = vmatprep.subr.bf16.mxu1 %v7225_v57  ;;  %v7282_v53 = vld [vmem:[%s7992_s4 + $0xa54] ss:$8 sps:$4 sm:$0xff]   ;;  %v7297_v57 = vld [vmem:[%s7992_s4 + $0x284] ss:$8 sps:$4 sm:$0xff]  }
  0xa7   : > { %5540 = vmatpush1.bf16.msra.mxu0 %v7208_v59  ;;  %5202 = vmatpush1.bf16.msra.mxu1 %v7223_v11  ;;  %v7280_v59 = vld [vmem:[%s7992_s4 + $0xa50] ss:$8 sps:$4 sm:$0xff]   ;;  %v7295_v11 = vld [vmem:[%s7992_s4 + $0x280] ss:$8 sps:$4 sm:$0xff]  }
  0xa8   : > { %5541 = vmatprep.subr.bf16.mxu0 %v7216_v60  ;;  %5203 = vmatprep.subr.bf16.mxu1 %v7231_v17  ;;  %v7288_v60 = vld [vmem:[%s7992_s4 + $0xa64] ss:$8 sps:$4 sm:$0xff]   ;;  %v7303_v17 = vld [vmem:[%s7992_s4 + $0x294] ss:$8 sps:$4 sm:$0xff]  }
  0xab   : > { %5542 = vmatpush1.bf16.msra.mxu0 %v7214_v39  ;;  %5204 = vmatpush1.bf16.msra.mxu1 %v7229_v2  ;;  %v7286_v39 = vld [vmem:[%s7992_s4 + $0xa60] ss:$8 sps:$4 sm:$0xff]   ;;  %v7301_v2 = vld [vmem:[%s7992_s4 + $0x290] ss:$8 sps:$4 sm:$0xff]  }
  0xac   : > { %5543 = vmatprep.subr.bf16.mxu0 %v7222_v0  ;;  %5205 = vmatprep.subr.bf16.mxu1 %v7237_v3  ;;  %v7294_v0 = vld [vmem:[%s7992_s4 + $0xa74] ss:$8 sps:$4 sm:$0xff]   ;;  %v7309_v3 = vld [vmem:[%s7992_s4 + $0x2a4] ss:$8 sps:$4 sm:$0xff]  }
  0xaf   : > { %5544 = vmatpush1.bf16.msra.mxu0 %v7220_v23  ;;  %5206 = vmatpush1.bf16.msra.mxu1 %v7235_v10  ;;  %v7292_v23 = vld [vmem:[%s7992_s4 + $0xa70] ss:$8 sps:$4 sm:$0xff]   ;;  %v7307_v10 = vld [vmem:[%s7992_s4 + $0x2a0] ss:$8 sps:$4 sm:$0xff]  }
  0xb0   : > { %5545 = vmatprep.subr.bf16.mxu0 %v7228_v6  ;;  %5207 = vmatprep.subr.bf16.mxu1 %v7243_v15  ;;  %v7300_v6 = vld [vmem:[%s7992_s4 + $0xa84] ss:$8 sps:$4 sm:$0xff]   ;;  %v7315_v15 = vld [vmem:[%s7992_s4 + $0x2b4] ss:$8 sps:$4 sm:$0xff]  }
  0xb3   : > { %5546 = vmatpush1.bf16.msra.mxu0 %v7226_v44  ;;  %5208 = vmatpush1.bf16.msra.mxu1 %v7241_v14  ;;  %v7298_v44 = vld [vmem:[%s7992_s4 + $0xa80] ss:$8 sps:$4 sm:$0xff]   ;;  %v7313_v14 = vld [vmem:[%s7992_s4 + $0x2b0] ss:$8 sps:$4 sm:$0xff]  }
  0xb4   : > { %5547 = vmatprep.subr.bf16.mxu0 %v7234_v33  ;;  %5220 = vmatprep.subr.bf16.mxu1 %v7249_v37  ;;  %v7306_v33 = vld [vmem:[%s7992_s4 + $0xa94] ss:$8 sps:$4 sm:$0xff]   ;;  %v7321_v37 = vld [vmem:[%s7992_s4 + $0x2c4] ss:$8 sps:$4 sm:$0xff]  }
  0xb6   : > { %5210 = vmatmul.mubr.bf16.vlgmr.msra.gmra.mrb[0].mxu1 %v2184_v40  ;;  %v7267_v40 = vld [vmem:[%s7992_s4 + $0x234] ss:$8 sps:$4 sm:$0xff]  }
  0xb7   : > { %5548 = vmatpush1.bf16.msra.mxu0 %v7232_v24  ;;  %5221 = vmatpush1.bf16.msra.mxu1 %v7247_v50  ;;  %v8498_v24 = vld [vmem:[%s8046_s9 + $0x10] sm:$0x33] }
  0xb8   : > { %5549 = vmatprep.subr.bf16.mxu0 %v7240_v47  ;;  %5222 = vmatprep.subr.bf16.mxu1 %v7255_v55  ;;  %v6334_v47 = vcombine.low %v8498_v24, %v8498_v24  ;;  %v6335_v50 = vcombine.high %v8498_v24, %v8498_v24  ;;  %v7304_v55 = vld [vmem:[%s7992_s4 + $0xa90] ss:$8 sps:$4 sm:$0xff]  }
  0xb9   : > { %5252 = vmatprep.mubr.bf16.mxu1 %v2189_v13  ;;  %v2190_v13 = vcombine.high %v8347_v62, %v8352_v5 }
  0xbb   : > { %5550 = vmatpush1.bf16.msra.mxu0 %v7238_v63  ;;  %5223 = vmatpush1.bf16.msra.mxu1 %v7253_v1  ;;  %v7319_v63 = vld [vmem:[%s7992_s4 + $0x2c0] ss:$8 sps:$4 sm:$0xff]   ;;  %v7327_v1 = vld [vmem:[%s7992_s4 + $0x2d4] ss:$8 sps:$4 sm:$0xff]  }
  0xbc   : > { %5551 = vmatprep.subr.bf16.mxu0 %v7246_v18  ;;  %5224 = vmatprep.subr.bf16.mxu1 %v7261_v52  ;;  %v7312_v18 = vld [vmem:[%s7992_s4 + $0xaa4] ss:$8 sps:$4 sm:$0xff]  }
  0xbd   : > { %v8509_v52 = vld [vmem:[%s8046_s9 + $0x8] sm:$0x33] }
  0xbf   : > { %5552 = vmatpush1.bf16.msra.mxu0 %v7244_v28  ;;  %5225 = vmatpush1.bf16.msra.mxu1 %v7259_v27  ;;  %v8512_v28 = vld [vmem:[%s8046_s9 + $0x18] sm:$0x33]  ;;  %v6333_v27 = vcombine.high %v8509_v52, %v8509_v52 }
  0xc0   : > { %5564 = vmatprep.subr.bf16.mxu0 %v7252_v26  ;;  %5226 = vmatprep.subr.bf16.mxu1 %v7267_v40  ;;  %v6332_v26 = vcombine.low %v8509_v52, %v8509_v52  ;;  %v365_v40 = vshll.u32 %v6334_v47, 16 }
  0xc2   : > { %5554 = vmatmul.mubr.bf16.vlgmr.msra.gmra.mrb[0].mxu0 %v2418_v61  ;;  %v7277_v61 = vld [vmem:[%s7992_s4 + $0x250] ss:$8 sps:$4 sm:$0xff]  }
  0xc3   : > { %5565 = vmatpush1.bf16.msra.mxu0 %v7250_v21  ;;  %5227 = vmatpush1.bf16.msra.mxu1 %v7265_v22  ;;  %v372_v21 = vshll.u32 %v6335_v50, 16  ;;  %v7325_v22 = vld [vmem:[%s7992_s4 + $0x2d0] ss:$8 sps:$4 sm:$0xff]  }
  0xc4   : > { %5566 = vmatprep.subr.bf16.mxu0 %v7258_v42  ;;  %5228 = vmatprep.subr.bf16.mxu1 %v7273_v34  ;;  %v7310_v42 = vld [vmem:[%s7992_s4 + $0xaa0] ss:$8 sps:$4 sm:$0xff]   ;;  %v8522_v34 = vcombine.low %v8512_v28, %v8512_v28 }
  0xc5   : > { %5596 = vmatprep.mubr.bf16.mxu0 %v2423_v36  ;;  %v7283_v36 = vld [vmem:[%s7992_s4 + $0x260] ss:$8 sps:$4 sm:$0xff]  }
  0xc7   : > { %5567 = vmatpush1.bf16.msra.mxu0 %v7256_v45  ;;  %5229 = vmatpush1.bf16.msra.mxu1 %v7271_v54  ;;  %v8526_v45 = vcombine.high %v8512_v28, %v8512_v28  ;;  %v7333_v54 = vld [vmem:[%s7992_s4 + $0x2e4] ss:$8 sps:$4 sm:$0xff]  }
  0xc8   : > { %5568 = vmatprep.subr.bf16.mxu0 %v7264_v48  ;;  %5230 = vmatprep.subr.bf16.mxu1 %v7279_v58  ;;  %v7318_v48 = vld [vmem:[%s7992_s4 + $0xab4] ss:$8 sps:$4 sm:$0xff]   ;;  %v351_v58 = vshll.u32 %v6332_v26, 16 }
  0xcb   : > { %5569 = vmatpush1.bf16.msra.mxu0 %v7262_v49  ;;  %5231 = vmatpush1.bf16.msra.mxu1 %v7277_v61  ;;  %v358_v49 = vshll.u32 %v6333_v27, 16  ;;  %v6305_v61 = vld [vmem:[%s8046_s9 + $0x8] sm:$0x66] }
  0xcc   : > { %5570 = vmatprep.subr.bf16.mxu0 %v7270_v20  ;;  %5232 = vmatprep.subr.bf16.mxu1 %v7285_v35  ;;  %v7316_v20 = vld [vmem:[%s7992_s4 + $0xab0] ss:$8 sps:$4 sm:$0xff]  }
  0xcd   : > { %v6306_v35 = vld [vmem:[%s8046_s9 + $0x10] sm:$0x66] }
  0xcf   : > { %5571 = vmatpush1.bf16.msra.mxu0 %v7268_v16  ;;  %5233 = vmatpush1.bf16.msra.mxu1 %v7283_v36  ;;  %v363_v16 = vshrl.u32 %v6334_v47, 16  ;;  %v7324_v36 = vld [vmem:[%s7992_s4 + $0xac4] ss:$8 sps:$4 sm:$0xff]  }
  0xd0   : > { %5572 = vmatprep.subr.bf16.mxu0 %v7276_v19  ;;  %5234 = vmatprep.subr.bf16.mxu1 %v7291_v25  ;;  %v370_v19 = vshrl.u32 %v6335_v50, 16  ;;  %v6307_v25 = vld [vmem:[%s8046_s9 + $0x18] sm:$0x66] }
  0xd1   : > { %v8556_v47 = vcombine.high %v6307_v25, %v6307_v25  ;;  %v7330_v50 = vld [vmem:[%s7992_s4 + $0xad4] ss:$8 sps:$4 sm:$0xff]  }
  0xd3   : > { %5573 = vmatpush1.bf16.msra.mxu0 %v7274_v31  ;;  %5235 = vmatpush1.bf16.msra.mxu1 %v7289_v56  ;;  %v349_v31 = vshrl.u32 %v6332_v26, 16  ;;  %v367_v56 = vrot.slane %v365_v40, 1 }
  0xd4   : > { %5574 = vmatprep.subr.bf16.mxu0 %v7282_v53  ;;  %5236 = vmatprep.subr.bf16.mxu1 %v7297_v57  ;;  %v356_v53 = vshrl.u32 %v6333_v27, 16  ;;  %v374_v57 = vrot.slane %v372_v21, 1  ;;  %v7345_v27 = vld [vmem:[%s7992_s4 + $0x304] ss:$8 sps:$4 sm:$0xff]  }
  0xd7   : > { %5575 = vmatpush1.bf16.msra.mxu0 %v7280_v59  ;;  %5237 = vmatpush1.bf16.msra.mxu1 %v7295_v11  ;;  %v7331_v59 = vld [vmem:[%s7992_s4 + $0x2e0] ss:$8 sps:$4 sm:$0xff]   ;;  %v360_v11 = vrot.slane %v358_v49, 1 }
  0xd8   : > { %5576 = vmatprep.subr.bf16.mxu0 %v7288_v60  ;;  %5238 = vmatprep.subr.bf16.mxu1 %v7303_v17  ;;  %v353_v60 = vrot.slane %v351_v58, 1  ;;  %v379_v17 = vshll.u32 %v8522_v34, 16 }
  0xdb   : > { %5577 = vmatpush1.bf16.msra.mxu0 %v7286_v39  ;;  %5239 = vmatpush1.bf16.msra.mxu1 %v7301_v2  ;;  %v386_v39 = vshll.u32 %v8526_v45, 16  ;;  %v8539_v2 = vcombine.low %v6305_v61, %v6305_v61 }
  0xdc   : > { %5578 = vmatprep.subr.bf16.mxu0 %v7294_v0  ;;  %5240 = vmatprep.subr.bf16.mxu1 %v7309_v3  ;;  %v7339_v0 = vld [vmem:[%s7992_s4 + $0x2f4] ss:$8 sps:$4 sm:$0xff]   ;;  %v8541_v3 = vcombine.high %v6305_v61, %v6305_v61  ;;  %v7336_v61 = vld [vmem:[%s7992_s4 + $0xae4] ss:$8 sps:$4 sm:$0xff]  }
  0xdd   : > { %v8564_v26 = vrot.slane %v386_v39, 1  ;;  %v412_v40 = vshrl.u32 %v8539_v2, 16  ;;  %v415_v21 = vshll.u32 %v8539_v2, 16 }
  0xdf   : > { %5579 = vmatpush1.bf16.msra.mxu0 %v7292_v23  ;;  %5241 = vmatpush1.bf16.msra.mxu1 %v7307_v10  ;;  %v7322_v23 = vld [vmem:[%s7992_s4 + $0xac0] ss:$8 sps:$4 sm:$0xff]   ;;  %v8545_v10 = vcombine.low %v6306_v35, %v6306_v35 }
  0xe0   : > { %5580 = vmatprep.subr.bf16.mxu0 %v7300_v6  ;;  %5242 = vmatprep.subr.bf16.mxu1 %v7315_v15  ;;  %v377_v6 = vshrl.u32 %v8522_v34, 16  ;;  %v8547_v15 = vcombine.high %v6306_v35, %v6306_v35  ;;  %v414_v35 = vrot.slane %v412_v40, 1  ;;  %v7342_v40 = vld [vmem:[%s7992_s4 + $0xaf4] ss:$8 sps:$4 sm:$0xff]  }
  0xe1   : > { %v431_v58 = vshll.u32 %v8545_v10, 16 }
  0xe2   : > { %v436_v49 = vshrl.u32 %v8547_v15, 16 }
  0xe3   : > { %5581 = vmatpush1.bf16.msra.mxu0 %v7298_v44  ;;  %5243 = vmatpush1.bf16.msra.mxu1 %v7313_v14  ;;  %v8549_v44 = vcombine.low %v6307_v25, %v6307_v25  ;;  %v8553_v14 = vor.u32 %v374_v57, %v370_v19  ;;  %v7343_v25 = vld [vmem:[%s7992_s4 + $0x300] ss:$8 sps:$4 sm:$0xff]   ;;  %v408_v57 = vrot.slane %v8547_v15, 1  ;;  %v433_v39 = vrot.slane %v431_v58, 2 }
  0xe4   : > { %5582 = vmatprep.subr.bf16.mxu0 %v7306_v33  ;;  %5244 = vmatprep.subr.bf16.mxu1 %v7321_v37  ;;  %v8551_v33 = vor.u32 %v367_v56, %v363_v16  ;;  %v384_v37 = vshrl.u32 %v8526_v45, 16  ;;  %v417_v16 = vrot.slane %v415_v21, 2  ;;  %v407_v56 = vrot.slane %v8545_v10, 1  ;;  %v7349_v21 = vld [vmem:[%s7992_s4 + $0x310] ss:$8 sps:$4 sm:$0xff]  }
  0xe7   : > { %5583 = vmatpush1.bf16.msra.mxu0 %v7304_v55  ;;  %5245 = vmatpush1.bf16.msra.mxu1 %v7319_v63  ;;  %v7337_v55 = vld [vmem:[%s7992_s4 + $0x2f0] ss:$8 sps:$4 sm:$0xff]   ;;  %v8560_v63 = vor.u32 %v353_v60, %v349_v31  ;;  %v405_v31 = vrot.slane %v8539_v2, 1  ;;  %v418_v60 = vor.u32 %v417_v16, %v414_v35  ;;  %v444_v2 = vshrl.u32 %v8549_v44, 16  ;;  %v7363_v16 = vld [vmem:[%s7992_s4 + $0x334] ss:$8 sps:$4 sm:$0xff]  }
  0xe8   : > { %5584 = vmatprep.subr.bf16.mxu0 %v7312_v18  ;;  %5246 = vmatprep.subr.bf16.mxu1 %v7327_v1  ;;  %v8562_v18 = vor.u32 %v360_v11, %v356_v53  ;;  %v381_v1 = vrot.slane %v379_v17, 1  ;;  %v406_v53 = vrot.slane %v8541_v3, 1 }
  0xea   : > { %v779_v35 = vcombine.low %v405_v31, %v406_v53 }
  0xeb   : > { %5585 = vmatpush1.bf16.msra.mxu0 %v7310_v42  ;;  %5247 = vmatpush1.bf16.msra.mxu1 %v7325_v22  ;;  %v420_v42 = vshrl.u32 %v8541_v3, 16  ;;  %v423_v22 = vshll.u32 %v8541_v3, 16  ;;  %v447_v3 = vshll.u32 %v8549_v44, 16 }
  0xec   : > { %5586 = vmatprep.subr.bf16.mxu0 %v7318_v48  ;;  %5248 = vmatprep.subr.bf16.mxu1 %v7333_v54  ;;  %v7328_v48 = vld [vmem:[%s7992_s4 + $0xad0] ss:$8 sps:$4 sm:$0xff]   ;;  %v428_v54 = vshrl.u32 %v8545_v10, 16  ;;  %v8640_v31 = vrot.slane %v779_v35, %v8050_v51 }
  0xed   : > { %v422_v19 = vrot.slane %v420_v42, 1  ;;  %v449_v58 = vrot.slane %v447_v3, 2 }
  0xee   : > { %v430_v17 = vrot.slane %v428_v54, 1  ;;  %v446_v54 = vrot.slane %v444_v2, 1 }
  0xef   : > { %5587 = vmatpush1.bf16.msra.mxu0 %v7316_v20  ;;  %5249 = vmatpush1.bf16.msra.mxu1 %v7331_v59  ;;  %v439_v20 = vshll.u32 %v8547_v15, 16  ;;  %v7351_v59 = vld [vmem:[%s7992_s4 + $0x314] ss:$8 sps:$4 sm:$0xff]   ;;  %v452_v15 = vshrl.u32 %v8556_v47, 16 }
  0xf0   : > { %5588 = vmatprep.subr.bf16.mxu0 %v7324_v36  ;;  %5250 = vmatprep.subr.bf16.mxu1 %v7339_v0  ;;  %v425_v36 = vrot.slane %v423_v22, 2  ;;  %v438_v0 = vrot.slane %v436_v49, 1  ;;  %v434_v10 = vor.u32 %v433_v39, %v430_v17  ;;  %v7357_v22 = vld [vmem:[%s7992_s4 + $0x324] ss:$8 sps:$4 sm:$0xff]   ;;  %v450_v34 = vor.u32 %v449_v58, %v446_v54  ;;  %v7367_v54 = vld [vmem:[%s7992_s4 + $0x340] ss:$8 sps:$4 sm:$0xff]  }
  0xf1   : > { %v454_v49 = vrot.slane %v452_v15, 1  ;;  %v7352_v15 = vld [vmem:[%s7992_s4 + $0xb10] ss:$8 sps:$4 sm:$0xff]  }
  0xf2   : > { %v426_v11 = vor.u32 %v425_v36, %v422_v19  ;;  %v389_v19 = vor.u32 %v8564_v26, %v384_v37  ;;  %v8612_v36 = vrot.slane %v8509_v52, %v8050_v51  ;;  %v8626_v52 = vld [vmem:[%s8046_s9 + $0x20] sm:$0x33] }
  0xf3   : > { %5589 = vmatpush1.bf16.msra.mxu0 %v7322_v23  ;;  %5251 = vmatpush1.bf16.msra.mxu1 %v7337_v55  ;;  %v441_v23 = vrot.slane %v439_v20, 2  ;;  %v778_v55 = vcombine.low %v8560_v63, %v8562_v18  ;;  %v7340_v63 = vld [vmem:[%s7992_s4 + $0xaf0] ss:$8 sps:$4 sm:$0xff]   ;;  %v7355_v18 = vld [vmem:[%s7992_s4 + $0x320] ss:$8 sps:$4 sm:$0xff]  }
  0xf4   : > { %5590 = vmatprep.subr.bf16.mxu0 %v7330_v50  ;;  %5263 = vmatprep.subr.bf16.mxu1 %v7345_v27  ;;  %v455_v50 = vshll.u32 %v8556_v47, 16  ;;  %v7334_v27 = vld [vmem:[%s7992_s4 + $0xae0] ss:$8 sps:$4 sm:$0xff]  }
  0xf5   : > { %v442_v42 = vor.u32 %v441_v23, %v438_v0  ;;  %v8615_v62 = vrot.slane %v778_v55, %v8050_v51  ;;  %v6318_v37 = vld [vmem:[%s8046_s9 + $0x20] sm:$0x66]  ;;  %v7354_v0 = vld [vmem:[%s7992_s4 + $0xb14] ss:$8 sps:$4 sm:$0xff]  }
  0xf6   : > { %5253 = vmatmul.mubr.bf16.vlgmr.msra.gmra.mrb[0].mxu1 %v2185_v41  ;;  %v1042_v41 = vcombine.low %v8551_v33, %v8553_v14  ;;  %v457_v20 = vrot.slane %v455_v50, 2  ;;  %v780_v33 = vcombine.low %v418_v60, %v426_v11  ;;  %v1043_v14 = vcombine.low %v407_v56, %v408_v57  ;;  %v7361_v60 = vld [vmem:[%s7992_s4 + $0x330] ss:$8 sps:$4 sm:$0xff]   ;;  %v7369_v23 = vld [vmem:[%s7992_s4 + $0x344] ss:$8 sps:$4 sm:$0xff]  }
  0xf7   : > { %5591 = vmatpush1.bf16.msra.mxu0 %v7328_v48  ;;  %5264 = vmatpush1.bf16.msra.mxu1 %v7343_v25  ;;  %v382_v48 = vor.u32 %v381_v1, %v377_v6  ;;  %v1044_v5 = vcombine.low %v434_v10, %v442_v42  ;;  %v8620_v6 = vrot.slane %v8498_v24, %v8050_v51  ;;  %v410_v1 = vrot.slane %v8556_v47, 1  ;;  %v8637_v25 = vld [vmem:[%s8046_s9 + $0x18] sm:$0x33] }
  0xf8   : > { %5592 = vmatprep.subr.bf16.mxu0 %v7336_v61  ;;  %5265 = vmatprep.subr.bf16.mxu1 %v7351_v59  ;;  %v7348_v61 = vld [vmem:[%s7992_s4 + $0xb04] ss:$8 sps:$4 sm:$0xff]   ;;  %v8623_v45 = vrot.slane %v1042_v41, %v8050_v51  ;;  %v458_v26 = vor.u32 %v457_v20, %v454_v49  ;;  %v8643_v53 = vrot.slane %v780_v33, %v8050_v51  ;;  %v7346_v59 = vld [vmem:[%s7992_s4 + $0xb00] ss:$8 sps:$4 sm:$0xff]  }
  0xf9   : > { %5295 = vmatprep.mubr.bf16.mxu1 %v2190_v13  ;;  %v409_v13 = vrot.slane %v8549_v44, 1  ;;  %v8631_v44 = vrot.slane %v1043_v14, %v8050_v51  ;;  %v8634_v24 = vrot.slane %v1044_v5, %v8050_v51  ;;  %v809_v47 = vcombine.low %v8612_v36, %v8615_v62  ;;  %v8700_v20 = vld [vmem:[%s8046_s9 + $0x28] sm:$0x33] }
  0xfa   : > { %v8649_v56 = vcombine.low %v8626_v52, %v8626_v52  ;;  %v8653_v57 = vcombine.high %v8626_v52, %v8626_v52  ;;  %v1073_v11 = vcombine.low %v8620_v6, %v8623_v45  ;;  %v1306_v17 = vcombine.low %v382_v48, %v389_v19  ;;  %v7358_v14 = vld [vmem:[%s7992_s4 + $0xb20] ss:$8 sps:$4 sm:$0xff]  }
  0xfb   : > { %5593 = vmatpush1.bf16.msra.mxu0 %v7334_v27  ;;  %5266 = vmatpush1.bf16.msra.mxu1 %v7349_v21  ;;  %v8659_v39 = vcombine.low %v6318_v37, %v6318_v37  ;;  %v1075_v2 = vcombine.low %v8631_v44, %v8634_v24  ;;  %v1307_v3 = vcombine.low %v409_v13, %v410_v1  ;;  %v7373_v13 = vld [vmem:[%s7992_s4 + $0x350] ss:$8 sps:$4 sm:$0xff]  }
  0xfc   : > { %5594 = vmatprep.subr.bf16.mxu0 %v7342_v40  ;;  %5267 = vmatprep.subr.bf16.mxu1 %v7357_v22  ;;  %v1308_v10 = vcombine.low %v450_v34, %v458_v26  ;;  %v810_v50 = vcombine.high %v8612_v36, %v8615_v62  ;;  %v812_v55 = vcombine.high %v8640_v31, %v8643_v53  ;;  %v7366_v62 = vld [vmem:[%s7992_s4 + $0xb34] ss:$8 sps:$4 sm:$0xff]   ;;  %v615_v30 = vshrl.u32 %v8649_v56, 16  ;;  %v7381_v34 = vld [vmem:[%s7992_s4 + $0x364] ss:$8 sps:$4 sm:$0xff]  }
  0xfd   : > { %v8672_v27 = vcombine.low %v8637_v25, %v8637_v25  ;;  %v8674_v40 = vcombine.high %v6318_v37, %v6318_v37  ;;  %v8680_v21 = vrot.slane %v809_v47, %v8050_v51  ;;  %v1074_v42 = vcombine.high %v8620_v6, %v8623_v45 }
  0xfe   : > { %v1076_v41 = vcombine.high %v8631_v44, %v8634_v24  ;;  %v8688_v22 = vcombine.high %v8637_v25, %v8637_v25  ;;  %v1083_v58 = vrot.slane %v1073_v11, %v8050_v51  ;;  %v8697_v49 = vrot.slane %v1306_v17, %v8050_v51  ;;  %v6317_v24 = vld [vmem:[%s8046_s9 + $0x18] sm:$0x66] }
  0xff   : > { %5595 = vmatpush1.bf16.msra.mxu0 %v7340_v63  ;;  %5268 = vmatpush1.bf16.msra.mxu1 %v7355_v18  ;;  %v7360_v63 = vld [vmem:[%s7992_s4 + $0xb24] ss:$8 sps:$4 sm:$0xff]   ;;  %v7375_v18 = vld [vmem:[%s7992_s4 + $0x354] ss:$8 sps:$4 sm:$0xff]   ;;  %v1097_v48 = vrot.slane %v1075_v2, %v8050_v51  ;;  %v8706_v35 = vrot.slane %v1307_v3, %v8050_v51  ;;  %v8709_v33 = vrot.slane %v1308_v10, %v8050_v51  ;;  %v603_v19 = vshll.u32 %v8672_v27, 16 }
 0x100   : > { %5607 = vmatprep.subr.bf16.mxu0 %v7348_v61  ;;  %5269 = vmatprep.subr.bf16.mxu1 %v7363_v16  ;;  %v8717_v61 = vrot.slane %v810_v50, %v8050_v51  ;;  %v8720_v16 = vrot.slane %v812_v55, %v8050_v51  ;;  %v610_v36 = vshll.u32 %v8688_v22, 16  ;;  %v8727_v5 = vcombine.low %v8700_v20, %v8700_v20  ;;  %v7379_v10 = vld [vmem:[%s7992_s4 + $0x360] ss:$8 sps:$4 sm:$0xff]  }
 0x101   : > { %v8731_v8 = vcombine.high %v8700_v20, %v8700_v20  ;;  %v8738_v6 = vrot.slane %v1074_v42, %v8050_v51  ;;  %v8741_v45 = vrot.slane %v1076_v41, %v8050_v51  ;;  %v622_v1 = vshrl.u32 %v8653_v57, 16  ;;  %v6319_v55 = vld [vmem:[%s8046_s9 + $0x28] sm:$0x66]  ;;  %v7387_v41 = vld [vmem:[%s7992_s4 + $0x374] ss:$8 sps:$4 sm:$0xff]  }
 0x102   : > { %5597 = vmatmul.mubr.bf16.vlgmr.msra.gmra.mrb[0].mxu0 %v2419_v7  ;;  %v8694_v7 = vrot.slane %v8512_v28, %v8050_v51  ;;  %v617_v28 = vshll.u32 %v8649_v56, 16  ;;  %v8746_v26 = vcombine.low %v1083_v58, %v1097_v48  ;;  %v1340_v44 = vcombine.high %v8706_v35, %v8709_v33  ;;  %v7372_v42 = vld [vmem:[%s7992_s4 + $0xb44] ss:$8 sps:$4 sm:$0xff]  }
 0x103   : > { %5608 = vmatpush1.bf16.msra.mxu0 %v7346_v59  ;;  %5270 = vmatpush1.bf16.msra.mxu1 %v7361_v60  ;;  %v601_v47 = vshrl.u32 %v8672_v27, 16  ;;  %v7364_v59 = vld [vmem:[%s7992_s4 + $0xb30] ss:$8 sps:$4 sm:$0xff]   ;;  %v605_v11 = vrot.slane %v603_v19, 1  ;;  %v612_v17 = vrot.slane %v610_v36, 1  ;;  %v631_v2 = vshll.u32 %v8727_v5, 16 }
 0x104   : > { %5609 = vmatprep.subr.bf16.mxu0 %v7354_v0  ;;  %5271 = vmatprep.subr.bf16.mxu1 %v7369_v23  ;;  %v1338_v37 = vcombine.high %v8694_v7, %v8697_v49  ;;  %v619_v56 = vrot.slane %v617_v28, 1  ;;  %v638_v3 = vshll.u32 %v8731_v8, 16  ;;  %v8767_v27 = vcombine.low %v6317_v24, %v6317_v24  ;;  %v7378_v36 = vld [vmem:[%s7992_s4 + $0xb54] ss:$8 sps:$4 sm:$0xff]  }
 0x105   : > { %5639 = vmatprep.mubr.bf16.mxu0 %v2424_v29  ;;  %v624_v29 = vshll.u32 %v8653_v57, 16  ;;  %v608_v57 = vshrl.u32 %v8688_v22, 16  ;;  %v8772_v22 = vrot.slane %v1340_v44, %v8050_v51  ;;  %v8780_v48 = vor.u32 %v605_v11, %v601_v47 }
 0x106   : > { %v8764_v50 = vrot.slane %v1338_v37, %v8050_v51  ;;  %v8775_v58 = vor.u32 %v619_v56, %v615_v30  ;;  %v8789_v30 = vcombine.low %v6319_v55, %v6319_v55  ;;  %v8792_v37 = vcombine.high %v6319_v55, %v6319_v55  ;;  %v7384_v55 = vld [vmem:[%s7992_s4 + $0xb64] ss:$8 sps:$4 sm:$0xff]  }
 0x107   : > { %5610 = vmatpush1.bf16.msra.mxu0 %v7352_v15  ;;  %5272 = vmatpush1.bf16.msra.mxu1 %v7367_v54  ;;  %v626_v23 = vrot.slane %v624_v29, 1  ;;  %v8782_v28 = vor.u32 %v612_v17, %v608_v57  ;;  %v633_v29 = vrot.slane %v631_v2, 1  ;;  %v657_v44 = vrot.slane %v8767_v27, 1  ;;  %v7376_v17 = vld [vmem:[%s7992_s4 + $0xb50] ss:$8 sps:$4 sm:$0xff]  }
 0x108   : > { %5611 = vmatprep.subr.bf16.mxu0 %v7360_v63  ;;  %5273 = vmatprep.subr.bf16.mxu1 %v7375_v18  ;;  %v8777_v63 = vcombine.high %v6317_v24, %v6317_v24  ;;  %v7370_v18 = vld [vmem:[%s7992_s4 + $0xb40] ss:$8 sps:$4 sm:$0xff]   ;;  %v664_v24 = vshrl.u32 %v8767_v27, 16  ;;  %v667_v47 = vshll.u32 %v8767_v27, 16  ;;  %v683_v57 = vshll.u32 %v8659_v39, 16 }
 0x109   : > { %v691_v60 = vshll.u32 %v8674_v40, 16 }
 0x10a   : > { %v672_v56 = vshrl.u32 %v8777_v63, 16  ;;  %v675_v11 = vshll.u32 %v8777_v63, 16  ;;  %v666_v2 = vrot.slane %v664_v24, 1  ;;  %v685_v4 = vrot.slane %v683_v57, 2  ;;  %v7399_v24 = vld [vmem:[%s7992_s4 + $0x394] ss:$8 sps:$4 sm:$0xff]  }
 0x10b   : > { %5612 = vmatpush1.bf16.msra.mxu0 %v7358_v14  ;;  %5274 = vmatpush1.bf16.msra.mxu1 %v7373_v13  ;;  %v640_v13 = vrot.slane %v638_v3, 1  ;;  %v669_v3 = vrot.slane %v667_v47, 2  ;;  %v659_v47 = vrot.slane %v8659_v39, 1 }
 0x10c   : > { %5613 = vmatprep.subr.bf16.mxu0 %v7366_v62  ;;  %5275 = vmatprep.subr.bf16.mxu1 %v7381_v34  ;;  %v8787_v62 = vor.u32 %v626_v23, %v622_v1  ;;  %v7385_v34 = vld [vmem:[%s7992_s4 + $0x370] ss:$8 sps:$4 sm:$0xff]   ;;  %v7393_v1 = vld [vmem:[%s7992_s4 + $0x384] ss:$8 sps:$4 sm:$0xff]   ;;  %v658_v23 = vrot.slane %v8777_v63, 1  ;;  %v674_v27 = vrot.slane %v672_v56, 1 }
 0x10d   : > { %v670_v15 = vor.u32 %v669_v3, %v666_v2  ;;  %v696_v63 = vshrl.u32 %v8789_v30, 16  ;;  %v707_v2 = vshll.u32 %v8792_v37, 16 }
 0x10e   : > { %v911_v14 = vcombine.low %v657_v44, %v658_v23 }
 0x10f   : > { %5614 = vmatpush1.bf16.msra.mxu0 %v7364_v59  ;;  %5276 = vmatpush1.bf16.msra.mxu1 %v7379_v10  ;;  %v680_v59 = vshrl.u32 %v8659_v39, 16  ;;  %v688_v10 = vshrl.u32 %v8674_v40, 16  ;;  %v698_v57 = vrot.slane %v696_v63, 1  ;;  %v709_v19 = vrot.slane %v707_v2, 2  ;;  %v7405_v63 = vld [vmem:[%s7992_s4 + $0x3a4] ss:$8 sps:$4 sm:$0xff]  }
 0x110   : > { %5615 = vmatprep.subr.bf16.mxu0 %v7372_v42  ;;  %5277 = vmatprep.subr.bf16.mxu1 %v7387_v41  ;;  %v677_v42 = vrot.slane %v675_v11, 2  ;;  %v699_v11 = vshll.u32 %v8789_v30, 16 }
 0x111   : > { %v682_v41 = vrot.slane %v680_v59, 1  ;;  %v690_v54 = vrot.slane %v688_v10, 1  ;;  %v693_v59 = vrot.slane %v691_v60, 2 }
 0x112   : > { %v678_v56 = vor.u32 %v677_v42, %v674_v27  ;;  %v701_v10 = vrot.slane %v699_v11, 2  ;;  %v7390_v27 = vld [vmem:[%s7992_s4 + $0xb74] ss:$8 sps:$4 sm:$0xff]   ;;  %v7397_v42 = vld [vmem:[%s7992_s4 + $0x390] ss:$8 sps:$4 sm:$0xff]  }
 0x113   : > { %5616 = vmatpush1.bf16.msra.mxu0 %v7370_v18  ;;  %5278 = vmatpush1.bf16.msra.mxu1 %v7385_v34  ;;  %v704_v18 = vshrl.u32 %v8792_v37, 16  ;;  %v7382_v34 = vld [vmem:[%s7992_s4 + $0xb60] ss:$8 sps:$4 sm:$0xff]   ;;  %v686_v3 = vor.u32 %v685_v4, %v682_v41  ;;  %v694_v0 = vor.u32 %v693_v59, %v690_v54  ;;  %v9462_v4 = vshrl.u32 %v8731_v8, 16 }
 0x114   : > { %5617 = vmatprep.subr.bf16.mxu0 %v7378_v36  ;;  %5279 = vmatprep.subr.bf16.mxu1 %v7393_v1  ;;  %v910_v36 = vcombine.low %v8780_v48, %v8782_v28  ;;  %v660_v1 = vrot.slane %v8674_v40, 1  ;;  %v912_v60 = vcombine.low %v670_v15, %v678_v56  ;;  %v9461_v48 = vshrl.u32 %v8727_v5, 16 }
 0x115   : > { %v706_v39 = vrot.slane %v704_v18, 1  ;;  %v641_v40 = vor.u32 %v640_v13, %v9462_v4  ;;  %v702_v54 = vor.u32 %v701_v10, %v698_v57  ;;  %v8829_v15 = vrot.slane %v8637_v25, %v8050_v51 }
 0x116   : > { %v634_v28 = vor.u32 %v633_v29, %v9461_v48  ;;  %v8832_v44 = vrot.slane %v910_v36, %v8050_v51  ;;  %v1174_v5 = vcombine.low %v8775_v58, %v8787_v62  ;;  %v1175_v8 = vcombine.low %v659_v47, %v660_v1  ;;  %v7409_v36 = vld [vmem:[%s7992_s4 + $0x3b0] ss:$8 sps:$4 sm:$0xff]   ;;  %v7415_v48 = vld [vmem:[%s7992_s4 + $0x3c0] ss:$8 sps:$4 sm:$0xff]  }
 0x117   : > { %5618 = vmatpush1.bf16.msra.mxu0 %v7376_v17  ;;  %5280 = vmatpush1.bf16.msra.mxu1 %v7391_v43  ;;  %v661_v17 = vrot.slane %v8789_v30, 1  ;;  %v662_v43 = vrot.slane %v8792_v37, 1  ;;  %v710_v29 = vor.u32 %v709_v19, %v706_v39  ;;  %v1176_v23 = vcombine.low %v686_v3, %v694_v0  ;;  %v7388_v30 = vld [vmem:[%s7992_s4 + $0xb70] ss:$8 sps:$4 sm:$0xff]   ;;  %v7396_v37 = vld [vmem:[%s7992_s4 + $0xb84] ss:$8 sps:$4 sm:$0xff]  }
 0x118   : > { %5619 = vmatprep.subr.bf16.mxu0 %v7384_v55  ;;  %5281 = vmatprep.subr.bf16.mxu1 %v7399_v24  ;;  %v1183_v13 = vrot.slane %v8626_v52, %v8050_v51  ;;  %v7403_v55 = vld [vmem:[%s7992_s4 + $0x3a0] ss:$8 sps:$4 sm:$0xff]   ;;  %v8842_v25 = vrot.slane %v911_v14, %v8050_v51  ;;  %v8845_v41 = vrot.slane %v912_v60, %v8050_v51  ;;  %v7411_v0 = vld [vmem:[%s7992_s4 + $0x3b4] ss:$8 sps:$4 sm:$0xff]   ;;  %v7400_v60 = vld [vmem:[%s7992_s4 + $0xb90] ss:$8 sps:$4 sm:$0xff]  }
 0x119   : > { %v1190_v24 = vrot.slane %v1174_v5, %v8050_v51  ;;  %v9463_v52 = vcombine.low %v8694_v7, %v8697_v49  ;;  %v1197_v14 = vrot.slane %v1175_v8, %v8050_v51  ;;  %v1204_v19 = vrot.slane %v1176_v23, %v8050_v51 }
 0x11a   : > { %v9464_v62 = vcombine.low %v8717_v61, %v8720_v16  ;;  %v1438_v11 = vcombine.low %v634_v28, %v641_v40  ;;  %v1439_v18 = vcombine.low %v661_v17, %v662_v43  ;;  %v1370_v7 = vcombine.low %v8764_v50, %v8772_v22  ;;  %v7394_v61 = vld [vmem:[%s7992_s4 + $0xb80] ss:$8 sps:$4 sm:$0xff]   ;;  %v7402_v16 = vld [vmem:[%s7992_s4 + $0xb94] ss:$8 sps:$4 sm:$0xff]  }
 0x11b   : > { %5620 = vmatpush1.bf16.msra.mxu0 %v7382_v34  ;;  %5282 = vmatpush1.bf16.msra.mxu1 %v7397_v42  ;;  %v8853_v58 = vrot.slane %v9463_v52, %v8050_v51  ;;  %v1205_v56 = vcombine.low %v1183_v13, %v1190_v24  ;;  %v9465_v49 = vunpack.i.h.s16 %v8746_v26  ;;  %v9466_v34 = vcombine.low %v8738_v6, %v8741_v45  ;;  %v7417_v6 = vld [vmem:[%s7992_s4 + $0x3c4] ss:$8 sps:$4 sm:$0xff]   ;;  %v7423_v17 = vld [vmem:[%s7992_s4 + $0x3d4] ss:$8 sps:$4 sm:$0xff]  }
 0x11c   : > { %5621 = vmatprep.subr.bf16.mxu0 %v7390_v27  ;;  %5283 = vmatprep.subr.bf16.mxu1 %v7405_v63  ;;  %v8861_v47 = vpack.i.b16 %v8746_v26, %v9464_v62  ;;  %v1207_v57 = vcombine.low %v1197_v14, %v1204_v19  ;;  %v1440_v2 = vcombine.low %v702_v54, %v710_v29  ;;  %v7408_v63 = vld [vmem:[%s7992_s4 + $0xba4] ss:$8 sps:$4 sm:$0xff]   ;;  %v8894_v28 = vunpack.i.l.s16 %v1370_v7 }
 0x11d   : > { %v8870_v59 = vpack.i.b16 %v9466_v34, %v9465_v49  ;;  %v942_v1 = vcombine.high %v8829_v15, %v8832_v44  ;;  %v944_v26 = vcombine.high %v8842_v25, %v8845_v41  ;;  %v1206_v50 = vcombine.high %v1183_v13, %v1190_v24  ;;  %v7406_v13 = vld [vmem:[%s7992_s4 + $0xba0] ss:$8 sps:$4 sm:$0xff]   ;;  %v7429_v52 = vld [vmem:[%s7992_s4 + $0x3e4] ss:$8 sps:$4 sm:$0xff]   ;;  %v7412_v49 = vld [vmem:[%s7992_s4 + $0xbb0] ss:$8 sps:$4 sm:$0xff]  }
 0x11e   : > { %v1208_v45 = vcombine.high %v1197_v14, %v1204_v19  ;;  %v1215_v22 = vrot.slane %v1205_v56, %v8050_v51  ;;  %v1447_v3 = vrot.slane %v8700_v20, %v8050_v51  ;;  %v1229_v10 = vrot.slane %v1207_v57, %v8050_v51  ;;  %v7420_v34 = vld [vmem:[%s7992_s4 + $0xbc4] ss:$8 sps:$4 sm:$0xff]   ;;  %v7427_v57 = vld [vmem:[%s7992_s4 + $0x3e0] ss:$8 sps:$4 sm:$0xff]  }
 0x11f   : > { %5622 = vmatpush1.bf16.msra.mxu0 %v7388_v30  ;;  %5284 = vmatpush1.bf16.msra.mxu1 %v7403_v55  ;;  %v1454_v39 = vrot.slane %v1438_v11, %v8050_v51  ;;  %v8886_v27 = vrot.slane %v1439_v18, %v8050_v51  ;;  %v8889_v42 = vrot.slane %v1440_v2, %v8050_v51  ;;  %v7414_v30 = vld [vmem:[%s7992_s4 + $0xbb4] ss:$8 sps:$4 sm:$0xff]  }
 0x120   : > { %5623 = vmatprep.subr.bf16.mxu0 %v7396_v37  ;;  %5285 = vmatprep.subr.bf16.mxu1 %v7411_v0  ;;  %v6380_v20 = vcombine.low %v8680_v21, %v8861_v47  ;;  %v6381_v4 = vcombine.low %v8870_v59, %v8853_v58  ;;  %v958_v40 = vrot.slane %v942_v1, %v8050_v51  ;;  %v7421_v37 = vld [vmem:[%s7992_s4 + $0x3d0] ss:$8 sps:$4 sm:$0xff]  }
 0x121   : > { %v972_v43 = vrot.slane %v944_v26, %v8050_v51  ;;  %v1222_v54 = vrot.slane %v1206_v50, %v8050_v51  ;;  %v1236_v5 = vrot.slane %v1208_v45, %v8050_v51  ;;  %v1237_v29 = vcombine.low %v1215_v22, %v1229_v10  ;;  %v7418_v50 = vld [vmem:[%s7992_s4 + $0xbc0] ss:$8 sps:$4 sm:$0xff]   ;;  %v7433_v45 = vld [vmem:[%s7992_s4 + $0x3f0] ss:$8 sps:$4 sm:$0xff]   ;;  %v7441_v22 = vld [vmem:[%s7992_s4 + $0x404] ss:$8 sps:$4 sm:$0xff]  }
 0x122   : > { %v1470_v8 = vcombine.high %v1447_v3, %v1454_v39  ;;  %v1472_v23 = vcombine.high %v8886_v27, %v8889_v42  ;;  %v8911_v55 = vrot.slane %v6380_v20, %v8050_v51  ;;  %v8914_v24 = vrot.slane %v6381_v4, %v8050_v51  ;;  %v7432_v20 = vld [vmem:[%s7992_s4 + $0xbe4] ss:$8 sps:$4 sm:$0xff]   ;;  %v7439_v4 = vld [vmem:[%s7992_s4 + $0x400] ss:$8 sps:$4 sm:$0xff]  }
 0x123   : > { %5624 = vmatpush1.bf16.msra.mxu0 %v7394_v61  ;;  %5286 = vmatpush1.bf16.msra.mxu1 %v7409_v36  ;;  %v8918_v0 = vrot.slane %v8894_v28, %v8050_v51  ;;  %v941_v14 = vcombine.low %v8829_v15, %v8832_v44  ;;  %v974_v19 = vcombine.low %v958_v40, %v972_v43  ;;  %v1522_v7 = vunpack.i.h.s16 %v1237_v29  ;;  %v7435_v15 = vld [vmem:[%s7992_s4 + $0x3f4] ss:$8 sps:$4 sm:$0xff]  }
 0x124   : > { %5625 = vmatprep.subr.bf16.mxu0 %v7402_v16  ;;  %5287 = vmatprep.subr.bf16.mxu1 %v7417_v6  ;;  %v1238_v62 = vcombine.low %v1222_v54, %v1236_v5  ;;  %v1469_v56 = vcombine.low %v1447_v3, %v1454_v39  ;;  %v1486_v11 = vrot.slane %v1470_v8, %v8050_v51  ;;  %v7426_v6 = vld [vmem:[%s7992_s4 + $0xbd4] ss:$8 sps:$4 sm:$0xff]   ;;  %v7430_v8 = vld [vmem:[%s7992_s4 + $0xbe0] ss:$8 sps:$4 sm:$0xff]  }
 0x125   : > { %v1500_v18 = vrot.slane %v1472_v23, %v8050_v51  ;;  %v2239_v44 = vcombine.high %v8911_v55, %v8914_v24  ;;  %v2242_v2 = vcombine.high %v8918_v0, %v8918_v0  ;;  %v8934_v61 = vrot.slane %v941_v14, %v8050_v51  ;;  %v7447_v40 = vld [vmem:[%s7992_s4 + $0x414] ss:$8 sps:$4 sm:$0xff]  }
 0x126   : > { %v8937_v16 = vrot.slane %v1469_v56, %v8050_v51  ;;  %v8939_v1 = vpack.i.b16 %v1237_v29, %v974_v19  ;;  %v8941_v26 = vpack.i.b16 %v1238_v62, %v1522_v7  ;;  %v9467_v29 = vcombine.high %v8359_v12, %v8362_v9  ;;  %v7438_v23 = vld [vmem:[%s7992_s4 + $0xbf4] ss:$8 sps:$4 sm:$0xff]   ;;  %v7436_v9 = vld [vmem:[%s7992_s4 + $0xbf0] ss:$8 sps:$4 sm:$0xff]   ;;  %v7444_v19 = vld [vmem:[%s7992_s4 + $0xc04] ss:$8 sps:$4 sm:$0xff]  }
 0x127   : > { %5626 = vmatpush1.bf16.msra.mxu0 %v7400_v60  ;;  %5288 = vmatpush1.bf16.msra.mxu1 %v7415_v48  ;;  %v1502_v36 = vcombine.low %v1486_v11, %v1500_v18  ;;  %v8948_v3 = vrot.slane %v2239_v44, %v8050_v51  ;;  %v8951_v10 = vrot.slane %v2242_v2, %v8050_v51  ;;  %v7424_v48 = vld [vmem:[%s7992_s4 + $0xbd0] ss:$8 sps:$4 sm:$0xff]   ;;  %v7451_v62 = vld [vmem:[%s7992_s4 + $0x420] ss:$8 sps:$4 sm:$0xff]   ;;  %v7459_v56 = vld [vmem:[%s7992_s4 + $0x434] ss:$8 sps:$4 sm:$0xff]  }
 0x128   : > { %5627 = vmatprep.subr.bf16.mxu0 %v7408_v63  ;;  %5289 = vmatprep.subr.bf16.mxu1 %v7423_v17  ;;  %v6384_v60 = vcombine.low %v8934_v61, %v8939_v1  ;;  %v6385_v63 = vcombine.low %v8941_v26, %v8937_v16  ;;  %v2238_v14 = vcombine.low %v8911_v55, %v8914_v24  ;;  %v7465_v2 = vld [vmem:[%s7992_s4 + $0x444] ss:$8 sps:$4 sm:$0xff]  }
 0x129   : > { %v8953_v39 = vunpack.i.l.s16 %v1502_v36  ;;  %v2304_v17 = vcombine.low %v8948_v3, %v8951_v10  ;;  %v8993_v24 = vrot.slane %v8918_v0, %v8050_v51  ;;  %v2305_v44 = vcombine.high %v8948_v3, %v8951_v10  ;;  %v7562_v3 = vld [vmem:[%s7992_s4 + $0xd00] ss:$8 sps:$4 sm:$0xff]   ;;  %v7577_v10 = vld [vmem:[%s7992_s4 + $0x530] ss:$8 sps:$4 sm:$0xff]  }
 0x12a   : > { %v2436_v43 = vrot.slane %v6384_v60, %v8050_v51  ;;  %v2450_v54 = vrot.slane %v6385_v63, %v8050_v51  ;;  %v8989_v55 = vrot.slane %v2238_v14, %v8050_v51  ;;  %v7456_v60 = vld [vmem:[%s7992_s4 + $0xc24] ss:$8 sps:$4 sm:$0xff]   ;;  %v7463_v63 = vld [vmem:[%s7992_s4 + $0x440] ss:$8 sps:$4 sm:$0xff]  }
 0x12b   : > { %5628 = vmatpush1.bf16.msra.mxu0 %v7406_v13  ;;  %5290 = vmatpush1.bf16.msra.mxu1 %v7421_v37  ;;  %v2464_v5 = vrot.slane %v8953_v39, %v8050_v51  ;;  %v7445_v13 = vld [vmem:[%s7992_s4 + $0x410] ss:$8 sps:$4 sm:$0xff]   ;;  %v7478_v14 = vld [vmem:[%s7992_s4 + $0xc60] ss:$8 sps:$4 sm:$0xff]  }
 0x12c   : > { %5629 = vmatprep.subr.bf16.mxu0 %v7414_v30  ;;  %5291 = vmatprep.subr.bf16.mxu1 %v7429_v52  ;;  %v7453_v30 = vld [vmem:[%s7992_s4 + $0x424] ss:$8 sps:$4 sm:$0xff]   ;;  %v2473_v37 = vcombine.high %v2436_v43, %v2450_v54  ;;  %v2472_v12 = vcombine.low %v2436_v43, %v2450_v54  ;;  %v2301_v36 = vcombine.high %v8989_v55, %v8993_v24  ;;  %v7475_v43 = vld [vmem:[%s7992_s4 + $0x460] ss:$8 sps:$4 sm:$0xff]   ;;  %v7483_v54 = vld [vmem:[%s7992_s4 + $0x474] ss:$8 sps:$4 sm:$0xff]  }
 0x12d   : > { %v2476_v52 = vcombine.high %v2464_v5, %v2464_v5 }
 0x12e   : > { %v8983_v11 = vrot.slane %v2473_v37, %v8050_v51  ;;  %v8996_v7 = vrot.slane %v2472_v12, %v8050_v51  ;;  %v7480_v37 = vld [vmem:[%s7992_s4 + $0xc64] ss:$8 sps:$4 sm:$0xff]   ;;  %v7493_v12 = vld [vmem:[%s7992_s4 + $0x490] ss:$8 sps:$4 sm:$0xff]  }
 0x12f   : > { %5630 = vmatpush1.bf16.msra.mxu0 %v7412_v49  ;;  %5292 = vmatpush1.bf16.msra.mxu1 %v7427_v57  ;;  %v8986_v18 = vrot.slane %v2476_v52, %v8050_v51  ;;  %v8999_v49 = vrot.slane %v2464_v5, %v8050_v51  ;;  %v7450_v57 = vld [vmem:[%s7992_s4 + $0xc14] ss:$8 sps:$4 sm:$0xff]   ;;  %v7466_v5 = vld [vmem:[%s7992_s4 + $0xc40] ss:$8 sps:$4 sm:$0xff]  }
 0x130   : > { %5631 = vmatprep.subr.bf16.mxu0 %v7420_v34  ;;  %5293 = vmatprep.subr.bf16.mxu1 %v7435_v15  ;;  %v7442_v34 = vld [vmem:[%s7992_s4 + $0xc00] ss:$8 sps:$4 sm:$0xff]   ;;  %v7457_v15 = vld [vmem:[%s7992_s4 + $0x430] ss:$8 sps:$4 sm:$0xff]   ;;  %v7495_v52 = vld [vmem:[%s7992_s4 + $0x494] ss:$8 sps:$4 sm:$0xff]  }
 0x131   : > { %v2539_v0 = vcombine.high %v8983_v11, %v8986_v18 }
 0x133   : > { %5632 = vmatpush1.bf16.msra.mxu0 %v7418_v50  ;;  %5294 = vmatpush1.bf16.msra.mxu1 %v7433_v45  ;;  %v2535_v50 = vcombine.high %v8996_v7, %v8999_v49  ;;  %v9468_v45 = vcombine.high %v8376_v32, %v8370_v38  ;;  %v7469_v38 = vld [vmem:[%s7992_s4 + $0x450] ss:$8 sps:$4 sm:$0xff]   ;;  %v7477_v32 = vld [vmem:[%s7992_s4 + $0x464] ss:$8 sps:$4 sm:$0xff]  }
 0x134   : > { %5633 = vmatprep.subr.bf16.mxu0 %v7426_v6  ;;  %5306 = vmatprep.subr.bf16.mxu1 %v7441_v22  ;;  %v2538_v6 = vcombine.low %v8983_v11, %v8986_v18  ;;  %v7448_v22 = vld [vmem:[%s7992_s4 + $0xc10] ss:$8 sps:$4 sm:$0xff]   ;;  %v7588_v11 = vld [vmem:[%s7992_s4 + $0xd44] ss:$8 sps:$4 sm:$0xff]   ;;  %v7603_v18 = vld [vmem:[%s7992_s4 + $0x574] ss:$8 sps:$4 sm:$0xff]  }
 0x136   : > { %5296 = vmatmul.mubr.bf16.vlgmr.msra.gmra.mrb[0].mxu1 %v9467_v29  ;;  %v7474_v29 = vld [vmem:[%s7992_s4 + $0xc54] ss:$8 sps:$4 sm:$0xff]  }
 0x137   : > { %5634 = vmatpush1.bf16.msra.mxu0 %v7424_v48  ;;  %5307 = vmatpush1.bf16.msra.mxu1 %v7439_v4  ;;  %v7471_v48 = vld [vmem:[%s7992_s4 + $0x454] ss:$8 sps:$4 sm:$0xff]  }
 0x138   : > { %5635 = vmatprep.subr.bf16.mxu0 %v7432_v20  ;;  %5308 = vmatprep.subr.bf16.mxu1 %v7447_v40  ;;  %v7454_v20 = vld [vmem:[%s7992_s4 + $0xc20] ss:$8 sps:$4 sm:$0xff]   ;;  %v7462_v4 = vld [vmem:[%s7992_s4 + $0xc34] ss:$8 sps:$4 sm:$0xff]   ;;  %v7460_v40 = vld [vmem:[%s7992_s4 + $0xc30] ss:$8 sps:$4 sm:$0xff]  }
 0x139   : > { %5338 = vmatprep.mubr.bf16.mxu1 %v2304_v17  ;;  %v7468_v17 = vld [vmem:[%s7992_s4 + $0xc44] ss:$8 sps:$4 sm:$0xff]  }
 0x13b   : > { %5636 = vmatpush1.bf16.msra.mxu0 %v7430_v8  ;;  %5309 = vmatpush1.bf16.msra.mxu1 %v7445_v13  ;;  %v7481_v8 = vld [vmem:[%s7992_s4 + $0x470] ss:$8 sps:$4 sm:$0xff]  }
 0x13c   : > { %5637 = vmatprep.subr.bf16.mxu0 %v7438_v23  ;;  %5310 = vmatprep.subr.bf16.mxu1 %v7453_v30  ;;  %v7489_v23 = vld [vmem:[%s7992_s4 + $0x484] ss:$8 sps:$4 sm:$0xff]   ;;  %v7472_v13 = vld [vmem:[%s7992_s4 + $0xc50] ss:$8 sps:$4 sm:$0xff]   ;;  %v7487_v30 = vld [vmem:[%s7992_s4 + $0x480] ss:$8 sps:$4 sm:$0xff]  }
 0x13f   : > { %5638 = vmatpush1.bf16.msra.mxu0 %v7436_v9  ;;  %5311 = vmatpush1.bf16.msra.mxu1 %v7451_v62  ;;  %v7486_v9 = vld [vmem:[%s7992_s4 + $0xc74] ss:$8 sps:$4 sm:$0xff]   ;;  %v7484_v62 = vld [vmem:[%s7992_s4 + $0xc70] ss:$8 sps:$4 sm:$0xff]  }
 0x140   : > { %5650 = vmatprep.subr.bf16.mxu0 %v7444_v19  ;;  %5312 = vmatprep.subr.bf16.mxu1 %v7459_v56  ;;  %v7501_v19 = vld [vmem:[%s7992_s4 + $0x4a4] ss:$8 sps:$4 sm:$0xff]   ;;  %v7499_v56 = vld [vmem:[%s7992_s4 + $0x4a0] ss:$8 sps:$4 sm:$0xff]  }
 0x142   : > { %5640 = vmatmul.mubr.bf16.vlgmr.msra.gmra.mrb[0].mxu0 %v9468_v45  ;;  %v7513_v45 = vld [vmem:[%s7992_s4 + $0x4c4] ss:$8 sps:$4 sm:$0xff]  }
 0x143   : > { %5651 = vmatpush1.bf16.msra.mxu0 %v7442_v34  ;;  %5313 = vmatpush1.bf16.msra.mxu1 %v7457_v15  ;;  %v7492_v34 = vld [vmem:[%s7992_s4 + $0xc84] ss:$8 sps:$4 sm:$0xff]   ;;  %v7490_v15 = vld [vmem:[%s7992_s4 + $0xc80] ss:$8 sps:$4 sm:$0xff]  }
 0x144   : > { %5652 = vmatprep.subr.bf16.mxu0 %v7450_v57  ;;  %5314 = vmatprep.subr.bf16.mxu1 %v7465_v2  ;;  %v7507_v57 = vld [vmem:[%s7992_s4 + $0x4b4] ss:$8 sps:$4 sm:$0xff]   ;;  %v7505_v2 = vld [vmem:[%s7992_s4 + $0x4b0] ss:$8 sps:$4 sm:$0xff]  }
 0x145   : > { %5682 = vmatprep.mubr.bf16.mxu0 %v2538_v6  ;;  %v7498_v6 = vld [vmem:[%s7992_s4 + $0xc94] ss:$8 sps:$4 sm:$0xff]  }
 0x147   : > { %5653 = vmatpush1.bf16.msra.mxu0 %v7448_v22  ;;  %5315 = vmatpush1.bf16.msra.mxu1 %v7463_v63  ;;  %v7496_v22 = vld [vmem:[%s7992_s4 + $0xc90] ss:$8 sps:$4 sm:$0xff]   ;;  %v7504_v63 = vld [vmem:[%s7992_s4 + $0xca4] ss:$8 sps:$4 sm:$0xff]  }
 0x148   : > { %5654 = vmatprep.subr.bf16.mxu0 %v7456_v60  ;;  %5316 = vmatprep.subr.bf16.mxu1 %v7471_v48  ;;  %v7511_v60 = vld [vmem:[%s7992_s4 + $0x4c0] ss:$8 sps:$4 sm:$0xff]   ;;  %v7519_v48 = vld [vmem:[%s7992_s4 + $0x4d4] ss:$8 sps:$4 sm:$0xff]  }
 0x14b   : > { %5655 = vmatpush1.bf16.msra.mxu0 %v7454_v20  ;;  %5317 = vmatpush1.bf16.msra.mxu1 %v7469_v38  ;;  %v7502_v20 = vld [vmem:[%s7992_s4 + $0xca0] ss:$8 sps:$4 sm:$0xff]   ;;  %v7510_v38 = vld [vmem:[%s7992_s4 + $0xcb4] ss:$8 sps:$4 sm:$0xff]  }
 0x14c   : > { %5656 = vmatprep.subr.bf16.mxu0 %v7462_v4  ;;  %5318 = vmatprep.subr.bf16.mxu1 %v7477_v32  ;;  %v7517_v4 = vld [vmem:[%s7992_s4 + $0x4d0] ss:$8 sps:$4 sm:$0xff]   ;;  %v7525_v32 = vld [vmem:[%s7992_s4 + $0x4e4] ss:$8 sps:$4 sm:$0xff]  }
 0x14f   : > { %5657 = vmatpush1.bf16.msra.mxu0 %v7460_v40  ;;  %5319 = vmatpush1.bf16.msra.mxu1 %v7475_v43  ;;  %v7508_v40 = vld [vmem:[%s7992_s4 + $0xcb0] ss:$8 sps:$4 sm:$0xff]   ;;  %v7516_v43 = vld [vmem:[%s7992_s4 + $0xcc4] ss:$8 sps:$4 sm:$0xff]  }
 0x150   : > { %5658 = vmatprep.subr.bf16.mxu0 %v7468_v17  ;;  %5320 = vmatprep.subr.bf16.mxu1 %v7483_v54  ;;  %v7523_v17 = vld [vmem:[%s7992_s4 + $0x4e0] ss:$8 sps:$4 sm:$0xff]   ;;  %v7531_v54 = vld [vmem:[%s7992_s4 + $0x4f4] ss:$8 sps:$4 sm:$0xff]  }
 0x153   : > { %5659 = vmatpush1.bf16.msra.mxu0 %v7466_v5  ;;  %5321 = vmatpush1.bf16.msra.mxu1 %v7481_v8  ;;  %v7514_v5 = vld [vmem:[%s7992_s4 + $0xcc0] ss:$8 sps:$4 sm:$0xff]   ;;  %v7522_v8 = vld [vmem:[%s7992_s4 + $0xcd4] ss:$8 sps:$4 sm:$0xff]  }
 0x154   : > { %5660 = vmatprep.subr.bf16.mxu0 %v7474_v29  ;;  %5322 = vmatprep.subr.bf16.mxu1 %v7489_v23  ;;  %v7529_v29 = vld [vmem:[%s7992_s4 + $0x4f0] ss:$8 sps:$4 sm:$0xff]   ;;  %v7549_v23 = vld [vmem:[%s7992_s4 + $0x504] ss:$8 sps:$4 sm:$0xff]  }
 0x157   : > { %5661 = vmatpush1.bf16.msra.mxu0 %v7472_v13  ;;  %5323 = vmatpush1.bf16.msra.mxu1 %v7487_v30  ;;  %v2300_v13 = vcombine.low %v8989_v55, %v8993_v24  ;;  %v7520_v30 = vld [vmem:[%s7992_s4 + $0xcd0] ss:$8 sps:$4 sm:$0xff]  }
 0x158   : > { %5662 = vmatprep.subr.bf16.mxu0 %v7480_v37  ;;  %5324 = vmatprep.subr.bf16.mxu1 %v7495_v52  ;;  %v7547_v37 = vld [vmem:[%s7992_s4 + $0x500] ss:$8 sps:$4 sm:$0xff]   ;;  %v7528_v52 = vld [vmem:[%s7992_s4 + $0xce4] ss:$8 sps:$4 sm:$0xff]   ;;  %v7652_v24 = vld [vmem:[%s7992_s4 + $0xdf0] ss:$8 sps:$4 sm:$0xff]  }
 0x15b   : > { %5663 = vmatpush1.bf16.msra.mxu0 %v7478_v14  ;;  %5325 = vmatpush1.bf16.msra.mxu1 %v7493_v12  ;;  %v7567_v14 = vld [vmem:[%s7992_s4 + $0x514] ss:$8 sps:$4 sm:$0xff]   ;;  %v7526_v12 = vld [vmem:[%s7992_s4 + $0xce0] ss:$8 sps:$4 sm:$0xff]  }
 0x15c   : > { %5664 = vmatprep.subr.bf16.mxu0 %v7486_v9  ;;  %5326 = vmatprep.subr.bf16.mxu1 %v7501_v19  ;;  %v7565_v9 = vld [vmem:[%s7992_s4 + $0x510] ss:$8 sps:$4 sm:$0xff]   ;;  %v7534_v19 = vld [vmem:[%s7992_s4 + $0xcf4] ss:$8 sps:$4 sm:$0xff]  }
 0x15f   : > { %5665 = vmatpush1.bf16.msra.mxu0 %v7484_v62  ;;  %5327 = vmatpush1.bf16.msra.mxu1 %v7499_v56  ;;  %v7573_v62 = vld [vmem:[%s7992_s4 + $0x524] ss:$8 sps:$4 sm:$0xff]   ;;  %v7532_v56 = vld [vmem:[%s7992_s4 + $0xcf0] ss:$8 sps:$4 sm:$0xff]  }
 0x160   : > { %5666 = vmatprep.subr.bf16.mxu0 %v7492_v34  ;;  %5328 = vmatprep.subr.bf16.mxu1 %v7507_v57  ;;  %v7571_v34 = vld [vmem:[%s7992_s4 + $0x520] ss:$8 sps:$4 sm:$0xff]   ;;  %v7564_v57 = vld [vmem:[%s7992_s4 + $0xd04] ss:$8 sps:$4 sm:$0xff]  }
 0x163   : > { %5667 = vmatpush1.bf16.msra.mxu0 %v7490_v15  ;;  %5329 = vmatpush1.bf16.msra.mxu1 %v7505_v2  ;;  %v7579_v15 = vld [vmem:[%s7992_s4 + $0x534] ss:$8 sps:$4 sm:$0xff]   ;;  %v2534_v2 = vcombine.low %v8996_v7, %v8999_v49  ;;  %v7685_v7 = vld [vmem:[%s7992_s4 + $0x650] ss:$8 sps:$4 sm:$0xff]  }
 0x164   : > { %5668 = vmatprep.subr.bf16.mxu0 %v7498_v6  ;;  %5330 = vmatprep.subr.bf16.mxu1 %v7513_v45  ;;  %v7585_v6 = vld [vmem:[%s7992_s4 + $0x544] ss:$8 sps:$4 sm:$0xff]   ;;  %v7568_v45 = vld [vmem:[%s7992_s4 + $0xd10] ss:$8 sps:$4 sm:$0xff]   ;;  %v7678_v49 = vld [vmem:[%s7992_s4 + $0xe34] ss:$8 sps:$4 sm:$0xff]  }
 0x167   : > { %5669 = vmatpush1.bf16.msra.mxu0 %v7496_v22  ;;  %5331 = vmatpush1.bf16.msra.mxu1 %v7511_v60  ;;  %v7583_v22 = vld [vmem:[%s7992_s4 + $0x540] ss:$8 sps:$4 sm:$0xff]   ;;  %v7576_v60 = vld [vmem:[%s7992_s4 + $0xd24] ss:$8 sps:$4 sm:$0xff]  }
 0x168   : > { %5670 = vmatprep.subr.bf16.mxu0 %v7504_v63  ;;  %5332 = vmatprep.subr.bf16.mxu1 %v7519_v48  ;;  %v7591_v63 = vld [vmem:[%s7992_s4 + $0x554] ss:$8 sps:$4 sm:$0xff]   ;;  %v7574_v48 = vld [vmem:[%s7992_s4 + $0xd20] ss:$8 sps:$4 sm:$0xff]  }
 0x16b   : > { %5671 = vmatpush1.bf16.msra.mxu0 %v7502_v20  ;;  %5333 = vmatpush1.bf16.msra.mxu1 %v7517_v4  ;;  %v7589_v20 = vld [vmem:[%s7992_s4 + $0x550] ss:$8 sps:$4 sm:$0xff]   ;;  %v7582_v4 = vld [vmem:[%s7992_s4 + $0xd34] ss:$8 sps:$4 sm:$0xff]  }
 0x16c   : > { %5672 = vmatprep.subr.bf16.mxu0 %v7510_v38  ;;  %5334 = vmatprep.subr.bf16.mxu1 %v7525_v32  ;;  %v7597_v38 = vld [vmem:[%s7992_s4 + $0x564] ss:$8 sps:$4 sm:$0xff]   ;;  %v7580_v32 = vld [vmem:[%s7992_s4 + $0xd30] ss:$8 sps:$4 sm:$0xff]  }
 0x16f   : > { %5673 = vmatpush1.bf16.msra.mxu0 %v7508_v40  ;;  %5335 = vmatpush1.bf16.msra.mxu1 %v7523_v17  ;;  %v7595_v40 = vld [vmem:[%s7992_s4 + $0x560] ss:$8 sps:$4 sm:$0xff]   ;;  %v7601_v17 = vld [vmem:[%s7992_s4 + $0x570] ss:$8 sps:$4 sm:$0xff]  }
 0x170   : > { %5674 = vmatprep.subr.bf16.mxu0 %v7516_v43  ;;  %5336 = vmatprep.subr.bf16.mxu1 %v7531_v54  ;;  %v7594_v43 = vld [vmem:[%s7992_s4 + $0xd54] ss:$8 sps:$4 sm:$0xff]   ;;  %v7609_v54 = vld [vmem:[%s7992_s4 + $0x584] ss:$8 sps:$4 sm:$0xff]  }
 0x173   : > { %5675 = vmatpush1.bf16.msra.mxu0 %v7514_v5  ;;  %5337 = vmatpush1.bf16.msra.mxu1 %v7529_v29  ;;  %v7592_v5 = vld [vmem:[%s7992_s4 + $0xd50] ss:$8 sps:$4 sm:$0xff]   ;;  %v7607_v29 = vld [vmem:[%s7992_s4 + $0x580] ss:$8 sps:$4 sm:$0xff]  }
 0x174   : > { %5676 = vmatprep.subr.bf16.mxu0 %v7522_v8  ;;  %5349 = vmatprep.subr.bf16.mxu1 %v7549_v23  ;;  %v7600_v8 = vld [vmem:[%s7992_s4 + $0xd64] ss:$8 sps:$4 sm:$0xff]   ;;  %v7615_v23 = vld [vmem:[%s7992_s4 + $0x594] ss:$8 sps:$4 sm:$0xff]  }
 0x176   : > { %5339 = vmatmul.mubr.bf16.vlgmr.msra.gmra.mrb[0].mxu1 %v2300_v13  ;;  %v7598_v13 = vld [vmem:[%s7992_s4 + $0xd60] ss:$8 sps:$4 sm:$0xff]  }
 0x177   : > { %5677 = vmatpush1.bf16.msra.mxu0 %v7520_v30  ;;  %5350 = vmatpush1.bf16.msra.mxu1 %v7547_v37  ;;  %v7613_v30 = vld [vmem:[%s7992_s4 + $0x590] ss:$8 sps:$4 sm:$0xff]   ;;  %v7606_v37 = vld [vmem:[%s7992_s4 + $0xd74] ss:$8 sps:$4 sm:$0xff]  }
 0x178   : > { %5678 = vmatprep.subr.bf16.mxu0 %v7528_v52  ;;  %5351 = vmatprep.subr.bf16.mxu1 %v7567_v14  ;;  %v7621_v52 = vld [vmem:[%s7992_s4 + $0x5a4] ss:$8 sps:$4 sm:$0xff]   ;;  %v811_v14 = vcombine.low %v8640_v31, %v8643_v53  ;;  %v7610_v31 = vld [vmem:[%s7992_s4 + $0xd80] ss:$8 sps:$4 sm:$0xff]   ;;  %v7625_v53 = vld [vmem:[%s7992_s4 + $0x5b0] ss:$8 sps:$4 sm:$0xff]  }
 0x179   : > { %5381 = vmatprep.mubr.bf16.mxu1 %v2305_v44  ;;  %v7570_v44 = vld [vmem:[%s7992_s4 + $0xd14] ss:$8 sps:$4 sm:$0xff]  }
 0x17b   : > { %5679 = vmatpush1.bf16.msra.mxu0 %v7526_v12  ;;  %5352 = vmatpush1.bf16.msra.mxu1 %v7565_v9  ;;  %v1339_v12 = vcombine.low %v8706_v35, %v8709_v33  ;;  %v7604_v9 = vld [vmem:[%s7992_s4 + $0xd70] ss:$8 sps:$4 sm:$0xff]   ;;  %v7618_v35 = vld [vmem:[%s7992_s4 + $0xd94] ss:$8 sps:$4 sm:$0xff]   ;;  %v7633_v33 = vld [vmem:[%s7992_s4 + $0x5c4] ss:$8 sps:$4 sm:$0xff]  }
 0x17c   : > { %5680 = vmatprep.subr.bf16.mxu0 %v7534_v19  ;;  %5353 = vmatprep.subr.bf16.mxu1 %v7573_v62  ;;  %v7619_v19 = vld [vmem:[%s7992_s4 + $0x5a0] ss:$8 sps:$4 sm:$0xff]   ;;  %v7612_v62 = vld [vmem:[%s7992_s4 + $0xd84] ss:$8 sps:$4 sm:$0xff]  }
 0x17f   : > { %5681 = vmatpush1.bf16.msra.mxu0 %v7532_v56  ;;  %5354 = vmatpush1.bf16.msra.mxu1 %v7571_v34  ;;  %v7627_v56 = vld [vmem:[%s7992_s4 + $0x5b4] ss:$8 sps:$4 sm:$0xff]   ;;  %v833_v34 = vrot.slane %v811_v14, %v8050_v51 }
 0x180   : > { %5693 = vmatprep.subr.bf16.mxu0 %v7564_v57  ;;  %5355 = vmatprep.subr.bf16.mxu1 %v7579_v15  ;;  %v1361_v57 = vrot.slane %v1339_v12, %v8050_v51  ;;  %v7646_v12 = vld [vmem:[%s7992_s4 + $0xde0] ss:$8 sps:$4 sm:$0xff]  }
 0x181   : > { %v841_v15 = vcombine.low %v8680_v21, %v833_v34 }
 0x182   : > { %5683 = vmatmul.mubr.bf16.vlgmr.msra.gmra.mrb[0].mxu0 %v2534_v2  ;;  %v1369_v2 = vcombine.low %v8853_v58, %v1361_v57  ;;  %v2195_v58 = vcombine.high %v8894_v28, %v8894_v28 }
 0x183   : > { %5694 = vmatpush1.bf16.msra.mxu0 %v7562_v3  ;;  %5356 = vmatpush1.bf16.msra.mxu1 %v7577_v10  ;;  %v7616_v3 = vld [vmem:[%s7992_s4 + $0xd90] ss:$8 sps:$4 sm:$0xff]   ;;  %v7631_v10 = vld [vmem:[%s7992_s4 + $0x5c0] ss:$8 sps:$4 sm:$0xff]  }
 0x184   : > { %5695 = vmatprep.subr.bf16.mxu0 %v7570_v44  ;;  %5357 = vmatprep.subr.bf16.mxu1 %v7585_v6  ;;  %v7624_v44 = vld [vmem:[%s7992_s4 + $0xda4] ss:$8 sps:$4 sm:$0xff]   ;;  %v7639_v6 = vld [vmem:[%s7992_s4 + $0x5d4] ss:$8 sps:$4 sm:$0xff]   ;;  %v2194_v21 = vcombine.high %v8870_v59, %v1369_v2 }
 0x185   : > { %5725 = vmatprep.mubr.bf16.mxu0 %v2539_v0  ;;  %v7586_v0 = vld [vmem:[%s7992_s4 + $0xd40] ss:$8 sps:$4 sm:$0xff]  }
 0x186   : > { %v9153_v28 = vrot.slane %v2194_v21, %v8050_v51 }
 0x187   : > { %5696 = vmatpush1.bf16.msra.mxu0 %v7568_v45  ;;  %5358 = vmatpush1.bf16.msra.mxu1 %v7583_v22  ;;  %v943_v45 = vcombine.low %v8842_v25, %v8845_v41  ;;  %v2192_v22 = vcombine.high %v841_v15, %v8861_v47  ;;  %v7630_v25 = vld [vmem:[%s7992_s4 + $0xdb4] ss:$8 sps:$4 sm:$0xff]   ;;  %v7645_v41 = vld [vmem:[%s7992_s4 + $0x5e4] ss:$8 sps:$4 sm:$0xff]  }
 0x188   : > { %5697 = vmatprep.subr.bf16.mxu0 %v7576_v60  ;;  %5359 = vmatprep.subr.bf16.mxu1 %v7591_v63  ;;  %v1471_v60 = vcombine.low %v8886_v27, %v8889_v42  ;;  %v7622_v63 = vld [vmem:[%s7992_s4 + $0xda0] ss:$8 sps:$4 sm:$0xff]   ;;  %v9156_v27 = vrot.slane %v2195_v58, %v8050_v51  ;;  %v7666_v58 = vld [vmem:[%s7992_s4 + $0xe14] ss:$8 sps:$4 sm:$0xff]  }
 0x189   : > { %v965_v47 = vrot.slane %v943_v45, %v8050_v51  ;;  %v9150_v59 = vrot.slane %v2192_v22, %v8050_v51 }
 0x18a   : > { %v1493_v42 = vrot.slane %v1471_v60, %v8050_v51  ;;  %v9216_v2 = vrot.slane %v9156_v27, %v8050_v51  ;;  %v7681_v60 = vld [vmem:[%s7992_s4 + $0x644] ss:$8 sps:$4 sm:$0xff]  }
 0x18b   : > { %5698 = vmatpush1.bf16.msra.mxu0 %v7574_v48  ;;  %5360 = vmatpush1.bf16.msra.mxu1 %v7589_v20  ;;  %v7637_v48 = vld [vmem:[%s7992_s4 + $0x5d0] ss:$8 sps:$4 sm:$0xff]   ;;  %v2240_v57 = vcombine.low %v9150_v59, %v9153_v28 }
 0x18c   : > { %5699 = vmatprep.subr.bf16.mxu0 %v7582_v4  ;;  %5361 = vmatprep.subr.bf16.mxu1 %v7597_v38  ;;  %v7628_v20 = vld [vmem:[%s7992_s4 + $0xdb0] ss:$8 sps:$4 sm:$0xff]   ;;  %v7643_v4 = vld [vmem:[%s7992_s4 + $0x5e0] ss:$8 sps:$4 sm:$0xff]   ;;  %v7636_v38 = vld [vmem:[%s7992_s4 + $0xdc4] ss:$8 sps:$4 sm:$0xff]  }
 0x18d   : > { %v9212_v15 = vrot.slane %v2240_v57, %v8050_v51  ;;  %v7741_v57 = vld [vmem:[%s7992_s4 + $0x6e4] ss:$8 sps:$4 sm:$0xff]  }
 0x18f   : > { %5700 = vmatpush1.bf16.msra.mxu0 %v7580_v32  ;;  %5362 = vmatpush1.bf16.msra.mxu1 %v7595_v40  ;;  %v7651_v32 = vld [vmem:[%s7992_s4 + $0x5f4] ss:$8 sps:$4 sm:$0xff]   ;;  %v973_v40 = vcombine.low %v8934_v61, %v965_v47  ;;  %v7657_v61 = vld [vmem:[%s7992_s4 + $0x604] ss:$8 sps:$4 sm:$0xff]   ;;  %v2303_v21 = vcombine.high %v9212_v15, %v9216_v2 }
 0x190   : > { %5701 = vmatprep.subr.bf16.mxu0 %v7588_v11  ;;  %5363 = vmatprep.subr.bf16.mxu1 %v7603_v18  ;;  %v2241_v11 = vcombine.high %v9150_v59, %v9153_v28  ;;  %v2243_v18 = vcombine.high %v9156_v27, %v9156_v27  ;;  %v7672_v47 = vld [vmem:[%s7992_s4 + $0xe24] ss:$8 sps:$4 sm:$0xff]   ;;  %v7687_v59 = vld [vmem:[%s7992_s4 + $0x654] ss:$8 sps:$4 sm:$0xff]   ;;  %v7670_v28 = vld [vmem:[%s7992_s4 + $0xe20] ss:$8 sps:$4 sm:$0xff]  }
 0x191   : > { %v7676_v27 = vld [vmem:[%s7992_s4 + $0xe30] ss:$8 sps:$4 sm:$0xff]  }
 0x193   : > { %5702 = vmatpush1.bf16.msra.mxu0 %v7586_v0  ;;  %5364 = vmatpush1.bf16.msra.mxu1 %v7601_v17  ;;  %v1501_v0 = vcombine.low %v8937_v16, %v1493_v42  ;;  %v7634_v17 = vld [vmem:[%s7992_s4 + $0xdc0] ss:$8 sps:$4 sm:$0xff]  }
 0x194   : > { %5703 = vmatprep.subr.bf16.mxu0 %v7594_v43  ;;  %5365 = vmatprep.subr.bf16.mxu1 %v7609_v54  ;;  %v7649_v43 = vld [vmem:[%s7992_s4 + $0x5f0] ss:$8 sps:$4 sm:$0xff]   ;;  %v7642_v54 = vld [vmem:[%s7992_s4 + $0xdd4] ss:$8 sps:$4 sm:$0xff]   ;;  %v7691_v42 = vld [vmem:[%s7992_s4 + $0x660] ss:$8 sps:$4 sm:$0xff]  }
 0x195   : > { %v2428_v16 = vcombine.high %v8941_v26, %v1501_v0  ;;  %v7703_v0 = vld [vmem:[%s7992_s4 + $0x680] ss:$8 sps:$4 sm:$0xff]  }
 0x197   : > { %5704 = vmatpush1.bf16.msra.mxu0 %v7592_v5  ;;  %5366 = vmatpush1.bf16.msra.mxu1 %v7607_v29  ;;  %v2426_v5 = vcombine.high %v973_v40, %v8939_v1  ;;  %v9175_v29 = vrot.slane %v2241_v11, %v8050_v51  ;;  %v7648_v1 = vld [vmem:[%s7992_s4 + $0xde4] ss:$8 sps:$4 sm:$0xff]   ;;  %v2457_v14 = vrot.slane %v2428_v16, %v8050_v51  ;;  %v7690_v40 = vld [vmem:[%s7992_s4 + $0xe54] ss:$8 sps:$4 sm:$0xff]  }
 0x198   : > { %5705 = vmatprep.subr.bf16.mxu0 %v7600_v8  ;;  %5367 = vmatprep.subr.bf16.mxu1 %v7615_v23  ;;  %v9178_v8 = vrot.slane %v2243_v18, %v8050_v51  ;;  %v2429_v23 = vcombine.high %v8953_v39, %v8953_v39  ;;  %v7705_v11 = vld [vmem:[%s7992_s4 + $0x684] ss:$8 sps:$4 sm:$0xff]   ;;  %v7688_v18 = vld [vmem:[%s7992_s4 + $0xe50] ss:$8 sps:$4 sm:$0xff]  }
 0x199   : > { %v2443_v26 = vrot.slane %v2426_v5, %v8050_v51  ;;  %v7702_v5 = vld [vmem:[%s7992_s4 + $0xe74] ss:$8 sps:$4 sm:$0xff]   ;;  %v7717_v16 = vld [vmem:[%s7992_s4 + $0x6a4] ss:$8 sps:$4 sm:$0xff]  }
 0x19a   : > { %v2471_v39 = vrot.slane %v2429_v23, %v8050_v51  ;;  %v2307_v45 = vcombine.high %v9175_v29, %v9178_v8  ;;  %v7700_v23 = vld [vmem:[%s7992_s4 + $0xe70] ss:$8 sps:$4 sm:$0xff]  }
 0x19b   : > { %5706 = vmatpush1.bf16.msra.mxu0 %v7598_v13  ;;  %5368 = vmatpush1.bf16.msra.mxu1 %v7613_v30  ;;  %v7640_v13 = vld [vmem:[%s7992_s4 + $0xdd0] ss:$8 sps:$4 sm:$0xff]   ;;  %v7655_v30 = vld [vmem:[%s7992_s4 + $0x600] ss:$8 sps:$4 sm:$0xff]   ;;  %v2474_v55 = vcombine.low %v2443_v26, %v2457_v14 }
 0x19c   : > { %5707 = vmatprep.subr.bf16.mxu0 %v7606_v37  ;;  %5369 = vmatprep.subr.bf16.mxu1 %v7621_v52  ;;  %v7663_v37 = vld [vmem:[%s7992_s4 + $0x614] ss:$8 sps:$4 sm:$0xff]   ;;  %v2306_v52 = vcombine.low %v9175_v29, %v9178_v8  ;;  %v2477_v34 = vcombine.high %v2471_v39, %v2471_v39  ;;  %v7754_v29 = vld [vmem:[%s7992_s4 + $0xf00] ss:$8 sps:$4 sm:$0xff]   ;;  %v7769_v8 = vld [vmem:[%s7992_s4 + $0x730] ss:$8 sps:$4 sm:$0xff]  }
 0x19f   : > { %5708 = vmatpush1.bf16.msra.mxu0 %v7604_v9  ;;  %5370 = vmatpush1.bf16.msra.mxu1 %v7619_v19  ;;  %v7661_v9 = vld [vmem:[%s7992_s4 + $0x610] ss:$8 sps:$4 sm:$0xff]   ;;  %v7654_v19 = vld [vmem:[%s7992_s4 + $0xdf4] ss:$8 sps:$4 sm:$0xff]  }
 0x1a0   : > { %5709 = vmatprep.subr.bf16.mxu0 %v7612_v62  ;;  %5371 = vmatprep.subr.bf16.mxu1 %v7627_v56  ;;  %v7669_v62 = vld [vmem:[%s7992_s4 + $0x624] ss:$8 sps:$4 sm:$0xff]   ;;  %v2475_v56 = vcombine.high %v2443_v26, %v2457_v14  ;;  %v7714_v26 = vld [vmem:[%s7992_s4 + $0xe94] ss:$8 sps:$4 sm:$0xff]  }
 0x1a1   : > { %v7729_v14 = vld [vmem:[%s7992_s4 + $0x6c4] ss:$8 sps:$4 sm:$0xff]  }
 0x1a3   : > { %5710 = vmatpush1.bf16.msra.mxu0 %v7610_v31  ;;  %5372 = vmatpush1.bf16.msra.mxu1 %v7625_v53  ;;  %v7660_v31 = vld [vmem:[%s7992_s4 + $0xe04] ss:$8 sps:$4 sm:$0xff]   ;;  %v7675_v53 = vld [vmem:[%s7992_s4 + $0x634] ss:$8 sps:$4 sm:$0xff]  }
 0x1a4   : > { %5711 = vmatprep.subr.bf16.mxu0 %v7618_v35  ;;  %5373 = vmatprep.subr.bf16.mxu1 %v7633_v33  ;;  %v9206_v35 = vrot.slane %v2475_v56, %v8050_v51  ;;  %v9209_v33 = vrot.slane %v2477_v34, %v8050_v51  ;;  %v7733_v56 = vld [vmem:[%s7992_s4 + $0x6d0] ss:$8 sps:$4 sm:$0xff]   ;;  %v7726_v34 = vld [vmem:[%s7992_s4 + $0xeb4] ss:$8 sps:$4 sm:$0xff]  }
 0x1a6   : > { %v2541_v22 = vcombine.high %v9206_v35, %v9209_v33 }
 0x1a7   : > { %5712 = vmatpush1.bf16.msra.mxu0 %v7616_v3  ;;  %5374 = vmatpush1.bf16.msra.mxu1 %v7631_v10  ;;  %v9219_v3 = vrot.slane %v2474_v55, %v8050_v51  ;;  %v9222_v10 = vrot.slane %v2471_v39, %v8050_v51  ;;  %v7712_v39 = vld [vmem:[%s7992_s4 + $0xe90] ss:$8 sps:$4 sm:$0xff]  }
 0x1a8   : > { %5713 = vmatprep.subr.bf16.mxu0 %v7624_v44  ;;  %5375 = vmatprep.subr.bf16.mxu1 %v7639_v6  ;;  %v7658_v44 = vld [vmem:[%s7992_s4 + $0xe00] ss:$8 sps:$4 sm:$0xff]   ;;  %v7673_v6 = vld [vmem:[%s7992_s4 + $0x630] ss:$8 sps:$4 sm:$0xff]  }
 0x1a9   : > { %v7724_v55 = vld [vmem:[%s7992_s4 + $0xeb0] ss:$8 sps:$4 sm:$0xff]  }
 0x1ab   : > { %5714 = vmatpush1.bf16.msra.mxu0 %v7622_v63  ;;  %5376 = vmatpush1.bf16.msra.mxu1 %v7637_v48  ;;  %v2537_v63 = vcombine.high %v9219_v3, %v9222_v10  ;;  %v2540_v48 = vcombine.low %v9206_v35, %v9209_v33  ;;  %v7780_v35 = vld [vmem:[%s7992_s4 + $0xf44] ss:$8 sps:$4 sm:$0xff]   ;;  %v7795_v33 = vld [vmem:[%s7992_s4 + $0x774] ss:$8 sps:$4 sm:$0xff]  }
 0x1ac   : > { %5715 = vmatprep.subr.bf16.mxu0 %v7630_v25  ;;  %5377 = vmatprep.subr.bf16.mxu1 %v7645_v41  ;;  %v7664_v25 = vld [vmem:[%s7992_s4 + $0xe10] ss:$8 sps:$4 sm:$0xff]   ;;  %v7679_v41 = vld [vmem:[%s7992_s4 + $0x640] ss:$8 sps:$4 sm:$0xff]  }
 0x1af   : > { %5716 = vmatpush1.bf16.msra.mxu0 %v7628_v20  ;;  %5378 = vmatpush1.bf16.msra.mxu1 %v7643_v4  ;;  %v7684_v20 = vld [vmem:[%s7992_s4 + $0xe44] ss:$8 sps:$4 sm:$0xff]   ;;  %v7699_v4 = vld [vmem:[%s7992_s4 + $0x674] ss:$8 sps:$4 sm:$0xff]  }
 0x1b0   : > { %5717 = vmatprep.subr.bf16.mxu0 %v7636_v38  ;;  %5379 = vmatprep.subr.bf16.mxu1 %v7651_v32  ;;  %v7682_v38 = vld [vmem:[%s7992_s4 + $0xe40] ss:$8 sps:$4 sm:$0xff]   ;;  %v7697_v32 = vld [vmem:[%s7992_s4 + $0x670] ss:$8 sps:$4 sm:$0xff]  }
 0x1b3   : > { %5718 = vmatpush1.bf16.msra.mxu0 %v7634_v17  ;;  %5380 = vmatpush1.bf16.msra.mxu1 %v7649_v43  ;;  %v7696_v17 = vld [vmem:[%s7992_s4 + $0xe64] ss:$8 sps:$4 sm:$0xff]   ;;  %v7711_v43 = vld [vmem:[%s7992_s4 + $0x694] ss:$8 sps:$4 sm:$0xff]  }
 0x1b4   : > { %5719 = vmatprep.subr.bf16.mxu0 %v7642_v54  ;;  %5392 = vmatprep.subr.bf16.mxu1 %v7657_v61  ;;  %v7694_v54 = vld [vmem:[%s7992_s4 + $0xe60] ss:$8 sps:$4 sm:$0xff]   ;;  %v7709_v61 = vld [vmem:[%s7992_s4 + $0x690] ss:$8 sps:$4 sm:$0xff]  }
 0x1b6   : > { %5382 = vmatmul.mubr.bf16.vlgmr.msra.gmra.mrb[0].mxu1 %v2301_v36  ;;  %v7667_v36 = vld [vmem:[%s7992_s4 + $0x620] ss:$8 sps:$4 sm:$0xff]  }
 0x1b7   : > { %5720 = vmatpush1.bf16.msra.mxu0 %v7640_v13  ;;  %5393 = vmatpush1.bf16.msra.mxu1 %v7655_v30  ;;  %v7715_v13 = vld [vmem:[%s7992_s4 + $0x6a0] ss:$8 sps:$4 sm:$0xff]   ;;  %v7708_v30 = vld [vmem:[%s7992_s4 + $0xe84] ss:$8 sps:$4 sm:$0xff]  }
 0x1b8   : > { %5721 = vmatprep.subr.bf16.mxu0 %v7648_v1  ;;  %5394 = vmatprep.subr.bf16.mxu1 %v7663_v37  ;;  %v7723_v1 = vld [vmem:[%s7992_s4 + $0x6b4] ss:$8 sps:$4 sm:$0xff]   ;;  %v7706_v37 = vld [vmem:[%s7992_s4 + $0xe80] ss:$8 sps:$4 sm:$0xff]  }
 0x1b9   : > { %5424 = vmatprep.mubr.bf16.mxu1 %v2306_v52  ;;  %v7721_v52 = vld [vmem:[%s7992_s4 + $0x6b0] ss:$8 sps:$4 sm:$0xff]  }
 0x1bb   : > { %5722 = vmatpush1.bf16.msra.mxu0 %v7646_v12  ;;  %5395 = vmatpush1.bf16.msra.mxu1 %v7661_v9  ;;  %v7727_v12 = vld [vmem:[%s7992_s4 + $0x6c0] ss:$8 sps:$4 sm:$0xff]   ;;  %v7720_v9 = vld [vmem:[%s7992_s4 + $0xea4] ss:$8 sps:$4 sm:$0xff]  }
 0x1bc   : > { %5723 = vmatprep.subr.bf16.mxu0 %v7654_v19  ;;  %5396 = vmatprep.subr.bf16.mxu1 %v7669_v62  ;;  %v7735_v19 = vld [vmem:[%s7992_s4 + $0x6d4] ss:$8 sps:$4 sm:$0xff]   ;;  %v7718_v62 = vld [vmem:[%s7992_s4 + $0xea0] ss:$8 sps:$4 sm:$0xff]  }
 0x1bf   : > { %5724 = vmatpush1.bf16.msra.mxu0 %v7652_v24  ;;  %5397 = vmatpush1.bf16.msra.mxu1 %v7667_v36  ;;  %v7739_v24 = vld [vmem:[%s7992_s4 + $0x6e0] ss:$8 sps:$4 sm:$0xff]   ;;  %v7732_v36 = vld [vmem:[%s7992_s4 + $0xec4] ss:$8 sps:$4 sm:$0xff]  }
 0x1c0   : > { %5736 = vmatprep.subr.bf16.mxu0 %v7660_v31  ;;  %5398 = vmatprep.subr.bf16.mxu1 %v7675_v53  ;;  %v7747_v31 = vld [vmem:[%s7992_s4 + $0x6f4] ss:$8 sps:$4 sm:$0xff]   ;;  %v7730_v53 = vld [vmem:[%s7992_s4 + $0xec0] ss:$8 sps:$4 sm:$0xff]  }
 0x1c2   : > { %5726 = vmatmul.mubr.bf16.vlgmr.msra.gmra.mrb[0].mxu0 %v2535_v50  ;;  %v7693_v50 = vld [vmem:[%s7992_s4 + $0x664] ss:$8 sps:$4 sm:$0xff]  }
 0x1c3   : > { %5737 = vmatpush1.bf16.msra.mxu0 %v7658_v44  ;;  %5399 = vmatpush1.bf16.msra.mxu1 %v7673_v6  ;;  %v7745_v44 = vld [vmem:[%s7992_s4 + $0x6f0] ss:$8 sps:$4 sm:$0xff]   ;;  %v7738_v6 = vld [vmem:[%s7992_s4 + $0xed4] ss:$8 sps:$4 sm:$0xff]  }
 0x1c4   : > { %5738 = vmatprep.subr.bf16.mxu0 %v7666_v58  ;;  %5400 = vmatprep.subr.bf16.mxu1 %v7681_v60  ;;  %v7753_v58 = vld [vmem:[%s7992_s4 + $0x704] ss:$8 sps:$4 sm:$0xff]   ;;  %v2302_v60 = vcombine.low %v9212_v15, %v9216_v2 }
 0x1c5   : > { %5768 = vmatprep.mubr.bf16.mxu0 %v2540_v48  ;;  %v7736_v48 = vld [vmem:[%s7992_s4 + $0xed0] ss:$8 sps:$4 sm:$0xff]  }
 0x1c7   : > { %5739 = vmatpush1.bf16.msra.mxu0 %v7664_v25  ;;  %5401 = vmatpush1.bf16.msra.mxu1 %v7679_v41  ;;  %v7751_v25 = vld [vmem:[%s7992_s4 + $0x700] ss:$8 sps:$4 sm:$0xff]   ;;  %v7744_v41 = vld [vmem:[%s7992_s4 + $0xee4] ss:$8 sps:$4 sm:$0xff]  }
 0x1c8   : > { %5740 = vmatprep.subr.bf16.mxu0 %v7672_v47  ;;  %5402 = vmatprep.subr.bf16.mxu1 %v7687_v59  ;;  %v7759_v47 = vld [vmem:[%s7992_s4 + $0x714] ss:$8 sps:$4 sm:$0xff]   ;;  %v7742_v59 = vld [vmem:[%s7992_s4 + $0xee0] ss:$8 sps:$4 sm:$0xff]  }
 0x1cb   : > { %5741 = vmatpush1.bf16.msra.mxu0 %v7670_v28  ;;  %5403 = vmatpush1.bf16.msra.mxu1 %v7685_v7  ;;  %v7757_v28 = vld [vmem:[%s7992_s4 + $0x710] ss:$8 sps:$4 sm:$0xff]   ;;  %v7750_v7 = vld [vmem:[%s7992_s4 + $0xef4] ss:$8 sps:$4 sm:$0xff]  }
 0x1cc   : > { %5742 = vmatprep.subr.bf16.mxu0 %v7678_v49  ;;  %5404 = vmatprep.subr.bf16.mxu1 %v7693_v50  ;;  %v7765_v49 = vld [vmem:[%s7992_s4 + $0x724] ss:$8 sps:$4 sm:$0xff]   ;;  %v7748_v50 = vld [vmem:[%s7992_s4 + $0xef0] ss:$8 sps:$4 sm:$0xff]  }
 0x1cf   : > { %5743 = vmatpush1.bf16.msra.mxu0 %v7676_v27  ;;  %5405 = vmatpush1.bf16.msra.mxu1 %v7691_v42  ;;  %v7763_v27 = vld [vmem:[%s7992_s4 + $0x720] ss:$8 sps:$4 sm:$0xff]   ;;  %v7756_v42 = vld [vmem:[%s7992_s4 + $0xf04] ss:$8 sps:$4 sm:$0xff]  }
 0x1d0   : > { %5744 = vmatprep.subr.bf16.mxu0 %v7684_v20  ;;  %5406 = vmatprep.subr.bf16.mxu1 %v7699_v4  ;;  %v7771_v20 = vld [vmem:[%s7992_s4 + $0x734] ss:$8 sps:$4 sm:$0xff]   ;;  %v2536_v4 = vcombine.low %v9219_v3, %v9222_v10 }
 0x1d3   : > { %5745 = vmatpush1.bf16.msra.mxu0 %v7682_v38  ;;  %5407 = vmatpush1.bf16.msra.mxu1 %v7697_v32  ;;  %v7777_v38 = vld [vmem:[%s7992_s4 + $0x744] ss:$8 sps:$4 sm:$0xff]   ;;  %v7760_v32 = vld [vmem:[%s7992_s4 + $0xf10] ss:$8 sps:$4 sm:$0xff]  }
 0x1d4   : > { %5746 = vmatprep.subr.bf16.mxu0 %v7690_v40  ;;  %5408 = vmatprep.subr.bf16.mxu1 %v7705_v11  ;;  %v7775_v40 = vld [vmem:[%s7992_s4 + $0x740] ss:$8 sps:$4 sm:$0xff]   ;;  %v7768_v11 = vld [vmem:[%s7992_s4 + $0xf24] ss:$8 sps:$4 sm:$0xff]  }
 0x1d7   : > { %5747 = vmatpush1.bf16.msra.mxu0 %v7688_v18  ;;  %5409 = vmatpush1.bf16.msra.mxu1 %v7703_v0  ;;  %v7783_v18 = vld [vmem:[%s7992_s4 + $0x754] ss:$8 sps:$4 sm:$0xff]   ;;  %v7766_v0 = vld [vmem:[%s7992_s4 + $0xf20] ss:$8 sps:$4 sm:$0xff]  }
 0x1d8   : > { %5748 = vmatprep.subr.bf16.mxu0 %v7696_v17  ;;  %5410 = vmatprep.subr.bf16.mxu1 %v7711_v43  ;;  %v7781_v17 = vld [vmem:[%s7992_s4 + $0x750] ss:$8 sps:$4 sm:$0xff]   ;;  %v7774_v43 = vld [vmem:[%s7992_s4 + $0xf34] ss:$8 sps:$4 sm:$0xff]  }
 0x1db   : > { %5749 = vmatpush1.bf16.msra.mxu0 %v7694_v54  ;;  %5411 = vmatpush1.bf16.msra.mxu1 %v7709_v61  ;;  %v7789_v54 = vld [vmem:[%s7992_s4 + $0x764] ss:$8 sps:$4 sm:$0xff]   ;;  %v7772_v61 = vld [vmem:[%s7992_s4 + $0xf30] ss:$8 sps:$4 sm:$0xff]  }
 0x1dc   : > { %5750 = vmatprep.subr.bf16.mxu0 %v7702_v5  ;;  %5412 = vmatprep.subr.bf16.mxu1 %v7717_v16  ;;  %v7787_v5 = vld [vmem:[%s7992_s4 + $0x760] ss:$8 sps:$4 sm:$0xff]   ;;  %v7793_v16 = vld [vmem:[%s7992_s4 + $0x770] ss:$8 sps:$4 sm:$0xff]  }
 0x1df   : > { %5751 = vmatpush1.bf16.msra.mxu0 %v7700_v23  ;;  %5413 = vmatpush1.bf16.msra.mxu1 %v7715_v13  ;;  %v7786_v23 = vld [vmem:[%s7992_s4 + $0xf54] ss:$8 sps:$4 sm:$0xff]   ;;  %v7801_v13 = vld [vmem:[%s7992_s4 + $0x784] ss:$8 sps:$4 sm:$0xff]  }
 0x1e0   : > { %5752 = vmatprep.subr.bf16.mxu0 %v7708_v30  ;;  %5414 = vmatprep.subr.bf16.mxu1 %v7723_v1  ;;  %v7784_v30 = vld [vmem:[%s7992_s4 + $0xf50] ss:$8 sps:$4 sm:$0xff]   ;;  %v7799_v1 = vld [vmem:[%s7992_s4 + $0x780] ss:$8 sps:$4 sm:$0xff]  }
 0x1e3   : > { %5753 = vmatpush1.bf16.msra.mxu0 %v7706_v37  ;;  %5415 = vmatpush1.bf16.msra.mxu1 %v7721_v52  ;;  %v7792_v37 = vld [vmem:[%s7992_s4 + $0xf64] ss:$8 sps:$4 sm:$0xff]   ;;  %v7807_v52 = vld [vmem:[%s7992_s4 + $0x794] ss:$8 sps:$4 sm:$0xff]  }
 0x1e4   : > { %5754 = vmatprep.subr.bf16.mxu0 %v7714_v26  ;;  %5416 = vmatprep.subr.bf16.mxu1 %v7729_v14  ;;  %v7790_v26 = vld [vmem:[%s7992_s4 + $0xf60] ss:$8 sps:$4 sm:$0xff]   ;;  %v7805_v14 = vld [vmem:[%s7992_s4 + $0x790] ss:$8 sps:$4 sm:$0xff]  }
 0x1e7   : > { %5755 = vmatpush1.bf16.msra.mxu0 %v7712_v39  ;;  %5417 = vmatpush1.bf16.msra.mxu1 %v7727_v12  ;;  %v7798_v39 = vld [vmem:[%s7992_s4 + $0xf74] ss:$8 sps:$4 sm:$0xff]   ;;  %v7813_v12 = vld [vmem:[%s7992_s4 + $0x7a4] ss:$8 sps:$4 sm:$0xff]  }
 0x1e8   : > { %5756 = vmatprep.subr.bf16.mxu0 %v7720_v9  ;;  %5418 = vmatprep.subr.bf16.mxu1 %v7735_v19  ;;  %v7796_v9 = vld [vmem:[%s7992_s4 + $0xf70] ss:$8 sps:$4 sm:$0xff]   ;;  %v7811_v19 = vld [vmem:[%s7992_s4 + $0x7a0] ss:$8 sps:$4 sm:$0xff]  }
 0x1eb   : > { %5757 = vmatpush1.bf16.msra.mxu0 %v7718_v62  ;;  %5419 = vmatpush1.bf16.msra.mxu1 %v7733_v56  ;;  %v7804_v62 = vld [vmem:[%s7992_s4 + $0xf84] ss:$8 sps:$4 sm:$0xff]   ;;  %v7819_v56 = vld [vmem:[%s7992_s4 + $0x7b4] ss:$8 sps:$4 sm:$0xff]  }
 0x1ec   : > { %5758 = vmatprep.subr.bf16.mxu0 %v7726_v34  ;;  %5420 = vmatprep.subr.bf16.mxu1 %v7741_v57  ;;  %v7802_v34 = vld [vmem:[%s7992_s4 + $0xf80] ss:$8 sps:$4 sm:$0xff]   ;;  %v7817_v57 = vld [vmem:[%s7992_s4 + $0x7b0] ss:$8 sps:$4 sm:$0xff]  }
 0x1ef   : > { %5759 = vmatpush1.bf16.msra.mxu0 %v7724_v55  ;;  %5421 = vmatpush1.bf16.msra.mxu1 %v7739_v24  ;;  %v7810_v55 = vld [vmem:[%s7992_s4 + $0xf94] ss:$8 sps:$4 sm:$0xff]   ;;  %v7825_v24 = vld [vmem:[%s7992_s4 + $0x7c4] ss:$8 sps:$4 sm:$0xff]  }
 0x1f0   : > { %5760 = vmatprep.subr.bf16.mxu0 %v7732_v36  ;;  %5422 = vmatprep.subr.bf16.mxu1 %v7747_v31  ;;  %v7808_v36 = vld [vmem:[%s7992_s4 + $0xf90] ss:$8 sps:$4 sm:$0xff]   ;;  %v7823_v31 = vld [vmem:[%s7992_s4 + $0x7c0] ss:$8 sps:$4 sm:$0xff]  }
 0x1f3   : > { %5761 = vmatpush1.bf16.msra.mxu0 %v7730_v53  ;;  %5423 = vmatpush1.bf16.msra.mxu1 %v7745_v44  ;;  %v7816_v53 = vld [vmem:[%s7992_s4 + $0xfa4] ss:$8 sps:$4 sm:$0xff]   ;;  %v7831_v44 = vld [vmem:[%s7992_s4 + $0x7d4] ss:$8 sps:$4 sm:$0xff]  }
 0x1f4   : > { %5762 = vmatprep.subr.bf16.mxu0 %v7738_v6  ;;  %5435 = vmatprep.subr.bf16.mxu1 %v7753_v58  ;;  %v7814_v6 = vld [vmem:[%s7992_s4 + $0xfa0] ss:$8 sps:$4 sm:$0xff]   ;;  %v7829_v58 = vld [vmem:[%s7992_s4 + $0x7d0] ss:$8 sps:$4 sm:$0xff]  }
 0x1f6   : > { %5425 = vmatmul.mubr.bf16.vlgmr.msra.gmra.mrb[0].mxu1 %v2302_v60  ;;  %v7822_v60 = vld [vmem:[%s7992_s4 + $0xfb4] ss:$8 sps:$4 sm:$0xff]  }
 0x1f7   : > { %5763 = vmatpush1.bf16.msra.mxu0 %v7736_v48  ;;  %5436 = vmatpush1.bf16.msra.mxu1 %v7751_v25  ;;  %v7837_v48 = vld [vmem:[%s7992_s4 + $0x7e4] ss:$8 sps:$4 sm:$0xff]   ;;  %v7820_v25 = vld [vmem:[%s7992_s4 + $0xfb0] ss:$8 sps:$4 sm:$0xff]  }
 0x1f8   : > { %5764 = vmatprep.subr.bf16.mxu0 %v7744_v41  ;;  %5437 = vmatprep.subr.bf16.mxu1 %v7759_v47  ;;  %v7835_v41 = vld [vmem:[%s7992_s4 + $0x7e0] ss:$8 sps:$4 sm:$0xff]   ;;  %v7828_v47 = vld [vmem:[%s7992_s4 + $0xfc4] ss:$8 sps:$4 sm:$0xff]  }
 0x1f9   : > { %5467 = vmatprep.mubr.bf16.mxu1 %v2307_v45  ;;  %v7762_v45 = vld [vmem:[%s7992_s4 + $0xf14] ss:$8 sps:$4 sm:$0xff]  }
 0x1fb   : > { %5765 = vmatpush1.bf16.msra.mxu0 %v7742_v59  ;;  %5438 = vmatpush1.bf16.msra.mxu1 %v7757_v28  ;;  %v7843_v59 = vld [vmem:[%s7992_s4 + $0x7f4] ss:$8 sps:$4 sm:$0xff]   ;;  %v7826_v28 = vld [vmem:[%s7992_s4 + $0xfc0] ss:$8 sps:$4 sm:$0xff]  }
 0x1fc   : > { %5766 = vmatprep.subr.bf16.mxu0 %v7750_v7  ;;  %5439 = vmatprep.subr.bf16.mxu1 %v7765_v49  ;;  %v7841_v7 = vld [vmem:[%s7992_s4 + $0x7f0] ss:$8 sps:$4 sm:$0xff]   ;;  %v7834_v49 = vld [vmem:[%s7992_s4 + $0xfd4] ss:$8 sps:$4 sm:$0xff]  }
 0x1ff   : > { %5767 = vmatpush1.bf16.msra.mxu0 %v7748_v50  ;;  %5440 = vmatpush1.bf16.msra.mxu1 %v7763_v27  ;;  %v7832_v50 = vld [vmem:[%s7992_s4 + $0xfd0] ss:$8 sps:$4 sm:$0xff]   ;;  %v7840_v27 = vld [vmem:[%s7992_s4 + $0xfe4] ss:$8 sps:$4 sm:$0xff]  }
 0x200   : > { %5779 = vmatprep.subr.bf16.mxu0 %v7756_v42  ;;  %5441 = vmatprep.subr.bf16.mxu1 %v7771_v20  ;;  %v7838_v42 = vld [vmem:[%s7992_s4 + $0xfe0] ss:$8 sps:$4 sm:$0xff]   ;;  %v7846_v20 = vld [vmem:[%s7992_s4 + $0xff4] ss:$8 sps:$4 sm:$0xff]  }
 0x202   : > { %5769 = vmatmul.mubr.bf16.vlgmr.msra.gmra.mrb[0].mxu0 %v2536_v4  ;;  %v7844_v4 = vld [vmem:[%s7992_s4 + $0xff0] ss:$8 sps:$4 sm:$0xff]  }
 0x203   : > { %5780 = vmatpush1.bf16.msra.mxu0 %v7754_v29  ;;  %5442 = vmatpush1.bf16.msra.mxu1 %v7769_v8 }
 0x204   : > { %5781 = vmatprep.subr.bf16.mxu0 %v7762_v45  ;;  %5443 = vmatprep.subr.bf16.mxu1 %v7777_v38 }
 0x205   : > { %5811 = vmatprep.mubr.bf16.mxu0 %v2541_v22  ;;  %v7778_v22 = vld [vmem:[%s7992_s4 + $0xf40] ss:$8 sps:$4 sm:$0xff]  }
 0x207   : > { %5782 = vmatpush1.bf16.msra.mxu0 %v7760_v32  ;;  %5444 = vmatpush1.bf16.msra.mxu1 %v7775_v40 }
 0x208   : > { %5783 = vmatprep.subr.bf16.mxu0 %v7768_v11  ;;  %5445 = vmatprep.subr.bf16.mxu1 %v7783_v18 }
 0x20b   : > { %5784 = vmatpush1.bf16.msra.mxu0 %v7766_v0  ;;  %5446 = vmatpush1.bf16.msra.mxu1 %v7781_v17 }
 0x20c   : > { %5785 = vmatprep.subr.bf16.mxu0 %v7774_v43  ;;  %5447 = vmatprep.subr.bf16.mxu1 %v7789_v54 }
 0x20f   : > { %5786 = vmatpush1.bf16.msra.mxu0 %v7772_v61  ;;  %5448 = vmatpush1.bf16.msra.mxu1 %v7787_v5 }
 0x210   : > { %5787 = vmatprep.subr.bf16.mxu0 %v7780_v35  ;;  %5449 = vmatprep.subr.bf16.mxu1 %v7795_v33 }
 0x213   : > { %5788 = vmatpush1.bf16.msra.mxu0 %v7778_v22  ;;  %5450 = vmatpush1.bf16.msra.mxu1 %v7793_v16 }
 0x214   : > { %5789 = vmatprep.subr.bf16.mxu0 %v7786_v23  ;;  %5451 = vmatprep.subr.bf16.mxu1 %v7801_v13 }
 0x217   : > { %5790 = vmatpush1.bf16.msra.mxu0 %v7784_v30  ;;  %5452 = vmatpush1.bf16.msra.mxu1 %v7799_v1 }
 0x218   : > { %5791 = vmatprep.subr.bf16.mxu0 %v7792_v37  ;;  %5453 = vmatprep.subr.bf16.mxu1 %v7807_v52 }
 0x21b   : > { %5792 = vmatpush1.bf16.msra.mxu0 %v7790_v26  ;;  %5454 = vmatpush1.bf16.msra.mxu1 %v7805_v14 }
 0x21c   : > { %5793 = vmatprep.subr.bf16.mxu0 %v7798_v39  ;;  %5455 = vmatprep.subr.bf16.mxu1 %v7813_v12 }
 0x21f   : > { %5794 = vmatpush1.bf16.msra.mxu0 %v7796_v9  ;;  %5456 = vmatpush1.bf16.msra.mxu1 %v7811_v19 }
 0x220   : > { %5795 = vmatprep.subr.bf16.mxu0 %v7804_v62  ;;  %5457 = vmatprep.subr.bf16.mxu1 %v7819_v56 }
 0x223   : > { %5796 = vmatpush1.bf16.msra.mxu0 %v7802_v34  ;;  %5458 = vmatpush1.bf16.msra.mxu1 %v7817_v57 }
 0x224   : > { %5797 = vmatprep.subr.bf16.mxu0 %v7810_v55  ;;  %5459 = vmatprep.subr.bf16.mxu1 %v7825_v24 }
 0x227   : > { %5798 = vmatpush1.bf16.msra.mxu0 %v7808_v36  ;;  %5460 = vmatpush1.bf16.msra.mxu1 %v7823_v31 }
 0x228   : > { %5799 = vmatprep.subr.bf16.mxu0 %v7816_v53  ;;  %5461 = vmatprep.subr.bf16.mxu1 %v7831_v44 }
 0x22b   : > { %5800 = vmatpush1.bf16.msra.mxu0 %v7814_v6  ;;  %5462 = vmatpush1.bf16.msra.mxu1 %v7829_v58 }
 0x22c   : > { %5801 = vmatprep.subr.bf16.mxu0 %v7822_v60  ;;  %5463 = vmatprep.subr.bf16.mxu1 %v7837_v48 }
 0x22f   : > { %5802 = vmatpush1.bf16.msra.mxu0 %v7820_v25  ;;  %5464 = vmatpush1.bf16.msra.mxu1 %v7835_v41 }
 0x230   : > { %5803 = vmatprep.subr.bf16.mxu0 %v7828_v47  ;;  %5465 = vmatprep.subr.bf16.mxu1 %v7843_v59 }
 0x233   : > { %5804 = vmatpush1.bf16.msra.mxu0 %v7826_v28  ;;  %5466 = vmatpush1.bf16.msra.mxu1 %v7841_v7 }
 0x234   : > { %5805 = vmatprep.subr.bf16.mxu0 %v7834_v49 }
 0x236   : > { %5468 = vmatmul.mubr.bf16.vlgmr.msra.gmra.mrb[0].mxu1 %v2303_v21 }
 0x237   : > { %5806 = vmatpush1.bf16.msra.mxu0 %v7832_v50 }
 0x238   : > { %5807 = vmatprep.subr.bf16.mxu0 %v7840_v27 }
 0x23b   : > { %5808 = vmatpush1.bf16.msra.mxu0 %v7838_v42 }
 0x23c   : > { %5809 = vmatprep.subr.bf16.mxu0 %v7846_v20 }
 0x23f   : > { %5810 = vmatpush1.bf16.msra.mxu0 %v7844_v4 }
 0x242   : > { %5812 = vmatmul.mubr.bf16.vlgmr.msra.gmra.mrb[0].mxu0 %v2537_v63 }
 0x309   : > { %v5469_v29 = vpop.f32.mrb[0].mxu1 }
 0x30a   : > { %v5471_v8 = vpop.f32.mrb[1].mxu1 }
 0x30b   : > { %v5473_v45 = vpop.f32.mrb[2].mxu1 }
 0x30c   : > { %v5475_v38 = vpop.f32.mrb[3].mxu1 }
 0x315   : > { %v5813_v32 = vpop.f32.mrb[0].mxu0 }
 0x316   : > { %v9373_v40 = vadd.f32 %v5813_v32, %v5469_v29  ;;  %v5815_v15 = vpop.f32.mrb[1].mxu0  ;;  %v5890_v32 = vsub.s32 5, %v8038_v46 }
 0x317   : > { %v9375_v2 = vadd.f32 %v5815_v15, %v5471_v8  ;;  %v5817_v21 = vpop.f32.mrb[2].mxu0  ;;  %v5825_v8 = vld [vmem:[%s5824_s22] sm:$0x77] }
 0x318   : > { %v9377_v11 = vadd.f32 %v5817_v21, %v5473_v45  ;;  %v5819_v18 = vpop.f32.mrb[3].mxu0  ;;  %v5845_v63 = vmul.f32 %v9373_v40, %v9373_v40 }
 0x319   : > { %v9379_v0 = vadd.f32 %v5819_v18, %v5475_v38  ;;  %v5846_v61 = vmul.f32 %v9375_v2, %v9375_v2  ;;  %v5886_v38 = vsub.s32 1, %v8038_v46 }
 0x31a   : > { %v5827_v3 = vsel %vm5826_vm0, %v9377_v11, 0.0  ;;  %v5847_v10 = vmul.f32 %v9377_v11, %v9377_v11 }
 0x31b   : > { %v5828_v17 = vadd.f32 %v9373_v40, %v5827_v3  ;;  %v5835_v43 = vsel %vm5826_vm0, %v9379_v0, 0.0  ;;  %v5848_v54 = vmul.f32 %v9379_v0, %v9379_v0 }
 0x31c   : > { %v5849_v5 = vsel %vm5826_vm0, %v5847_v10, 0.0  ;;  %v5836_v35 = vadd.f32 %v9375_v2, %v5835_v43 }
 0x31d   : > { %v5829_v33 = vrot.slane %v5828_v17, 4  ;;  %v5850_v22 = vadd.f32 %v5849_v5, %v5845_v63  ;;  %v5857_v16 = vsel %vm5826_vm0, %v5848_v54, 0.0 }
 0x31e   : > { %v5837_v23 = vrot.slane %v5836_v35, 4  ;;  %v5858_v13 = vadd.f32 %v5857_v16, %v5846_v61  ;;  %v5921_v16 = vsub.s32 6, %v8038_v46 }
 0x31f   : > { %v5830_v30 = vadd.f32 %v5829_v33, %v5828_v17  ;;  %v5851_v1 = vrot.slane %v5850_v22, 4 }
 0x320   : > { %v5838_v37 = vadd.f32 %v5837_v23, %v5836_v35  ;;  %v5859_v52 = vrot.slane %v5858_v13, 4 }
 0x321   : > { %v5831_v26 = vrot.slane %v5830_v30, 2  ;;  %v5852_v14 = vadd.f32 %v5851_v1, %v5850_v22  ;;  %v5917_v22 = vsub.s32 2, %v8038_v46 }
 0x322   : > { %v5839_v39 = vrot.slane %v5838_v37, 2  ;;  %v5860_v12 = vadd.f32 %v5859_v52, %v5858_v13 }
 0x323   : > { %v5832_v9 = vadd.f32 %v5831_v26, %v5830_v30  ;;  %v5853_v19 = vrot.slane %v5852_v14, 2 }
 0x324   : > { %v5840_v62 = vadd.f32 %v5839_v39, %v5838_v37  ;;  %v5861_v56 = vrot.slane %v5860_v12, 2 }
 0x325   : > { %v5833_v34 = vrot.slane %v5832_v9, 1  ;;  %v5854_v57 = vadd.f32 %v5853_v19, %v5852_v14 }
 0x326   : > { %v5841_v55 = vrot.slane %v5840_v62, 1  ;;  %v5862_v24 = vadd.f32 %v5861_v56, %v5860_v12 }
 0x327   : > { %v5834_v36 = vadd.f32 %v5833_v34, %v5832_v9  ;;  %v5855_v31 = vrot.slane %v5854_v57, 1 }
 0x328   : > { %v5842_v53 = vadd.f32 %v5841_v55, %v5840_v62  ;;  %v5863_v44 = vrot.slane %v5862_v24, 1 }
 0x329   : > { %v5843_v6 = vmul.f32 0.11111111, %v5834_v36  ;;  %v5856_v58 = vadd.f32 %v5855_v31, %v5854_v57 }
 0x32a   : > { %v5844_v60 = vmul.f32 0.11111111, %v5842_v53  ;;  %v5864_v48 = vadd.f32 %v5863_v44, %v5862_v24 }
 0x32b   : > { %v5865_v25 = vmul.f32 0.11111111, %v5856_v58  ;;  %v5867_v41 = vmul.f32 %v5843_v6, %v5843_v6 }
 0x32c   : > { %v5866_v47 = vmul.f32 0.11111111, %v5864_v48  ;;  %v5868_v59 = vmul.f32 %v5844_v60, %v5844_v60 }
 0x32d   : > { %v5869_v28 = vsub.f32 %v5865_v25, %v5867_v41 }
 0x32e   : > { %v5870_v7 = vsub.f32 %v5866_v47, %v5868_v59 }
 0x32f   : > { %v5871_v49 = vmax.f32 %v5869_v28, 0.0 }
 0x330   : > { %v5872_v50 = vmax.f32 %v5870_v7, 0.0 }
 0x331   : > { %v5873_v27 = vadd.f32 1e-05, %v5871_v49 }
 0x332   : > { %v5874_v42 = vadd.f32 1e-05, %v5872_v50 }
 0x333   : > { %7847 = vrsqrt.f32 %v5873_v27 }
 0x334   : > { %7849 = vrsqrt.f32 %v5874_v42 }
 0x33d   : > { %v7848_v20 = vpop.eup %7847 }
 0x33e   : > { %v7850_v4 = vpop.eup %7849 }
 0x33f   : > { %v5879_v29 = vcombine.low %v7848_v20, %v7850_v4 }
 0x341   : > { %v5880_v45 = vrot.slane %v5879_v29, 7 }
 0x343   : > { %v5882_v15 = vmul.f32 %v5880_v45, %v5825_v8 }
 0x345   : > { %v5887_v21 = vrot.slane %v5882_v15, %v5886_v38  ;;  %v5891_v18 = vrot.slane %v5882_v15, %v5890_v32 }
 0x347   : > { %v5894_v3 = vmul.f32 %v5887_v21, %v5843_v6  ;;  %v5895_v10 = vmul.f32 %v5891_v18, %v5844_v60  ;;  %v5905_v63 = vrot.slane %v5887_v21, %v5886_v38  ;;  %v5909_v17 = vrot.slane %v5891_v18, %v5886_v38 }
 0x348   : > { %v7908_v6 = vmov 1983009808  }
 0x349   : > { %v5898_v43 = vcombine.low %v5894_v3, %v5895_v10  ;;  %v5910_v54 = vmul.f32 %v9373_v40, %v5905_v63  ;;  %v5911_v61 = vmul.f32 %v9375_v2, %v5909_v17  ;;  %v5912_v5 = vmul.f32 %v9377_v11, %v5905_v63 }
 0x34a   : > { %v5913_v35 = vmul.f32 %v9379_v0, %v5909_v17  ;;  %v6127_v58 = vunpack.c.l.s4 %v7908_v6 }
 0x34b   : > { %v5899_v33 = vrot.slane %v5898_v43, 6 }
 0x34c   : > { %v6128_v49 = vunpack.c.0.s8 %v6127_v58 }
 0x34d   : > { %v5901_v23 = vsub.f32 %v5825_v8, %v5899_v33 }
 0x34e   : > { %v6131_v21 = vsub.s32 %v6128_v49, %v8038_v46  ;;  %v6159_v46 = vld [vmem:[%s173_s12] sm:$0xf] }
 0x34f   : > { %v5918_v13 = vrot.slane %v5901_v23, %v5917_v22  ;;  %v5922_v30 = vrot.slane %v5901_v23, %v5921_v16  ;;  %v6165_v16 = vld [vmem:[%s173_s12 + $0x8] sm:$0xf] }
 0x351   : > { %v5928_v1 = vrot.slane %v5918_v13, %v5917_v22  ;;  %v5932_v37 = vrot.slane %v5922_v30, %v5917_v22  ;;  %v6162_v13 = vld [vmem:[%s173_s12 + $0x4] sm:$0xf] }
 0x353   : > { %v5933_v52 = vadd.f32 %v5928_v1, %v5910_v54  ;;  %v5934_v26 = vadd.f32 %v5932_v37, %v5911_v61  ;;  %v5935_v14 = vadd.f32 %v5928_v1, %v5912_v5  ;;  %v5936_v40 = vadd.f32 %v5932_v37, %v5913_v35 }
 0x355   : > { %v5937_v39 = vmul.f32 0.2, %v5933_v52  ;;  %v5938_v2 = vmul.f32 0.2, %v5934_v26  ;;  %v5939_v12 = vmul.f32 0.2, %v5935_v14 }
 0x356   : > { %v5940_v11 = vmul.f32 0.2, %v5936_v40 }
 0x357   : > { %v5941_v9 = vmax.f32 %v5933_v52, %v5937_v39  ;;  %v5942_v0 = vmax.f32 %v5934_v26, %v5938_v2  ;;  %v5943_v19 = vmax.f32 %v5935_v14, %v5939_v12 }
 0x358   : > { %v5944_v62 = vmax.f32 %v5936_v40, %v5940_v11 }
 0x359   : > { %v5949_v56 = vcombine.low %v5941_v9, %v5942_v0  ;;  %v5950_v34 = vcombine.high %v5941_v9, %v5942_v0 }
 0x35a   : > { %v5999_v57 = vcombine.low %v5943_v19, %v5944_v62 }
 0x35b   : > { %v5957_v55 = vrot.slane %v5949_v56, %v8050_v51  ;;  %v5964_v24 = vrot.slane %v5950_v34, %v8050_v51 }
 0x35c   : > { %v6006_v36 = vrot.slane %v5999_v57, %v8050_v51 }
 0x35d   : > { %v5965_v31 = vcombine.high %v5957_v55, %v5957_v55  ;;  %v5966_v53 = vcombine.high %v5964_v24, %v5964_v24  ;;  %v5973_v44 = vrot.slane %v5957_v55, %v8050_v51  ;;  %v5980_v41 = vrot.slane %v5964_v24, %v8050_v51 }
 0x35e   : > { %v6013_v47 = vrot.slane %v6006_v36, %v8050_v51 }
 0x35f   : > { %v5987_v60 = vrot.slane %v5965_v31, %v8050_v51  ;;  %v5994_v48 = vrot.slane %v5966_v53, %v8050_v51  ;;  %v5995_v25 = vcombine.high %v5973_v44, %v5973_v44 }
 0x360   : > { %v6090_v4 = vrot.slane %v6013_v47, %v8050_v51 }
 0x361   : > { %v5997_v59 = vcombine.high %v5987_v60, %v5987_v60  ;;  %v6014_v28 = vcombine.low %v5973_v44, %v5987_v60  ;;  %v6900_v7 = vcombine.high %v5980_v41, %v5994_v48  ;;  %v6028_v27 = vrot.slane %v5995_v25, %v8050_v51 }
 0x362   : > { %v6059_v38 = vrot.slane %v5994_v48, %v8050_v51 }
 0x363   : > { %v6021_v50 = vrot.slane %v6014_v28, %v8050_v51  ;;  %v6045_v42 = vcombine.low %v5997_v59, %v5980_v41  ;;  %v6083_v20 = vrot.slane %v6900_v7, %v8050_v51 }
 0x365   : > { %v6029_v29 = vcombine.low %v6021_v50, %v6028_v27  ;;  %v6030_v8 = vcombine.high %v6021_v50, %v6028_v27  ;;  %v6052_v45 = vrot.slane %v6045_v42, %v8050_v51  ;;  %v6091_v32 = vcombine.low %v6083_v20, %v6090_v4 }
 0x366   : > { %v6092_v15 = vcombine.high %v6083_v20, %v6090_v4 }
 0x367   : > { %v6037_v18 = vrot.slane %v6029_v29, %v8050_v51  ;;  %v6044_v3 = vrot.slane %v6030_v8, %v8050_v51  ;;  %v6060_v10 = vcombine.low %v6052_v45, %v6059_v38  ;;  %v6061_v63 = vcombine.high %v6052_v45, %v6059_v38 }
 0x368   : > { %v6099_v17 = vrot.slane %v6091_v32, %v8050_v51  ;;  %v6106_v43 = vrot.slane %v6092_v15, %v8050_v51 }
 0x369   : > { %v6068_v54 = vrot.slane %v6060_v10, %v8050_v51  ;;  %v6075_v61 = vrot.slane %v6061_v63, %v8050_v51  ;;  %v6901_v5 = vpack.c.bf16 %v6044_v3, %v6037_v18 }
 0x36a   : > { %v6903_v35 = vpack.c.bf16 %v6106_v43, %v6099_v17  ;;  %6174 = sbr.rel (!%p7975_p5) target bundleno = 889 (0x379), region = 36 }
 0x36b   : > { %v6132_v33 = vrot.slane %v6901_v5, %v6131_v21  ;;  %v6902_v22 = vpack.c.bf16 %v6075_v61, %v6068_v54 }
 0x36c   : > { %v6148_v23 = vrot.slane %v6903_v35, %v6131_v21 }
 0x36d   : > { %v6140_v30 = vrot.slane %v6902_v22, %v6131_v21  ;;  %v6160_v1 = vsel %vm6158_vm7, %v6132_v33, %v6159_v46 }
 0x36e   : > { %6161 = vst [vmem:[%s173_s12] sm:$0xf] %v6160_v1  ;;  %v6166_v37 = vsel %vm6158_vm7, %v6148_v23, %v6165_v16 }
 0x36f   : > { %v6163_v52 = vsel %vm6158_vm7, %v6140_v30, %v6162_v13  ;;  %6167 = vst [vmem:[%s173_s12 + $0x8] sm:$0xf] %v6166_v37 }
 0x370   : > { %6164 = vst [vmem:[%s173_s12 + $0x4] sm:$0xf] %v6163_v52 }
 0x375   : > { %v6195_v51 = vld [vmem:[%s173_s12] sm:$0xf] }
 0x376   : > { %v6199_v14 = vld [vmem:[%s173_s12 + $0x8] sm:$0xf]  ;;  %6196 = vst [vmem:[%s6179_s6] sm:$0xf] %v6195_v51 }
 0x377   : > { %v6197_v26 = vld [vmem:[%s173_s12 + $0x4] sm:$0xf]  ;;  %6200 = vst [vmem:[%s6179_s6 + $0x10] sm:$0xf] %v6199_v14 }
 0x378   : > { %6198 = vst [vmem:[%s6179_s6 + $0x8] sm:$0xf] %v6197_v26 }
 0x379 PF: > { %s13_s18 = sadd.s32 1, %s7905_s18   ;;  %s9469_s12 = smov %s7885_s13 }
 0x37a   : > { %p10_p10 = scmp.ge.s32.totalorder %s13_s18, 6   ;;  %s9470_s13 = smov %s7986_s27 }
 0x37b   : > { %s9471_s14 = smov %s7897_s16  ;;  %s9472_s15 = smov %s7901_s17 }
 0x37c   : > { %s9473_s16 = smov %s9476_s19  ;;  %s9474_s17 = smov %s9480_s20 }
 0x37d   :  { %12 = sbr.rel (!%p10_p10) target bundleno = 4 (0x4), region = 108 }

// kernel: _lambda_.9
= control target key start
LH: loop header
LB: loop body
LE: loop exit
PB: predicated region body
PF: predicated region fallthrough
CT: control target
= control target key end

     0   :  { %s9984_s12 = smov 0   ;;  %s9986_s13 = smov 0   ;;  %s11793_s0 = inlined_call_operand.vmem [shape: bf16[2,5,5,512], index: 0, kind: input, shape index: {}]   ;;  %s11794_s1 = inlined_call_operand.vmem [shape: bf16[1,8192,128], index: 1, kind: input, shape index: {}]   ;;  %s11795_s2 = inlined_call_operand.vmem [shape: f32[1,3,128], index: 2, kind: input, shape index: {}]   ;;  %s11796_s3 = inlined_call_operand.vmem [shape: f32[2,2,2,128], index: 3, kind: output, shape index: {}]  }
   0x1   :  { %s9988_s14 = smov 0  }
   0x2 LB: > { %s25_s15 = sadd.s32 1, %s9956_s13  ;;  %p7864_p0 = scmp.ge.s32.totalorder %s9960_s14, 1  ;;  %s9960_s14 = sphi %s9988_s14, %s13_s14   ;;  %s9956_s13 = sphi %s9986_s13, %s11798_s13   ;;  %s9952_s12 = sphi %s9984_s12, %s11797_s12  }
   0x3   : > { %p27_p1 = scmp.ge.s32.totalorder %s25_s15, 2  ;;  %p151_p2 = scmp.lt.s32.totalorder %s9960_s14, 3 }
   0x5   : > { %s11800_s15 = smov (%p27_p1, %s25_s15), 0  ;;  %p152_p3 = pnand %p7864_p0, %p151_p2 }
   0x6   : > { %v9324_v0 = vld [vmem:[%s11794_s1 + $0x40] sm:$0xff] (!%p152_p3)   ;;  %v9328_v4 = vld [vmem:[%s11794_s1 + $0x48] sm:$0xff] (!%p152_p3)   ;;  %v9332_v8 = vld [vmem:[%s11794_s1 + $0x50] sm:$0xff] (!%p152_p3)   ;;  %p178_p4 = scmp.lt.s32.totalorder (!%p152_p3), %s9952_s12, 1  ;;  %v1112_v28 = vlaneseq (!%p152_p3)  ;;  %v9962_v36 = vmov (!%p152_p3), 1966171168  }
   0x7   : > { %155 = sbr.rel (%p152_p3) target bundleno = 851 (0x353), region = 32  ;;  %v9325_v1 = vld [vmem:[%s11794_s1 + $0xc0] sm:$0xff] (!%p152_p3)   ;;  %8593 = vmatprep.subr.bf16.mxu0 (!%p152_p3), %v9324_v0  ;;  %v9329_v5 = vld [vmem:[%s11794_s1 + $0xc8] sm:$0xff] (!%p152_p3)   ;;  %v9333_v9 = vld [vmem:[%s11794_s1 + $0xd0] sm:$0xff] (!%p152_p3)   ;;  %v1110_v37 = vunpack.c.l.s4 (!%p152_p3), %v9962_v36  ;;  %vm7721_vm0 = vcmask (!%p152_p3), 1043456  }
   0x8   : > { %v9326_v2 = vld [vmem:[%s11794_s1] sm:$0xff] (!%p152_p3)   ;;  %8615 = vmatprep.subr.bf16.mxu1 (!%p152_p3), %v9325_v1  ;;  %v9330_v6 = vld [vmem:[%s11794_s1 + $0x8] sm:$0xff] (!%p152_p3)   ;;  %v9334_v10 = vld [vmem:[%s11794_s1 + $0x10] sm:$0xff] (!%p152_p3)   ;;  %v10110_v33 = vshrl.u32 (!%p152_p3), %v1112_v28, 7 }
   0x9   : > { %v9327_v3 = vld [vmem:[%s11794_s1 + $0x80] sm:$0xff] (!%p152_p3)   ;;  %8594 = vmatpush3.bf16.msra.mxu0 (!%p152_p3), %v9326_v2  ;;  %v9331_v7 = vld [vmem:[%s11794_s1 + $0x88] sm:$0xff] (!%p152_p3)   ;;  %v9335_v11 = vld [vmem:[%s11794_s1 + $0x90] sm:$0xff] (!%p152_p3)   ;;  %v1111_v40 = vunpack.c.0.s8 (!%p152_p3), %v1110_v37 }
   0xa   : > { %8616 = vmatpush3.bf16.msra.mxu1 (!%p152_p3), %v9327_v3  ;;  %8595 = vmatprep.subr.bf16.mxu0 (!%p152_p3), %v9328_v4  ;;  %v9336_v12 = vld [vmem:[%s11794_s1 + $0x58] sm:$0xff] (!%p152_p3)   ;;  %v9340_v16 = vld [vmem:[%s11794_s1 + $0x60] sm:$0xff] (!%p152_p3)   ;;  %v9344_v20 = vld [vmem:[%s11794_s1 + $0x68] sm:$0xff] (!%p152_p3)  }
   0xb   : > { %8617 = vmatprep.subr.bf16.mxu1 (!%p152_p3), %v9329_v5  ;;  %v9337_v13 = vld [vmem:[%s11794_s1 + $0xd8] sm:$0xff] (!%p152_p3)   ;;  %v9341_v17 = vld [vmem:[%s11794_s1 + $0xe0] sm:$0xff] (!%p152_p3)   ;;  %v9345_v21 = vld [vmem:[%s11794_s1 + $0xe8] sm:$0xff] (!%p152_p3)   ;;  %v10123_v45 = vsub.s32 (!%p152_p3), %v1111_v40, %v10110_v33 }
   0xc   : > { %v9338_v14 = vld [vmem:[%s11794_s1 + $0x18] sm:$0xff] (!%p152_p3)   ;;  %v9342_v18 = vld [vmem:[%s11794_s1 + $0x20] sm:$0xff] (!%p152_p3)   ;;  %v9346_v22 = vld [vmem:[%s11794_s1 + $0x28] sm:$0xff] (!%p152_p3)  }
   0xd   : > { %8596 = vmatpush3.bf16.msra.mxu0 (!%p152_p3), %v9330_v6  ;;  %v9339_v15 = vld [vmem:[%s11794_s1 + $0x98] sm:$0xff] (!%p152_p3)   ;;  %v9343_v19 = vld [vmem:[%s11794_s1 + $0xa0] sm:$0xff] (!%p152_p3)   ;;  %v9347_v23 = vld [vmem:[%s11794_s1 + $0xa8] sm:$0xff] (!%p152_p3)  }
   0xe   : > { %8618 = vmatpush3.bf16.msra.mxu1 %v9331_v7  ;;  %8597 = vmatprep.subr.bf16.mxu0 %v9332_v8  ;;  %s11802_s12 = smov (!%p178_p4, %s9952_s12), 1  ;;  %v9348_v24 = vld [vmem:[%s11794_s1 + $0x70] sm:$0xff]   ;;  %v9352_v29 = vld [vmem:[%s11794_s1 + $0x78] sm:$0xff]   ;;  %v9356_v42 = vld [vmem:[%s11794_s1 + $0x140] sm:$0xff]  }
   0xf   : > { %8619 = vmatprep.subr.bf16.mxu1 %v9333_v9  ;;  %v9349_v25 = vld [vmem:[%s11794_s1 + $0xf0] sm:$0xff]   ;;  %s9297_s22 = smul.u32 80, %s11802_s12  ;;  %v9353_v30 = vld [vmem:[%s11794_s1 + $0xf8] sm:$0xff]   ;;  %v9357_v43 = vld [vmem:[%s11794_s1 + $0x1c0] sm:$0xff]   ;;  %s8576_s29 = sshll.u32 %s11802_s12, 2 }
  0x10   : > { %v9350_v26 = vld [vmem:[%s11794_s1 + $0x30] sm:$0xff]   ;;  %v9354_v31 = vld [vmem:[%s11794_s1 + $0x38] sm:$0xff]   ;;  %v9358_v52 = vld [vmem:[%s11794_s1 + $0x100] sm:$0xff]   ;;  %s190_s5 = scalar_lea.vmem %s11796_s3, %s8576_s29 }
  0x11   : > { %8598 = vmatpush3.bf16.msra.mxu0 %v9334_v10  ;;  %v9351_v27 = vld [vmem:[%s11794_s1 + $0xb0] sm:$0xff]   ;;  %s10102_s6 = scalar_lea.vmem %s11793_s0, %s9297_s22  ;;  %v9355_v32 = vld [vmem:[%s11794_s1 + $0xb8] sm:$0xff]   ;;  %v9359_v54 = vld [vmem:[%s11794_s1 + $0x180] sm:$0xff]  }
  0x12   : > { %8620 = vmatpush3.bf16.msra.mxu1 %v9335_v11  ;;  %8599 = vmatprep.subr.bf16.mxu0 %v9336_v12  ;;  %v8577_v34 = vld.sshfl [vmem:[%s10102_s6] sm:$0x5 pattern:$0x75316420]  ;;  %v9360_v56 = vld [vmem:[%s11794_s1 + $0x148] sm:$0xff]   ;;  %v9364_v61 = vld [vmem:[%s11794_s1 + $0x150] sm:$0xff]  }
  0x13   : > { %8621 = vmatprep.subr.bf16.mxu1 %v9337_v13  ;;  %v8578_v35 = vld.sshfl [vmem:[%s10102_s6 + $0x8] sm:$0x5 pattern:$0x75316420]  ;;  %v9365_v62 = vld [vmem:[%s11794_s1 + $0x1d0] sm:$0xff]   ;;  %v9368_v1 = vld [vmem:[%s11794_s1 + $0x158] sm:$0xff]  }
  0x14   : > { %v8585_v38 = vld.sshfl [vmem:[%s10102_s6 + $0x10] sm:$0x5 pattern:$0x75316420]  ;;  %v1123_v41 = vcombine.low %v8577_v34, %v8578_v35  ;;  %v9361_v58 = vld [vmem:[%s11794_s1 + $0x1c8] sm:$0xff]   ;;  %v9369_v2 = vld [vmem:[%s11794_s1 + $0x1d8] sm:$0xff]  }
  0x15   : > { %8600 = vmatpush3.bf16.msra.mxu0 %v9338_v14  ;;  %v8586_v39 = vld.sshfl [vmem:[%s10102_s6 + $0x18] sm:$0x5 pattern:$0x75316420]  ;;  %v9362_v59 = vld [vmem:[%s11794_s1 + $0x108] sm:$0xff]   ;;  %v9366_v63 = vld [vmem:[%s11794_s1 + $0x110] sm:$0xff]  }
  0x16   : > { %8622 = vmatpush3.bf16.msra.mxu1 %v9339_v15  ;;  %8601 = vmatprep.subr.bf16.mxu0 %v9340_v16  ;;  %v1515_v44 = vcombine.low %v8585_v38, %v8586_v39  ;;  %v1131_v46 = vrot.slane %v1123_v41, %v10123_v45  ;;  %v9363_v60 = vld [vmem:[%s11794_s1 + $0x188] sm:$0xff]   ;;  %v9367_v0 = vld [vmem:[%s11794_s1 + $0x190] sm:$0xff]   ;;  %v9370_v3 = vld [vmem:[%s11794_s1 + $0x118] sm:$0xff]  }
  0x17   : > { %8623 = vmatprep.subr.bf16.mxu1 %v9341_v17  ;;  %v9371_v4 = vld [vmem:[%s11794_s1 + $0x198] sm:$0xff]   ;;  %v9372_v5 = vld [vmem:[%s11794_s1 + $0x160] sm:$0xff]   ;;  %v9376_v9 = vld [vmem:[%s11794_s1 + $0x168] sm:$0xff]  }
  0x18   : > { %v1523_v47 = vrot.slane %v1515_v44, %v10123_v45  ;;  %v9373_v6 = vld [vmem:[%s11794_s1 + $0x1e0] sm:$0xff]   ;;  %v9377_v10 = vld [vmem:[%s11794_s1 + $0x1e8] sm:$0xff]   ;;  %v9380_v12 = vld [vmem:[%s11794_s1 + $0x170] sm:$0xff]  }
  0x19   : > { %8602 = vmatpush3.bf16.msra.mxu0 %v9342_v18  ;;  %v9374_v7 = vld [vmem:[%s11794_s1 + $0x120] sm:$0xff]   ;;  %v9378_v11 = vld [vmem:[%s11794_s1 + $0x128] sm:$0xff]   ;;  %v198_v16 = vld [vmem:[%s10102_s6 + $0x10] sm:$0x33] }
  0x1a   : > { %8624 = vmatpush3.bf16.msra.mxu1 %v9343_v19  ;;  %8603 = vmatprep.subr.bf16.mxu0 %v9344_v20  ;;  %v8044_v48 = vcombine.low %v1131_v46, %v1523_v47  ;;  %v9375_v8 = vld [vmem:[%s11794_s1 + $0x1a0] sm:$0xff]   ;;  %v9379_v14 = vld [vmem:[%s11794_s1 + $0x1a8] sm:$0xff]   ;;  %v199_v17 = vld [vmem:[%s10102_s6 + $0x18] sm:$0x33] }
  0x1b   : > { %8625 = vmatprep.subr.bf16.mxu1 %v9345_v21  ;;  %v196_v13 = vld [vmem:[%s10102_s6] sm:$0x33]  ;;  %v197_v15 = vld [vmem:[%s10102_s6 + $0x8] sm:$0x33]  ;;  %v9381_v20 = vld [vmem:[%s11794_s1 + $0x1f0] sm:$0xff]  }
  0x1c   : > { %v2910_v49 = vrot.slane %v8044_v48, %v10123_v45  ;;  %v7924_v18 = vcombine.low %v196_v13, %v196_v13  ;;  %v7925_v19 = vcombine.high %v196_v13, %v196_v13  ;;  %v7926_v21 = vcombine.low %v197_v15, %v197_v15  ;;  %v9383_v36 = vld [vmem:[%s11794_s1 + $0x1b0] sm:$0xff]   ;;  %v9385_v46 = vld [vmem:[%s11794_s1 + $0x1f8] sm:$0xff]  }
  0x1d   : > { %8604 = vmatpush3.bf16.msra.mxu0 %v9346_v22  ;;  %v7927_v22 = vcombine.high %v197_v15, %v197_v15 }
  0x1e   : > { %8626 = vmatpush3.bf16.msra.mxu1 %v9347_v23  ;;  %8605 = vmatprep.subr.bf16.mxu0 %v9348_v24  ;;  %v2918_v50 = vcombine.high %v2910_v49, %v2910_v49  ;;  %v2926_v51 = vrot.slane %v2910_v49, %v10123_v45  ;;  %v7928_v23 = vcombine.low %v198_v16, %v198_v16  ;;  %v302_v28 = vshll.u32 %v7924_v18, 16 }
  0x1f   : > { %8627 = vmatprep.subr.bf16.mxu1 %v9349_v25  ;;  %v7929_v24 = vcombine.high %v198_v16, %v198_v16  ;;  %v7930_v25 = vcombine.low %v199_v17, %v199_v17  ;;  %v314_v34 = vshrl.u32 %v7926_v21, 16  ;;  %v316_v35 = vshll.u32 %v7926_v21, 16  ;;  %v9398_v21 = vld [vmem:[%s11794_s1 + $0x200] sm:$0xff]  }
  0x20   : > { %v2940_v53 = vrot.slane %v2918_v50, %v10123_v45  ;;  %v2948_v55 = vcombine.high %v2926_v51, %v2926_v51  ;;  %v304_v37 = vrot.slane %v302_v28, 1  ;;  %v321_v38 = vshrl.u32 %v7927_v22, 16  ;;  %v9402_v28 = vld [vmem:[%s11794_s1 + $0x208] sm:$0xff]  }
  0x21   : > { %8606 = vmatpush3.bf16.msra.mxu0 %v9350_v26  ;;  %v7931_v26 = vcombine.high %v199_v17, %v199_v17  ;;  %v323_v39 = vshll.u32 %v7927_v22, 16  ;;  %v328_v40 = vshrl.u32 %v7928_v23, 16  ;;  %v335_v44 = vshrl.u32 %v7929_v24, 16 }
  0x22   : > { %8628 = vmatpush3.bf16.msra.mxu1 %v9351_v27  ;;  %8607 = vmatprep.subr.bf16.mxu0 %v9352_v29  ;;  %v2950_v57 = vcombine.high %v2940_v53, %v2940_v53  ;;  %v300_v27 = vshrl.u32 %v7924_v18, 16  ;;  %v9382_v29 = vld [vmem:[%s11794_s1 + $0x130] sm:$0xff]   ;;  %v337_v49 = vshll.u32 %v7929_v24, 16  ;;  %v342_v50 = vshrl.u32 %v7930_v25, 16 }
  0x23   : > { %8629 = vmatprep.subr.bf16.mxu1 %v9353_v30  ;;  %6470 = vmatprep.mubr.bf16.mxu0 %v2940_v53  ;;  %v9384_v30 = vld [vmem:[%s11794_s1 + $0x178] sm:$0xff]   ;;  %v325_v48 = vrot.slane %v323_v39, 1 }
  0x24   : > { %6510 = vmatprep.mubr.bf16.mxu1 %v2950_v57  ;;  %v305_v47 = vor.u32 %v304_v37, %v300_v27  ;;  %v339_v57 = vrot.slane %v337_v49, 1  ;;  %v9401_v27 = vld [vmem:[%s11794_s1 + $0x2c8] sm:$0xff]   ;;  %v203_v39 = vld [vmem:[%s10102_s6 + $0x18] sm:$0x22] }
  0x25   : > { %8608 = vmatpush3.bf16.msra.mxu0 %v9354_v31  ;;  %v307_v31 = vshrl.u32 %v7925_v19, 16  ;;  %v201_v37 = vld [vmem:[%s10102_s6 + $0x8] sm:$0x22]  ;;  %v7939_v49 = vcombine.high %v203_v39, %v203_v39 }
  0x26   : > { %8630 = vmatpush3.bf16.msra.mxu1 %v9355_v32  ;;  %8637 = vmatprep.subr.bf16.mxu0 %v9356_v42  ;;  %v309_v32 = vshll.u32 %v7925_v19, 16  ;;  %v318_v42 = vrot.slane %v316_v35, 1  ;;  %v9407_v35 = vld [vmem:[%s11794_s1 + $0x290] sm:$0xff]  }
  0x27   : > { %8659 = vmatprep.subr.bf16.mxu1 %v9357_v43  ;;  %v330_v43 = vshll.u32 %v7928_v23, 16  ;;  %v9399_v23 = vld [vmem:[%s11794_s1 + $0x280] sm:$0xff]  }
  0x28   : > { %6471 = vmatmul.mubr.bf16.vlgmr.msra.gmra.mrb[0].mxu0 %v2926_v51  ;;  %v311_v41 = vrot.slane %v309_v32, 1  ;;  %v9406_v32 = vld [vmem:[%s11794_s1 + $0x210] sm:$0xff]  }
  0x29   : > { %8638 = vmatpush3.bf16.msra.mxu0 %v9358_v52  ;;  %6511 = vmatmul.mubr.bf16.vlgmr.msra.gmra.mrb[0].mxu1 %v2948_v55  ;;  %v319_v52 = vor.u32 %v318_v42, %v314_v34  ;;  %v332_v53 = vrot.slane %v330_v43, 1  ;;  %v9386_v55 = vld [vmem:[%s11794_s1 + $0x138] sm:$0xff]   ;;  %v7934_v42 = vcombine.low %v201_v37, %v201_v37  ;;  %v7935_v43 = vcombine.high %v201_v37, %v201_v37  ;;  %v9441_v37 = vld [vmem:[%s11794_s1 + $0x3c8] sm:$0xff]  }
  0x2a   : > { %8639 = vmatprep.subr.bf16.mxu0 %v9360_v56  ;;  %8660 = vmatpush3.bf16.msra.mxu1 %v9359_v54  ;;  %v312_v51 = vor.u32 %v311_v41, %v307_v31  ;;  %v344_v54 = vshll.u32 %v7930_v25, 16  ;;  %v326_v56 = vor.u32 %v325_v48, %v321_v38  ;;  %v9400_v25 = vld [vmem:[%s11794_s1 + $0x248] sm:$0xff]   ;;  %v9405_v31 = vld [vmem:[%s11794_s1 + $0x2d0] sm:$0xff]   ;;  %v9408_v34 = vld [vmem:[%s11794_s1 + $0x258] sm:$0xff]   ;;  %v7938_v48 = vcombine.low %v203_v39, %v203_v39 }
  0x2b   : > { %8661 = vmatprep.subr.bf16.mxu1 %v9361_v58  ;;  %v349_v58 = vshrl.u32 %v7931_v26, 16  ;;  %v202_v38 = vld [vmem:[%s10102_s6 + $0x10] sm:$0x22]  ;;  %v9443_v39 = vld [vmem:[%s11794_s1 + $0x388] sm:$0xff]  }
  0x2d   : > { %8640 = vmatpush3.bf16.msra.mxu0 %v9362_v59  ;;  %v351_v59 = vshll.u32 %v7931_v26, 16 }
  0x2e   : > { %8641 = vmatprep.subr.bf16.mxu0 %v9364_v61  ;;  %8662 = vmatpush3.bf16.msra.mxu1 %v9363_v60  ;;  %v333_v60 = vor.u32 %v332_v53, %v328_v40  ;;  %v346_v61 = vrot.slane %v344_v54, 1  ;;  %v377_v54 = vrot.slane %v7934_v42, 1  ;;  %v9446_v42 = vld [vmem:[%s11794_s1 + $0x310] sm:$0xff]  }
  0x2f   : > { %8663 = vmatprep.subr.bf16.mxu1 %v9365_v62  ;;  %v1093_v62 = vcombine.low %v305_v47, %v312_v51  ;;  %v7937_v47 = vcombine.high %v202_v38, %v202_v38  ;;  %v9412_v51 = vld [vmem:[%s11794_s1 + $0x260] sm:$0xff]  }
  0x31   : > { %8642 = vmatpush3.bf16.msra.mxu0 %v9366_v63  ;;  %v9396_v63 = vld [vmem:[%s11794_s1 + $0x240] sm:$0xff]  }
  0x32   : > { %8643 = vmatprep.subr.bf16.mxu0 %v9368_v1  ;;  %8664 = vmatpush3.bf16.msra.mxu1 %v9367_v0  ;;  %v9387_v0 = vld [vmem:[%s11794_s1 + $0x1b8] sm:$0xff]   ;;  %v340_v1 = vor.u32 %v339_v57, %v335_v44 }
  0x33   : > { %8665 = vmatprep.subr.bf16.mxu1 %v9369_v2  ;;  %v353_v2 = vrot.slane %v351_v59, 1  ;;  %v9409_v44 = vld [vmem:[%s11794_s1 + $0x2d8] sm:$0xff]   ;;  %v381_v59 = vrot.slane %v7938_v48, 1  ;;  %v204_v48 = vld [vmem:[%s10102_s6] sm:$0x66] }
  0x35   : > { %8644 = vmatpush3.bf16.msra.mxu0 %v9370_v3  ;;  %v1094_v3 = vcombine.low %v319_v52, %v326_v56  ;;  %v9411_v56 = vld [vmem:[%s11794_s1 + $0x298] sm:$0xff]  }
  0x36   : > { %8645 = vmatprep.subr.bf16.mxu0 %v9372_v5  ;;  %8666 = vmatpush3.bf16.msra.mxu1 %v9371_v4  ;;  %v347_v4 = vor.u32 %v346_v61, %v342_v50  ;;  %v1115_v5 = vrot.slane %v1093_v62, %v10123_v45  ;;  %v9410_v50 = vld [vmem:[%s11794_s1 + $0x218] sm:$0xff]  }
  0x37   : > { %8667 = vmatprep.subr.bf16.mxu1 %v9373_v6  ;;  %v9397_v6 = vld [vmem:[%s11794_s1 + $0x2c0] sm:$0xff]  }
  0x39   : > { %8646 = vmatpush3.bf16.msra.mxu0 %v9374_v7  ;;  %v354_v7 = vor.u32 %v353_v2, %v349_v58  ;;  %v380_v58 = vrot.slane %v7937_v47, 1  ;;  %v9414_v2 = vld [vmem:[%s11794_s1 + $0x220] sm:$0xff]   ;;  %v9450_v47 = vld [vmem:[%s11794_s1 + $0x318] sm:$0xff]  }
  0x3a   : > { %8647 = vmatprep.subr.bf16.mxu0 %v9376_v9  ;;  %8668 = vmatpush3.bf16.msra.mxu1 %v9375_v8  ;;  %v1122_v8 = vrot.slane %v1094_v3, %v10123_v45  ;;  %v1485_v9 = vcombine.low %v333_v60, %v340_v1  ;;  %v382_v60 = vrot.slane %v7939_v49, 1  ;;  %v205_v49 = vld [vmem:[%s10102_s6 + $0x8] sm:$0x66] }
  0x3b   : > { %8669 = vmatprep.subr.bf16.mxu1 %v9377_v10 }
  0x3c   : > { %v1124_v10 = vcombine.low %v1115_v5, %v1122_v8  ;;  %v1533_v1 = vcombine.low %v381_v59, %v382_v60  ;;  %v9415_v5 = vld [vmem:[%s11794_s1 + $0x2a0] sm:$0xff]   ;;  %v9416_v8 = vld [vmem:[%s11794_s1 + $0x268] sm:$0xff]  }
  0x3d   : > { %8648 = vmatpush3.bf16.msra.mxu0 %v9378_v11  ;;  %v1486_v11 = vcombine.low %v347_v4, %v354_v7 }
  0x3e   : > { %8649 = vmatprep.subr.bf16.mxu0 %v9380_v12  ;;  %8670 = vmatpush3.bf16.msra.mxu1 %v9379_v14  ;;  %v1507_v12 = vrot.slane %v1485_v9, %v10123_v45  ;;  %v1138_v14 = vrot.slane %v1124_v10, %v10123_v45  ;;  %v1549_v7 = vrot.slane %v1533_v1, %v10123_v45  ;;  %v9417_v10 = vld [vmem:[%s11794_s1 + $0x2e8] sm:$0xff]  }
  0x3f   : > { %8671 = vmatprep.subr.bf16.mxu1 %v9381_v20  ;;  %v1514_v13 = vrot.slane %v1486_v11, %v10123_v45 }
  0x41   : > { %8650 = vmatpush3.bf16.msra.mxu0 %v9382_v29  ;;  %v1516_v15 = vcombine.low %v1507_v12, %v1514_v13  ;;  %v9403_v29 = vld [vmem:[%s11794_s1 + $0x288] sm:$0xff]  }
  0x42   : > { %8651 = vmatprep.subr.bf16.mxu0 %v9384_v30  ;;  %8672 = vmatpush3.bf16.msra.mxu1 %v9383_v36  ;;  %v9404_v30 = vld [vmem:[%s11794_s1 + $0x250] sm:$0xff]   ;;  %v200_v36 = vld [vmem:[%s10102_s6] sm:$0x22]  ;;  %v9418_v12 = vld [vmem:[%s11794_s1 + $0x228] sm:$0xff]  }
  0x43   : > { %8673 = vmatprep.subr.bf16.mxu1 %v9385_v46  ;;  %v1530_v16 = vrot.slane %v1516_v15, %v10123_v45  ;;  %v7932_v40 = vcombine.low %v200_v36, %v200_v36  ;;  %v7933_v41 = vcombine.high %v200_v36, %v200_v36  ;;  %v7936_v46 = vcombine.low %v202_v38, %v202_v38  ;;  %v9440_v36 = vld [vmem:[%s11794_s1 + $0x348] sm:$0xff]  }
  0x44   : > { %v9442_v38 = vld [vmem:[%s11794_s1 + $0x308] sm:$0xff]  }
  0x45   : > { %8652 = vmatpush3.bf16.msra.mxu0 %v9386_v55  ;;  %v8045_v17 = vcombine.low %v1138_v14, %v1530_v16  ;;  %v375_v52 = vrot.slane %v7932_v40, 1  ;;  %v376_v53 = vrot.slane %v7933_v41, 1  ;;  %v378_v55 = vrot.slane %v7935_v43, 1  ;;  %v9419_v14 = vld [vmem:[%s11794_s1 + $0x2a8] sm:$0xff]   ;;  %v9420_v16 = vld [vmem:[%s11794_s1 + $0x270] sm:$0xff]  }
  0x46   : > { %8681 = vmatprep.subr.bf16.mxu0 %v9396_v63  ;;  %8674 = vmatpush3.bf16.msra.mxu1 %v9387_v0  ;;  %v379_v57 = vrot.slane %v7936_v46, 1  ;;  %v9413_v63 = vld [vmem:[%s11794_s1 + $0x2e0] sm:$0xff]   ;;  %v9444_v40 = vld [vmem:[%s11794_s1 + $0x350] sm:$0xff]   ;;  %v9449_v46 = vld [vmem:[%s11794_s1 + $0x3d8] sm:$0xff]  }
  0x47   : > { %8703 = vmatprep.subr.bf16.mxu1 %v9397_v6  ;;  %v2917_v18 = vrot.slane %v8045_v17, %v10123_v45  ;;  %v1140_v61 = vcombine.low %v375_v52, %v376_v53  ;;  %v1141_v62 = vcombine.low %v377_v54, %v378_v55  ;;  %v9421_v17 = vld [vmem:[%s11794_s1 + $0x2f0] sm:$0xff]   ;;  %v7940_v52 = vcombine.low %v204_v48, %v204_v48 }
  0x48   : > { %v1532_v0 = vcombine.low %v379_v57, %v380_v58  ;;  %v9445_v41 = vld [vmem:[%s11794_s1 + $0x3d0] sm:$0xff]   ;;  %v7941_v53 = vcombine.high %v204_v48, %v204_v48  ;;  %v7942_v54 = vcombine.low %v205_v49, %v205_v49  ;;  %v7943_v55 = vcombine.high %v205_v49, %v205_v49  ;;  %v9452_v57 = vld [vmem:[%s11794_s1 + $0x360] sm:$0xff]  }
  0x49   : > { %v2919_v19 = vcombine.high %v2917_v18, %v2917_v18  ;;  %v2933_v20 = vrot.slane %v2917_v18, %v10123_v45  ;;  %v1150_v3 = vrot.slane %v1140_v61, %v10123_v45  ;;  %v1157_v4 = vrot.slane %v1141_v62, %v10123_v45  ;;  %v9447_v43 = vld [vmem:[%s11794_s1 + $0x390] sm:$0xff]  }
  0x4a   : > { %v1542_v6 = vrot.slane %v1532_v0, %v10123_v45  ;;  %v404_v62 = vshrl.u32 %v7940_v52, 16  ;;  %v412_v0 = vshrl.u32 %v7941_v53, 16  ;;  %v415_v1 = vshll.u32 %v7941_v53, 16  ;;  %v9461_v48 = vld [vmem:[%s11794_s1 + $0x3f0] sm:$0xff]  }
  0x4b   : > { %v2947_v22 = vrot.slane %v2919_v19, %v10123_v45  ;;  %v2949_v24 = vcombine.high %v2933_v20, %v2933_v20  ;;  %v1172_v9 = vcombine.low %v1150_v3, %v1157_v4  ;;  %v9422_v19 = vld [vmem:[%s11794_s1 + $0x230] sm:$0xff]   ;;  %v9454_v3 = vld [vmem:[%s11794_s1 + $0x320] sm:$0xff]   ;;  %v420_v4 = vshrl.u32 %v7942_v54, 16 }
  0x4c   : > { %v1564_v11 = vcombine.low %v1542_v6, %v1549_v7  ;;  %v428_v6 = vshrl.u32 %v7943_v55, 16  ;;  %v431_v7 = vshll.u32 %v7943_v55, 16  ;;  %v9464_v55 = vld [vmem:[%s11794_s1 + $0x378] sm:$0xff]  }
  0x4d   : > { %6550 = vmatprep.mubr.bf16.mxu0 %v2947_v22  ;;  %v2951_v26 = vcombine.high %v2947_v22, %v2947_v22  ;;  %v1180_v13 = vrot.slane %v1172_v9, %v10123_v45  ;;  %v9424_v22 = vld [vmem:[%s11794_s1 + $0x278] sm:$0xff]   ;;  %v406_v9 = vrot.slane %v404_v62, 1 }
  0x4e   : > { %6551 = vmatmul.mubr.bf16.vlgmr.msra.gmra.mrb[4].mxu0 %v2933_v20  ;;  %v1572_v15 = vrot.slane %v1564_v11, %v10123_v45  ;;  %v9423_v20 = vld [vmem:[%s11794_s1 + $0x2b0] sm:$0xff]   ;;  %v414_v11 = vrot.slane %v412_v0, 1  ;;  %v9467_v0 = vld [vmem:[%s11794_s1 + $0x3b8] sm:$0xff]  }
  0x4f   : > { %6590 = vmatprep.mubr.bf16.mxu1 %v2951_v26  ;;  %8682 = vmatpush3.bf16.msra.mxu0 %v9398_v21  ;;  %v9427_v26 = vld [vmem:[%s11794_s1 + $0x2b8] sm:$0xff]  }
  0x50   : > { %6591 = vmatmul.mubr.bf16.vlgmr.msra.gmra.mrb[4].mxu1 %v2949_v24  ;;  %8683 = vmatprep.subr.bf16.mxu0 %v9400_v25  ;;  %v8046_v18 = vcombine.low %v1180_v13, %v1572_v15  ;;  %v9426_v25 = vld [vmem:[%s11794_s1 + $0x238] sm:$0xff]   ;;  %v9455_v13 = vld [vmem:[%s11794_s1 + $0x3a0] sm:$0xff]  }
  0x51   : > { %8704 = vmatpush3.bf16.msra.mxu1 %v9399_v23  ;;  %v9425_v23 = vld [vmem:[%s11794_s1 + $0x2f8] sm:$0xff]  }
  0x52   : > { %8705 = vmatprep.subr.bf16.mxu1 %v9401_v27  ;;  %v2960_v21 = vrot.slane %v8046_v18, %v10123_v45 }
  0x53   : > { %8684 = vmatpush3.bf16.msra.mxu0 %v9402_v28 }
  0x54   : > { %8685 = vmatprep.subr.bf16.mxu0 %v9404_v30  ;;  %v2968_v24 = vcombine.high %v2960_v21, %v2960_v21  ;;  %v2976_v28 = vrot.slane %v2960_v21, %v10123_v45 }
  0x55   : > { %8706 = vmatpush3.bf16.msra.mxu1 %v9403_v29  ;;  %v9436_v29 = vld [vmem:[%s11794_s1 + $0x340] sm:$0xff]  }
  0x56   : > { %8707 = vmatprep.subr.bf16.mxu1 %v9405_v31  ;;  %v2990_v27 = vrot.slane %v2968_v24, %v10123_v45  ;;  %v9437_v31 = vld [vmem:[%s11794_s1 + $0x3c0] sm:$0xff]  }
  0x57   : > { %8686 = vmatpush3.bf16.msra.mxu0 %v9406_v32  ;;  %v9438_v32 = vld [vmem:[%s11794_s1 + $0x300] sm:$0xff]  }
  0x58   : > { %8687 = vmatprep.subr.bf16.mxu0 %v9408_v34  ;;  %6630 = vmatprep.mubr.bf16.mxu0 %v2990_v27  ;;  %v3000_v30 = vcombine.high %v2990_v27, %v2990_v27  ;;  %v9439_v34 = vld [vmem:[%s11794_s1 + $0x380] sm:$0xff]  }
  0x59   : > { %8708 = vmatpush3.bf16.msra.mxu1 %v9407_v35  ;;  %v2998_v35 = vcombine.high %v2976_v28, %v2976_v28 }
  0x5a   : > { %8709 = vmatprep.subr.bf16.mxu1 %v9409_v44  ;;  %6670 = vmatprep.mubr.bf16.mxu1 %v3000_v30  ;;  %v9448_v44 = vld [vmem:[%s11794_s1 + $0x358] sm:$0xff]  }
  0x5b   : > { %8688 = vmatpush3.bf16.msra.mxu0 %v9410_v50  ;;  %v206_v50 = vld [vmem:[%s10102_s6 + $0x10] sm:$0x66] }
  0x5c   : > { %8689 = vmatprep.subr.bf16.mxu0 %v9412_v51  ;;  %v207_v51 = vld [vmem:[%s10102_s6 + $0x18] sm:$0x66]  ;;  %v7944_v58 = vcombine.low %v206_v50, %v206_v50  ;;  %v7945_v59 = vcombine.high %v206_v50, %v206_v50 }
  0x5d   : > { %8710 = vmatpush3.bf16.msra.mxu1 %v9411_v56  ;;  %v9451_v56 = vld [vmem:[%s11794_s1 + $0x398] sm:$0xff]   ;;  %v7946_v60 = vcombine.low %v207_v51, %v207_v51  ;;  %v7947_v61 = vcombine.high %v207_v51, %v207_v51  ;;  %v9462_v51 = vld [vmem:[%s11794_s1 + $0x330] sm:$0xff]  }
  0x5e   : > { %8711 = vmatprep.subr.bf16.mxu1 %v9413_v63  ;;  %v407_v63 = vshll.u32 %v7940_v52, 16  ;;  %v439_v21 = vshll.u32 %v7944_v58, 16  ;;  %v447_v27 = vshll.u32 %v7945_v59, 16 }
  0x5f   : > { %8690 = vmatpush3.bf16.msra.mxu0 %v9414_v2  ;;  %v9453_v2 = vld [vmem:[%s11794_s1 + $0x3e0] sm:$0xff]   ;;  %v452_v30 = vshrl.u32 %v7946_v60, 16 }
  0x60   : > { %8691 = vmatprep.subr.bf16.mxu0 %v9416_v8  ;;  %v9456_v8 = vld [vmem:[%s11794_s1 + $0x368] sm:$0xff]  }
  0x61   : > { %8712 = vmatpush3.bf16.msra.mxu1 %v9415_v5  ;;  %v423_v5 = vshll.u32 %v7942_v54, 16 }
  0x62   : > { %8713 = vmatprep.subr.bf16.mxu1 %v9417_v10  ;;  %v409_v10 = vrot.slane %v407_v63, 2  ;;  %v9476_v63 = vld [vmem:[%s11794_s1 + $0x440] sm:$0xff]  }
  0x63   : > { %8692 = vmatpush3.bf16.msra.mxu0 %v9418_v12  ;;  %v417_v12 = vrot.slane %v415_v1, 2  ;;  %v425_v15 = vrot.slane %v423_v5, 2 }
  0x64   : > { %8693 = vmatprep.subr.bf16.mxu0 %v9420_v16  ;;  %v430_v16 = vrot.slane %v428_v6, 1  ;;  %v410_v18 = vor.u32 %v409_v10, %v406_v9  ;;  %v9478_v9 = vld [vmem:[%s11794_s1 + $0x400] sm:$0xff]  }
  0x65   : > { %8714 = vmatpush3.bf16.msra.mxu1 %v9419_v14  ;;  %v422_v14 = vrot.slane %v420_v4, 1 }
  0x66   : > { %8715 = vmatprep.subr.bf16.mxu1 %v9421_v17  ;;  %v433_v17 = vrot.slane %v431_v7, 2 }
  0x67   : > { %8694 = vmatpush3.bf16.msra.mxu0 %v9422_v19  ;;  %v418_v19 = vor.u32 %v417_v12, %v414_v11  ;;  %v426_v24 = vor.u32 %v425_v15, %v422_v14  ;;  %v9479_v11 = vld [vmem:[%s11794_s1 + $0x480] sm:$0xff]   ;;  %v9481_v15 = vld [vmem:[%s11794_s1 + $0x4c8] sm:$0xff]  }
  0x68   : > { %8695 = vmatprep.subr.bf16.mxu0 %v9424_v22  ;;  %v9457_v22 = vld [vmem:[%s11794_s1 + $0x3e8] sm:$0xff]  }
  0x69   : > { %8716 = vmatpush3.bf16.msra.mxu1 %v9423_v20  ;;  %v436_v20 = vshrl.u32 %v7944_v58, 16 }
  0x6a   : > { %8717 = vmatprep.subr.bf16.mxu1 %v9425_v23  ;;  %v9458_v23 = vld [vmem:[%s11794_s1 + $0x328] sm:$0xff]  }
  0x6b   : > { %8696 = vmatpush3.bf16.msra.mxu0 %v9426_v25  ;;  %v434_v25 = vor.u32 %v433_v17, %v430_v16  ;;  %v9482_v16 = vld [vmem:[%s11794_s1 + $0x408] sm:$0xff]  }
  0x6c   : > { %8725 = vmatprep.subr.bf16.mxu0 %v9436_v29  ;;  %v441_v29 = vrot.slane %v439_v21, 2  ;;  %v9483_v17 = vld [vmem:[%s11794_s1 + $0x488] sm:$0xff]   ;;  %v9488_v21 = vld [vmem:[%s11794_s1 + $0x458] sm:$0xff]  }
  0x6d   : > { %8718 = vmatpush3.bf16.msra.mxu1 %v9427_v26  ;;  %v444_v26 = vshrl.u32 %v7945_v59, 16 }
  0x6e   : > { %6631 = vmatmul.mubr.bf16.vlgmr.msra.gmra.mrb[8].mxu0 %v2976_v28  ;;  %8747 = vmatprep.subr.bf16.mxu1 %v9437_v31  ;;  %v438_v28 = vrot.slane %v436_v20, 1  ;;  %v455_v31 = vshll.u32 %v7946_v60, 16  ;;  %v9465_v60 = vld [vmem:[%s11794_s1 + $0x3f8] sm:$0xff]   ;;  %v9486_v20 = vld [vmem:[%s11794_s1 + $0x410] sm:$0xff]  }
  0x6f   : > { %8726 = vmatpush3.bf16.msra.mxu0 %v9438_v32  ;;  %v446_v32 = vrot.slane %v444_v26, 1  ;;  %v9490_v26 = vld [vmem:[%s11794_s1 + $0x418] sm:$0xff]  }
  0x70   : > { %6671 = vmatmul.mubr.bf16.vlgmr.msra.gmra.mrb[8].mxu1 %v2998_v35  ;;  %8727 = vmatprep.subr.bf16.mxu0 %v9440_v36  ;;  %v460_v35 = vshrl.u32 %v7947_v61, 16  ;;  %v463_v36 = vshll.u32 %v7947_v61, 16  ;;  %v9466_v61 = vld [vmem:[%s11794_s1 + $0x338] sm:$0xff]  }
  0x71   : > { %8748 = vmatpush3.bf16.msra.mxu1 %v9439_v34  ;;  %v449_v34 = vrot.slane %v447_v27, 2  ;;  %v8587_v27 = vld.sshfl [vmem:[%s10102_s6 + $0x20] sm:$0x5 pattern:$0x75316420] }
  0x72   : > { %8749 = vmatprep.subr.bf16.mxu1 %v9441_v37  ;;  %v9459_v37 = vld [vmem:[%s11794_s1 + $0x3a8] sm:$0xff]  }
  0x73   : > { %8728 = vmatpush3.bf16.msra.mxu0 %v9442_v38  ;;  %v9460_v38 = vld [vmem:[%s11794_s1 + $0x370] sm:$0xff]  }
  0x74   : > { %8729 = vmatprep.subr.bf16.mxu0 %v9444_v40  ;;  %v454_v40 = vrot.slane %v452_v30, 1  ;;  %v9491_v30 = vld [vmem:[%s11794_s1 + $0x498] sm:$0xff]  }
  0x75   : > { %8750 = vmatpush3.bf16.msra.mxu1 %v9443_v39  ;;  %v442_v39 = vor.u32 %v441_v29, %v438_v28  ;;  %v8588_v29 = vld.sshfl [vmem:[%s10102_s6 + $0x28] sm:$0x5 pattern:$0x75316420] }
  0x76   : > { %8751 = vmatprep.subr.bf16.mxu1 %v9445_v41  ;;  %v457_v41 = vrot.slane %v455_v31, 2 }
  0x77   : > { %8730 = vmatpush3.bf16.msra.mxu0 %v9446_v42  ;;  %v1142_v42 = vcombine.low %v410_v18, %v418_v19  ;;  %v9484_v18 = vld [vmem:[%s11794_s1 + $0x450] sm:$0xff]  }
  0x78   : > { %8731 = vmatprep.subr.bf16.mxu0 %v9448_v44  ;;  %v462_v44 = vrot.slane %v460_v35, 1  ;;  %v458_v49 = vor.u32 %v457_v41, %v454_v40  ;;  %v9485_v19 = vld [vmem:[%s11794_s1 + $0x4d0] sm:$0xff]   ;;  %v9493_v35 = vld [vmem:[%s11794_s1 + $0x4e0] sm:$0xff]   ;;  %v9496_v40 = vld [vmem:[%s11794_s1 + $0x468] sm:$0xff]  }
  0x79   : > { %8752 = vmatpush3.bf16.msra.mxu1 %v9447_v43  ;;  %v450_v43 = vor.u32 %v449_v34, %v446_v32  ;;  %v1164_v50 = vrot.slane %v1142_v42, %v10123_v45  ;;  %v1613_v32 = vcombine.low %v8587_v27, %v8588_v29  ;;  %v9492_v34 = vld [vmem:[%s11794_s1 + $0x460] sm:$0xff]   ;;  %v9497_v41 = vld [vmem:[%s11794_s1 + $0x4e8] sm:$0xff]  }
  0x7a   : > { %8753 = vmatprep.subr.bf16.mxu1 %v9449_v46  ;;  %v465_v46 = vrot.slane %v463_v36, 2  ;;  %v9526_v29 = vld [vmem:[%s11794_s1 + $0x520] sm:$0xff]  }
  0x7b   : > { %8732 = vmatpush3.bf16.msra.mxu0 %v9450_v47  ;;  %v1143_v47 = vcombine.low %v426_v24, %v434_v25  ;;  %v1534_v54 = vcombine.low %v442_v39, %v450_v43  ;;  %v8580_v24 = vld.sshfl [vmem:[%s10102_s6 + $0x18] sm:$0x5 pattern:$0x75316420]  ;;  %v1621_v36 = vrot.slane %v1613_v32, %v10123_v45  ;;  %v9498_v43 = vld [vmem:[%s11794_s1 + $0x428] sm:$0xff]  }
  0x7c   : > { %8733 = vmatprep.subr.bf16.mxu0 %v9452_v57  ;;  %v466_v52 = vor.u32 %v465_v46, %v462_v44  ;;  %v9489_v25 = vld [vmem:[%s11794_s1 + $0x4d8] sm:$0xff]   ;;  %v9499_v44 = vld [vmem:[%s11794_s1 + $0x4a8] sm:$0xff]  }
  0x7d   : > { %8754 = vmatpush3.bf16.msra.mxu1 %v9451_v56  ;;  %v1171_v53 = vrot.slane %v1143_v47, %v10123_v45  ;;  %v9463_v56 = vld [vmem:[%s11794_s1 + $0x3b0] sm:$0xff]   ;;  %v1556_v59 = vrot.slane %v1534_v54, %v10123_v45  ;;  %v9505_v54 = vld [vmem:[%s11794_s1 + $0x4f8] sm:$0xff]  }
  0x7e   : > { %8755 = vmatprep.subr.bf16.mxu1 %v9453_v2  ;;  %v1535_v58 = vcombine.low %v458_v49, %v466_v52  ;;  %v9500_v47 = vld [vmem:[%s11794_s1 + $0x470] sm:$0xff]  }
  0x7f   : > { %8734 = vmatpush3.bf16.msra.mxu0 %v9454_v3  ;;  %v1173_v57 = vcombine.low %v1164_v50, %v1171_v53  ;;  %v9477_v3 = vld [vmem:[%s11794_s1 + $0x4c0] sm:$0xff]   ;;  %v9502_v50 = vld [vmem:[%s11794_s1 + $0x430] sm:$0xff]   ;;  %v9504_v53 = vld [vmem:[%s11794_s1 + $0x478] sm:$0xff]  }
  0x80   : > { %8735 = vmatprep.subr.bf16.mxu0 %v9456_v8  ;;  %v1563_v62 = vrot.slane %v1535_v58, %v10123_v45  ;;  %v9508_v58 = vld [vmem:[%s11794_s1 + $0x540] sm:$0xff]  }
  0x81   : > { %8756 = vmatpush3.bf16.msra.mxu1 %v9455_v13  ;;  %v1187_v1 = vrot.slane %v1173_v57, %v10123_v45  ;;  %v9480_v13 = vld [vmem:[%s11794_s1 + $0x448] sm:$0xff]  }
  0x82   : > { %8757 = vmatprep.subr.bf16.mxu1 %v9457_v22  ;;  %v1565_v2 = vcombine.low %v1556_v59, %v1563_v62  ;;  %v9487_v22 = vld [vmem:[%s11794_s1 + $0x490] sm:$0xff]   ;;  %v9509_v59 = vld [vmem:[%s11794_s1 + $0x5c0] sm:$0xff]  }
  0x83   : > { %8736 = vmatpush3.bf16.msra.mxu0 %v9458_v23  ;;  %v8579_v23 = vld.sshfl [vmem:[%s10102_s6 + $0x10] sm:$0x5 pattern:$0x75316420] }
  0x84   : > { %8737 = vmatprep.subr.bf16.mxu0 %v9460_v38  ;;  %v1579_v4 = vrot.slane %v1565_v2, %v10123_v45  ;;  %v1221_v28 = vcombine.low %v8579_v23, %v8580_v24  ;;  %v9495_v38 = vld [vmem:[%s11794_s1 + $0x4a0] sm:$0xff]   ;;  %v9515_v2 = vld [vmem:[%s11794_s1 + $0x588] sm:$0xff]  }
  0x85   : > { %8758 = vmatpush3.bf16.msra.mxu1 %v9459_v37  ;;  %v9494_v37 = vld [vmem:[%s11794_s1 + $0x420] sm:$0xff]  }
  0x86   : > { %8759 = vmatprep.subr.bf16.mxu1 %v9461_v48  ;;  %v8047_v5 = vcombine.low %v1187_v1, %v1579_v4  ;;  %v1229_v31 = vrot.slane %v1221_v28, %v10123_v45  ;;  %v9501_v48 = vld [vmem:[%s11794_s1 + $0x4f0] sm:$0xff]   ;;  %v9514_v1 = vld [vmem:[%s11794_s1 + $0x508] sm:$0xff]   ;;  %v9525_v28 = vld [vmem:[%s11794_s1 + $0x5e0] sm:$0xff]  }
  0x87   : > { %8738 = vmatpush3.bf16.msra.mxu0 %v9462_v51  ;;  %v9503_v51 = vld [vmem:[%s11794_s1 + $0x4b0] sm:$0xff]  }
  0x88   : > { %8739 = vmatprep.subr.bf16.mxu0 %v9464_v55  ;;  %v2967_v6 = vrot.slane %v8047_v5, %v10123_v45  ;;  %v8048_v39 = vcombine.low %v1229_v31, %v1621_v36  ;;  %v9506_v55 = vld [vmem:[%s11794_s1 + $0x438] sm:$0xff]   ;;  %v9517_v4 = vld [vmem:[%s11794_s1 + $0x5d0] sm:$0xff]  }
  0x89   : > { %8760 = vmatpush3.bf16.msra.mxu1 %v9463_v56  ;;  %v9507_v56 = vld [vmem:[%s11794_s1 + $0x4b8] sm:$0xff]   ;;  %v9518_v5 = vld [vmem:[%s11794_s1 + $0x510] sm:$0xff]  }
  0x8a   : > { %8761 = vmatprep.subr.bf16.mxu1 %v9465_v60  ;;  %v2969_v7 = vcombine.high %v2967_v6, %v2967_v6  ;;  %v2983_v8 = vrot.slane %v2967_v6, %v10123_v45  ;;  %v3010_v42 = vrot.slane %v8048_v39, %v10123_v45  ;;  %v9510_v60 = vld [vmem:[%s11794_s1 + $0x500] sm:$0xff]   ;;  %v9519_v6 = vld [vmem:[%s11794_s1 + $0x590] sm:$0xff]  }
  0x8b   : > { %8740 = vmatpush3.bf16.msra.mxu0 %v9466_v61  ;;  %v9511_v61 = vld [vmem:[%s11794_s1 + $0x580] sm:$0xff]  }
  0x8c   : > { %8769 = vmatprep.subr.bf16.mxu0 %v9476_v63  ;;  %v2997_v10 = vrot.slane %v2969_v7, %v10123_v45  ;;  %v2999_v12 = vcombine.high %v2983_v8, %v2983_v8  ;;  %v3018_v46 = vcombine.high %v3010_v42, %v3010_v42  ;;  %v3026_v57 = vrot.slane %v3010_v42, %v10123_v45  ;;  %v9512_v63 = vld [vmem:[%s11794_s1 + $0x548] sm:$0xff]   ;;  %v9520_v7 = vld [vmem:[%s11794_s1 + $0x558] sm:$0xff]  }
  0x8d   : > { %8762 = vmatpush3.bf16.msra.mxu1 %v9467_v0  ;;  %v9513_v0 = vld [vmem:[%s11794_s1 + $0x5c8] sm:$0xff]  }
  0x8e   : > { %8791 = vmatprep.subr.bf16.mxu1 %v9477_v3  ;;  %6710 = vmatprep.mubr.bf16.mxu0 %v2997_v10  ;;  %v3001_v14 = vcombine.high %v2997_v10, %v2997_v10  ;;  %v3040_v49 = vrot.slane %v3018_v46, %v10123_v45  ;;  %v3048_v62 = vcombine.high %v3026_v57, %v3026_v57  ;;  %v9516_v3 = vld [vmem:[%s11794_s1 + $0x550] sm:$0xff]  }
  0x8f   : > { %6711 = vmatmul.mubr.bf16.vlgmr.msra.gmra.mrb[12].mxu0 %v2983_v8  ;;  %v9521_v8 = vld [vmem:[%s11794_s1 + $0x5d8] sm:$0xff]   ;;  %v7872_v10 = vld [vmem:[%s10102_s6 + $0x10] sm:$0x33] }
  0x90   : > { %6750 = vmatprep.mubr.bf16.mxu1 %v3001_v14  ;;  %8770 = vmatpush3.bf16.msra.mxu0 %v9478_v9  ;;  %v3050_v52 = vcombine.high %v3040_v49, %v3040_v49  ;;  %v9522_v9 = vld [vmem:[%s11794_s1 + $0x518] sm:$0xff]   ;;  %v7956_v14 = vcombine.low %v7872_v10, %v7872_v10 }
  0x91   : > { %6751 = vmatmul.mubr.bf16.vlgmr.msra.gmra.mrb[12].mxu1 %v2999_v12  ;;  %8771 = vmatprep.subr.bf16.mxu0 %v9480_v13  ;;  %v7874_v12 = vld [vmem:[%s10102_s6 + $0x20] sm:$0x33]  ;;  %v7875_v13 = vld [vmem:[%s10102_s6 + $0x28] sm:$0x33] }
  0x92   : > { %8792 = vmatpush3.bf16.msra.mxu1 %v9479_v11  ;;  %6790 = vmatprep.mubr.bf16.mxu0 %v3040_v49  ;;  %v7873_v11 = vld [vmem:[%s10102_s6 + $0x18] sm:$0x33]  ;;  %v7963_v23 = vcombine.high %v7875_v13, %v7875_v13  ;;  %v508_v24 = vshrl.u32 %v7956_v14, 16  ;;  %v9527_v49 = vld [vmem:[%s11794_s1 + $0x5a0] sm:$0xff]  }
  0x93   : > { %8793 = vmatprep.subr.bf16.mxu1 %v9481_v15  ;;  %6830 = vmatprep.mubr.bf16.mxu1 %v3050_v52  ;;  %v7957_v15 = vcombine.high %v7872_v10, %v7872_v10 }
  0x94   : > { %8772 = vmatpush3.bf16.msra.mxu0 %v9482_v16  ;;  %v7958_v16 = vcombine.low %v7873_v11, %v7873_v11 }
  0x95   : > { %8773 = vmatprep.subr.bf16.mxu0 %v9484_v18  ;;  %v9523_v18 = vld [vmem:[%s11794_s1 + $0x598] sm:$0xff]   ;;  %v517_v27 = vshll.u32 %v7957_v15, 16 }
  0x96   : > { %8794 = vmatpush3.bf16.msra.mxu1 %v9483_v17  ;;  %v7959_v17 = vcombine.high %v7873_v11, %v7873_v11  ;;  %v524_v31 = vshll.u32 %v7958_v16, 16 }
  0x97   : > { %8795 = vmatprep.subr.bf16.mxu1 %v9485_v19  ;;  %v9524_v19 = vld [vmem:[%s11794_s1 + $0x560] sm:$0xff]  }
  0x98   : > { %8774 = vmatpush3.bf16.msra.mxu0 %v9486_v20  ;;  %v7960_v20 = vcombine.low %v7874_v12, %v7874_v12  ;;  %v529_v32 = vshrl.u32 %v7959_v17, 16 }
  0x99   : > { %8775 = vmatprep.subr.bf16.mxu0 %v9488_v21  ;;  %v7961_v21 = vcombine.high %v7874_v12, %v7874_v12 }
  0x9a   : > { %8796 = vmatpush3.bf16.msra.mxu1 %v9487_v22  ;;  %v7962_v22 = vcombine.low %v7875_v13, %v7875_v13  ;;  %v538_v39 = vshll.u32 %v7960_v20, 16  ;;  %v9535_v13 = vld [vmem:[%s11794_s1 + $0x5b0] sm:$0xff]  }
  0x9b   : > { %8797 = vmatprep.subr.bf16.mxu1 %v9489_v25  ;;  %v510_v25 = vshll.u32 %v7956_v14, 16  ;;  %v543_v42 = vshrl.u32 %v7961_v21, 16  ;;  %v9537_v14 = vld [vmem:[%s11794_s1 + $0x5f8] sm:$0xff]  }
  0x9c   : > { %8776 = vmatpush3.bf16.msra.mxu0 %v9490_v26  ;;  %v515_v26 = vshrl.u32 %v7957_v15, 16 }
  0x9d   : > { %8777 = vmatprep.subr.bf16.mxu0 %v9492_v34  ;;  %v531_v34 = vshll.u32 %v7959_v17, 16  ;;  %v512_v36 = vrot.slane %v510_v25, 1 }
  0x9e   : > { %8798 = vmatpush3.bf16.msra.mxu1 %v9491_v30  ;;  %v522_v30 = vshrl.u32 %v7958_v16, 16  ;;  %v9538_v16 = vld [vmem:[%s11794_s1 + $0x538] sm:$0xff]  }
  0x9f   : > { %8799 = vmatprep.subr.bf16.mxu1 %v9493_v35  ;;  %v9528_v35 = vld [vmem:[%s11794_s1 + $0x568] sm:$0xff]  }
  0xa0   : > { %8778 = vmatpush3.bf16.msra.mxu0 %v9494_v37  ;;  %v519_v37 = vrot.slane %v517_v27, 1  ;;  %v9550_v27 = vld [vmem:[%s11794_s1 + $0x600] sm:$0xff]  }
  0xa1   : > { %8779 = vmatprep.subr.bf16.mxu0 %v9496_v40  ;;  %v526_v40 = vrot.slane %v524_v31, 1  ;;  %v9552_v31 = vld [vmem:[%s11794_s1 + $0x648] sm:$0xff]  }
  0xa2   : > { %8800 = vmatpush3.bf16.msra.mxu1 %v9495_v38  ;;  %v536_v38 = vshrl.u32 %v7960_v20, 16  ;;  %v520_v46 = vor.u32 %v519_v37, %v515_v26  ;;  %v9539_v20 = vld [vmem:[%s11794_s1 + $0x5b8] sm:$0xff]   ;;  %v9556_v37 = vld [vmem:[%s11794_s1 + $0x650] sm:$0xff]  }
  0xa3   : > { %8801 = vmatprep.subr.bf16.mxu1 %v9497_v41  ;;  %v533_v41 = vrot.slane %v531_v34, 1  ;;  %v9553_v34 = vld [vmem:[%s11794_s1 + $0x6c8] sm:$0xff]  }
  0xa4   : > { %8780 = vmatpush3.bf16.msra.mxu0 %v9498_v43  ;;  %v545_v43 = vshll.u32 %v7961_v21, 16 }
  0xa5   : > { %8781 = vmatprep.subr.bf16.mxu0 %v9500_v47  ;;  %v540_v47 = vrot.slane %v538_v39, 1  ;;  %v534_v52 = vor.u32 %v533_v41, %v529_v32  ;;  %v9558_v39 = vld [vmem:[%s11794_s1 + $0x610] sm:$0xff]  }
  0xa6   : > { %8802 = vmatpush3.bf16.msra.mxu1 %v9499_v44  ;;  %v513_v44 = vor.u32 %v512_v36, %v508_v24  ;;  %v9555_v36 = vld [vmem:[%s11794_s1 + $0x688] sm:$0xff]   ;;  %v9559_v41 = vld [vmem:[%s11794_s1 + $0x690] sm:$0xff]  }
  0xa7   : > { %8803 = vmatprep.subr.bf16.mxu1 %v9501_v48  ;;  %v550_v48 = vshrl.u32 %v7962_v22, 16 }
  0xa8   : > { %8782 = vmatpush3.bf16.msra.mxu0 %v9502_v50  ;;  %v9529_v50 = vld [vmem:[%s11794_s1 + $0x5e8] sm:$0xff]  }
  0xa9   : > { %8783 = vmatprep.subr.bf16.mxu0 %v9504_v53  ;;  %v547_v53 = vrot.slane %v545_v43, 1  ;;  %v7878_v43 = vld [vmem:[%s10102_s6 + $0x20] sm:$0x22] }
  0xaa   : > { %8804 = vmatpush3.bf16.msra.mxu1 %v9503_v51  ;;  %v527_v51 = vor.u32 %v526_v40, %v522_v30  ;;  %v7876_v40 = vld [vmem:[%s10102_s6 + $0x10] sm:$0x22] }
  0xab   : > { %8805 = vmatprep.subr.bf16.mxu1 %v9505_v54  ;;  %v552_v54 = vshll.u32 %v7962_v22, 16  ;;  %v9549_v22 = vld [vmem:[%s11794_s1 + $0x6c0] sm:$0xff]  }
  0xac   : > { %8784 = vmatpush3.bf16.msra.mxu0 %v9506_v55  ;;  %v541_v55 = vor.u32 %v540_v47, %v536_v38  ;;  %v9557_v38 = vld [vmem:[%s11794_s1 + $0x6d0] sm:$0xff]   ;;  %v7965_v47 = vcombine.high %v7876_v40, %v7876_v40 }
  0xad   : > { %8813 = vmatprep.subr.bf16.mxu0 %v9508_v58  ;;  %v1191_v58 = vcombine.low %v513_v44, %v520_v46  ;;  %v7879_v44 = vld [vmem:[%s10102_s6 + $0x28] sm:$0x22]  ;;  %v7964_v46 = vcombine.low %v7876_v40, %v7876_v40  ;;  %v9579_v40 = vld [vmem:[%s11794_s1 + $0x6b8] sm:$0xff]  }
  0xae   : > { %8806 = vmatpush3.bf16.msra.mxu1 %v9507_v56  ;;  %v557_v56 = vshrl.u32 %v7963_v23, 16 }
  0xaf   : > { %6791 = vmatmul.mubr.bf16.vlgmr.msra.gmra.mrb[16].mxu0 %v3026_v57  ;;  %8835 = vmatprep.subr.bf16.mxu1 %v9509_v59  ;;  %v559_v57 = vshll.u32 %v7963_v23, 16  ;;  %v9530_v59 = vld [vmem:[%s11794_s1 + $0x528] sm:$0xff]  }
  0xb0   : > { %8814 = vmatpush3.bf16.msra.mxu0 %v9510_v60  ;;  %v548_v60 = vor.u32 %v547_v53, %v543_v42  ;;  %v7877_v42 = vld [vmem:[%s10102_s6 + $0x18] sm:$0x22]  ;;  %v7970_v53 = vcombine.low %v7879_v44, %v7879_v44 }
  0xb1   : > { %6831 = vmatmul.mubr.bf16.vlgmr.msra.gmra.mrb[16].mxu1 %v3048_v62  ;;  %8815 = vmatprep.subr.bf16.mxu0 %v9512_v63  ;;  %v1192_v62 = vcombine.low %v527_v51, %v534_v52  ;;  %v9532_v63 = vld [vmem:[%s11794_s1 + $0x570] sm:$0xff]   ;;  %v7968_v51 = vcombine.low %v7878_v43, %v7878_v43  ;;  %v7969_v52 = vcombine.high %v7878_v43, %v7878_v43 }
  0xb2   : > { %8836 = vmatpush3.bf16.msra.mxu1 %v9511_v61  ;;  %v554_v61 = vrot.slane %v552_v54, 1  ;;  %v7971_v54 = vcombine.high %v7879_v44, %v7879_v44  ;;  %v9588_v44 = vld [vmem:[%s11794_s1 + $0x740] sm:$0xff]  }
  0xb3   : > { %8837 = vmatprep.subr.bf16.mxu1 %v9513_v0  ;;  %v561_v0 = vrot.slane %v559_v57, 1  ;;  %v9561_v57 = vld [vmem:[%s11794_s1 + $0x6d8] sm:$0xff]  }
  0xb4   : > { %8816 = vmatpush3.bf16.msra.mxu0 %v9514_v1  ;;  %v1213_v1 = vrot.slane %v1191_v58, %v10123_v45  ;;  %v9562_v58 = vld [vmem:[%s11794_s1 + $0x618] sm:$0xff]  }
  0xb5   : > { %8817 = vmatprep.subr.bf16.mxu0 %v9516_v3  ;;  %v555_v3 = vor.u32 %v554_v61, %v550_v48  ;;  %v9560_v48 = vld [vmem:[%s11794_s1 + $0x658] sm:$0xff]   ;;  %v587_v61 = vrot.slane %v7968_v51, 1  ;;  %v9590_v51 = vld [vmem:[%s11794_s1 + $0x700] sm:$0xff]  }
  0xb6   : > { %8838 = vmatpush3.bf16.msra.mxu1 %v9515_v2  ;;  %v9531_v2 = vld [vmem:[%s11794_s1 + $0x5a8] sm:$0xff]  }
  0xb7   : > { %8839 = vmatprep.subr.bf16.mxu1 %v9517_v4  ;;  %v1220_v4 = vrot.slane %v1192_v62, %v10123_v45  ;;  %v588_v62 = vrot.slane %v7969_v52, 1  ;;  %v9591_v52 = vld [vmem:[%s11794_s1 + $0x780] sm:$0xff]  }
  0xb8   : > { %8818 = vmatpush3.bf16.msra.mxu0 %v9518_v5  ;;  %v1583_v5 = vcombine.low %v541_v55, %v548_v60  ;;  %v583_v55 = vrot.slane %v7964_v46, 1 }
  0xb9   : > { %8819 = vmatprep.subr.bf16.mxu0 %v9520_v7  ;;  %v562_v7 = vor.u32 %v561_v0, %v557_v56  ;;  %v1222_v10 = vcombine.low %v1213_v1, %v1220_v4  ;;  %v584_v56 = vrot.slane %v7965_v47, 1  ;;  %v589_v0 = vrot.slane %v7970_v53, 1 }
  0xba   : > { %8840 = vmatpush3.bf16.msra.mxu1 %v9519_v6  ;;  %v9533_v6 = vld [vmem:[%s11794_s1 + $0x5f0] sm:$0xff]   ;;  %v1605_v12 = vrot.slane %v1583_v5, %v10123_v45  ;;  %v590_v1 = vrot.slane %v7971_v54, 1  ;;  %v1630_v5 = vcombine.low %v587_v61, %v588_v62  ;;  %v9592_v54 = vld [vmem:[%s11794_s1 + $0x748] sm:$0xff]   ;;  %v9600_v62 = vld [vmem:[%s11794_s1 + $0x758] sm:$0xff]  }
  0xbb   : > { %8841 = vmatprep.subr.bf16.mxu1 %v9521_v8  ;;  %v9534_v8 = vld [vmem:[%s11794_s1 + $0x530] sm:$0xff]   ;;  %v1584_v11 = vcombine.low %v555_v3, %v562_v7  ;;  %v1236_v17 = vrot.slane %v1222_v10, %v10123_v45  ;;  %v9564_v3 = vld [vmem:[%s11794_s1 + $0x660] sm:$0xff]  }
  0xbc   : > { %8820 = vmatpush3.bf16.msra.mxu0 %v9522_v9  ;;  %v9536_v9 = vld [vmem:[%s11794_s1 + $0x578] sm:$0xff]   ;;  %v9599_v61 = vld [vmem:[%s11794_s1 + $0x790] sm:$0xff]  }
  0xbd   : > { %8821 = vmatprep.subr.bf16.mxu0 %v9524_v19  ;;  %v1612_v15 = vrot.slane %v1584_v11, %v10123_v45  ;;  %v9548_v19 = vld [vmem:[%s11794_s1 + $0x640] sm:$0xff]   ;;  %v1640_v11 = vrot.slane %v1630_v5, %v10123_v45 }
  0xbe   : > { %8842 = vmatpush3.bf16.msra.mxu1 %v9523_v18 }
  0xbf   : > { %8843 = vmatprep.subr.bf16.mxu1 %v9525_v28  ;;  %v1614_v18 = vcombine.low %v1605_v12, %v1612_v15  ;;  %v9567_v12 = vld [vmem:[%s11794_s1 + $0x6a0] sm:$0xff]  }
  0xc0   : > { %8822 = vmatpush3.bf16.msra.mxu0 %v9526_v29  ;;  %v9551_v29 = vld [vmem:[%s11794_s1 + $0x680] sm:$0xff]  }
  0xc1   : > { %8823 = vmatprep.subr.bf16.mxu0 %v9528_v35  ;;  %v1628_v21 = vrot.slane %v1614_v18, %v10123_v45  ;;  %v9554_v35 = vld [vmem:[%s11794_s1 + $0x608] sm:$0xff]  }
  0xc2   : > { %8844 = vmatpush3.bf16.msra.mxu1 %v9527_v49  ;;  %v7966_v49 = vcombine.low %v7877_v42, %v7877_v42  ;;  %v9570_v18 = vld [vmem:[%s11794_s1 + $0x628] sm:$0xff]  }
  0xc3   : > { %8845 = vmatprep.subr.bf16.mxu1 %v9529_v50  ;;  %v8049_v23 = vcombine.low %v1236_v17, %v1628_v21  ;;  %v7967_v50 = vcombine.high %v7877_v42, %v7877_v42 }
  0xc4   : > { %8824 = vmatpush3.bf16.msra.mxu0 %v9530_v59  ;;  %v585_v59 = vrot.slane %v7966_v49, 1  ;;  %v9589_v49 = vld [vmem:[%s11794_s1 + $0x7c0] sm:$0xff]  }
  0xc5   : > { %8825 = vmatprep.subr.bf16.mxu0 %v9532_v63  ;;  %v3017_v24 = vrot.slane %v8049_v23, %v10123_v45  ;;  %v586_v60 = vrot.slane %v7967_v50, 1  ;;  %v9563_v63 = vld [vmem:[%s11794_s1 + $0x698] sm:$0xff]   ;;  %v9573_v23 = vld [vmem:[%s11794_s1 + $0x6f0] sm:$0xff]  }
  0xc6   : > { %8846 = vmatpush3.bf16.msra.mxu1 %v9531_v2  ;;  %v1238_v2 = vcombine.low %v583_v55, %v584_v56  ;;  %v9593_v55 = vld [vmem:[%s11794_s1 + $0x7c8] sm:$0xff]  }
  0xc7   : > { %8847 = vmatprep.subr.bf16.mxu1 %v9533_v6  ;;  %v3019_v25 = vcombine.high %v3017_v24, %v3017_v24  ;;  %v3033_v26 = vrot.slane %v3017_v24, %v10123_v45  ;;  %v1239_v4 = vcombine.low %v585_v59, %v586_v60  ;;  %v9565_v6 = vld [vmem:[%s11794_s1 + $0x6e0] sm:$0xff]   ;;  %v9594_v56 = vld [vmem:[%s11794_s1 + $0x708] sm:$0xff]   ;;  %v9597_v59 = vld [vmem:[%s11794_s1 + $0x7d0] sm:$0xff]  }
  0xc8   : > { %8826 = vmatpush3.bf16.msra.mxu0 %v9534_v8  ;;  %v1248_v7 = vrot.slane %v1238_v2, %v10123_v45  ;;  %v1631_v8 = vcombine.low %v589_v0, %v590_v1  ;;  %v9598_v60 = vld [vmem:[%s11794_s1 + $0x710] sm:$0xff]   ;;  %v9602_v0 = vld [vmem:[%s11794_s1 + $0x718] sm:$0xff]  }
  0xc9   : > { %8827 = vmatprep.subr.bf16.mxu0 %v9536_v9  ;;  %v3047_v28 = vrot.slane %v3019_v25, %v10123_v45  ;;  %v3049_v30 = vcombine.high %v3033_v26, %v3033_v26  ;;  %v9566_v9 = vld [vmem:[%s11794_s1 + $0x620] sm:$0xff]   ;;  %v1255_v10 = vrot.slane %v1239_v4, %v10123_v45  ;;  %v9574_v25 = vld [vmem:[%s11794_s1 + $0x630] sm:$0xff]   ;;  %v7881_v2 = vld [vmem:[%s10102_s6 + $0x18] sm:$0x66] }
  0xca   : > { %8848 = vmatpush3.bf16.msra.mxu1 %v9535_v13  ;;  %v1647_v13 = vrot.slane %v1631_v8, %v10123_v45  ;;  %v7880_v1 = vld [vmem:[%s10102_s6 + $0x10] sm:$0x66]  ;;  %v7883_v4 = vld [vmem:[%s10102_s6 + $0x28] sm:$0x66]  ;;  %v7975_v8 = vcombine.high %v7881_v2, %v7881_v2 }
  0xcb   : > { %8849 = vmatprep.subr.bf16.mxu1 %v9537_v14  ;;  %6870 = vmatprep.mubr.bf16.mxu0 %v3047_v28  ;;  %v3051_v32 = vcombine.high %v3047_v28, %v3047_v28  ;;  %v9568_v14 = vld [vmem:[%s11794_s1 + $0x668] sm:$0xff]   ;;  %v1270_v15 = vcombine.low %v1248_v7, %v1255_v10  ;;  %v7972_v5 = vcombine.low %v7880_v1, %v7880_v1 }
  0xcc   : > { %8828 = vmatpush3.bf16.msra.mxu0 %v9538_v16  ;;  %v9569_v16 = vld [vmem:[%s11794_s1 + $0x6e8] sm:$0xff]   ;;  %v1662_v17 = vcombine.low %v1640_v11, %v1647_v13  ;;  %v7974_v7 = vcombine.low %v7881_v2, %v7881_v2  ;;  %v7979_v13 = vcombine.high %v7883_v4, %v7883_v4  ;;  %v9613_v2 = vld [vmem:[%s11794_s1 + $0x7f0] sm:$0xff]  }
  0xcd   : > { %8857 = vmatprep.subr.bf16.mxu0 %v9548_v19  ;;  %6910 = vmatprep.mubr.bf16.mxu1 %v3051_v32  ;;  %v1278_v19 = vrot.slane %v1270_v15, %v10123_v45  ;;  %v9605_v15 = vld [vmem:[%s11794_s1 + $0x7e0] sm:$0xff]  }
  0xce   : > { %8850 = vmatpush3.bf16.msra.mxu1 %v9539_v20  ;;  %v9571_v20 = vld [vmem:[%s11794_s1 + $0x6a8] sm:$0xff]   ;;  %v1670_v21 = vrot.slane %v1662_v17, %v10123_v45  ;;  %v615_v17 = vshll.u32 %v7972_v5, 16 }
  0xcf   : > { %8879 = vmatprep.subr.bf16.mxu1 %v9549_v22  ;;  %6871 = vmatmul.mubr.bf16.vlgmr.msra.gmra.mrb[20].mxu0 %v3033_v26  ;;  %v9572_v22 = vld [vmem:[%s11794_s1 + $0x670] sm:$0xff]  }
  0xd0   : > { %8858 = vmatpush3.bf16.msra.mxu0 %v9550_v27  ;;  %v8050_v24 = vcombine.low %v1278_v19, %v1670_v21  ;;  %v9575_v27 = vld [vmem:[%s11794_s1 + $0x6b0] sm:$0xff]   ;;  %v628_v21 = vshrl.u32 %v7974_v7, 16 }
  0xd1   : > { %6911 = vmatmul.mubr.bf16.vlgmr.msra.gmra.mrb[20].mxu1 %v3049_v30  ;;  %8859 = vmatprep.subr.bf16.mxu0 %v9552_v31  ;;  %v9576_v30 = vld [vmem:[%s11794_s1 + $0x678] sm:$0xff]  }
  0xd2   : > { %8880 = vmatpush3.bf16.msra.mxu1 %v9551_v29  ;;  %v3060_v28 = vrot.slane %v8050_v24, %v10123_v45  ;;  %v639_v24 = vshll.u32 %v7975_v8, 16 }
  0xd3   : > { %8881 = vmatprep.subr.bf16.mxu1 %v9553_v34  ;;  %v9577_v34 = vld [vmem:[%s11794_s1 + $0x6f8] sm:$0xff]  }
  0xd4   : > { %8860 = vmatpush3.bf16.msra.mxu0 %v9554_v35  ;;  %v3068_v35 = vcombine.high %v3060_v28, %v3060_v28  ;;  %v3076_v43 = vrot.slane %v3060_v28, %v10123_v45 }
  0xd5   : > { %8861 = vmatprep.subr.bf16.mxu0 %v9556_v37  ;;  %v9578_v37 = vld [vmem:[%s11794_s1 + $0x638] sm:$0xff]  }
  0xd6   : > { %8882 = vmatpush3.bf16.msra.mxu1 %v9555_v36  ;;  %v3098_v53 = vcombine.high %v3076_v43, %v3076_v43 }
  0xd7   : > { %8883 = vmatprep.subr.bf16.mxu1 %v9557_v38 }
  0xd8   : > { %8862 = vmatpush3.bf16.msra.mxu0 %v9558_v39 }
  0xd9   : > { %8863 = vmatprep.subr.bf16.mxu0 %v9560_v48 }
  0xda   : > { %8884 = vmatpush3.bf16.msra.mxu1 %v9559_v41  ;;  %v3090_v41 = vrot.slane %v3068_v35, %v10123_v45  ;;  %v9608_v35 = vld [vmem:[%s11794_s1 + $0x768] sm:$0xff]  }
  0xdb   : > { %8885 = vmatprep.subr.bf16.mxu1 %v9561_v57  ;;  %v9595_v57 = vld [vmem:[%s11794_s1 + $0x788] sm:$0xff]  }
  0xdc   : > { %8864 = vmatpush3.bf16.msra.mxu0 %v9562_v58  ;;  %6950 = vmatprep.mubr.bf16.mxu0 %v3090_v41  ;;  %v3100_v48 = vcombine.high %v3090_v41, %v3090_v41  ;;  %v9596_v58 = vld [vmem:[%s11794_s1 + $0x750] sm:$0xff]   ;;  %v9610_v41 = vld [vmem:[%s11794_s1 + $0x728] sm:$0xff]  }
  0xdd   : > { %8865 = vmatprep.subr.bf16.mxu0 %v9564_v3  ;;  %v7882_v3 = vld [vmem:[%s10102_s6 + $0x20] sm:$0x66] }
  0xde   : > { %8886 = vmatpush3.bf16.msra.mxu1 %v9563_v63  ;;  %6990 = vmatprep.mubr.bf16.mxu1 %v3100_v48  ;;  %v9601_v63 = vld [vmem:[%s11794_s1 + $0x7d8] sm:$0xff]   ;;  %v7976_v10 = vcombine.low %v7882_v3, %v7882_v3  ;;  %v7977_v11 = vcombine.high %v7882_v3, %v7882_v3 }
  0xdf   : > { %8887 = vmatprep.subr.bf16.mxu1 %v9565_v6  ;;  %v7973_v6 = vcombine.high %v7880_v1, %v7880_v1 }
  0xe0   : > { %8866 = vmatpush3.bf16.msra.mxu0 %v9566_v9  ;;  %v9603_v9 = vld [vmem:[%s11794_s1 + $0x798] sm:$0xff]  }
  0xe1   : > { %8867 = vmatprep.subr.bf16.mxu0 %v9568_v14  ;;  %v9604_v14 = vld [vmem:[%s11794_s1 + $0x760] sm:$0xff]   ;;  %v623_v19 = vshll.u32 %v7973_v6, 16 }
  0xe2   : > { %8888 = vmatpush3.bf16.msra.mxu1 %v9567_v12  ;;  %v7978_v12 = vcombine.low %v7883_v4, %v7883_v4 }
  0xe3   : > { %8889 = vmatprep.subr.bf16.mxu1 %v9569_v16  ;;  %v612_v16 = vshrl.u32 %v7972_v5, 16  ;;  %v625_v28 = vrot.slane %v623_v19, 2  ;;  %v9614_v5 = vld [vmem:[%s11794_s1 + $0x730] sm:$0xff]  }
  0xe4   : > { %8868 = vmatpush3.bf16.msra.mxu0 %v9570_v18  ;;  %v620_v18 = vshrl.u32 %v7973_v6, 16 }
  0xe5   : > { %8869 = vmatprep.subr.bf16.mxu0 %v9572_v22  ;;  %v631_v22 = vshll.u32 %v7974_v7, 16 }
  0xe6   : > { %8890 = vmatpush3.bf16.msra.mxu1 %v9571_v20  ;;  %v9606_v20 = vld [vmem:[%s11794_s1 + $0x720] sm:$0xff]  }
  0xe7   : > { %8891 = vmatprep.subr.bf16.mxu1 %v9573_v23  ;;  %v636_v23 = vshrl.u32 %v7975_v8, 16 }
  0xe8   : > { %8870 = vmatpush3.bf16.msra.mxu0 %v9574_v25  ;;  %v614_v25 = vrot.slane %v612_v16, 1 }
  0xe9   : > { %8871 = vmatprep.subr.bf16.mxu0 %v9576_v30  ;;  %v630_v30 = vrot.slane %v628_v21, 1  ;;  %v9629_v21 = vld [vmem:[%s11794_s1 + $0x8c0] sm:$0xff]  }
  0xea   : > { %8892 = vmatpush3.bf16.msra.mxu1 %v9575_v27  ;;  %v622_v27 = vrot.slane %v620_v18, 1  ;;  %v9619_v18 = vld [vmem:[%s11794_s1 + $0x7b8] sm:$0xff]  }
  0xeb   : > { %8893 = vmatprep.subr.bf16.mxu1 %v9577_v34  ;;  %v641_v34 = vrot.slane %v639_v24, 2 }
  0xec   : > { %8872 = vmatpush3.bf16.msra.mxu0 %v9578_v37 }
  0xed   : > { %8901 = vmatprep.subr.bf16.mxu0 %v9588_v44  ;;  %v652_v44 = vshrl.u32 %v7977_v11, 16 }
  0xee   : > { %8894 = vmatpush3.bf16.msra.mxu1 %v9579_v40  ;;  %v647_v40 = vshll.u32 %v7976_v10, 16 }
  0xef   : > { %6951 = vmatmul.mubr.bf16.vlgmr.msra.gmra.mrb[24].mxu0 %v3076_v43  ;;  %8923 = vmatprep.subr.bf16.mxu1 %v9589_v49 }
  0xf0   : > { %8902 = vmatpush3.bf16.msra.mxu0 %v9590_v51  ;;  %v649_v49 = vrot.slane %v647_v40, 2  ;;  %v663_v51 = vshll.u32 %v7978_v12, 16 }
  0xf1   : > { %6991 = vmatmul.mubr.bf16.vlgmr.msra.gmra.mrb[24].mxu1 %v3098_v53  ;;  %8903 = vmatprep.subr.bf16.mxu0 %v9592_v54  ;;  %v668_v54 = vshrl.u32 %v7979_v13, 16 }
  0xf2   : > { %8924 = vmatpush3.bf16.msra.mxu1 %v9591_v52  ;;  %v654_v52 = vrot.slane %v652_v44, 1 }
  0xf3   : > { %8925 = vmatprep.subr.bf16.mxu1 %v9593_v55  ;;  %v671_v55 = vshll.u32 %v7979_v13, 16 }
  0xf4   : > { %8904 = vmatpush3.bf16.msra.mxu0 %v9594_v56  ;;  %v9611_v56 = vld [vmem:[%s11794_s1 + $0x7a8] sm:$0xff]  }
  0xf5   : > { %8905 = vmatprep.subr.bf16.mxu0 %v9596_v58 }
  0xf6   : > { %8926 = vmatpush3.bf16.msra.mxu1 %v9595_v57  ;;  %v9612_v57 = vld [vmem:[%s11794_s1 + $0x770] sm:$0xff]  }
  0xf7   : > { %8927 = vmatprep.subr.bf16.mxu1 %v9597_v59 }
  0xf8   : > { %8906 = vmatpush3.bf16.msra.mxu0 %v9598_v60  ;;  %v665_v60 = vrot.slane %v663_v51, 2 }
  0xf9   : > { %8907 = vmatprep.subr.bf16.mxu0 %v9600_v62 }
  0xfa   : > { %8928 = vmatpush3.bf16.msra.mxu1 %v9599_v61 }
  0xfb   : > { %v8609_v26 = vpop.f32.mrb[0].mxu0  ;;  %8929 = vmatprep.subr.bf16.mxu1 %v9601_v63  ;;  %v670_v63 = vrot.slane %v668_v54, 1  ;;  %v9639_v54 = vld [vmem:[%s11794_s1 + $0x890] sm:$0xff]  }
  0xfc   : > { %v8610_v29 = vpop.f32.mrb[1].mxu0  ;;  %v8631_v31 = vpop.f32.mrb[0].mxu1  ;;  %8908 = vmatpush3.bf16.msra.mxu0 %v9602_v0  ;;  %v673_v0 = vrot.slane %v671_v55, 2 }
  0xfd   : > { %v8611_v32 = vadd.f32 %v8610_v29, %v8609_v26  ;;  %v8632_v36 = vpop.f32.mrb[1].mxu1  ;;  %v8612_v39 = vpop.f32.mrb[2].mxu0  ;;  %v617_v26 = vrot.slane %v615_v17, 2  ;;  %v9607_v29 = vld [vmem:[%s11794_s1 + $0x7a0] sm:$0xff]   ;;  %8909 = vmatprep.subr.bf16.mxu0 %v9604_v14  ;;  %v9617_v14 = vld [vmem:[%s11794_s1 + $0x7f8] sm:$0xff]  }
  0xfe   : > { %v8633_v38 = vadd.f32 %v8632_v36, %v8631_v31  ;;  %v8634_v42 = vpop.f32.mrb[2].mxu1  ;;  %v8613_v47 = vpop.f32.mrb[3].mxu0  ;;  %v633_v31 = vrot.slane %v631_v22, 2  ;;  %v9609_v36 = vld [vmem:[%s11794_s1 + $0x7e8] sm:$0xff]   ;;  %v644_v39 = vshrl.u32 %v7976_v10, 16  ;;  %8930 = vmatpush3.bf16.msra.mxu1 %v9603_v9  ;;  %v674_v6 = vor.u32 %v673_v0, %v670_v63  ;;  %v9616_v9 = vld [vmem:[%s11794_s1 + $0x778] sm:$0xff]  }
  0xff   : > { %v8635_v50 = vpop.f32.mrb[3].mxu1  ;;  %v618_v37 = vor.u32 %v617_v26, %v614_v25  ;;  %v655_v47 = vshll.u32 %v7977_v11, 16  ;;  %8931 = vmatprep.subr.bf16.mxu1 %v9605_v15  ;;  %v9615_v10 = vld [vmem:[%s11794_s1 + $0x7b0] sm:$0xff]   ;;  %v9618_v15 = vld [vmem:[%s11794_s1 + $0x738] sm:$0xff]   ;;  %v9628_v17 = vld [vmem:[%s11794_s1 + $0x840] sm:$0xff]  }
 0x100   : > { %v10777_v46 = vadd.f32 %v8633_v38, %v8611_v32  ;;  %v638_v32 = vrot.slane %v636_v23, 1  ;;  %v626_v38 = vor.u32 %v625_v28, %v622_v27  ;;  %v634_v42 = vor.u32 %v633_v31, %v630_v30  ;;  %8910 = vmatpush3.bf16.msra.mxu0 %v9606_v20  ;;  %v9630_v27 = vld [vmem:[%s11794_s1 + $0x800] sm:$0xff]  }
 0x101   : > { %v646_v48 = vrot.slane %v644_v39, 1  ;;  %v660_v50 = vshrl.u32 %v7978_v12, 16  ;;  %v657_v53 = vrot.slane %v655_v47, 2  ;;  %8911 = vmatprep.subr.bf16.mxu0 %v9608_v35  ;;  %v9631_v30 = vld [vmem:[%s11794_s1 + $0x880] sm:$0xff]   ;;  %v9633_v35 = vld [vmem:[%s11794_s1 + $0x8c8] sm:$0xff]  }
 0x102   : > { %v642_v43 = vor.u32 %v641_v34, %v638_v32  ;;  %v1240_v61 = vcombine.low %v618_v37, %v626_v38  ;;  %8932 = vmatpush3.bf16.msra.mxu1 %v9607_v29  ;;  %v9632_v34 = vld [vmem:[%s11794_s1 + $0x848] sm:$0xff]   ;;  %v8581_v55 = vld.sshfl [vmem:[%s10102_s6 + $0x20] sm:$0x5 pattern:$0x75316420] }
 0x103   : > { %v650_v58 = vor.u32 %v649_v49, %v646_v48  ;;  %v662_v59 = vrot.slane %v660_v50, 1  ;;  %v658_v62 = vor.u32 %v657_v53, %v654_v52  ;;  %8933 = vmatprep.subr.bf16.mxu1 %v9609_v36  ;;  %v9635_v48 = vld [vmem:[%s11794_s1 + $0x888] sm:$0xff]   ;;  %v9636_v49 = vld [vmem:[%s11794_s1 + $0x850] sm:$0xff]   ;;  %v9640_v53 = vld [vmem:[%s11794_s1 + $0x858] sm:$0xff]  }
 0x104   : > { %v1241_v1 = vcombine.low %v634_v42, %v642_v43  ;;  %v1262_v4 = vrot.slane %v1240_v61, %v10123_v45  ;;  %8912 = vmatpush3.bf16.msra.mxu0 %v9610_v41  ;;  %v9634_v42 = vld [vmem:[%s11794_s1 + $0x808] sm:$0xff]   ;;  %v9638_v52 = vld [vmem:[%s11794_s1 + $0x810] sm:$0xff]   ;;  %v8590_v61 = vld.sshfl [vmem:[%s10102_s6 + $0x38] sm:$0x5 pattern:$0x75316420] }
 0x105   : > { %v666_v3 = vor.u32 %v665_v60, %v662_v59  ;;  %v1632_v8 = vcombine.low %v650_v58, %v658_v62  ;;  %8913 = vmatprep.subr.bf16.mxu0 %v9612_v57  ;;  %v9641_v57 = vld [vmem:[%s11794_s1 + $0x8d8] sm:$0xff]   ;;  %v8589_v59 = vld.sshfl [vmem:[%s10102_s6 + $0x30] sm:$0x5 pattern:$0x75316420] }
 0x106   : > { %v1269_v7 = vrot.slane %v1241_v1, %v10123_v45  ;;  %8934 = vmatpush3.bf16.msra.mxu1 %v9611_v56  ;;  %v8582_v56 = vld.sshfl [vmem:[%s10102_s6 + $0x28] sm:$0x5 pattern:$0x75316420]  ;;  %v9642_v58 = vld [vmem:[%s11794_s1 + $0x818] sm:$0xff]   ;;  %v1711_v0 = vcombine.low %v8589_v59, %v8590_v61  ;;  %v9644_v1 = vld [vmem:[%s11794_s1 + $0x860] sm:$0xff]  }
 0x107   : > { %v1633_v12 = vcombine.low %v666_v3, %v674_v6  ;;  %v1654_v13 = vrot.slane %v1632_v8, %v10123_v45  ;;  %8935 = vmatprep.subr.bf16.mxu1 %v9613_v2  ;;  %v1319_v60 = vcombine.low %v8581_v55, %v8582_v56  ;;  %v9643_v62 = vld [vmem:[%s11794_s1 + $0x898] sm:$0xff]   ;;  %v9645_v2 = vld [vmem:[%s11794_s1 + $0x8e0] sm:$0xff]   ;;  %v9649_v8 = vld [vmem:[%s11794_s1 + $0x8e8] sm:$0xff]  }
 0x108   : > { %v1271_v11 = vcombine.low %v1262_v4, %v1269_v7  ;;  %8914 = vmatpush3.bf16.msra.mxu0 %v9614_v5  ;;  %v1719_v3 = vrot.slane %v1711_v0, %v10123_v45  ;;  %v9646_v4 = vld [vmem:[%s11794_s1 + $0x820] sm:$0xff]   ;;  %v9648_v7 = vld [vmem:[%s11794_s1 + $0x868] sm:$0xff]   ;;  %v7890_v56 = vld [vmem:[%s10102_s6 + $0x30] sm:$0x33] }
 0x109   : > { %v1661_v16 = vrot.slane %v1633_v12, %v10123_v45  ;;  %8915 = vmatprep.subr.bf16.mxu0 %v9616_v9  ;;  %v1327_v63 = vrot.slane %v1319_v60, %v10123_v45  ;;  %v9647_v5 = vld [vmem:[%s11794_s1 + $0x8a0] sm:$0xff]   ;;  %v7889_v55 = vld [vmem:[%s10102_s6 + $0x28] sm:$0x33]  ;;  %v9675_v60 = vld [vmem:[%s11794_s1 + $0x998] sm:$0xff]   ;;  %v7992_v0 = vcombine.low %v7890_v56, %v7890_v56 }
 0x10a   : > { %8936 = vmatpush3.bf16.msra.mxu1 %v9615_v10  ;;  %v1285_v19 = vrot.slane %v1271_v11, %v10123_v45  ;;  %v9650_v10 = vld [vmem:[%s11794_s1 + $0x828] sm:$0xff]   ;;  %v9676_v61 = vld [vmem:[%s11794_s1 + $0x960] sm:$0xff]  }
 0x10b   : > { %v1663_v20 = vcombine.low %v1654_v13, %v1661_v16  ;;  %8937 = vmatprep.subr.bf16.mxu1 %v9617_v14  ;;  %v8052_v6 = vcombine.low %v1327_v63, %v1719_v3  ;;  %v9651_v11 = vld [vmem:[%s11794_s1 + $0x8a8] sm:$0xff]   ;;  %v9652_v13 = vld [vmem:[%s11794_s1 + $0x870] sm:$0xff]   ;;  %v7991_v63 = vcombine.high %v7889_v55, %v7889_v55 }
 0x10c   : > { %8916 = vmatpush3.bf16.msra.mxu0 %v9618_v15  ;;  %v9653_v14 = vld [vmem:[%s11794_s1 + $0x8f0] sm:$0xff]  }
 0x10d   : > { %v1677_v22 = vrot.slane %v1663_v20, %v10123_v45  ;;  %8945 = vmatprep.subr.bf16.mxu0 %v9628_v17  ;;  %v3110_v9 = vrot.slane %v8052_v6, %v10123_v45  ;;  %v9654_v16 = vld [vmem:[%s11794_s1 + $0x830] sm:$0xff]   ;;  %v9657_v20 = vld [vmem:[%s11794_s1 + $0x8f8] sm:$0xff]   ;;  %v9677_v6 = vld [vmem:[%s11794_s1 + $0x9e0] sm:$0xff]  }
 0x10e   : > { %8938 = vmatpush3.bf16.msra.mxu1 %v9619_v18  ;;  %v9655_v17 = vld [vmem:[%s11794_s1 + $0x8b0] sm:$0xff]  }
 0x10f   : > { %v8051_v23 = vcombine.low %v1285_v19, %v1677_v22  ;;  %8967 = vmatprep.subr.bf16.mxu1 %v9629_v21  ;;  %v3118_v12 = vcombine.high %v3110_v9, %v3110_v9  ;;  %v9656_v19 = vld [vmem:[%s11794_s1 + $0x878] sm:$0xff]  }
 0x110   : > { %v9658_v21 = vld [vmem:[%s11794_s1 + $0x838] sm:$0xff]  }
 0x111   : > { %v3067_v24 = vrot.slane %v8051_v23, %v10123_v45  ;;  %v3140_v15 = vrot.slane %v3118_v12, %v10123_v45  ;;  %v9659_v22 = vld [vmem:[%s11794_s1 + $0x8b8] sm:$0xff]   ;;  %v3126_v23 = vrot.slane %v3110_v9, %v10123_v45 }
 0x113   : > { %v3069_v25 = vcombine.high %v3067_v24, %v3067_v24  ;;  %v3083_v26 = vrot.slane %v3067_v24, %v10123_v45  ;;  %v3150_v18 = vcombine.high %v3140_v15, %v3140_v15  ;;  %v9660_v24 = vld [vmem:[%s11794_s1 + $0x940] sm:$0xff]  }
 0x115   : > { %v3097_v29 = vrot.slane %v3069_v25, %v10123_v45  ;;  %v3099_v32 = vcombine.high %v3083_v26, %v3083_v26  ;;  %v9661_v25 = vld [vmem:[%s11794_s1 + $0x9c0] sm:$0xff]  }
 0x117   : > { %7030 = vmatprep.mubr.bf16.mxu0 %v3097_v29  ;;  %v3101_v39 = vcombine.high %v3097_v29, %v3097_v29 }
 0x118   : > { %7031 = vmatmul.mubr.bf16.vlgmr.msra.gmra.mrb[28].mxu0 %v3083_v26  ;;  %v9662_v26 = vld [vmem:[%s11794_s1 + $0x900] sm:$0xff]  }
 0x119   : > { %7070 = vmatprep.mubr.bf16.mxu1 %v3101_v39  ;;  %8946 = vmatpush3.bf16.msra.mxu0 %v9630_v27  ;;  %v9666_v39 = vld [vmem:[%s11794_s1 + $0x908] sm:$0xff]  }
 0x11a   : > { %7071 = vmatmul.mubr.bf16.vlgmr.msra.gmra.mrb[28].mxu1 %v3099_v32  ;;  %8947 = vmatprep.subr.bf16.mxu0 %v9632_v34  ;;  %v9665_v32 = vld [vmem:[%s11794_s1 + $0x9c8] sm:$0xff]  }
 0x11b   : > { %8968 = vmatpush3.bf16.msra.mxu1 %v9631_v30  ;;  %7110 = vmatprep.mubr.bf16.mxu0 %v3140_v15  ;;  %v3148_v30 = vcombine.high %v3126_v23, %v3126_v23  ;;  %v744_v15 = vshrl.u32 %v7992_v0, 16 }
 0x11c   : > { %8969 = vmatprep.subr.bf16.mxu1 %v9633_v35  ;;  %7150 = vmatprep.mubr.bf16.mxu1 %v3150_v18 }
 0x11d   : > { %8948 = vmatpush3.bf16.msra.mxu0 %v9634_v42 }
 0x11e   : > { %8949 = vmatprep.subr.bf16.mxu0 %v9636_v49  ;;  %v9669_v49 = vld [vmem:[%s11794_s1 + $0x9d0] sm:$0xff]  }
 0x11f   : > { %8970 = vmatpush3.bf16.msra.mxu1 %v9635_v48 }
 0x121   : > { %v8653_v28 = vpop.f32.mrb[4].mxu0  ;;  %8950 = vmatpush3.bf16.msra.mxu0 %v9638_v52  ;;  %v9673_v52 = vld [vmem:[%s11794_s1 + $0x9d8] sm:$0xff]  }
 0x122   : > { %v8654_v31 = vpop.f32.mrb[5].mxu0  ;;  %8951 = vmatprep.subr.bf16.mxu0 %v9640_v53  ;;  %v9674_v53 = vld [vmem:[%s11794_s1 + $0x918] sm:$0xff]  }
 0x123   : > { %v8675_v36 = vpop.f32.mrb[4].mxu1  ;;  %v8655_v37 = vadd.f32 %v8654_v31, %v8653_v28  ;;  %v8656_v38 = vpop.f32.mrb[6].mxu0  ;;  %v9663_v28 = vld [vmem:[%s11794_s1 + $0x980] sm:$0xff]   ;;  %v9664_v31 = vld [vmem:[%s11794_s1 + $0x948] sm:$0xff]  }
 0x124   : > { %v8676_v40 = vpop.f32.mrb[5].mxu1  ;;  %v8657_v41 = vpop.f32.mrb[7].mxu0 }
 0x125   : > { %v6553_v43 = vadd.f32 %v8655_v37, %v10777_v46  ;;  %v8677_v44 = vadd.f32 %v8676_v40, %v8675_v36  ;;  %v8678_v47 = vpop.f32.mrb[6].mxu1  ;;  %v9637_v46 = vld [vmem:[%s11794_s1 + $0x8d0] sm:$0xff]   ;;  %8952 = vmatpush3.bf16.msra.mxu0 %v9642_v58 }
 0x126   : > { %v8679_v50 = vpop.f32.mrb[7].mxu1  ;;  %8971 = vmatprep.subr.bf16.mxu1 %v9637_v46  ;;  %8953 = vmatprep.subr.bf16.mxu0 %v9644_v1  ;;  %v9668_v47 = vld [vmem:[%s11794_s1 + $0x950] sm:$0xff]   ;;  %v7993_v1 = vcombine.high %v7890_v56, %v7890_v56 }
 0x127   : > { %v10916_v51 = vadd.f32 %v8677_v44, %v6553_v43  ;;  %8972 = vmatpush3.bf16.msra.mxu1 %v9639_v54  ;;  %v9667_v43 = vld [vmem:[%s11794_s1 + $0x988] sm:$0xff]   ;;  %v9670_v50 = vld [vmem:[%s11794_s1 + $0x910] sm:$0xff]   ;;  %v7888_v54 = vld [vmem:[%s10102_s6 + $0x20] sm:$0x33] }
 0x128   : > { %8973 = vmatprep.subr.bf16.mxu1 %v9641_v57  ;;  %v9671_v46 = vld [vmem:[%s11794_s1 + $0x990] sm:$0xff]   ;;  %v7891_v57 = vld [vmem:[%s10102_s6 + $0x38] sm:$0x33]  ;;  %v7988_v58 = vcombine.low %v7888_v54, %v7888_v54  ;;  %v7989_v59 = vcombine.high %v7888_v54, %v7888_v54 }
 0x129   : > { %8954 = vmatpush3.bf16.msra.mxu0 %v9646_v4  ;;  %v7995_v3 = vcombine.high %v7891_v57, %v7891_v57  ;;  %v9688_v54 = vld [vmem:[%s11794_s1 + $0x978] sm:$0xff]  }
 0x12a   : > { %8955 = vmatprep.subr.bf16.mxu0 %v9648_v7  ;;  %v716_v4 = vshrl.u32 %v7988_v58, 16  ;;  %v9678_v7 = vld [vmem:[%s11794_s1 + $0x920] sm:$0xff]   ;;  %v725_v9 = vshll.u32 %v7989_v59, 16 }
 0x12b   : > { %8974 = vmatpush3.bf16.msra.mxu1 %v9643_v62  ;;  %v7990_v62 = vcombine.low %v7889_v55, %v7889_v55 }
 0x12c   : > { %8975 = vmatprep.subr.bf16.mxu1 %v9645_v2  ;;  %v7994_v2 = vcombine.low %v7891_v57, %v7891_v57 }
 0x12d   : > { %8956 = vmatpush3.bf16.msra.mxu0 %v9650_v10  ;;  %v730_v10 = vshrl.u32 %v7990_v62, 16 }
 0x12e   : > { %8957 = vmatprep.subr.bf16.mxu0 %v9652_v13  ;;  %v737_v13 = vshrl.u32 %v7991_v63, 16 }
 0x12f   : > { %8976 = vmatpush3.bf16.msra.mxu1 %v9647_v5  ;;  %v718_v5 = vshll.u32 %v7988_v58, 16  ;;  %v9687_v58 = vld [vmem:[%s11794_s1 + $0x9b0] sm:$0xff]  }
 0x130   : > { %8977 = vmatprep.subr.bf16.mxu1 %v9649_v8  ;;  %v723_v8 = vshrl.u32 %v7989_v59, 16  ;;  %v9689_v59 = vld [vmem:[%s11794_s1 + $0x9f8] sm:$0xff]  }
 0x131   : > { %8958 = vmatpush3.bf16.msra.mxu0 %v9654_v16  ;;  %v720_v12 = vrot.slane %v718_v5, 1  ;;  %v9679_v16 = vld [vmem:[%s11794_s1 + $0x9a0] sm:$0xff]  }
 0x132   : > { %8959 = vmatprep.subr.bf16.mxu0 %v9656_v19  ;;  %v746_v19 = vshll.u32 %v7992_v0, 16  ;;  %v9700_v0 = vld [vmem:[%s11794_s1 + $0xa40] sm:$0xff]  }
 0x133   : > { %8978 = vmatpush3.bf16.msra.mxu1 %v9651_v11  ;;  %v732_v11 = vshll.u32 %v7990_v62, 16 }
 0x134   : > { %8979 = vmatprep.subr.bf16.mxu1 %v9653_v14  ;;  %v739_v14 = vshll.u32 %v7991_v63, 16 }
 0x135   : > { %8960 = vmatpush3.bf16.msra.mxu0 %v9658_v21  ;;  %v734_v18 = vrot.slane %v732_v11, 1  ;;  %v9680_v21 = vld [vmem:[%s11794_s1 + $0x968] sm:$0xff]  }
 0x136   : > { %8989 = vmatprep.subr.bf16.mxu0 %v9660_v24  ;;  %v753_v24 = vshll.u32 %v7993_v1, 16 }
 0x137   : > { %8980 = vmatpush3.bf16.msra.mxu1 %v9655_v17  ;;  %v727_v17 = vrot.slane %v725_v9, 1 }
 0x138   : > { %8981 = vmatprep.subr.bf16.mxu1 %v9657_v20  ;;  %7111 = vmatmul.mubr.bf16.vlgmr.msra.gmra.mrb[32].mxu0 %v3126_v23  ;;  %v751_v20 = vshrl.u32 %v7993_v1, 16  ;;  %v741_v23 = vrot.slane %v739_v14, 1  ;;  %v9691_v1 = vld [vmem:[%s11794_s1 + $0x9b8] sm:$0xff]  }
 0x139   : > { %8990 = vmatpush3.bf16.msra.mxu0 %v9662_v26  ;;  %v728_v26 = vor.u32 %v727_v17, %v723_v8  ;;  %v9702_v8 = vld [vmem:[%s11794_s1 + $0xa00] sm:$0xff]  }
 0x13a   : > { %8991 = vmatprep.subr.bf16.mxu0 %v9664_v31  ;;  %v742_v31 = vor.u32 %v741_v23, %v737_v13  ;;  %v9704_v13 = vld [vmem:[%s11794_s1 + $0xa48] sm:$0xff]  }
 0x13b   : > { %8982 = vmatpush3.bf16.msra.mxu1 %v9659_v22  ;;  %v721_v22 = vor.u32 %v720_v12, %v716_v4  ;;  %v9707_v23 = vld [vmem:[%s11794_s1 + $0xa88] sm:$0xff]  }
 0x13c   : > { %9011 = vmatprep.subr.bf16.mxu1 %v9661_v25  ;;  %v758_v25 = vshrl.u32 %v7994_v2, 16 }
 0x13d   : > { %8992 = vmatpush3.bf16.msra.mxu0 %v9666_v39  ;;  %v1289_v39 = vcombine.low %v721_v22, %v728_v26 }
 0x13e   : > { %7151 = vmatmul.mubr.bf16.vlgmr.msra.gmra.mrb[32].mxu1 %v3148_v30  ;;  %8993 = vmatprep.subr.bf16.mxu0 %v9668_v47  ;;  %v9681_v30 = vld [vmem:[%s11794_s1 + $0x9e8] sm:$0xff]  }
 0x13f   : > { %9012 = vmatpush3.bf16.msra.mxu1 %v9663_v28  ;;  %v748_v28 = vrot.slane %v746_v19, 1  ;;  %v9705_v19 = vld [vmem:[%s11794_s1 + $0xac8] sm:$0xff]  }
 0x140   : > { %9013 = vmatprep.subr.bf16.mxu1 %v9665_v32  ;;  %v755_v32 = vrot.slane %v753_v24, 1  ;;  %v9708_v24 = vld [vmem:[%s11794_s1 + $0xa50] sm:$0xff]  }
 0x141   : > { %v8697_v27 = vpop.f32.mrb[8].mxu0  ;;  %8994 = vmatpush3.bf16.msra.mxu0 %v9670_v50  ;;  %v9685_v50 = vld [vmem:[%s11794_s1 + $0x9f0] sm:$0xff]  }
 0x142   : > { %v8698_v29 = vpop.f32.mrb[9].mxu0 }
 0x143   : > { %v8719_v34 = vpop.f32.mrb[8].mxu1  ;;  %v8699_v35 = vadd.f32 %v8698_v29, %v8697_v27  ;;  %v8700_v36 = vpop.f32.mrb[10].mxu0  ;;  %9014 = vmatpush3.bf16.msra.mxu1 %v9667_v43  ;;  %v735_v27 = vor.u32 %v734_v18, %v730_v10  ;;  %v760_v29 = vshll.u32 %v7994_v2, 16  ;;  %v9703_v10 = vld [vmem:[%s11794_s1 + $0xa80] sm:$0xff]  }
 0x144   : > { %v8720_v37 = vpop.f32.mrb[9].mxu1  ;;  %v8701_v38 = vpop.f32.mrb[11].mxu0  ;;  %9015 = vmatprep.subr.bf16.mxu1 %v9669_v49  ;;  %v9682_v36 = vld [vmem:[%s11794_s1 + $0x928] sm:$0xff]   ;;  %v1311_v49 = vrot.slane %v1289_v39, %v10123_v45 }
 0x145   : > { %v6633_v40 = vadd.f32 %v8699_v35, %v10916_v51  ;;  %v8721_v41 = vadd.f32 %v8720_v37, %v8719_v34  ;;  %v8722_v42 = vpop.f32.mrb[10].mxu1  ;;  %v9672_v51 = vld [vmem:[%s11794_s1 + $0x958] sm:$0xff]   ;;  %v765_v34 = vshrl.u32 %v7995_v3, 16  ;;  %v767_v35 = vshll.u32 %v7995_v3, 16  ;;  %v9701_v3 = vld [vmem:[%s11794_s1 + $0xac0] sm:$0xff]  }
 0x146   : > { %v8723_v44 = vpop.f32.mrb[11].mxu1  ;;  %8995 = vmatprep.subr.bf16.mxu0 %v9672_v51  ;;  %v749_v37 = vor.u32 %v748_v28, %v744_v15  ;;  %v762_v38 = vrot.slane %v760_v29, 1  ;;  %v1290_v43 = vcombine.low %v735_v27, %v742_v31  ;;  %v9709_v28 = vld [vmem:[%s11794_s1 + $0xad0] sm:$0xff]  }
 0x147   : > { %v11021_v48 = vadd.f32 %v8721_v41, %v6633_v40  ;;  %9016 = vmatpush3.bf16.msra.mxu1 %v9671_v46  ;;  %8996 = vmatpush3.bf16.msra.mxu0 %v9674_v53  ;;  %v9684_v40 = vld [vmem:[%s11794_s1 + $0x970] sm:$0xff]   ;;  %v756_v41 = vor.u32 %v755_v32, %v751_v20  ;;  %v769_v42 = vrot.slane %v767_v35, 1  ;;  %v9683_v44 = vld [vmem:[%s11794_s1 + $0x9a8] sm:$0xff]   ;;  %v9712_v32 = vld [vmem:[%s11794_s1 + $0xa58] sm:$0xff]  }
 0x148   : > { %9017 = vmatprep.subr.bf16.mxu1 %v9673_v52  ;;  %8997 = vmatprep.subr.bf16.mxu0 %v9676_v61  ;;  %v763_v47 = vor.u32 %v762_v38, %v758_v25  ;;  %v1318_v51 = vrot.slane %v1290_v43, %v10123_v45  ;;  %v9686_v53 = vld [vmem:[%s11794_s1 + $0x930] sm:$0xff]   ;;  %v9690_v61 = vld [vmem:[%s11794_s1 + $0x938] sm:$0xff]   ;;  %v9706_v20 = vld [vmem:[%s11794_s1 + $0xa08] sm:$0xff]  }
 0x149   : > { %v770_v46 = vor.u32 %v769_v42, %v765_v34  ;;  %v1681_v52 = vcombine.low %v749_v37, %v756_v41  ;;  %v9710_v31 = vld [vmem:[%s11794_s1 + $0xa10] sm:$0xff]   ;;  %v7892_v34 = vld [vmem:[%s10102_s6 + $0x20] sm:$0x22]  ;;  %v7893_v35 = vld [vmem:[%s10102_s6 + $0x28] sm:$0x22] }
 0x14a   : > { %v1320_v55 = vcombine.low %v1311_v49, %v1318_v51  ;;  %v7894_v37 = vld [vmem:[%s10102_s6 + $0x30] sm:$0x22]  ;;  %v7895_v38 = vld [vmem:[%s10102_s6 + $0x38] sm:$0x22]  ;;  %v7996_v39 = vcombine.low %v7892_v34, %v7892_v34  ;;  %v7998_v41 = vcombine.low %v7893_v35, %v7893_v35  ;;  %v7999_v42 = vcombine.high %v7893_v35, %v7893_v35 }
 0x14b   : > { %9018 = vmatpush3.bf16.msra.mxu1 %v9675_v60  ;;  %8998 = vmatpush3.bf16.msra.mxu0 %v9678_v7  ;;  %v1682_v56 = vcombine.low %v763_v47, %v770_v46  ;;  %v1703_v57 = vrot.slane %v1681_v52, %v10123_v45  ;;  %v9714_v43 = vld [vmem:[%s11794_s1 + $0xa18] sm:$0xff]   ;;  %v8001_v47 = vcombine.high %v7894_v37, %v7894_v37 }
 0x14c   : > { %9019 = vmatprep.subr.bf16.mxu1 %v9677_v6  ;;  %8999 = vmatprep.subr.bf16.mxu0 %v9680_v21  ;;  %v1334_v62 = vrot.slane %v1320_v55, %v10123_v45  ;;  %v8002_v49 = vcombine.low %v7895_v38, %v7895_v38  ;;  %v791_v46 = vrot.slane %v7996_v39, 1  ;;  %v793_v52 = vrot.slane %v7998_v41, 1  ;;  %v9716_v55 = vld [vmem:[%s11794_s1 + $0xa60] sm:$0xff]   ;;  %v9746_v39 = vld [vmem:[%s11794_s1 + $0xb08] sm:$0xff]  }
 0x14d   : > { %v1710_v60 = vrot.slane %v1682_v56, %v10123_v45 }
 0x14f   : > { %9020 = vmatpush3.bf16.msra.mxu1 %v9679_v16  ;;  %9000 = vmatpush3.bf16.msra.mxu0 %v9682_v36  ;;  %v1712_v63 = vcombine.low %v1703_v57, %v1710_v60  ;;  %v9713_v36 = vld [vmem:[%s11794_s1 + $0xad8] sm:$0xff]   ;;  %v796_v57 = vrot.slane %v8001_v47, 1  ;;  %v9747_v47 = vld [vmem:[%s11794_s1 + $0xb88] sm:$0xff]  }
 0x150   : > { %9021 = vmatprep.subr.bf16.mxu1 %v9681_v30  ;;  %9001 = vmatprep.subr.bf16.mxu0 %v9684_v40  ;;  %v7997_v40 = vcombine.high %v7892_v34, %v7892_v34 }
 0x151   : > { %v1726_v2 = vrot.slane %v1712_v63, %v10123_v45 }
 0x152   : > { %v792_v51 = vrot.slane %v7997_v40, 1 }
 0x153   : > { %9022 = vmatpush3.bf16.msra.mxu1 %v9683_v44  ;;  %9002 = vmatpush3.bf16.msra.mxu0 %v9686_v53  ;;  %v8053_v4 = vcombine.low %v1334_v62, %v1726_v2  ;;  %v8000_v44 = vcombine.low %v7894_v37, %v7894_v37  ;;  %v794_v53 = vrot.slane %v7999_v42, 1  ;;  %v9717_v62 = vld [vmem:[%s11794_s1 + $0xae0] sm:$0xff]  }
 0x154   : > { %9023 = vmatprep.subr.bf16.mxu1 %v9685_v50  ;;  %9003 = vmatprep.subr.bf16.mxu0 %v9688_v54  ;;  %v8003_v50 = vcombine.high %v7895_v38, %v7895_v38  ;;  %v9715_v54 = vld [vmem:[%s11794_s1 + $0xa98] sm:$0xff]   ;;  %v1336_v60 = vcombine.low %v791_v46, %v792_v51  ;;  %v9745_v38 = vld [vmem:[%s11794_s1 + $0xbc8] sm:$0xff]   ;;  %v9748_v51 = vld [vmem:[%s11794_s1 + $0xb50] sm:$0xff]  }
 0x155   : > { %v3117_v5 = vrot.slane %v8053_v4, %v10123_v45  ;;  %v795_v56 = vrot.slane %v8000_v44, 1  ;;  %v9719_v4 = vld [vmem:[%s11794_s1 + $0xaa0] sm:$0xff]  }
 0x156   : > { %v1346_v2 = vrot.slane %v1336_v60, %v10123_v45  ;;  %v7897_v60 = vld [vmem:[%s10102_s6 + $0x28] sm:$0x66] }
 0x157   : > { %9024 = vmatpush3.bf16.msra.mxu1 %v9687_v58  ;;  %9004 = vmatpush3.bf16.msra.mxu0 %v9690_v61  ;;  %v3119_v6 = vcombine.high %v3117_v5, %v3117_v5  ;;  %v3133_v7 = vrot.slane %v3117_v5, %v10123_v45  ;;  %v797_v58 = vrot.slane %v8002_v49, 1  ;;  %v1337_v61 = vcombine.low %v793_v52, %v794_v53  ;;  %v9749_v53 = vld [vmem:[%s11794_s1 + $0xbd0] sm:$0xff]  }
 0x158   : > { %9025 = vmatprep.subr.bf16.mxu1 %v9689_v59  ;;  %9033 = vmatprep.subr.bf16.mxu0 %v9700_v0  ;;  %v798_v59 = vrot.slane %v8003_v50, 1  ;;  %v1728_v63 = vcombine.low %v795_v56, %v796_v57  ;;  %v9752_v56 = vld [vmem:[%s11794_s1 + $0xb58] sm:$0xff]  }
 0x159   : > { %v3147_v9 = vrot.slane %v3119_v6, %v10123_v45  ;;  %v3149_v12 = vcombine.high %v3133_v7, %v3133_v7  ;;  %v9753_v57 = vld [vmem:[%s11794_s1 + $0xbd8] sm:$0xff]  }
 0x15a   : > { %v1729_v0 = vcombine.low %v797_v58, %v798_v59  ;;  %v1738_v5 = vrot.slane %v1728_v63, %v10123_v45  ;;  %v9754_v58 = vld [vmem:[%s11794_s1 + $0xb18] sm:$0xff]   ;;  %v7896_v59 = vld [vmem:[%s10102_s6 + $0x20] sm:$0x66] }
 0x15b   : > { %9026 = vmatpush3.bf16.msra.mxu1 %v9691_v1  ;;  %7190 = vmatprep.mubr.bf16.mxu0 %v3147_v9  ;;  %v3151_v15 = vcombine.high %v3147_v9, %v3147_v9  ;;  %v9718_v1 = vld [vmem:[%s11794_s1 + $0xa20] sm:$0xff]   ;;  %v9721_v9 = vld [vmem:[%s11794_s1 + $0xae8] sm:$0xff]   ;;  %v7899_v63 = vld [vmem:[%s10102_s6 + $0x38] sm:$0x66] }
 0x15c   : > { %9055 = vmatprep.subr.bf16.mxu1 %v9701_v3  ;;  %7191 = vmatmul.mubr.bf16.vlgmr.msra.gmra.mrb[36].mxu0 %v3133_v7  ;;  %v1353_v3 = vrot.slane %v1337_v61, %v10123_v45  ;;  %v1745_v6 = vrot.slane %v1729_v0, %v10123_v45  ;;  %v9720_v7 = vld [vmem:[%s11794_s1 + $0xa68] sm:$0xff]   ;;  %v7898_v61 = vld [vmem:[%s10102_s6 + $0x30] sm:$0x66]  ;;  %v8004_v0 = vcombine.low %v7896_v59, %v7896_v59 }
 0x15d   : > { %7230 = vmatprep.mubr.bf16.mxu1 %v3151_v15  ;;  %9034 = vmatpush3.bf16.msra.mxu0 %v9702_v8  ;;  %v9724_v15 = vld [vmem:[%s11794_s1 + $0xa70] sm:$0xff]  }
 0x15e   : > { %7231 = vmatmul.mubr.bf16.vlgmr.msra.gmra.mrb[36].mxu1 %v3149_v12  ;;  %9035 = vmatprep.subr.bf16.mxu0 %v9704_v13  ;;  %v1368_v8 = vcombine.low %v1346_v2, %v1353_v3  ;;  %v9723_v13 = vld [vmem:[%s11794_s1 + $0xaa8] sm:$0xff]   ;;  %v8006_v2 = vcombine.low %v7897_v60, %v7897_v60  ;;  %v8007_v3 = vcombine.high %v7897_v60, %v7897_v60 }
 0x15f   : > { %9056 = vmatpush3.bf16.msra.mxu1 %v9703_v10  ;;  %v1760_v10 = vcombine.low %v1738_v5, %v1745_v6  ;;  %v8008_v5 = vcombine.low %v7898_v61, %v7898_v61  ;;  %v8009_v6 = vcombine.high %v7898_v61, %v7898_v61  ;;  %v9766_v61 = vld [vmem:[%s11794_s1 + $0xb30] sm:$0xff]  }
 0x160   : > { %9057 = vmatprep.subr.bf16.mxu1 %v9705_v19  ;;  %v1376_v12 = vrot.slane %v1368_v8, %v10123_v45  ;;  %v9727_v19 = vld [vmem:[%s11794_s1 + $0xab0] sm:$0xff]   ;;  %v8011_v8 = vcombine.high %v7899_v63, %v7899_v63 }
 0x161   : > { %9036 = vmatpush3.bf16.msra.mxu0 %v9706_v20 }
 0x162   : > { %v8741_v11 = vpop.f32.mrb[12].mxu0  ;;  %9037 = vmatprep.subr.bf16.mxu0 %v9708_v24  ;;  %v9730_v24 = vld [vmem:[%s11794_s1 + $0xa38] sm:$0xff]  }
 0x163   : > { %v8742_v14 = vpop.f32.mrb[13].mxu0  ;;  %9058 = vmatpush3.bf16.msra.mxu1 %v9707_v23 }
 0x164   : > { %v8763_v16 = vpop.f32.mrb[12].mxu1  ;;  %v8743_v17 = vadd.f32 %v8742_v14, %v8741_v11  ;;  %v8744_v18 = vpop.f32.mrb[14].mxu0  ;;  %9059 = vmatprep.subr.bf16.mxu1 %v9709_v28  ;;  %v9722_v11 = vld [vmem:[%s11794_s1 + $0xa28] sm:$0xff]   ;;  %v1768_v14 = vrot.slane %v1760_v10, %v10123_v45  ;;  %v9740_v28 = vld [vmem:[%s11794_s1 + $0xb40] sm:$0xff]  }
 0x165   : > { %v8764_v21 = vpop.f32.mrb[13].mxu1  ;;  %v8745_v22 = vpop.f32.mrb[15].mxu0  ;;  %9038 = vmatpush3.bf16.msra.mxu0 %v9710_v31  ;;  %v9726_v18 = vld [vmem:[%s11794_s1 + $0xa30] sm:$0xff]   ;;  %v9741_v31 = vld [vmem:[%s11794_s1 + $0xbc0] sm:$0xff]  }
 0x166   : > { %v6713_v25 = vadd.f32 %v8743_v17, %v11021_v48  ;;  %v8765_v26 = vadd.f32 %v8764_v21, %v8763_v16  ;;  %v8766_v27 = vpop.f32.mrb[14].mxu1  ;;  %v9711_v48 = vld [vmem:[%s11794_s1 + $0xa90] sm:$0xff]   ;;  %9039 = vmatprep.subr.bf16.mxu0 %v9712_v32  ;;  %v8054_v17 = vcombine.low %v1376_v12, %v1768_v14  ;;  %v9728_v21 = vld [vmem:[%s11794_s1 + $0xa78] sm:$0xff]   ;;  %v9743_v32 = vld [vmem:[%s11794_s1 + $0xb80] sm:$0xff]   ;;  %v823_v12 = vshll.u32 %v8004_v0, 16 }
 0x167   : > { %v8767_v29 = vpop.f32.mrb[15].mxu1  ;;  %9060 = vmatpush3.bf16.msra.mxu1 %v9711_v48  ;;  %v9725_v16 = vld [vmem:[%s11794_s1 + $0xaf0] sm:$0xff]   ;;  %v9729_v22 = vld [vmem:[%s11794_s1 + $0xaf8] sm:$0xff]   ;;  %v9742_v48 = vld [vmem:[%s11794_s1 + $0xb00] sm:$0xff]  }
 0x168   : > { %v11136_v30 = vadd.f32 %v8765_v26, %v6713_v25  ;;  %9061 = vmatprep.subr.bf16.mxu1 %v9713_v36  ;;  %v3160_v20 = vrot.slane %v8054_v17, %v10123_v45  ;;  %v9731_v25 = vld [vmem:[%s11794_s1 + $0xab8] sm:$0xff]   ;;  %v9744_v36 = vld [vmem:[%s11794_s1 + $0xb48] sm:$0xff]   ;;  %v9758_v10 = vld [vmem:[%s11794_s1 + $0xb20] sm:$0xff]   ;;  %v839_v17 = vshll.u32 %v8006_v2, 16 }
 0x169   : > { %9040 = vmatpush3.bf16.msra.mxu0 %v9714_v43 }
 0x16a   : > { %9041 = vmatprep.subr.bf16.mxu0 %v9716_v55  ;;  %v3168_v23 = vcombine.high %v3160_v20, %v3160_v20  ;;  %v3176_v27 = vrot.slane %v3160_v20, %v10123_v45  ;;  %v9751_v55 = vld [vmem:[%s11794_s1 + $0xb90] sm:$0xff]   ;;  %v9759_v20 = vld [vmem:[%s11794_s1 + $0xba0] sm:$0xff]  }
 0x16b   : > { %9062 = vmatpush3.bf16.msra.mxu1 %v9715_v54 }
 0x16c   : > { %9063 = vmatprep.subr.bf16.mxu1 %v9717_v62  ;;  %v3190_v26 = vrot.slane %v3168_v23, %v10123_v45  ;;  %v3198_v35 = vcombine.high %v3176_v27, %v3176_v27  ;;  %v9755_v62 = vld [vmem:[%s11794_s1 + $0xb98] sm:$0xff]  }
 0x16d   : > { %9042 = vmatpush3.bf16.msra.mxu0 %v9718_v1  ;;  %v8005_v1 = vcombine.high %v7896_v59, %v7896_v59 }
 0x16e   : > { %9043 = vmatprep.subr.bf16.mxu0 %v9720_v7  ;;  %7270 = vmatprep.mubr.bf16.mxu0 %v3190_v26  ;;  %v3200_v29 = vcombine.high %v3190_v26, %v3190_v26  ;;  %v8010_v7 = vcombine.low %v7899_v63, %v7899_v63  ;;  %v841_v26 = vrot.slane %v839_v17, 2 }
 0x16f   : > { %9064 = vmatpush3.bf16.msra.mxu1 %v9719_v4  ;;  %v9756_v4 = vld [vmem:[%s11794_s1 + $0xb60] sm:$0xff]   ;;  %v831_v14 = vshll.u32 %v8005_v1, 16 }
 0x170   : > { %9065 = vmatprep.subr.bf16.mxu1 %v9721_v9  ;;  %7310 = vmatprep.mubr.bf16.mxu1 %v3200_v29  ;;  %v9757_v9 = vld [vmem:[%s11794_s1 + $0xbe0] sm:$0xff]   ;;  %v9761_v29 = vld [vmem:[%s11794_s1 + $0xbe8] sm:$0xff]  }
 0x171   : > { %9044 = vmatpush3.bf16.msra.mxu0 %v9722_v11  ;;  %v820_v11 = vshrl.u32 %v8004_v0, 16  ;;  %v9768_v0 = vld [vmem:[%s11794_s1 + $0xb78] sm:$0xff]  }
 0x172   : > { %9045 = vmatprep.subr.bf16.mxu0 %v9724_v15  ;;  %v9760_v15 = vld [vmem:[%s11794_s1 + $0xb68] sm:$0xff]  }
 0x173   : > { %9066 = vmatpush3.bf16.msra.mxu1 %v9723_v13  ;;  %v828_v13 = vshrl.u32 %v8005_v1, 16 }
 0x174   : > { %9067 = vmatprep.subr.bf16.mxu1 %v9725_v16  ;;  %v836_v16 = vshrl.u32 %v8006_v2, 16 }
 0x175   : > { %9046 = vmatpush3.bf16.msra.mxu0 %v9726_v18  ;;  %v844_v18 = vshrl.u32 %v8007_v3, 16  ;;  %v830_v23 = vrot.slane %v828_v13, 1 }
 0x176   : > { %9047 = vmatprep.subr.bf16.mxu0 %v9728_v21  ;;  %v822_v21 = vrot.slane %v820_v11, 1  ;;  %v9780_v11 = vld [vmem:[%s11794_s1 + $0xc40] sm:$0xff]  }
 0x177   : > { %9068 = vmatpush3.bf16.msra.mxu1 %v9727_v19  ;;  %v847_v19 = vshll.u32 %v8007_v3, 16 }
 0x178   : > { %9069 = vmatprep.subr.bf16.mxu1 %v9729_v22  ;;  %v825_v22 = vrot.slane %v823_v12, 2  ;;  %v9771_v12 = vld [vmem:[%s11794_s1 + $0xbb8] sm:$0xff]  }
 0x179   : > { %9048 = vmatpush3.bf16.msra.mxu0 %v9730_v24  ;;  %v833_v24 = vrot.slane %v831_v14, 2 }
 0x17a   : > { %9077 = vmatprep.subr.bf16.mxu0 %v9740_v28  ;;  %v849_v28 = vrot.slane %v847_v19, 2 }
 0x17b   : > { %9070 = vmatpush3.bf16.msra.mxu1 %v9731_v25  ;;  %v838_v25 = vrot.slane %v836_v16, 1 }
 0x17c   : > { %7271 = vmatmul.mubr.bf16.vlgmr.msra.gmra.mrb[40].mxu0 %v3176_v27  ;;  %9099 = vmatprep.subr.bf16.mxu1 %v9741_v31  ;;  %v846_v27 = vrot.slane %v844_v18, 1  ;;  %v9762_v31 = vld [vmem:[%s11794_s1 + $0xb28] sm:$0xff]  }
 0x17d   : > { %9078 = vmatpush3.bf16.msra.mxu0 %v9742_v48  ;;  %v826_v48 = vor.u32 %v825_v22, %v822_v21  ;;  %v9782_v22 = vld [vmem:[%s11794_s1 + $0xc00] sm:$0xff]  }
 0x17e   : > { %7311 = vmatmul.mubr.bf16.vlgmr.msra.gmra.mrb[40].mxu1 %v3198_v35  ;;  %9079 = vmatprep.subr.bf16.mxu0 %v9744_v36  ;;  %v855_v35 = vshll.u32 %v8008_v5, 16  ;;  %v9764_v36 = vld [vmem:[%s11794_s1 + $0xb70] sm:$0xff]  }
 0x17f   : > { %9100 = vmatpush3.bf16.msra.mxu1 %v9743_v32  ;;  %v834_v32 = vor.u32 %v833_v24, %v830_v23 }
 0x180   : > { %9101 = vmatprep.subr.bf16.mxu1 %v9745_v38  ;;  %v850_v38 = vor.u32 %v849_v28, %v846_v27 }
 0x181   : > { %9080 = vmatpush3.bf16.msra.mxu0 %v9746_v39  ;;  %v860_v39 = vshrl.u32 %v8009_v6, 16 }
 0x182   : > { %v8785_v34 = vpop.f32.mrb[16].mxu0  ;;  %9081 = vmatprep.subr.bf16.mxu0 %v9748_v51  ;;  %v9763_v51 = vld [vmem:[%s11794_s1 + $0xba8] sm:$0xff]  }
 0x183   : > { %v8786_v37 = vpop.f32.mrb[17].mxu0  ;;  %9102 = vmatpush3.bf16.msra.mxu1 %v9747_v47  ;;  %v862_v47 = vrot.slane %v860_v39, 1  ;;  %v9786_v39 = vld [vmem:[%s11794_s1 + $0xc08] sm:$0xff]  }
 0x184   : > { %v8807_v40 = vpop.f32.mrb[16].mxu1  ;;  %v8787_v41 = vadd.f32 %v8786_v37, %v8785_v34  ;;  %v8788_v42 = vpop.f32.mrb[18].mxu0  ;;  %9103 = vmatprep.subr.bf16.mxu1 %v9749_v53  ;;  %v852_v34 = vshrl.u32 %v8008_v5, 16  ;;  %v842_v37 = vor.u32 %v841_v26, %v838_v25  ;;  %v9769_v5 = vld [vmem:[%s11794_s1 + $0xbf8] sm:$0xff]   ;;  %v9783_v25 = vld [vmem:[%s11794_s1 + $0xc80] sm:$0xff]   ;;  %v9784_v26 = vld [vmem:[%s11794_s1 + $0xc48] sm:$0xff]  }
 0x185   : > { %v8808_v43 = vpop.f32.mrb[17].mxu1  ;;  %v8789_v44 = vpop.f32.mrb[19].mxu0  ;;  %v857_v42 = vrot.slane %v855_v35, 2  ;;  %v9785_v35 = vld [vmem:[%s11794_s1 + $0xcc8] sm:$0xff]  }
 0x186   : > { %v6793_v49 = vadd.f32 %v8787_v41, %v11136_v30  ;;  %v8809_v50 = vadd.f32 %v8808_v43, %v8807_v40  ;;  %v8810_v46 = vpop.f32.mrb[18].mxu1  ;;  %v9750_v30 = vld [vmem:[%s11794_s1 + $0xb10] sm:$0xff]   ;;  %v863_v40 = vshll.u32 %v8009_v6, 16  ;;  %v854_v41 = vrot.slane %v852_v34, 1 }
 0x187   : > { %v8811_v52 = vpop.f32.mrb[19].mxu1  ;;  %9082 = vmatpush3.bf16.msra.mxu0 %v9750_v30  ;;  %9104 = vmatpush3.bf16.msra.mxu1 %v9751_v55  ;;  %v868_v43 = vshrl.u32 %v8010_v7, 16  ;;  %v871_v44 = vshll.u32 %v8010_v7, 16  ;;  %v879_v46 = vshll.u32 %v8011_v8, 16  ;;  %v1339_v60 = vcombine.low %v842_v37, %v850_v38 }
 0x188   : > { %v11248_v54 = vadd.f32 %v8809_v50, %v6793_v49  ;;  %9083 = vmatprep.subr.bf16.mxu0 %v9752_v56  ;;  %9105 = vmatprep.subr.bf16.mxu1 %v9753_v57  ;;  %v865_v49 = vrot.slane %v863_v40, 2  ;;  %v876_v50 = vshrl.u32 %v8011_v8, 16  ;;  %v9765_v52 = vld [vmem:[%s11794_s1 + $0xbf0] sm:$0xff]   ;;  %v858_v53 = vor.u32 %v857_v42, %v854_v41  ;;  %v9787_v41 = vld [vmem:[%s11794_s1 + $0xc88] sm:$0xff]  }
 0x189   : > { %v870_v30 = vrot.slane %v868_v43, 1  ;;  %v873_v55 = vrot.slane %v871_v44, 2  ;;  %v1338_v56 = vcombine.low %v826_v48, %v834_v32  ;;  %v881_v59 = vrot.slane %v879_v46, 2  ;;  %v9789_v43 = vld [vmem:[%s11794_s1 + $0xcd0] sm:$0xff]  }
 0x18a   : > { %v866_v57 = vor.u32 %v865_v49, %v862_v47  ;;  %v1367_v2 = vrot.slane %v1339_v60, %v10123_v45  ;;  %v9790_v44 = vld [vmem:[%s11794_s1 + $0xc10] sm:$0xff]   ;;  %v9792_v47 = vld [vmem:[%s11794_s1 + $0xc58] sm:$0xff]   ;;  %v9797_v60 = vld [vmem:[%s11794_s1 + $0xce0] sm:$0xff]  }
 0x18b   : > { %9084 = vmatpush3.bf16.msra.mxu0 %v9754_v58  ;;  %9106 = vmatpush3.bf16.msra.mxu1 %v9755_v62  ;;  %v878_v58 = vrot.slane %v876_v50, 1  ;;  %v874_v62 = vor.u32 %v873_v55, %v870_v30  ;;  %v1360_v63 = vrot.slane %v1338_v56, %v10123_v45  ;;  %v9791_v49 = vld [vmem:[%s11794_s1 + $0xc90] sm:$0xff]   ;;  %v8584_v46 = vld.sshfl [vmem:[%s10102_s6 + $0x38] sm:$0x5 pattern:$0x75316420] }
 0x18c   : > { %9085 = vmatprep.subr.bf16.mxu0 %v9756_v4  ;;  %9107 = vmatprep.subr.bf16.mxu1 %v9757_v9  ;;  %v1730_v3 = vcombine.low %v858_v53, %v866_v57  ;;  %v9767_v4 = vld [vmem:[%s11794_s1 + $0xbb0] sm:$0xff]   ;;  %v9770_v9 = vld [vmem:[%s11794_s1 + $0xb38] sm:$0xff]   ;;  %v8591_v53 = vld.sshfl [vmem:[%s10102_s6 + $0x40] sm:$0x5 pattern:$0x75316420] }
 0x18d   : > { %v882_v1 = vor.u32 %v881_v59, %v878_v58  ;;  %v1369_v6 = vcombine.low %v1360_v63, %v1367_v2  ;;  %v8583_v50 = vld.sshfl [vmem:[%s10102_s6 + $0x30] sm:$0x5 pattern:$0x75316420]  ;;  %v9795_v56 = vld [vmem:[%s11794_s1 + $0xc98] sm:$0xff]   ;;  %v9796_v59 = vld [vmem:[%s11794_s1 + $0xc60] sm:$0xff]  }
 0x18e   : > { %v1752_v8 = vrot.slane %v1730_v3, %v10123_v45  ;;  %v1417_v30 = vcombine.low %v8583_v50, %v8584_v46  ;;  %v8592_v55 = vld.sshfl [vmem:[%s10102_s6 + $0x48] sm:$0x5 pattern:$0x75316420]  ;;  %v9799_v63 = vld [vmem:[%s11794_s1 + $0xca0] sm:$0xff]  }
 0x18f   : > { %9086 = vmatpush3.bf16.msra.mxu0 %v9758_v10  ;;  %9108 = vmatpush3.bf16.msra.mxu1 %v9759_v20  ;;  %v1731_v7 = vcombine.low %v874_v62, %v882_v1  ;;  %v1383_v13 = vrot.slane %v1369_v6, %v10123_v45  ;;  %v1809_v58 = vcombine.low %v8591_v53, %v8592_v55  ;;  %v9798_v62 = vld [vmem:[%s11794_s1 + $0xc20] sm:$0xff]   ;;  %v9800_v1 = vld [vmem:[%s11794_s1 + $0xc68] sm:$0xff]   ;;  %v7905_v50 = vld [vmem:[%s10102_s6 + $0x38] sm:$0x33] }
 0x190   : > { %9087 = vmatprep.subr.bf16.mxu0 %v9760_v15  ;;  %9109 = vmatprep.subr.bf16.mxu1 %v9761_v29  ;;  %v9781_v15 = vld [vmem:[%s11794_s1 + $0xcc0] sm:$0xff]   ;;  %v1425_v57 = vrot.slane %v1417_v30, %v10123_v45  ;;  %v9801_v2 = vld [vmem:[%s11794_s1 + $0xce8] sm:$0xff]   ;;  %v9827_v30 = vld [vmem:[%s11794_s1 + $0xd98] sm:$0xff]  }
 0x191   : > { %v1759_v10 = vrot.slane %v1731_v7, %v10123_v45  ;;  %v9804_v7 = vld [vmem:[%s11794_s1 + $0xc70] sm:$0xff]   ;;  %v7906_v46 = vld [vmem:[%s10102_s6 + $0x40] sm:$0x33] }
 0x192   : > { %v9828_v55 = vld [vmem:[%s11794_s1 + $0xd60] sm:$0xff]  }
 0x193   : > { %9088 = vmatpush3.bf16.msra.mxu0 %v9762_v31  ;;  %9110 = vmatpush3.bf16.msra.mxu1 %v9763_v51  ;;  %v1761_v14 = vcombine.low %v1752_v8, %v1759_v10  ;;  %v9793_v51 = vld [vmem:[%s11794_s1 + $0xcd8] sm:$0xff]   ;;  %v9805_v8 = vld [vmem:[%s11794_s1 + $0xcf0] sm:$0xff]  }
 0x194   : > { %9089 = vmatprep.subr.bf16.mxu0 %v9764_v36  ;;  %9111 = vmatprep.subr.bf16.mxu1 %v9765_v52  ;;  %v9794_v52 = vld [vmem:[%s11794_s1 + $0xc18] sm:$0xff]   ;;  %v9806_v10 = vld [vmem:[%s11794_s1 + $0xc30] sm:$0xff]  }
 0x195   : > { %v1775_v16 = vrot.slane %v1761_v14, %v10123_v45  ;;  %v9809_v14 = vld [vmem:[%s11794_s1 + $0xcf8] sm:$0xff]  }
 0x197   : > { %9090 = vmatpush3.bf16.msra.mxu0 %v9766_v61  ;;  %9112 = vmatpush3.bf16.msra.mxu1 %v9767_v4  ;;  %v8055_v17 = vcombine.low %v1383_v13, %v1775_v16  ;;  %v1817_v61 = vrot.slane %v1809_v58, %v10123_v45  ;;  %v9802_v4 = vld [vmem:[%s11794_s1 + $0xc28] sm:$0xff]   ;;  %v9808_v13 = vld [vmem:[%s11794_s1 + $0xc78] sm:$0xff]   ;;  %v8024_v58 = vcombine.low %v7906_v46, %v7906_v46 }
 0x198   : > { %9091 = vmatprep.subr.bf16.mxu0 %v9768_v0  ;;  %9113 = vmatprep.subr.bf16.mxu1 %v9769_v5  ;;  %v9803_v5 = vld [vmem:[%s11794_s1 + $0xca8] sm:$0xff]   ;;  %v9811_v16 = vld [vmem:[%s11794_s1 + $0xcb8] sm:$0xff]  }
 0x199   : > { %v3167_v18 = vrot.slane %v8055_v17, %v10123_v45  ;;  %v8056_v0 = vcombine.low %v1425_v57, %v1817_v61  ;;  %v8023_v57 = vcombine.high %v7905_v50, %v7905_v50 }
 0x19b   : > { %9092 = vmatpush3.bf16.msra.mxu0 %v9770_v9  ;;  %9114 = vmatpush3.bf16.msra.mxu1 %v9771_v12  ;;  %v3169_v19 = vcombine.high %v3167_v18, %v3167_v18  ;;  %v3183_v20 = vrot.slane %v3167_v18, %v10123_v45  ;;  %v3210_v3 = vrot.slane %v8056_v0, %v10123_v45  ;;  %v9812_v18 = vld [vmem:[%s11794_s1 + $0xd40] sm:$0xff]  }
 0x19c   : > { %9121 = vmatprep.subr.bf16.mxu0 %v9780_v11  ;;  %9143 = vmatprep.subr.bf16.mxu1 %v9781_v15  ;;  %v9807_v11 = vld [vmem:[%s11794_s1 + $0xcb0] sm:$0xff]   ;;  %v9810_v15 = vld [vmem:[%s11794_s1 + $0xc38] sm:$0xff]   ;;  %v9829_v0 = vld [vmem:[%s11794_s1 + $0xde0] sm:$0xff]  }
 0x19d   : > { %v3197_v24 = vrot.slane %v3169_v19, %v10123_v45  ;;  %v3199_v31 = vcombine.high %v3183_v20, %v3183_v20  ;;  %v3218_v6 = vcombine.high %v3210_v3, %v3210_v3  ;;  %v3226_v17 = vrot.slane %v3210_v3, %v10123_v45  ;;  %v9813_v19 = vld [vmem:[%s11794_s1 + $0xdc0] sm:$0xff]  }
 0x19f   : > { %7350 = vmatprep.mubr.bf16.mxu0 %v3197_v24  ;;  %v3201_v34 = vcombine.high %v3197_v24, %v3197_v24  ;;  %v3240_v9 = vrot.slane %v3218_v6, %v10123_v45  ;;  %v9816_v24 = vld [vmem:[%s11794_s1 + $0xd48] sm:$0xff]  }
 0x1a0   : > { %7351 = vmatmul.mubr.bf16.vlgmr.msra.gmra.mrb[44].mxu0 %v3183_v20 }
 0x1a1   : > { %7390 = vmatprep.mubr.bf16.mxu1 %v3201_v34  ;;  %9122 = vmatpush3.bf16.msra.mxu0 %v9782_v22  ;;  %v3250_v12 = vcombine.high %v3240_v9, %v3240_v9 }
 0x1a2   : > { %v8829_v21 = vpop.f32.mrb[20].mxu0  ;;  %7391 = vmatmul.mubr.bf16.vlgmr.msra.gmra.mrb[44].mxu1 %v3199_v31  ;;  %9123 = vmatprep.subr.bf16.mxu0 %v9784_v26 }
 0x1a3   : > { %v8830_v23 = vpop.f32.mrb[21].mxu0  ;;  %9144 = vmatpush3.bf16.msra.mxu1 %v9783_v25  ;;  %7430 = vmatprep.mubr.bf16.mxu0 %v3240_v9  ;;  %v952_v9 = vshrl.u32 %v8024_v58, 16 }
 0x1a4   : > { %v8851_v27 = vpop.f32.mrb[20].mxu1  ;;  %v8831_v28 = vadd.f32 %v8830_v23, %v8829_v21  ;;  %v8832_v29 = vpop.f32.mrb[22].mxu0  ;;  %9145 = vmatprep.subr.bf16.mxu1 %v9785_v35  ;;  %7470 = vmatprep.mubr.bf16.mxu1 %v3250_v12  ;;  %v9814_v21 = vld [vmem:[%s11794_s1 + $0xd00] sm:$0xff]  }
 0x1a5   : > { %v8852_v48 = vpop.f32.mrb[21].mxu1  ;;  %v8833_v32 = vpop.f32.mrb[23].mxu0  ;;  %9124 = vmatpush3.bf16.msra.mxu0 %v9786_v39  ;;  %v9815_v23 = vld [vmem:[%s11794_s1 + $0xd80] sm:$0xff]   ;;  %v9817_v29 = vld [vmem:[%s11794_s1 + $0xdc8] sm:$0xff]  }
 0x1a6   : > { %v6873_v36 = vadd.f32 %v8831_v28, %v11248_v54  ;;  %v8853_v37 = vadd.f32 %v8852_v48, %v8851_v27  ;;  %v8854_v38 = vpop.f32.mrb[22].mxu1  ;;  %v9788_v54 = vld [vmem:[%s11794_s1 + $0xc50] sm:$0xff]   ;;  %v3248_v28 = vcombine.high %v3226_v17, %v3226_v17 }
 0x1a7   : > { %v8855_v40 = vpop.f32.mrb[23].mxu1  ;;  %9125 = vmatprep.subr.bf16.mxu0 %v9788_v54  ;;  %9146 = vmatpush3.bf16.msra.mxu1 %v9787_v41  ;;  %v9819_v38 = vld [vmem:[%s11794_s1 + $0xd88] sm:$0xff]   ;;  %v9821_v41 = vld [vmem:[%s11794_s1 + $0xdd0] sm:$0xff]  }
 0x1a8   : > { %v11357_v42 = vadd.f32 %v8853_v37, %v6873_v36  ;;  %9147 = vmatprep.subr.bf16.mxu1 %v9789_v43  ;;  %v9818_v36 = vld [vmem:[%s11794_s1 + $0xd08] sm:$0xff]   ;;  %v9820_v40 = vld [vmem:[%s11794_s1 + $0xd50] sm:$0xff]   ;;  %v9824_v43 = vld [vmem:[%s11794_s1 + $0xd58] sm:$0xff]  }
 0x1a9   : > { %9126 = vmatpush3.bf16.msra.mxu0 %v9790_v44  ;;  %v9822_v54 = vld [vmem:[%s11794_s1 + $0xd10] sm:$0xff]   ;;  %v9825_v44 = vld [vmem:[%s11794_s1 + $0xdd8] sm:$0xff]  }
 0x1aa   : > { %9127 = vmatprep.subr.bf16.mxu0 %v9792_v47  ;;  %v9826_v47 = vld [vmem:[%s11794_s1 + $0xd18] sm:$0xff]  }
 0x1ab   : > { %9148 = vmatpush3.bf16.msra.mxu1 %v9791_v49  ;;  %v7904_v49 = vld [vmem:[%s10102_s6 + $0x30] sm:$0x33] }
 0x1ac   : > { %9149 = vmatprep.subr.bf16.mxu1 %v9793_v51  ;;  %v7907_v51 = vld [vmem:[%s10102_s6 + $0x48] sm:$0x33]  ;;  %v8021_v53 = vcombine.high %v7904_v49, %v7904_v49 }
 0x1ad   : > { %9128 = vmatpush3.bf16.msra.mxu0 %v9794_v52  ;;  %v8020_v52 = vcombine.low %v7904_v49, %v7904_v49  ;;  %v8027_v61 = vcombine.high %v7907_v51, %v7907_v51  ;;  %v9840_v49 = vld [vmem:[%s11794_s1 + $0xd78] sm:$0xff]  }
 0x1ae   : > { %9129 = vmatprep.subr.bf16.mxu0 %v9796_v59  ;;  %v8025_v59 = vcombine.high %v7906_v46, %v7906_v46  ;;  %v933_v3 = vshll.u32 %v8021_v53, 16 }
 0x1af   : > { %9150 = vmatpush3.bf16.msra.mxu1 %v9795_v56  ;;  %v8022_v56 = vcombine.low %v7905_v50, %v7905_v50 }
 0x1b0   : > { %9151 = vmatprep.subr.bf16.mxu1 %v9797_v60  ;;  %v8026_v60 = vcombine.low %v7907_v51, %v7907_v51 }
 0x1b1   : > { %9130 = vmatpush3.bf16.msra.mxu0 %v9798_v62  ;;  %v924_v62 = vshrl.u32 %v8020_v52, 16 }
 0x1b2   : > { %9131 = vmatprep.subr.bf16.mxu0 %v9800_v1  ;;  %v9830_v1 = vld [vmem:[%s11794_s1 + $0xd20] sm:$0xff]  }
 0x1b3   : > { %9152 = vmatpush3.bf16.msra.mxu1 %v9799_v63  ;;  %v926_v63 = vshll.u32 %v8020_v52, 16  ;;  %v9839_v52 = vld [vmem:[%s11794_s1 + $0xdb0] sm:$0xff]  }
 0x1b4   : > { %9153 = vmatprep.subr.bf16.mxu1 %v9801_v2  ;;  %v931_v2 = vshrl.u32 %v8021_v53, 16  ;;  %v9841_v53 = vld [vmem:[%s11794_s1 + $0xdf8] sm:$0xff]  }
 0x1b5   : > { %9132 = vmatpush3.bf16.msra.mxu0 %v9802_v4  ;;  %v938_v4 = vshrl.u32 %v8022_v56, 16  ;;  %v928_v6 = vrot.slane %v926_v63, 1 }
 0x1b6   : > { %9133 = vmatprep.subr.bf16.mxu0 %v9804_v7  ;;  %v945_v7 = vshrl.u32 %v8023_v57, 16 }
 0x1b7   : > { %9154 = vmatpush3.bf16.msra.mxu1 %v9803_v5  ;;  %v940_v5 = vshll.u32 %v8022_v56, 16 }
 0x1b8   : > { %9155 = vmatprep.subr.bf16.mxu1 %v9805_v8  ;;  %v947_v8 = vshll.u32 %v8023_v57, 16 }
 0x1b9   : > { %9134 = vmatpush3.bf16.msra.mxu0 %v9806_v10  ;;  %v9831_v10 = vld [vmem:[%s11794_s1 + $0xda0] sm:$0xff]   ;;  %v942_v12 = vrot.slane %v940_v5, 1  ;;  %v9856_v5 = vld [vmem:[%s11794_s1 + $0xe48] sm:$0xff]  }
 0x1ba   : > { %9135 = vmatprep.subr.bf16.mxu0 %v9808_v13  ;;  %v954_v13 = vshll.u32 %v8024_v58, 16  ;;  %v9852_v58 = vld [vmem:[%s11794_s1 + $0xe40] sm:$0xff]  }
 0x1bb   : > { %9156 = vmatpush3.bf16.msra.mxu1 %v9807_v11  ;;  %v935_v11 = vrot.slane %v933_v3, 1 }
 0x1bc   : > { %9157 = vmatprep.subr.bf16.mxu1 %v9809_v14  ;;  %v959_v14 = vshrl.u32 %v8025_v59, 16 }
 0x1bd   : > { %9136 = vmatpush3.bf16.msra.mxu0 %v9810_v15  ;;  %v9832_v15 = vld [vmem:[%s11794_s1 + $0xd68] sm:$0xff]  }
 0x1be   : > { %9165 = vmatprep.subr.bf16.mxu0 %v9812_v18  ;;  %v961_v18 = vshll.u32 %v8025_v59, 16  ;;  %v9843_v59 = vld [vmem:[%s11794_s1 + $0xdb8] sm:$0xff]  }
 0x1bf   : > { %9158 = vmatpush3.bf16.msra.mxu1 %v9811_v16  ;;  %v929_v16 = vor.u32 %v928_v6, %v924_v62 }
 0x1c0   : > { %7431 = vmatmul.mubr.bf16.vlgmr.msra.gmra.mrb[48].mxu0 %v3226_v17  ;;  %9187 = vmatprep.subr.bf16.mxu1 %v9813_v19  ;;  %v949_v17 = vrot.slane %v947_v8, 1  ;;  %v966_v19 = vshrl.u32 %v8026_v60, 16 }
 0x1c1   : > { %9166 = vmatpush3.bf16.msra.mxu0 %v9814_v21  ;;  %v943_v21 = vor.u32 %v942_v12, %v938_v4  ;;  %v9855_v12 = vld [vmem:[%s11794_s1 + $0xe80] sm:$0xff]  }
 0x1c2   : > { %v8873_v20 = vpop.f32.mrb[24].mxu0  ;;  %7471 = vmatmul.mubr.bf16.vlgmr.msra.gmra.mrb[48].mxu1 %v3248_v28  ;;  %9167 = vmatprep.subr.bf16.mxu0 %v9816_v24  ;;  %v9833_v24 = vld [vmem:[%s11794_s1 + $0xde8] sm:$0xff]   ;;  %v975_v28 = vshll.u32 %v8027_v61, 16 }
 0x1c3   : > { %v8874_v22 = vpop.f32.mrb[25].mxu0  ;;  %9188 = vmatpush3.bf16.msra.mxu1 %v9815_v23  ;;  %v968_v23 = vshll.u32 %v8026_v60, 16 }
 0x1c4   : > { %v8895_v25 = vpop.f32.mrb[24].mxu1  ;;  %v8875_v26 = vadd.f32 %v8874_v22, %v8873_v20  ;;  %v8876_v27 = vpop.f32.mrb[26].mxu0  ;;  %9189 = vmatprep.subr.bf16.mxu1 %v9817_v29  ;;  %v936_v20 = vor.u32 %v935_v11, %v931_v2  ;;  %v956_v22 = vrot.slane %v954_v13, 1  ;;  %v9834_v29 = vld [vmem:[%s11794_s1 + $0xd28] sm:$0xff]   ;;  %v9854_v2 = vld [vmem:[%s11794_s1 + $0xe00] sm:$0xff]  }
 0x1c5   : > { %v8896_v31 = vpop.f32.mrb[25].mxu1  ;;  %v8877_v35 = vpop.f32.mrb[27].mxu0  ;;  %9168 = vmatpush3.bf16.msra.mxu0 %v9818_v36  ;;  %v973_v27 = vshrl.u32 %v8027_v61, 16  ;;  %v977_v36 = vrot.slane %v975_v28, 1  ;;  %v9853_v61 = vld [vmem:[%s11794_s1 + $0xec0] sm:$0xff]   ;;  %v9857_v13 = vld [vmem:[%s11794_s1 + $0xec8] sm:$0xff]  }
 0x1c6   : > { %v6953_v48 = vadd.f32 %v8875_v26, %v11357_v42  ;;  %v8897_v32 = vadd.f32 %v8896_v31, %v8895_v25  ;;  %v8898_v34 = vpop.f32.mrb[26].mxu1  ;;  %v9823_v42 = vld [vmem:[%s11794_s1 + $0xd90] sm:$0xff]   ;;  %9169 = vmatprep.subr.bf16.mxu0 %v9820_v40  ;;  %v950_v25 = vor.u32 %v949_v17, %v945_v7  ;;  %v963_v26 = vrot.slane %v961_v18, 1  ;;  %v7909_v28 = vld [vmem:[%s10102_s6 + $0x38] sm:$0x22] }
 0x1c7   : > { %v8899_v37 = vpop.f32.mrb[27].mxu1  ;;  %9190 = vmatpush3.bf16.msra.mxu1 %v9819_v38  ;;  %v957_v31 = vor.u32 %v956_v22, %v952_v9  ;;  %v9836_v34 = vld [vmem:[%s11794_s1 + $0xd70] sm:$0xff]   ;;  %v9835_v38 = vld [vmem:[%s11794_s1 + $0xda8] sm:$0xff]  }
 0x1c8   : > { %v11462_v39 = vadd.f32 %v8897_v32, %v6953_v48  ;;  %9191 = vmatprep.subr.bf16.mxu1 %v9821_v41  ;;  %v970_v48 = vrot.slane %v968_v23, 1  ;;  %v1387_v32 = vcombine.low %v929_v16, %v936_v20  ;;  %v964_v35 = vor.u32 %v963_v26, %v959_v14  ;;  %v9858_v16 = vld [vmem:[%s11794_s1 + $0xe08] sm:$0xff]   ;;  %v9861_v23 = vld [vmem:[%s11794_s1 + $0xed0] sm:$0xff]   ;;  %v9864_v26 = vld [vmem:[%s11794_s1 + $0xe58] sm:$0xff]  }
 0x1c9   : > { %9170 = vmatpush3.bf16.msra.mxu0 %v9822_v54  ;;  %v1388_v37 = vcombine.low %v943_v21, %v950_v25  ;;  %v9837_v54 = vld [vmem:[%s11794_s1 + $0xdf0] sm:$0xff]   ;;  %v9859_v20 = vld [vmem:[%s11794_s1 + $0xe88] sm:$0xff]  }
 0x1ca   : > { %9171 = vmatprep.subr.bf16.mxu0 %v9824_v43  ;;  %v971_v40 = vor.u32 %v970_v48, %v966_v19  ;;  %v1409_v41 = vrot.slane %v1387_v32, %v10123_v45  ;;  %v9860_v21 = vld [vmem:[%s11794_s1 + $0xe50] sm:$0xff]   ;;  %v7911_v48 = vld [vmem:[%s10102_s6 + $0x48] sm:$0x22] }
 0x1cb   : > { %9192 = vmatpush3.bf16.msra.mxu1 %v9823_v42  ;;  %v978_v42 = vor.u32 %v977_v36, %v973_v27  ;;  %v1416_v43 = vrot.slane %v1388_v37, %v10123_v45  ;;  %v9863_v25 = vld [vmem:[%s11794_s1 + $0xe90] sm:$0xff]   ;;  %v8031_v36 = vcombine.high %v7909_v28, %v7909_v28  ;;  %v9866_v37 = vld [vmem:[%s11794_s1 + $0xe18] sm:$0xff]  }
 0x1cc   : > { %9193 = vmatprep.subr.bf16.mxu1 %v9825_v44  ;;  %v1779_v44 = vcombine.low %v957_v31, %v964_v35  ;;  %v7908_v27 = vld [vmem:[%s10102_s6 + $0x30] sm:$0x22]  ;;  %v7910_v31 = vld [vmem:[%s10102_s6 + $0x40] sm:$0x22]  ;;  %v8030_v35 = vcombine.low %v7909_v28, %v7909_v28 }
 0x1cd   : > { %9172 = vmatpush3.bf16.msra.mxu0 %v9826_v47  ;;  %v9838_v47 = vld [vmem:[%s11794_s1 + $0xd30] sm:$0xff]   ;;  %v1418_v50 = vcombine.low %v1409_v41, %v1416_v43  ;;  %v1780_v46 = vcombine.low %v971_v40, %v978_v42  ;;  %v8028_v32 = vcombine.low %v7908_v27, %v7908_v27  ;;  %v8033_v40 = vcombine.high %v7910_v31, %v7910_v31 }
 0x1ce   : > { %9173 = vmatprep.subr.bf16.mxu0 %v9828_v55  ;;  %v1801_v51 = vrot.slane %v1779_v44, %v10123_v45  ;;  %v9842_v55 = vld [vmem:[%s11794_s1 + $0xd38] sm:$0xff]   ;;  %v8034_v41 = vcombine.low %v7911_v48, %v7911_v48  ;;  %v1001_v44 = vrot.slane %v8030_v35, 1 }
 0x1cf   : > { %9194 = vmatpush3.bf16.msra.mxu1 %v9827_v30  ;;  %v1808_v30 = vrot.slane %v1780_v46, %v10123_v45  ;;  %v1432_v56 = vrot.slane %v1418_v50, %v10123_v45  ;;  %v999_v42 = vrot.slane %v8028_v32, 1  ;;  %v9868_v50 = vld [vmem:[%s11794_s1 + $0xe60] sm:$0xff]  }
 0x1d0   : > { %9195 = vmatprep.subr.bf16.mxu1 %v9829_v0 }
 0x1d1   : > { %9174 = vmatpush3.bf16.msra.mxu0 %v9830_v1  ;;  %v1810_v57 = vcombine.low %v1801_v51, %v1808_v30  ;;  %v1004_v51 = vrot.slane %v8033_v40, 1 }
 0x1d2   : > { %9175 = vmatprep.subr.bf16.mxu0 %v9832_v15 }
 0x1d3   : > { %9196 = vmatpush3.bf16.msra.mxu1 %v9831_v10  ;;  %v1824_v60 = vrot.slane %v1810_v57, %v10123_v45 }
 0x1d4   : > { %9197 = vmatprep.subr.bf16.mxu1 %v9833_v24  ;;  %v9862_v24 = vld [vmem:[%s11794_s1 + $0xe10] sm:$0xff]  }
 0x1d5   : > { %9176 = vmatpush3.bf16.msra.mxu0 %v9834_v29  ;;  %v8057_v62 = vcombine.low %v1432_v56, %v1824_v60  ;;  %v9865_v29 = vld [vmem:[%s11794_s1 + $0xed8] sm:$0xff]   ;;  %v9869_v56 = vld [vmem:[%s11794_s1 + $0xee0] sm:$0xff]  }
 0x1d6   : > { %9177 = vmatprep.subr.bf16.mxu0 %v9836_v34  ;;  %v8029_v34 = vcombine.high %v7908_v27, %v7908_v27  ;;  %v9895_v27 = vld [vmem:[%s11794_s1 + $0xf80] sm:$0xff]  }
 0x1d7   : > { %9198 = vmatpush3.bf16.msra.mxu1 %v9835_v38  ;;  %v3217_v63 = vrot.slane %v8057_v62, %v10123_v45  ;;  %v8032_v38 = vcombine.low %v7910_v31, %v7910_v31  ;;  %v9871_v62 = vld [vmem:[%s11794_s1 + $0xea0] sm:$0xff]   ;;  %v9896_v31 = vld [vmem:[%s11794_s1 + $0xf48] sm:$0xff]  }
 0x1d8   : > { %9199 = vmatprep.subr.bf16.mxu1 %v9837_v54  ;;  %v8035_v54 = vcombine.high %v7911_v48, %v7911_v48  ;;  %v1000_v43 = vrot.slane %v8029_v34, 1  ;;  %v9897_v48 = vld [vmem:[%s11794_s1 + $0xfc8] sm:$0xff]  }
 0x1d9   : > { %9178 = vmatpush3.bf16.msra.mxu0 %v9838_v47  ;;  %v3219_v0 = vcombine.high %v3217_v63, %v3217_v63  ;;  %v3233_v1 = vrot.slane %v3217_v63, %v10123_v45  ;;  %v1002_v47 = vrot.slane %v8031_v36, 1  ;;  %v1003_v46 = vrot.slane %v8032_v38, 1  ;;  %v9898_v38 = vld [vmem:[%s11794_s1 + $0xf08] sm:$0xff]  }
 0x1da   : > { %9179 = vmatprep.subr.bf16.mxu0 %v9840_v49  ;;  %v9867_v49 = vld [vmem:[%s11794_s1 + $0xe98] sm:$0xff]   ;;  %v1434_v30 = vcombine.low %v999_v42, %v1000_v43  ;;  %v9899_v42 = vld [vmem:[%s11794_s1 + $0xf88] sm:$0xff]  }
 0x1db   : > { %9200 = vmatpush3.bf16.msra.mxu1 %v9839_v52  ;;  %v3247_v4 = vrot.slane %v3219_v0, %v10123_v45  ;;  %v3249_v7 = vcombine.high %v3233_v1, %v3233_v1  ;;  %v1005_v52 = vrot.slane %v8034_v41, 1  ;;  %v1826_v57 = vcombine.low %v1003_v46, %v1004_v51  ;;  %v9904_v46 = vld [vmem:[%s11794_s1 + $0xf58] sm:$0xff]  }
 0x1dc   : > { %9201 = vmatprep.subr.bf16.mxu1 %v9841_v53  ;;  %v1006_v53 = vrot.slane %v8035_v54, 1  ;;  %v1444_v60 = vrot.slane %v1434_v30, %v10123_v45  ;;  %v9905_v51 = vld [vmem:[%s11794_s1 + $0xfd8] sm:$0xff]   ;;  %v7914_v30 = vld [vmem:[%s10102_s6 + $0x40] sm:$0x66] }
 0x1dd   : > { %9180 = vmatpush3.bf16.msra.mxu0 %v9842_v55  ;;  %7510 = vmatprep.mubr.bf16.mxu0 %v3247_v4  ;;  %v3251_v11 = vcombine.high %v3247_v4, %v3247_v4  ;;  %v1435_v55 = vcombine.low %v1001_v44, %v1002_v47  ;;  %v1836_v63 = vrot.slane %v1826_v57, %v10123_v45  ;;  %v9900_v44 = vld [vmem:[%s11794_s1 + $0xf50] sm:$0xff]  }
 0x1de   : > { %9209 = vmatprep.subr.bf16.mxu0 %v9852_v58  ;;  %v1827_v58 = vcombine.low %v1005_v52, %v1006_v53  ;;  %v7912_v52 = vld [vmem:[%s10102_s6 + $0x30] sm:$0x66]  ;;  %v7913_v53 = vld [vmem:[%s10102_s6 + $0x38] sm:$0x66] }
 0x1df   : > { %9202 = vmatpush3.bf16.msra.mxu1 %v9843_v59  ;;  %7550 = vmatprep.mubr.bf16.mxu1 %v3251_v11  ;;  %v9870_v59 = vld [vmem:[%s11794_s1 + $0xe20] sm:$0xff]   ;;  %v8036_v57 = vcombine.low %v7912_v52, %v7912_v52 }
 0x1e0   : > { %9231 = vmatprep.subr.bf16.mxu1 %v9853_v61  ;;  %7511 = vmatmul.mubr.bf16.vlgmr.msra.gmra.mrb[52].mxu0 %v3233_v1  ;;  %v1451_v61 = vrot.slane %v1435_v55, %v10123_v45  ;;  %v1843_v0 = vrot.slane %v1827_v58, %v10123_v45  ;;  %v9872_v1 = vld [vmem:[%s11794_s1 + $0xe68] sm:$0xff]   ;;  %v9906_v55 = vld [vmem:[%s11794_s1 + $0xf18] sm:$0xff]   ;;  %v8037_v58 = vcombine.high %v7912_v52, %v7912_v52 }
 0x1e1   : > { %9210 = vmatpush3.bf16.msra.mxu0 %v9854_v2 }
 0x1e2   : > { %7551 = vmatmul.mubr.bf16.vlgmr.msra.gmra.mrb[52].mxu1 %v3249_v7  ;;  %9211 = vmatprep.subr.bf16.mxu0 %v9856_v5  ;;  %v1466_v2 = vcombine.low %v1444_v60, %v1451_v61  ;;  %v1858_v4 = vcombine.low %v1836_v63, %v1843_v0  ;;  %v9874_v5 = vld [vmem:[%s11794_s1 + $0xe28] sm:$0xff]   ;;  %v8039_v60 = vcombine.high %v7913_v53, %v7913_v53  ;;  %v9908_v61 = vld [vmem:[%s11794_s1 + $0xf60] sm:$0xff]  }
 0x1e3   : > { %9232 = vmatpush3.bf16.msra.mxu1 %v9855_v12  ;;  %v9875_v7 = vld [vmem:[%s11794_s1 + $0xea8] sm:$0xff]   ;;  %v9878_v12 = vld [vmem:[%s11794_s1 + $0xe30] sm:$0xff]   ;;  %v8041_v63 = vcombine.high %v7914_v30, %v7914_v30 }
 0x1e4   : > { %9233 = vmatprep.subr.bf16.mxu1 %v9857_v13  ;;  %v9879_v13 = vld [vmem:[%s11794_s1 + $0xeb0] sm:$0xff]  }
 0x1e5   : > { %9212 = vmatpush3.bf16.msra.mxu0 %v9858_v16  ;;  %v9881_v16 = vld [vmem:[%s11794_s1 + $0xef8] sm:$0xff]  }
 0x1e6   : > { %9213 = vmatprep.subr.bf16.mxu0 %v9860_v21 }
 0x1e7   : > { %9234 = vmatpush3.bf16.msra.mxu1 %v9859_v20 }
 0x1e8   : > { %9235 = vmatprep.subr.bf16.mxu1 %v9861_v23 }
 0x1e9   : > { %9214 = vmatpush3.bf16.msra.mxu0 %v9862_v24  ;;  %v9893_v24 = vld [vmem:[%s11794_s1 + $0xfc0] sm:$0xff]  }
 0x1ea   : > { %9215 = vmatprep.subr.bf16.mxu0 %v9864_v26 }
 0x1eb   : > { %v8917_v3 = vpop.f32.mrb[28].mxu0  ;;  %9236 = vmatpush3.bf16.msra.mxu1 %v9863_v25  ;;  %v9894_v25 = vld [vmem:[%s11794_s1 + $0xf00] sm:$0xff]  }
 0x1ec   : > { %v8918_v6 = vpop.f32.mrb[29].mxu0  ;;  %9237 = vmatprep.subr.bf16.mxu1 %v9865_v29 }
 0x1ed   : > { %v8939_v8 = vpop.f32.mrb[28].mxu1  ;;  %v8919_v9 = vadd.f32 %v8918_v6, %v8917_v3  ;;  %v8920_v10 = vpop.f32.mrb[30].mxu0  ;;  %9216 = vmatpush3.bf16.msra.mxu0 %v9866_v37  ;;  %v9873_v3 = vld [vmem:[%s11794_s1 + $0xee8] sm:$0xff]   ;;  %v1474_v6 = vrot.slane %v1466_v2, %v10123_v45  ;;  %v9907_v2 = vld [vmem:[%s11794_s1 + $0xf98] sm:$0xff]  }
 0x1ee   : > { %v8940_v14 = vpop.f32.mrb[29].mxu1  ;;  %v8921_v15 = vpop.f32.mrb[31].mxu0  ;;  %9217 = vmatprep.subr.bf16.mxu0 %v9868_v50  ;;  %v9877_v10 = vld [vmem:[%s11794_s1 + $0xef0] sm:$0xff]  }
 0x1ef   : > { %v7033_v17 = vadd.f32 %v8919_v9, %v11462_v39  ;;  %v8941_v18 = vadd.f32 %v8940_v14, %v8939_v8  ;;  %v8942_v19 = vpop.f32.mrb[30].mxu1  ;;  %9238 = vmatpush3.bf16.msra.mxu1 %v9867_v49  ;;  %v1866_v8 = vrot.slane %v1858_v4, %v10123_v45  ;;  %v9876_v9 = vld [vmem:[%s11794_s1 + $0xe70] sm:$0xff]   ;;  %v9880_v15 = vld [vmem:[%s11794_s1 + $0xe78] sm:$0xff]   ;;  %v1031_v4 = vshll.u32 %v8036_v57, 16 }
 0x1f0   : > { %v8943_v22 = vpop.f32.mrb[31].mxu1  ;;  %9239 = vmatprep.subr.bf16.mxu1 %v9869_v56  ;;  %v9883_v19 = vld [vmem:[%s11794_s1 + $0xeb8] sm:$0xff]   ;;  %v9902_v49 = vld [vmem:[%s11794_s1 + $0xf10] sm:$0xff]   ;;  %v7915_v56 = vld [vmem:[%s10102_s6 + $0x48] sm:$0x66] }
 0x1f1   : > { %v11577_v39 = vadd.f32 %v8941_v18, %v7033_v17  ;;  %9218 = vmatpush3.bf16.msra.mxu0 %v9870_v59  ;;  %v8058_v11 = vcombine.low %v1474_v6, %v1866_v8  ;;  %v9882_v18 = vld [vmem:[%s11794_s1 + $0xe38] sm:$0xff]   ;;  %v9892_v22 = vld [vmem:[%s11794_s1 + $0xf40] sm:$0xff]   ;;  %v9903_v50 = vld [vmem:[%s11794_s1 + $0xf90] sm:$0xff]   ;;  %v8038_v59 = vcombine.low %v7913_v53, %v7913_v53  ;;  %v8042_v0 = vcombine.low %v7915_v56, %v7915_v56 }
 0x1f2   : > { %9219 = vmatprep.subr.bf16.mxu0 %v9872_v1  ;;  %v8043_v1 = vcombine.high %v7915_v56, %v7915_v56  ;;  %v1039_v6 = vshll.u32 %v8037_v58, 16 }
 0x1f3   : > { %9240 = vmatpush3.bf16.msra.mxu1 %v9871_v62  ;;  %v3260_v14 = vrot.slane %v8058_v11, %v10123_v45  ;;  %v8040_v62 = vcombine.low %v7914_v30, %v7914_v30  ;;  %v1044_v8 = vshrl.u32 %v8038_v59, 16  ;;  %v1055_v11 = vshll.u32 %v8039_v60, 16 }
 0x1f4   : > { %9241 = vmatprep.subr.bf16.mxu1 %v9873_v3  ;;  %v1028_v3 = vshrl.u32 %v8036_v57, 16 }
 0x1f5   : > { %9220 = vmatpush3.bf16.msra.mxu0 %v9874_v5  ;;  %v3268_v17 = vcombine.high %v3260_v14, %v3260_v14  ;;  %v3276_v21 = vrot.slane %v3260_v14, %v10123_v45  ;;  %v1036_v5 = vshrl.u32 %v8037_v58, 16  ;;  %v1033_v14 = vrot.slane %v1031_v4, 2  ;;  %v9920_v58 = vld [vmem:[%s11794_s1 + $0xf78] sm:$0xff]  }
 0x1f6   : > { %9221 = vmatprep.subr.bf16.mxu0 %v9876_v9  ;;  %v1047_v9 = vshll.u32 %v8038_v59, 16 }
 0x1f7   : > { %9242 = vmatpush3.bf16.msra.mxu1 %v9875_v7  ;;  %v3290_v20 = vrot.slane %v3268_v17, %v10123_v45  ;;  %v3298_v29 = vcombine.high %v3276_v21, %v3276_v21  ;;  %v9909_v7 = vld [vmem:[%s11794_s1 + $0xfe0] sm:$0xff]   ;;  %v9912_v17 = vld [vmem:[%s11794_s1 + $0xf68] sm:$0xff]  }
 0x1f8   : > { %9243 = vmatprep.subr.bf16.mxu1 %v9877_v10  ;;  %v1052_v10 = vshrl.u32 %v8039_v60, 16 }
 0x1f9   : > { %9222 = vmatpush3.bf16.msra.mxu0 %v9878_v12  ;;  %7590 = vmatprep.mubr.bf16.mxu0 %v3290_v20  ;;  %v3300_v23 = vcombine.high %v3290_v20, %v3290_v20  ;;  %v9910_v12 = vld [vmem:[%s11794_s1 + $0xf20] sm:$0xff]  }
 0x1fa   : > { %9223 = vmatprep.subr.bf16.mxu0 %v9880_v15  ;;  %v1038_v15 = vrot.slane %v1036_v5, 1  ;;  %v1054_v20 = vrot.slane %v1052_v10, 1  ;;  %v9923_v5 = vld [vmem:[%s11794_s1 + $0xfb8] sm:$0xff]  }
 0x1fb   : > { %9244 = vmatpush3.bf16.msra.mxu1 %v9879_v13  ;;  %7630 = vmatprep.mubr.bf16.mxu1 %v3300_v23  ;;  %v1030_v13 = vrot.slane %v1028_v3, 1  ;;  %v9922_v3 = vld [vmem:[%s11794_s1 + $0xf38] sm:$0xff]  }
 0x1fc   : > { %9245 = vmatprep.subr.bf16.mxu1 %v9881_v16  ;;  %v1041_v16 = vrot.slane %v1039_v6, 2 }
 0x1fd   : > { %9224 = vmatpush3.bf16.msra.mxu0 %v9882_v18  ;;  %v1046_v18 = vrot.slane %v1044_v8, 1  ;;  %v1034_v23 = vor.u32 %v1033_v14, %v1030_v13 }
 0x1fe   : > { %9253 = vmatprep.subr.bf16.mxu0 %v9892_v22  ;;  %v9911_v22 = vld [vmem:[%s11794_s1 + $0xfa0] sm:$0xff]  }
 0x1ff   : > { %9246 = vmatpush3.bf16.msra.mxu1 %v9883_v19  ;;  %v1049_v19 = vrot.slane %v1047_v9, 2 }
 0x200   : > { %7591 = vmatmul.mubr.bf16.vlgmr.msra.gmra.mrb[56].mxu0 %v3276_v21  ;;  %9275 = vmatprep.subr.bf16.mxu1 %v9893_v24  ;;  %v1057_v21 = vrot.slane %v1055_v11, 2  ;;  %v1042_v24 = vor.u32 %v1041_v16, %v1038_v15 }
 0x201   : > { %9254 = vmatpush3.bf16.msra.mxu0 %v9894_v25  ;;  %v1060_v25 = vshrl.u32 %v8040_v62, 16 }
 0x202   : > { %7631 = vmatmul.mubr.bf16.vlgmr.msra.gmra.mrb[56].mxu1 %v3298_v29  ;;  %9255 = vmatprep.subr.bf16.mxu0 %v9896_v31  ;;  %v1058_v29 = vor.u32 %v1057_v21, %v1054_v20  ;;  %v1068_v31 = vshrl.u32 %v8041_v63, 16 }
 0x203   : > { %9276 = vmatpush3.bf16.msra.mxu1 %v9895_v27  ;;  %v9913_v27 = vld [vmem:[%s11794_s1 + $0xfe8] sm:$0xff]  }
 0x204   : > { %9277 = vmatprep.subr.bf16.mxu1 %v9897_v48  ;;  %v1071_v48 = vshll.u32 %v8041_v63, 16  ;;  %v9921_v63 = vld [vmem:[%s11794_s1 + $0xff8] sm:$0xff]  }
 0x205   : > { %9256 = vmatpush3.bf16.msra.mxu0 %v9898_v38  ;;  %v9916_v38 = vld [vmem:[%s11794_s1 + $0xf70] sm:$0xff]  }
 0x206   : > { %9257 = vmatprep.subr.bf16.mxu0 %v9900_v44 }
 0x207   : > { %9278 = vmatpush3.bf16.msra.mxu1 %v9899_v42  ;;  %v1087_v42 = vshll.u32 %v8043_v1, 16 }
 0x209   : > { %9258 = vmatpush3.bf16.msra.mxu0 %v9902_v49  ;;  %v1089_v53 = vrot.slane %v1087_v42, 2 }
 0x20a   : > { %9259 = vmatprep.subr.bf16.mxu0 %v9904_v46  ;;  %v9917_v46 = vld [vmem:[%s11794_s1 + $0xff0] sm:$0xff]  }
 0x20b   : > { %v8961_v26 = vpop.f32.mrb[32].mxu0 }
 0x20c   : > { %v8962_v28 = vpop.f32.mrb[33].mxu0 }
 0x20d   : > { %v8963_v34 = vadd.f32 %v8962_v28, %v8961_v26  ;;  %v8964_v35 = vpop.f32.mrb[34].mxu0  ;;  %9260 = vmatpush3.bf16.msra.mxu0 %v9906_v55  ;;  %v1063_v26 = vshll.u32 %v8040_v62, 16  ;;  %v1050_v28 = vor.u32 %v1049_v19, %v1046_v18  ;;  %v9918_v55 = vld [vmem:[%s11794_s1 + $0xf30] sm:$0xff]  }
 0x20e   : > { %v8965_v37 = vpop.f32.mrb[35].mxu0  ;;  %9261 = vmatprep.subr.bf16.mxu0 %v9908_v61  ;;  %v9919_v62 = vld [vmem:[%s11794_s1 + $0xfb0] sm:$0xff]  }
 0x20f   : > { %v7113_v40 = vadd.f32 %v8963_v34, %v11577_v39  ;;  %v9901_v39 = vld [vmem:[%s11794_s1 + $0xfd0] sm:$0xff]   ;;  %v1062_v34 = vrot.slane %v1060_v25, 1  ;;  %v1065_v35 = vrot.slane %v1063_v26, 2  ;;  %v1079_v37 = vshll.u32 %v8042_v0, 16 }
 0x210   : > { %9279 = vmatprep.subr.bf16.mxu1 %v9901_v39  ;;  %v1437_v30 = vcombine.low %v1050_v28, %v1058_v29 }
 0x211   : > { %v8983_v32 = vpop.f32.mrb[32].mxu1  ;;  %9280 = vmatpush3.bf16.msra.mxu1 %v9903_v50  ;;  %9262 = vmatpush3.bf16.msra.mxu0 %v9910_v12  ;;  %v1066_v44 = vor.u32 %v1065_v35, %v1062_v34  ;;  %v1081_v49 = vrot.slane %v1079_v37, 2  ;;  %v1436_v50 = vcombine.low %v1034_v23, %v1042_v24 }
 0x212   : > { %v8984_v36 = vpop.f32.mrb[33].mxu1  ;;  %9281 = vmatprep.subr.bf16.mxu1 %v9905_v51  ;;  %9263 = vmatprep.subr.bf16.mxu0 %v9912_v17  ;;  %v1465_v60 = vrot.slane %v1437_v30, %v10123_v45 }
 0x213   : > { %v8985_v41 = vadd.f32 %v8984_v36, %v8983_v32  ;;  %v8986_v54 = vpop.f32.mrb[34].mxu1  ;;  %v9914_v32 = vld [vmem:[%s11794_s1 + $0xf28] sm:$0xff]   ;;  %v1076_v36 = vshrl.u32 %v8042_v0, 16  ;;  %v1458_v57 = vrot.slane %v1436_v50, %v10123_v45 }
 0x214   : > { %v8987_v43 = vpop.f32.mrb[35].mxu1  ;;  %v1084_v54 = vshrl.u32 %v8043_v1, 16 }
 0x215   : > { %v11689_v47 = vadd.f32 %v8985_v41, %v7113_v40  ;;  %9282 = vmatpush3.bf16.msra.mxu1 %v9907_v2  ;;  %v1070_v40 = vrot.slane %v1068_v31, 1  ;;  %v1073_v41 = vrot.slane %v1071_v48, 2  ;;  %v9915_v43 = vld [vmem:[%s11794_s1 + $0xfa8] sm:$0xff]   ;;  %v1078_v39 = vrot.slane %v1076_v36, 1  ;;  %9264 = vmatpush3.bf16.msra.mxu0 %v9914_v32 }
 0x216   : > { %9283 = vmatprep.subr.bf16.mxu1 %v9909_v7  ;;  %v1086_v52 = vrot.slane %v1084_v54, 1  ;;  %9265 = vmatprep.subr.bf16.mxu0 %v9916_v38  ;;  %v1467_v0 = vcombine.low %v1458_v57, %v1465_v60 }
 0x217   : > { %v1074_v51 = vor.u32 %v1073_v41, %v1070_v40  ;;  %v1082_v56 = vor.u32 %v1081_v49, %v1078_v39 }
 0x218   : > { %v1090_v59 = vor.u32 %v1089_v53, %v1086_v52  ;;  %v1481_v6 = vrot.slane %v1467_v0, %v10123_v45 }
 0x219   : > { %9284 = vmatpush3.bf16.msra.mxu1 %v9911_v22  ;;  %v1828_v61 = vcombine.low %v1066_v44, %v1074_v51  ;;  %9266 = vmatpush3.bf16.msra.mxu0 %v9918_v55 }
 0x21a   : > { %9285 = vmatprep.subr.bf16.mxu1 %v9913_v27  ;;  %v1829_v1 = vcombine.low %v1082_v56, %v1090_v59  ;;  %9267 = vmatprep.subr.bf16.mxu0 %v9920_v58 }
 0x21b   : > { %v1850_v2 = vrot.slane %v1828_v61, %v10123_v45 }
 0x21c   : > { %v1857_v4 = vrot.slane %v1829_v1, %v10123_v45 }
 0x21d   : > { %9286 = vmatpush3.bf16.msra.mxu1 %v9915_v43  ;;  %9268 = vmatpush3.bf16.msra.mxu0 %v9922_v3 }
 0x21e   : > { %9287 = vmatprep.subr.bf16.mxu1 %v9917_v46  ;;  %v1859_v7 = vcombine.low %v1850_v2, %v1857_v4 }
 0x220   : > { %v1873_v8 = vrot.slane %v1859_v7, %v10123_v45 }
 0x221   : > { %9288 = vmatpush3.bf16.msra.mxu1 %v9919_v62 }
 0x222   : > { %9289 = vmatprep.subr.bf16.mxu1 %v9921_v63  ;;  %v8059_v9 = vcombine.low %v1481_v6, %v1873_v8 }
 0x224   : > { %v3267_v10 = vrot.slane %v8059_v9, %v10123_v45 }
 0x225   : > { %9290 = vmatpush3.bf16.msra.mxu1 %v9923_v5 }
 0x226   : > { %v3269_v12 = vcombine.high %v3267_v10, %v3267_v10  ;;  %v3283_v13 = vrot.slane %v3267_v10, %v10123_v45 }
 0x228   : > { %v3297_v18 = vrot.slane %v3269_v12, %v10123_v45  ;;  %v3299_v21 = vcombine.high %v3283_v13, %v3283_v13 }
 0x22a   : > { %7670 = vmatprep.mubr.bf16.mxu0 %v3297_v18  ;;  %v3301_v25 = vcombine.high %v3297_v18, %v3297_v18 }
 0x22b   : > { %7671 = vmatmul.mubr.bf16.vlgmr.msra.gmra.mrb[60].mxu0 %v3283_v13 }
 0x22c   : > { %7710 = vmatprep.mubr.bf16.mxu1 %v3301_v25 }
 0x22d   : > { %7711 = vmatmul.mubr.bf16.vlgmr.msra.gmra.mrb[60].mxu1 %v3299_v21 }
 0x22f   : > { %v9005_v11 = vpop.f32.mrb[36].mxu0 }
 0x230   : > { %v9006_v14 = vpop.f32.mrb[37].mxu0 }
 0x231   : > { %v9027_v15 = vpop.f32.mrb[36].mxu1  ;;  %v9007_v16 = vadd.f32 %v9006_v14, %v9005_v11  ;;  %v9008_v17 = vpop.f32.mrb[38].mxu0 }
 0x232   : > { %v9028_v19 = vpop.f32.mrb[37].mxu1  ;;  %v9009_v20 = vpop.f32.mrb[39].mxu0 }
 0x233   : > { %v7193_v22 = vadd.f32 %v9007_v16, %v11689_v47  ;;  %v9029_v23 = vadd.f32 %v9028_v19, %v9027_v15  ;;  %v9030_v24 = vpop.f32.mrb[38].mxu1 }
 0x234   : > { %v9031_v26 = vpop.f32.mrb[39].mxu1 }
 0x235   : > { %v7233_v27 = vadd.f32 %v9029_v23, %v7193_v22 }
 0x24f   : > { %v9049_v28 = vpop.f32.mrb[40].mxu0 }
 0x250   : > { %v9050_v29 = vpop.f32.mrb[41].mxu0 }
 0x251   : > { %v9071_v31 = vpop.f32.mrb[40].mxu1  ;;  %v9051_v48 = vadd.f32 %v9050_v29, %v9049_v28  ;;  %v9052_v32 = vpop.f32.mrb[42].mxu0 }
 0x252   : > { %v9072_v45 = vpop.f32.mrb[41].mxu1  ;;  %v9053_v34 = vpop.f32.mrb[43].mxu0 }
 0x253   : > { %v7273_v35 = vadd.f32 %v9051_v48, %v7233_v27  ;;  %v9073_v36 = vadd.f32 %v9072_v45, %v9071_v31  ;;  %v9074_v37 = vpop.f32.mrb[42].mxu1 }
 0x254   : > { %v9075_v47 = vpop.f32.mrb[43].mxu1 }
 0x255   : > { %v7313_v38 = vadd.f32 %v9073_v36, %v7273_v35 }
 0x273   : > { %v9093_v40 = vpop.f32.mrb[44].mxu0 }
 0x274   : > { %v9094_v41 = vpop.f32.mrb[45].mxu0 }
 0x275   : > { %v9115_v54 = vpop.f32.mrb[44].mxu1  ;;  %v9095_v42 = vadd.f32 %v9094_v41, %v9093_v40  ;;  %v9096_v43 = vpop.f32.mrb[46].mxu0 }
 0x276   : > { %v9116_v44 = vpop.f32.mrb[45].mxu1  ;;  %v9097_v39 = vpop.f32.mrb[47].mxu0 }
 0x277   : > { %v7353_v49 = vadd.f32 %v9095_v42, %v7313_v38  ;;  %v9117_v50 = vadd.f32 %v9116_v44, %v9115_v54  ;;  %v9118_v46 = vpop.f32.mrb[46].mxu1 }
 0x278   : > { %v9119_v51 = vpop.f32.mrb[47].mxu1 }
 0x279   : > { %v7393_v52 = vadd.f32 %v9117_v50, %v7353_v49 }
 0x293   : > { %v9137_v53 = vpop.f32.mrb[48].mxu0 }
 0x294   : > { %v9138_v30 = vpop.f32.mrb[49].mxu0 }
 0x295   : > { %v9159_v55 = vpop.f32.mrb[48].mxu1  ;;  %v9139_v56 = vadd.f32 %v9138_v30, %v9137_v53  ;;  %v9140_v57 = vpop.f32.mrb[50].mxu0 }
 0x296   : > { %v9160_v58 = vpop.f32.mrb[49].mxu1  ;;  %v9141_v59 = vpop.f32.mrb[51].mxu0 }
 0x297   : > { %v7433_v60 = vadd.f32 %v9139_v56, %v7393_v52  ;;  %v9161_v61 = vadd.f32 %v9160_v58, %v9159_v55  ;;  %v9162_v62 = vpop.f32.mrb[50].mxu1  ;;  %v7720_v59 = vld [vmem:[%s11795_s2] sm:$0x7] }
 0x298   : > { %v9163_v63 = vpop.f32.mrb[51].mxu1  ;;  %v7752_v62 = vsub.s32 1, %v10110_v33 }
 0x299   : > { %v7473_v0 = vadd.f32 %v9161_v61, %v7433_v60 }
 0x2b3   : > { %v9181_v1 = vpop.f32.mrb[52].mxu0 }
 0x2b4   : > { %v9182_v2 = vpop.f32.mrb[53].mxu0 }
 0x2b5   : > { %v9203_v3 = vpop.f32.mrb[52].mxu1  ;;  %v9183_v4 = vadd.f32 %v9182_v2, %v9181_v1  ;;  %v9184_v5 = vpop.f32.mrb[54].mxu0  ;;  %v7757_v2 = vsub.s32 2, %v10110_v33 }
 0x2b6   : > { %v9204_v6 = vpop.f32.mrb[53].mxu1  ;;  %v9185_v7 = vpop.f32.mrb[55].mxu0 }
 0x2b7   : > { %v7513_v8 = vadd.f32 %v9183_v4, %v7473_v0  ;;  %v9205_v9 = vadd.f32 %v9204_v6, %v9203_v3  ;;  %v9206_v10 = vpop.f32.mrb[54].mxu1 }
 0x2b8   : > { %v9207_v11 = vpop.f32.mrb[55].mxu1  ;;  %v9963_v10 = vmov 1983009808  }
 0x2b9   : > { %v7553_v12 = vadd.f32 %v9205_v9, %v7513_v8  ;;  %v7768_v11 = vunpack.c.l.s4 %v9963_v10 }
 0x2d3   : > { %v9225_v13 = vpop.f32.mrb[56].mxu0 }
 0x2d4   : > { %v9226_v14 = vpop.f32.mrb[57].mxu0 }
 0x2d5   : > { %v9247_v15 = vpop.f32.mrb[56].mxu1  ;;  %v9227_v16 = vadd.f32 %v9226_v14, %v9225_v13  ;;  %v9228_v17 = vpop.f32.mrb[58].mxu0 }
 0x2d6   : > { %v9248_v18 = vpop.f32.mrb[57].mxu1  ;;  %v9229_v19 = vpop.f32.mrb[59].mxu0 }
 0x2d7   : > { %v7593_v20 = vadd.f32 %v9227_v16, %v7553_v12  ;;  %v9249_v21 = vadd.f32 %v9248_v18, %v9247_v15  ;;  %v9250_v22 = vpop.f32.mrb[58].mxu1  ;;  %v7769_v12 = vunpack.c.0.s8 %v7768_v11 }
 0x2d8   : > { %v9251_v23 = vpop.f32.mrb[59].mxu1 }
 0x2d9   : > { %v7633_v24 = vadd.f32 %v9249_v21, %v7593_v20  ;;  %v7772_v13 = vsub.s32 %v7769_v12, %v10110_v33 }
 0x2fe   : > { %v9269_v25 = vpop.f32.mrb[60].mxu0 }
 0x2ff   : > { %v9270_v26 = vpop.f32.mrb[61].mxu0 }
 0x300   : > { %v9291_v27 = vpop.f32.mrb[60].mxu1  ;;  %v9271_v28 = vadd.f32 %v9270_v26, %v9269_v25  ;;  %v9272_v29 = vpop.f32.mrb[62].mxu0 }
 0x301   : > { %v9292_v31 = vpop.f32.mrb[61].mxu1  ;;  %v9273_v48 = vpop.f32.mrb[63].mxu0 }
 0x302   : > { %v7673_v32 = vadd.f32 %v9271_v28, %v7633_v24  ;;  %v9293_v45 = vadd.f32 %v9292_v31, %v9291_v27  ;;  %v9294_v34 = vpop.f32.mrb[62].mxu1 }
 0x303   : > { %v9295_v35 = vpop.f32.mrb[63].mxu1 }
 0x304   : > { %v7713_v36 = vadd.f32 %v9293_v45, %v7673_v32 }
 0x306   : > { %v7722_v37 = vsel %vm7721_vm0, %v7713_v36, 0.0  ;;  %v7730_v47 = vmul.f32 %v7713_v36, %v7713_v36 }
 0x307   : > { %v7723_v38 = vrot.slane %v7722_v37, 4 }
 0x308   : > { %v7731_v40 = vsel %vm7721_vm0, %v7730_v47, 0.0 }
 0x309   : > { %v7724_v41 = vadd.f32 %v7723_v38, %v7722_v37  ;;  %v7732_v54 = vrot.slane %v7731_v40, 4 }
 0x30b   : > { %v7725_v42 = vrot.slane %v7724_v41, 2  ;;  %v7733_v43 = vadd.f32 %v7732_v54, %v7731_v40 }
 0x30d   : > { %v7726_v44 = vadd.f32 %v7725_v42, %v7724_v41  ;;  %v7734_v39 = vrot.slane %v7733_v43, 2 }
 0x30f   : > { %v7727_v49 = vrot.slane %v7726_v44, 1  ;;  %v7735_v50 = vadd.f32 %v7734_v39, %v7733_v43 }
 0x311   : > { %v7728_v46 = vadd.f32 %v7727_v49, %v7726_v44  ;;  %v7736_v51 = vrot.slane %v7735_v50, 1 }
 0x313   : > { %v7729_v52 = vmul.f32 0.25, %v7728_v46  ;;  %v7737_v53 = vadd.f32 %v7736_v51, %v7735_v50 }
 0x315   : > { %v7738_v30 = vmul.f32 0.25, %v7737_v53  ;;  %v7739_v55 = vmul.f32 %v7729_v52, %v7729_v52 }
 0x317   : > { %v7740_v56 = vsub.f32 %v7738_v30, %v7739_v55 }
 0x319   : > { %v7741_v57 = vmax.f32 %v7740_v56, 0.0 }
 0x31b   : > { %v7742_v58 = vadd.f32 1e-05, %v7741_v57 }
 0x31d   : > { %9932 = vrsqrt.f32 %v7742_v58 }
 0x327   : > { %v9933_v60 = vpop.eup %9932 }
 0x328   : > { %v7744_v61 = vmul.f32 %v9933_v60, %v7720_v59 }
 0x32a   : > { %v7745_v63 = vmul.f32 %v7744_v61, %v7729_v52  ;;  %v7753_v1 = vrot.slane %v7744_v61, %v7752_v62 }
 0x32c   : > { %v7747_v0 = vrot.slane %v7745_v63, 7  ;;  %v7754_v4 = vmul.f32 %v7753_v1, %v7713_v36 }
 0x32e   : > { %v7749_v3 = vsub.f32 %v7720_v59, %v7747_v0 }
 0x330   : > { %v7758_v5 = vrot.slane %v7749_v3, %v7757_v2 }
 0x332   : > { %v7759_v6 = vadd.f32 %v7758_v5, %v7754_v4 }
 0x334   : > { %v8572_v7 = vmul.f32 -1.442695, %v7759_v6 }
 0x336   : > { %9934 = vpow2.f32 %v8572_v7 }
 0x340   : > { %v9935_v8 = vpop.eup %9934 }
 0x341   : > { %v7763_v9 = vadd.f32 1.0, %v9935_v8 }
 0x343   : > { %9936 = vrcp.f32 %v7763_v9 }
 0x34d   : > { %v9937_v14 = vpop.eup %9936 }
 0x34e   : > { %v7773_v15 = vrot.slane %v9937_v14, %v7772_v13  ;;  %8573 = vst.sshfl [vmem:[%s190_s5] sm:$0x3 pattern:$0x76325410] %v9937_v14 }
 0x350   : > { %v7774_v16 = vcombine.high %v7773_v15, %v7773_v15 }
 0x352   : > { %7778 = vst [vmem:[%s190_s5 + $0x2] sm:$0x3] %v7774_v16 }
 0x353 PF: > { %s13_s14 = sadd.s32 1, %s9960_s14   ;;  %s11797_s12 = smov %s9956_s13 }
 0x354   : > { %p10_p5 = scmp.ge.s32.totalorder %s13_s14, 4   ;;  %s11798_s13 = smov %s11800_s15 }
 0x356   :  { %12 = sbr.rel (!%p10_p5) target bundleno = 2 (0x2), region = 67 }

</bundles_post_ra>
